<compile_context>
chip_gen: v7x
topology: tpu7x:2x2x1
jax: 0.10.0
libtpu: 0.0.40
codegen_flags: <defaults>
</compile_context>

<pallas_src>
import jax
import jax.numpy as jnp
from jax.experimental import pallas as pl
from jax.experimental.pallas import tpu as pltpu


# ReLU after each fused layer (9 matmuls total):
#   branch l1, branch l2, branch l3 (no ReLU -> produces cat(out1,out2)),
#   combined_net1 l1, l2, l3 (F.relu from ACCNet fused here),
#   combined_net2 l1, l2, l3 (no ReLU on final output).
_RELU_FLAGS = (True, True, False,
               True, True, True,
               True, True, False)


# ----------------------------- Pallas kernel ----------------------------- #

def _accnet_fused_kernel(x_ref, *refs):
    o_ref = refs[-1]
    wb_refs = refs[:-1]
    h = x_ref[...]                                  # (tb, 128) bf16 row block
    for i, relu in enumerate(_RELU_FLAGS):          # statically unrolled
        w_ref = wb_refs[2 * i]
        b_ref = wb_refs[2 * i + 1]
        y = jnp.dot(h.astype(jnp.bfloat16), w_ref[...],
                    preferred_element_type=jnp.float32)  # bf16 x bf16 -> f32 (MXU)
        y = y + b_ref[...]                               # f32 bias, (1,N) broadcast
        h = jnp.maximum(y, 0.0) if relu else y
    o_ref[...] = h.astype(o_ref.dtype)              # (tb, 128), col 0 = real output


def accnet_forward_impl(packed, X, *, row_block=128):
    if X.shape[1] != 2:
        raise ValueError("WRONG INPUT DIM")
    B, _, D = X.shape
    # reshape == torch.cat((X[:,0,:], X[:,1,:]), dim=1)
    x = X.reshape(B, 2 * D).astype(jnp.bfloat16)

    # Batch tiling: one grid step per `tb` rows.  Weight/bias index_maps are
    # constant, so their DMA happens once and they stay VMEM-resident across
    # all grid steps (and across both v7x TensorCores with the parallel axis).
    if B <= row_block:
        tb = max(8, -(-B // 8) * 8)                 # sublane-align, single step
    else:
        tb = row_block
    Bp = -(-B // tb) * tb
    if Bp != B:
        x = jnp.pad(x, ((0, Bp - B), (0, 0)))       # cheaper than zeros().at[].set()

    flat = [x]
    for w, b in packed:
        flat += [w, b]

    in_specs = [pl.BlockSpec((tb, 2 * D), lambda i: (i, 0))]
    for a in flat[1:]:
        in_specs.append(pl.BlockSpec(a.shape, lambda i: (0, 0)))   # VMEM-resident

    out = pl.pallas_call(
        _accnet_fused_kernel,
        out_shape=jax.ShapeDtypeStruct((Bp, 128), jnp.float32),
        grid=(Bp // tb,),
        in_specs=in_specs,
        out_specs=pl.BlockSpec((tb, 128), lambda i: (i, 0)),
        compiler_params=pltpu.CompilerParams(
            dimension_semantics=("parallel",),       # engage v7x's 2nd TC on big B
            vmem_limit_bytes=28 * 1024 * 1024,       # weights x2 bufs + temps, w/ headroom
        ),
    )(*flat)
    return out[:B, 0:1]


accnet_forward = jax.jit(accnet_forward_impl, static_argnames=("row_block",))


# --------------------------- parameter setup ----------------------------- #

def init_linear(key, fan_in, fan_out):
    # nn.Linear-style U(-1/sqrt(fan_in), 1/sqrt(fan_in)); weight stored as (in, out).
    kw, kb = jax.random.split(key)
    bound = 1.0 / float(fan_in) ** 0.5
    w = jax.random.uniform(kw, (fan_in, fan_out), jnp.float32, -bound, bound)
    b = jax.random.uniform(kb, (fan_out,), jnp.float32, -bound, bound)
    return w, b


def init_three_layer(key, d_in, d_out, h1, h2):
    k1, k2, k3 = jax.random.split(key, 3)
    return {"l1": init_linear(k1, d_in, h1),
            "l2": init_linear(k2, h1, h2),
            "l3": init_linear(k3, h2, d_out)}


def init_accnet(key, d_in):
    k1, k2, k3, k4 = jax.random.split(key, 4)
    return {"net1": init_three_layer(k1, d_in, 512, 128, 96),
            "net2": init_three_layer(k2, d_in, 512, 128, 96),
            "combined_net1": init_three_layer(k3, 1024, 256, 2048, 516),
            "combined_net2": init_three_layer(k4, 256, 1, 128, 32)}


# -------- pack: pad to 128-multiples, block-diag the two branches, bf16 -------- #

def _pad2(w, rows, cols):
    return jnp.zeros((rows, cols), w.dtype).at[:w.shape[0], :w.shape[1]].set(w)


def _pad1(b, n):
    return jnp.zeros((n,), b.dtype).at[:b.shape[0]].set(b)


def _block_diag(wa, wb):
    ka, na = wa.shape
    kb, nb = wb.shape
    out = jnp.zeros((ka + kb, na + nb), wa.dtype)
    out = out.at[:ka, :na].set(wa)
    out = out.at[ka:, na:].set(wb)
    return out


def pack_accnet(raw):
    n1, n2 = raw["net1"], raw["net2"]
    c1, c2 = raw["combined_net1"], raw["combined_net2"]

    def layer(w, b):
        return (w.astype(jnp.bfloat16), b.reshape(1, -1).astype(jnp.float32))

    packed = []
    # --- net1/net2 as block-diagonal layers over the concatenated (B,128) input ---
    packed.append(layer(_block_diag(n1["l1"][0], n2["l1"][0]),            # (128, 256)
                        jnp.concatenate([n1["l1"][1], n2["l1"][1]])))
    packed.append(layer(_block_diag(_pad2(n1["l2"][0], 128, 128),          # (256, 256)
                                    _pad2(n2["l2"][0], 128, 128)),
                        jnp.concatenate([_pad1(n1["l2"][1], 128),
                                         _pad1(n2["l2"][1], 128)])))
    packed.append(layer(_block_diag(_pad2(n1["l3"][0], 128, 512),          # (256, 1024)
                                    _pad2(n2["l3"][0], 128, 512)),
                        jnp.concatenate([n1["l3"][1], n2["l3"][1]])))
    # --- combined_net1: 1024 -> 2048 -> 516(pad 640) -> 256 ---
    packed.append(layer(c1["l1"][0], c1["l1"][1]))                         # (1024, 2048)
    packed.append(layer(_pad2(c1["l2"][0], 2048, 640), _pad1(c1["l2"][1], 640)))
    packed.append(layer(_pad2(c1["l3"][0], 640, 256), c1["l3"][1]))
    # --- combined_net2: 256 -> 128 -> 32(pad 128) -> 1(pad 128) ---
    packed.append(layer(c2["l1"][0], c2["l1"][1]))                         # (256, 128)
    packed.append(layer(_pad2(c2["l2"][0], 128, 128), _pad1(c2["l2"][1], 128)))
    packed.append(layer(_pad2(c2["l3"][0], 128, 128), _pad1(c2["l3"][1], 128)))
    return packed


# ------------------------------ references -------------------------------- #

def accnet_reference_packed(packed, X):
    """Mirrors the kernel math exactly (same packed bf16 weights, f32 accumulate)."""
    B, _, D = X.shape
    h = X.reshape(B, 2 * D).astype(jnp.bfloat16)
    for (w, b), relu in zip(packed, _RELU_FLAGS):
        h = jnp.dot(h.astype(jnp.bfloat16), w, preferred_element_type=jnp.float32) + b
        if relu:
            h = jnp.maximum(h, 0.0)
    return h[:, 0:1]


def accnet_reference_f32(raw, X):
    """Unpadded full-f32 math (PyTorch-equivalent); validates the packing."""
    def lin(x, w, b, relu=False):
        y = x @ w + b
        return jnp.maximum(y, 0.0) if relu else y

    def tln(p, x, final_relu=False):
        h = lin(x, *p["l1"], relu=True)
        h = lin(h, *p["l2"], relu=True)
        return lin(h, *p["l3"], relu=final_relu)

    out1 = tln(raw["net1"], X[:, 0, :])
    out2 = tln(raw["net2"], X[:, 1, :])
    combined = jnp.concatenate([out1, out2], axis=1)
    res1 = tln(raw["combined_net1"], combined, final_relu=True)
    return tln(raw["combined_net2"], res1)


# -------------------------------- main ------------------------------------ #

if __name__ == "__main__":
    key = jax.random.PRNGKey(0)
    kx, kp = jax.random.split(key)

    B, D = 8, 64
    X = jax.random.normal(kx, (B, 2, D), dtype=jnp.float32)

    raw_params = init_accnet(kp, D)
    packed_params = pack_accnet(raw_params)

    out = jax.block_until_ready(accnet_forward(packed_params, X))
    assert out.shape == (B, 1), out.shape

    # 1) Tight check against a reference that mirrors the kernel math exactly.
    ref = accnet_reference_packed(packed_params, X)
    assert jnp.allclose(out, ref, rtol=2e-3, atol=2e-3), float(jnp.max(jnp.abs(out - ref)))

    # 2) Loose check against unpadded f32 math (validates block-diag / zero-padding
    #    packing; tolerance covers bf16 weight/activation rounding).
    ref32 = accnet_reference_f32(raw_params, X)
    assert jnp.allclose(out, ref32, rtol=1e-1, atol=3e-2), float(jnp.max(jnp.abs(out - ref32)))

    # 3) Exercise the multi-step batch grid (weights VMEM-resident across steps,
    #    row padding path, parallel batch axis).
    B2 = 300
    X2 = jax.random.normal(kx, (B2, 2, D), dtype=jnp.float32)
    out2 = jax.block_until_ready(accnet_forward(packed_params, X2))
    assert out2.shape == (B2, 1), out2.shape
    ref2 = accnet_reference_packed(packed_params, X2)
    assert jnp.allclose(out2, ref2, rtol=2e-3, atol=2e-3), float(jnp.max(jnp.abs(out2 - ref2)))

    print("KERNEL_OK")
</pallas_src>

<mosaic_0001>
module attributes {stable_mosaic.version = 11 : i64} {
  func.func @_accnet_fused_kernel(%arg0: i32, %arg1: memref<8x128xbf16, #tpu.memory_space<vmem>>, %arg2: memref<128x256xbf16, #tpu.memory_space<vmem>>, %arg3: memref<1x256xf32, #tpu.memory_space<vmem>>, %arg4: memref<256x256xbf16, #tpu.memory_space<vmem>>, %arg5: memref<1x256xf32, #tpu.memory_space<vmem>>, %arg6: memref<256x1024xbf16, #tpu.memory_space<vmem>>, %arg7: memref<1x1024xf32, #tpu.memory_space<vmem>>, %arg8: memref<1024x2048xbf16, #tpu.memory_space<vmem>>, %arg9: memref<1x2048xf32, #tpu.memory_space<vmem>>, %arg10: memref<2048x640xbf16, #tpu.memory_space<vmem>>, %arg11: memref<1x640xf32, #tpu.memory_space<vmem>>, %arg12: memref<640x256xbf16, #tpu.memory_space<vmem>>, %arg13: memref<1x256xf32, #tpu.memory_space<vmem>>, %arg14: memref<256x128xbf16, #tpu.memory_space<vmem>>, %arg15: memref<1x128xf32, #tpu.memory_space<vmem>>, %arg16: memref<128x128xbf16, #tpu.memory_space<vmem>>, %arg17: memref<1x128xf32, #tpu.memory_space<vmem>>, %arg18: memref<128x128xbf16, #tpu.memory_space<vmem>>, %arg19: memref<1x128xf32, #tpu.memory_space<vmem>>, %arg20: memref<8x128xf32, #tpu.memory_space<vmem>>) attributes {dimension_semantics = [#tpu.dimension_semantics<parallel>], iteration_bounds = array<i64: 1>, scalar_prefetch = 0 : i64, scratch_operands = 0 : i64, tpu.core_type = #tpu.core_type<tc>, window_params = [{transform_indices = @transform_0, window_bounds = array<i64: 8, 128>}, {pipeline_mode = #tpu.pipeline_mode<synchronous>, transform_indices = @transform_1, window_bounds = array<i64: 128, 256>}, {pipeline_mode = #tpu.pipeline_mode<synchronous>, transform_indices = @transform_2, window_bounds = array<i64: 1, 256>}, {pipeline_mode = #tpu.pipeline_mode<synchronous>, transform_indices = @transform_3, window_bounds = array<i64: 256, 256>}, {pipeline_mode = #tpu.pipeline_mode<synchronous>, transform_indices = @transform_4, window_bounds = array<i64: 1, 256>}, {pipeline_mode = #tpu.pipeline_mode<synchronous>, transform_indices = @transform_5, window_bounds = array<i64: 256, 1024>}, {pipeline_mode = #tpu.pipeline_mode<synchronous>, transform_indices = @transform_6, window_bounds = array<i64: 1, 1024>}, {pipeline_mode = #tpu.pipeline_mode<synchronous>, transform_indices = @transform_7, window_bounds = array<i64: 1024, 2048>}, {pipeline_mode = #tpu.pipeline_mode<synchronous>, transform_indices = @transform_8, window_bounds = array<i64: 1, 2048>}, {pipeline_mode = #tpu.pipeline_mode<synchronous>, transform_indices = @transform_9, window_bounds = array<i64: 2048, 640>}, {pipeline_mode = #tpu.pipeline_mode<synchronous>, transform_indices = @transform_10, window_bounds = array<i64: 1, 640>}, {pipeline_mode = #tpu.pipeline_mode<synchronous>, transform_indices = @transform_11, window_bounds = array<i64: 640, 256>}, {pipeline_mode = #tpu.pipeline_mode<synchronous>, transform_indices = @transform_12, window_bounds = array<i64: 1, 256>}, {pipeline_mode = #tpu.pipeline_mode<synchronous>, transform_indices = @transform_13, window_bounds = array<i64: 256, 128>}, {pipeline_mode = #tpu.pipeline_mode<synchronous>, transform_indices = @transform_14, window_bounds = array<i64: 1, 128>}, {pipeline_mode = #tpu.pipeline_mode<synchronous>, transform_indices = @transform_15, window_bounds = array<i64: 128, 128>}, {pipeline_mode = #tpu.pipeline_mode<synchronous>, transform_indices = @transform_16, window_bounds = array<i64: 1, 128>}, {pipeline_mode = #tpu.pipeline_mode<synchronous>, transform_indices = @transform_17, window_bounds = array<i64: 128, 128>}, {pipeline_mode = #tpu.pipeline_mode<synchronous>, transform_indices = @transform_18, window_bounds = array<i64: 1, 128>}, {transform_indices = @transform_19, window_bounds = array<i64: 8, 128>}]} {
    %c0 = arith.constant 0 : index
    %c0_0 = arith.constant 0 : index
    %0 = vector.load %arg1[%c0, %c0_0] : memref<8x128xbf16, #tpu.memory_space<vmem>>, vector<8x128xbf16>
    %c0_1 = arith.constant 0 : index
    %c0_2 = arith.constant 0 : index
    %1 = vector.load %arg2[%c0_1, %c0_2] : memref<128x256xbf16, #tpu.memory_space<vmem>>, vector<128x256xbf16>
    %cst = arith.constant dense<0.000000e+00> : vector<8x256xf32>
    %2 = tpu.matmul %0, %1, %cst {dimension_numbers = #tpu.dot_dimension_numbers<[1], [0], [0], [1], [0, 0, 1, 1], [], []>} : vector<8x128xbf16>, vector<128x256xbf16>, vector<8x256xf32> -> vector<8x256xf32>
    %c0_3 = arith.constant 0 : index
    %c0_4 = arith.constant 0 : index
    %3 = vector.load %arg3[%c0_3, %c0_4] : memref<1x256xf32, #tpu.memory_space<vmem>>, vector<1x256xf32>
    %4 = vector.broadcast %3 : vector<1x256xf32> to vector<8x256xf32>
    %5 = arith.addf %2, %4 : vector<8x256xf32>
    %cst_5 = arith.constant 0.000000e+00 : f32
    %6 = vector.broadcast %cst_5 : f32 to vector<8x256xf32>
    %7 = arith.maximumf %5, %6 : vector<8x256xf32>
    %8 = arith.truncf %7 : vector<8x256xf32> to vector<8x256xbf16>
    %c0_6 = arith.constant 0 : index
    %c0_7 = arith.constant 0 : index
    %9 = vector.load %arg4[%c0_6, %c0_7] : memref<256x256xbf16, #tpu.memory_space<vmem>>, vector<256x256xbf16>
    %cst_8 = arith.constant dense<0.000000e+00> : vector<8x256xf32>
    %10 = tpu.matmul %8, %9, %cst_8 {dimension_numbers = #tpu.dot_dimension_numbers<[1], [0], [0], [1], [0, 0, 1, 1], [], []>} : vector<8x256xbf16>, vector<256x256xbf16>, vector<8x256xf32> -> vector<8x256xf32>
    %c0_9 = arith.constant 0 : index
    %c0_10 = arith.constant 0 : index
    %11 = vector.load %arg5[%c0_9, %c0_10] : memref<1x256xf32, #tpu.memory_space<vmem>>, vector<1x256xf32>
    %12 = vector.broadcast %11 : vector<1x256xf32> to vector<8x256xf32>
    %13 = arith.addf %10, %12 : vector<8x256xf32>
    %cst_11 = arith.constant 0.000000e+00 : f32
    %14 = vector.broadcast %cst_11 : f32 to vector<8x256xf32>
    %15 = arith.maximumf %13, %14 : vector<8x256xf32>
    %16 = arith.truncf %15 : vector<8x256xf32> to vector<8x256xbf16>
    %c0_12 = arith.constant 0 : index
    %c0_13 = arith.constant 0 : index
    %17 = vector.load %arg6[%c0_12, %c0_13] : memref<256x1024xbf16, #tpu.memory_space<vmem>>, vector<256x1024xbf16>
    %cst_14 = arith.constant dense<0.000000e+00> : vector<8x1024xf32>
    %18 = tpu.matmul %16, %17, %cst_14 {dimension_numbers = #tpu.dot_dimension_numbers<[1], [0], [0], [1], [0, 0, 1, 1], [], []>} : vector<8x256xbf16>, vector<256x1024xbf16>, vector<8x1024xf32> -> vector<8x1024xf32>
    %c0_15 = arith.constant 0 : index
    %c0_16 = arith.constant 0 : index
    %19 = vector.load %arg7[%c0_15, %c0_16] : memref<1x1024xf32, #tpu.memory_space<vmem>>, vector<1x1024xf32>
    %20 = vector.broadcast %19 : vector<1x1024xf32> to vector<8x1024xf32>
    %21 = arith.addf %18, %20 : vector<8x1024xf32>
    %22 = arith.truncf %21 : vector<8x1024xf32> to vector<8x1024xbf16>
    %c0_17 = arith.constant 0 : index
    %c0_18 = arith.constant 0 : index
    %23 = vector.load %arg8[%c0_17, %c0_18] : memref<1024x2048xbf16, #tpu.memory_space<vmem>>, vector<1024x2048xbf16>
    %cst_19 = arith.constant dense<0.000000e+00> : vector<8x2048xf32>
    %24 = tpu.matmul %22, %23, %cst_19 {dimension_numbers = #tpu.dot_dimension_numbers<[1], [0], [0], [1], [0, 0, 1, 1], [], []>} : vector<8x1024xbf16>, vector<1024x2048xbf16>, vector<8x2048xf32> -> vector<8x2048xf32>
    %c0_20 = arith.constant 0 : index
    %c0_21 = arith.constant 0 : index
    %25 = vector.load %arg9[%c0_20, %c0_21] : memref<1x2048xf32, #tpu.memory_space<vmem>>, vector<1x2048xf32>
    %26 = vector.broadcast %25 : vector<1x2048xf32> to vector<8x2048xf32>
    %27 = arith.addf %24, %26 : vector<8x2048xf32>
    %cst_22 = arith.constant 0.000000e+00 : f32
    %28 = vector.broadcast %cst_22 : f32 to vector<8x2048xf32>
    %29 = arith.maximumf %27, %28 : vector<8x2048xf32>
    %30 = arith.truncf %29 : vector<8x2048xf32> to vector<8x2048xbf16>
    %c0_23 = arith.constant 0 : index
    %c0_24 = arith.constant 0 : index
    %31 = vector.load %arg10[%c0_23, %c0_24] : memref<2048x640xbf16, #tpu.memory_space<vmem>>, vector<2048x640xbf16>
    %cst_25 = arith.constant dense<0.000000e+00> : vector<8x640xf32>
    %32 = tpu.matmul %30, %31, %cst_25 {dimension_numbers = #tpu.dot_dimension_numbers<[1], [0], [0], [1], [0, 0, 1, 1], [], []>} : vector<8x2048xbf16>, vector<2048x640xbf16>, vector<8x640xf32> -> vector<8x640xf32>
    %c0_26 = arith.constant 0 : index
    %c0_27 = arith.constant 0 : index
    %33 = vector.load %arg11[%c0_26, %c0_27] : memref<1x640xf32, #tpu.memory_space<vmem>>, vector<1x640xf32>
    %34 = vector.broadcast %33 : vector<1x640xf32> to vector<8x640xf32>
    %35 = arith.addf %32, %34 : vector<8x640xf32>
    %cst_28 = arith.constant 0.000000e+00 : f32
    %36 = vector.broadcast %cst_28 : f32 to vector<8x640xf32>
    %37 = arith.maximumf %35, %36 : vector<8x640xf32>
    %38 = arith.truncf %37 : vector<8x640xf32> to vector<8x640xbf16>
    %c0_29 = arith.constant 0 : index
    %c0_30 = arith.constant 0 : index
    %39 = vector.load %arg12[%c0_29, %c0_30] : memref<640x256xbf16, #tpu.memory_space<vmem>>, vector<640x256xbf16>
    %cst_31 = arith.constant dense<0.000000e+00> : vector<8x256xf32>
    %40 = tpu.matmul %38, %39, %cst_31 {dimension_numbers = #tpu.dot_dimension_numbers<[1], [0], [0], [1], [0, 0, 1, 1], [], []>} : vector<8x640xbf16>, vector<640x256xbf16>, vector<8x256xf32> -> vector<8x256xf32>
    %c0_32 = arith.constant 0 : index
    %c0_33 = arith.constant 0 : index
    %41 = vector.load %arg13[%c0_32, %c0_33] : memref<1x256xf32, #tpu.memory_space<vmem>>, vector<1x256xf32>
    %42 = vector.broadcast %41 : vector<1x256xf32> to vector<8x256xf32>
    %43 = arith.addf %40, %42 : vector<8x256xf32>
    %cst_34 = arith.constant 0.000000e+00 : f32
    %44 = vector.broadcast %cst_34 : f32 to vector<8x256xf32>
    %45 = arith.maximumf %43, %44 : vector<8x256xf32>
    %46 = arith.truncf %45 : vector<8x256xf32> to vector<8x256xbf16>
    %c0_35 = arith.constant 0 : index
    %c0_36 = arith.constant 0 : index
    %47 = vector.load %arg14[%c0_35, %c0_36] : memref<256x128xbf16, #tpu.memory_space<vmem>>, vector<256x128xbf16>
    %cst_37 = arith.constant dense<0.000000e+00> : vector<8x128xf32>
    %48 = tpu.matmul %46, %47, %cst_37 {dimension_numbers = #tpu.dot_dimension_numbers<[1], [0], [0], [1], [0, 0, 1, 1], [], []>} : vector<8x256xbf16>, vector<256x128xbf16>, vector<8x128xf32> -> vector<8x128xf32>
    %c0_38 = arith.constant 0 : index
    %c0_39 = arith.constant 0 : index
    %49 = vector.load %arg15[%c0_38, %c0_39] : memref<1x128xf32, #tpu.memory_space<vmem>>, vector<1x128xf32>
    %50 = vector.broadcast %49 : vector<1x128xf32> to vector<8x128xf32>
    %51 = arith.addf %48, %50 : vector<8x128xf32>
    %cst_40 = arith.constant 0.000000e+00 : f32
    %52 = vector.broadcast %cst_40 : f32 to vector<8x128xf32>
    %53 = arith.maximumf %51, %52 : vector<8x128xf32>
    %54 = arith.truncf %53 : vector<8x128xf32> to vector<8x128xbf16>
    %c0_41 = arith.constant 0 : index
    %c0_42 = arith.constant 0 : index
    %55 = vector.load %arg16[%c0_41, %c0_42] : memref<128x128xbf16, #tpu.memory_space<vmem>>, vector<128x128xbf16>
    %cst_43 = arith.constant dense<0.000000e+00> : vector<8x128xf32>
    %56 = tpu.matmul %54, %55, %cst_43 {dimension_numbers = #tpu.dot_dimension_numbers<[1], [0], [0], [1], [0, 0, 1, 1], [], []>} : vector<8x128xbf16>, vector<128x128xbf16>, vector<8x128xf32> -> vector<8x128xf32>
    %c0_44 = arith.constant 0 : index
    %c0_45 = arith.constant 0 : index
    %57 = vector.load %arg17[%c0_44, %c0_45] : memref<1x128xf32, #tpu.memory_space<vmem>>, vector<1x128xf32>
    %58 = vector.broadcast %57 : vector<1x128xf32> to vector<8x128xf32>
    %59 = arith.addf %56, %58 : vector<8x128xf32>
    %cst_46 = arith.constant 0.000000e+00 : f32
    %60 = vector.broadcast %cst_46 : f32 to vector<8x128xf32>
    %61 = arith.maximumf %59, %60 : vector<8x128xf32>
    %62 = arith.truncf %61 : vector<8x128xf32> to vector<8x128xbf16>
    %c0_47 = arith.constant 0 : index
    %c0_48 = arith.constant 0 : index
    %63 = vector.load %arg18[%c0_47, %c0_48] : memref<128x128xbf16, #tpu.memory_space<vmem>>, vector<128x128xbf16>
    %cst_49 = arith.constant dense<0.000000e+00> : vector<8x128xf32>
    %64 = tpu.matmul %62, %63, %cst_49 {dimension_numbers = #tpu.dot_dimension_numbers<[1], [0], [0], [1], [0, 0, 1, 1], [], []>} : vector<8x128xbf16>, vector<128x128xbf16>, vector<8x128xf32> -> vector<8x128xf32>
    %c0_50 = arith.constant 0 : index
    %c0_51 = arith.constant 0 : index
    %65 = vector.load %arg19[%c0_50, %c0_51] : memref<1x128xf32, #tpu.memory_space<vmem>>, vector<1x128xf32>
    %66 = vector.broadcast %65 : vector<1x128xf32> to vector<8x128xf32>
    %67 = arith.addf %64, %66 : vector<8x128xf32>
    %c0_52 = arith.constant 0 : index
    %c0_53 = arith.constant 0 : index
    %68 = vector.load %arg20[%c0_52, %c0_53] : memref<8x128xf32, #tpu.memory_space<vmem>>, vector<8x128xf32>
    tpu.vector_store %arg20[%c0_52, %c0_53], %67 {strides = array<i32>} : memref<8x128xf32, #tpu.memory_space<vmem>>, vector<8x128xf32>,
    return
  }
  func.func @transform_0(%arg0: i32) -> (i32, i32) {
    %c0_i32 = arith.constant 0 : i32
    %c0_i32_0 = arith.constant 0 : i32
    return %arg0, %c0_i32 : i32, i32
  }
  func.func @transform_1(%arg0: i32) -> (i32, i32) {
    %c0_i32 = arith.constant 0 : i32
    %c0_i32_0 = arith.constant 0 : i32
    %c0_i32_1 = arith.constant 0 : i32
    return %c0_i32, %c0_i32_0 : i32, i32
  }
  func.func @transform_2(%arg0: i32) -> (i32, i32) {
    %c0_i32 = arith.constant 0 : i32
    %c0_i32_0 = arith.constant 0 : i32
    %c0_i32_1 = arith.constant 0 : i32
    return %c0_i32, %c0_i32_0 : i32, i32
  }
  func.func @transform_3(%arg0: i32) -> (i32, i32) {
    %c0_i32 = arith.constant 0 : i32
    %c0_i32_0 = arith.constant 0 : i32
    %c0_i32_1 = arith.constant 0 : i32
    return %c0_i32, %c0_i32_0 : i32, i32
  }
  func.func @transform_4(%arg0: i32) -> (i32, i32) {
    %c0_i32 = arith.constant 0 : i32
    %c0_i32_0 = arith.constant 0 : i32
    %c0_i32_1 = arith.constant 0 : i32
    return %c0_i32, %c0_i32_0 : i32, i32
  }
  func.func @transform_5(%arg0: i32) -> (i32, i32) {
    %c0_i32 = arith.constant 0 : i32
    %c0_i32_0 = arith.constant 0 : i32
    %c0_i32_1 = arith.constant 0 : i32
    return %c0_i32, %c0_i32_0 : i32, i32
  }
  func.func @transform_6(%arg0: i32) -> (i32, i32) {
    %c0_i32 = arith.constant 0 : i32
    %c0_i32_0 = arith.constant 0 : i32
    %c0_i32_1 = arith.constant 0 : i32
    return %c0_i32, %c0_i32_0 : i32, i32
  }
  func.func @transform_7(%arg0: i32) -> (i32, i32) {
    %c0_i32 = arith.constant 0 : i32
    %c0_i32_0 = arith.constant 0 : i32
    %c0_i32_1 = arith.constant 0 : i32
    return %c0_i32, %c0_i32_0 : i32, i32
  }
  func.func @transform_8(%arg0: i32) -> (i32, i32) {
    %c0_i32 = arith.constant 0 : i32
    %c0_i32_0 = arith.constant 0 : i32
    %c0_i32_1 = arith.constant 0 : i32
    return %c0_i32, %c0_i32_0 : i32, i32
  }
  func.func @transform_9(%arg0: i32) -> (i32, i32) {
    %c0_i32 = arith.constant 0 : i32
    %c0_i32_0 = arith.constant 0 : i32
    %c0_i32_1 = arith.constant 0 : i32
    return %c0_i32, %c0_i32_0 : i32, i32
  }
  func.func @transform_10(%arg0: i32) -> (i32, i32) {
    %c0_i32 = arith.constant 0 : i32
    %c0_i32_0 = arith.constant 0 : i32
    %c0_i32_1 = arith.constant 0 : i32
    return %c0_i32, %c0_i32_0 : i32, i32
  }
  func.func @transform_11(%arg0: i32) -> (i32, i32) {
    %c0_i32 = arith.constant 0 : i32
    %c0_i32_0 = arith.constant 0 : i32
    %c0_i32_1 = arith.constant 0 : i32
    return %c0_i32, %c0_i32_0 : i32, i32
  }
  func.func @transform_12(%arg0: i32) -> (i32, i32) {
    %c0_i32 = arith.constant 0 : i32
    %c0_i32_0 = arith.constant 0 : i32
    %c0_i32_1 = arith.constant 0 : i32
    return %c0_i32, %c0_i32_0 : i32, i32
  }
  func.func @transform_13(%arg0: i32) -> (i32, i32) {
    %c0_i32 = arith.constant 0 : i32
    %c0_i32_0 = arith.constant 0 : i32
    %c0_i32_1 = arith.constant 0 : i32
    return %c0_i32, %c0_i32_0 : i32, i32
  }
  func.func @transform_14(%arg0: i32) -> (i32, i32) {
    %c0_i32 = arith.constant 0 : i32
    %c0_i32_0 = arith.constant 0 : i32
    %c0_i32_1 = arith.constant 0 : i32
    return %c0_i32, %c0_i32_0 : i32, i32
  }
  func.func @transform_15(%arg0: i32) -> (i32, i32) {
    %c0_i32 = arith.constant 0 : i32
    %c0_i32_0 = arith.constant 0 : i32
    %c0_i32_1 = arith.constant 0 : i32
    return %c0_i32, %c0_i32_0 : i32, i32
  }
  func.func @transform_16(%arg0: i32) -> (i32, i32) {
    %c0_i32 = arith.constant 0 : i32
    %c0_i32_0 = arith.constant 0 : i32
    %c0_i32_1 = arith.constant 0 : i32
    return %c0_i32, %c0_i32_0 : i32, i32
  }
  func.func @transform_17(%arg0: i32) -> (i32, i32) {
    %c0_i32 = arith.constant 0 : i32
    %c0_i32_0 = arith.constant 0 : i32
    %c0_i32_1 = arith.constant 0 : i32
    return %c0_i32, %c0_i32_0 : i32, i32
  }
  func.func @transform_18(%arg0: i32) -> (i32, i32) {
    %c0_i32 = arith.constant 0 : i32
    %c0_i32_0 = arith.constant 0 : i32
    %c0_i32_1 = arith.constant 0 : i32
    return %c0_i32, %c0_i32_0 : i32, i32
  }
  func.func @transform_19(%arg0: i32) -> (i32, i32) {
    %c0_i32 = arith.constant 0 : i32
    %c0_i32_0 = arith.constant 0 : i32
    return %arg0, %c0_i32 : i32, i32
  }
}

</mosaic_0001>

<bundles_post_ra>
// kernel: accnet_forward_impl.1
= control target key start
LH: loop header
LB: loop body
LE: loop exit
PB: predicated region body
PF: predicated region fallthrough
CT: control target
= control target key end

     0   :  { %s20115_s0 = inlined_call_operand.vmem [shape: bf16[8,128], index: 0, kind: input, shape index: {}]   ;;  %s20116_s1 = inlined_call_operand.hbm [shape: bf16[128,256], index: 1, kind: input, shape index: {}]   ;;  %s20117_s2 = inlined_call_operand.hbm [shape: f32[1,256], index: 2, kind: input, shape index: {}]   ;;  %s20118_s3 = inlined_call_operand.hbm [shape: bf16[256,256], index: 3, kind: input, shape index: {}]   ;;  %s20119_s4 = inlined_call_operand.hbm [shape: f32[1,256], index: 4, kind: input, shape index: {}]   ;;  %s20120_s5 = inlined_call_operand.hbm [shape: bf16[256,1024], index: 5, kind: input, shape index: {}]   ;;  %s20121_s6 = inlined_call_operand.hbm [shape: f32[1,1024], index: 6, kind: input, shape index: {}]   ;;  %s20122_s7 = inlined_call_operand.hbm [shape: bf16[1024,2048], index: 7, kind: input, shape index: {}]   ;;  %s20123_s8 = inlined_call_operand.hbm [shape: f32[1,2048], index: 8, kind: input, shape index: {}]   ;;  %s20124_s9 = inlined_call_operand.hbm [shape: bf16[2048,640], index: 9, kind: input, shape index: {}]   ;;  %s20125_s10 = inlined_call_operand.hbm [shape: f32[1,640], index: 10, kind: input, shape index: {}]   ;;  %s20126_s11 = inlined_call_operand.hbm [shape: bf16[640,256], index: 11, kind: input, shape index: {}]   ;;  %s20127_s12 = inlined_call_operand.hbm [shape: f32[1,256], index: 12, kind: input, shape index: {}]   ;;  %s20128_s13 = inlined_call_operand.hbm [shape: bf16[256,128], index: 13, kind: input, shape index: {}]   ;;  %s20129_s14 = inlined_call_operand.hbm [shape: f32[1,128], index: 14, kind: input, shape index: {}]   ;;  %s20130_s15 = inlined_call_operand.hbm [shape: bf16[128,128], index: 15, kind: input, shape index: {}]   ;;  %s20131_s16 = inlined_call_operand.hbm [shape: f32[1,128], index: 16, kind: input, shape index: {}]   ;;  %s20132_s17 = inlined_call_operand.hbm [shape: bf16[128,128], index: 17, kind: input, shape index: {}]   ;;  %s20133_s18 = inlined_call_operand.hbm [shape: f32[1,128], index: 18, kind: input, shape index: {}]   ;;  %s20134_s19 = inlined_call_operand.vmem [shape: f32[8,128], index: 19, kind: output, shape index: {}]  }
   0x1   :  { %20138 = sst [smem:[#allocation40_spill]] %s20115_s0 }
   0x2   :  { %20139 = sst [smem:[#allocation41_spill]] %s20116_s1 }
   0x3   :  { %20140 = sst [smem:[#allocation42_spill]] %s20117_s2 }
   0x4   :  { %20141 = sst [smem:[#allocation43_spill]] %s20118_s3 }
   0x5   :  { %24 = vsyncpa [#allocation3], 0 }
   0x6   :  { %25 = vsyncpa [#allocation5], 0 }
   0x7   :  { %26 = vsyncpa [#allocation8], 0 }
   0x8   :  { %27 = vsyncpa [#allocation11], 0 }
   0x9   :  { %28 = vsyncpa [#allocation14], 0 }
   0xa   :  { %29 = vsyncpa [#allocation17], 0 }
   0xb   :  { %30 = vsyncpa [#allocation20], 0 }
   0xc   :  { %31 = vsyncpa [#allocation23], 0 }
   0xd   :  { %32 = vsyncpa [#allocation26], 0 }
   0xe   :  { %33 = vsyncpa [#allocation29], 0  ;;  %s19352_s0 = smov [#allocation4]   ;;  %s19353_s20 = smov [#allocation7]  }
   0xf   :  { %s54_s30 = sshll.u32 %s19352_s0, 4  ;;  %s76_s21 = sshll.u32 %s19353_s20, 4  ;;  %s55_s30 = int_to_ptr.vmem [resolvable:$true] %s54_s30  ;;  %s77_s21 = int_to_ptr.vmem [resolvable:$true] %s76_s21 }
  0x10   :  { %s20142_s2 = sld [smem:[#allocation42_spill]] }
  0x16   :  { %s18936_s23 = scalar_lea.hbm %s20142_s2, 32 }
  0x17   :  { %p18937_p0 = scmp.ne.s32.totalorder %s20142_s2, %s18936_s23  ;;  %p18940_p1 = scmp.lt.u32.totalorder %s18936_s23, %s20142_s2 }
  0x19   :  { %p18942_p2 = pnand %p18940_p1, %p18937_p0 }
  0x1b   :  { %18945 = shalt.err (!%p18942_p2)
}
  0x1c   :  { %s18946_s27 = scalar_lea.vmem %s55_s30, 32  ;;  %p18951_p4 = scmp.lt.s32.totalorder %s55_s30, %s55_s30 }
  0x1d   :  { %p18947_p3 = scmp.ne.s32.totalorder %s55_s30, %s18946_s27  ;;  %p18952_p5 = scmp.lt.s32.totalorder %s18946_s27, %s18946_s27 }
  0x1f   :  { %p18953_p6 = por %p18952_p5, %p18951_p4 }
  0x21   :  { %p18954_p7 = pnand %p18953_p6, %p18947_p3 }
  0x23   :  { %18957 = shalt.err (!%p18954_p7)
}
  0x24   :  { %57 = dma.hbm_to_vmem [thread:$0]  %s20142_s2, 32, %s55_s30, [#allocation5]  }
  0x25   :  { %s18958_s1 = scalar_lea.hbm %s20119_s4, 32 }
  0x26   :  { %p18959_p8 = scmp.ne.s32.totalorder %s20119_s4, %s18958_s1  ;;  %p18962_p9 = scmp.lt.u32.totalorder %s18958_s1, %s20119_s4 }
  0x28   :  { %p18964_p10 = pnand %p18962_p9, %p18959_p8 }
  0x2a   :  { %18967 = shalt.err (!%p18964_p10)
}
  0x2b   :  { %s18968_s3 = scalar_lea.vmem %s77_s21, 32  ;;  %p18973_p12 = scmp.lt.s32.totalorder %s77_s21, %s77_s21 }
  0x2c   :  { %p18969_p11 = scmp.ne.s32.totalorder %s77_s21, %s18968_s3  ;;  %p18974_p13 = scmp.lt.s32.totalorder %s18968_s3, %s18968_s3 }
  0x2e   :  { %p18975_p0 = por %p18974_p13, %p18973_p12 }
  0x30   :  { %p18976_p1 = pnand %p18975_p0, %p18969_p11 }
  0x32   :  { %18979 = shalt.err (!%p18976_p1)
}
  0x33   :  { %79 = dma.hbm_to_vmem [thread:$0]  %s20119_s4, 32, %s77_s21, [#allocation8]  }
  0x34   :  { %s19354_s26 = smov [#allocation10]   ;;  %s19355_s28 = smov [#allocation13]  }
  0x35   :  { %s98_s27 = sshll.u32 %s19354_s26, 4  ;;  %s120_s29 = sshll.u32 %s19355_s28, 4  ;;  %s99_s27 = int_to_ptr.vmem [resolvable:$true] %s98_s27  ;;  %s121_s29 = int_to_ptr.vmem [resolvable:$true] %s120_s29 }
  0x36   :  { %s18980_s1 = scalar_lea.hbm %s20121_s6, 128 }
  0x37   :  { %p18981_p2 = scmp.ne.s32.totalorder %s20121_s6, %s18980_s1  ;;  %p18984_p3 = scmp.lt.u32.totalorder %s18980_s1, %s20121_s6 }
  0x39   :  { %p18986_p4 = pnand %p18984_p3, %p18981_p2 }
  0x3b   :  { %18989 = shalt.err (!%p18986_p4)
}
  0x3c   :  { %s18990_s4 = scalar_lea.vmem %s99_s27, 128  ;;  %p18995_p6 = scmp.lt.s32.totalorder %s99_s27, %s99_s27 }
  0x3d   :  { %p18991_p5 = scmp.ne.s32.totalorder %s99_s27, %s18990_s4  ;;  %p18996_p7 = scmp.lt.s32.totalorder %s18990_s4, %s18990_s4 }
  0x3f   :  { %p18997_p8 = por %p18996_p7, %p18995_p6 }
  0x41   :  { %p18998_p9 = pnand %p18997_p8, %p18991_p5 }
  0x43   :  { %19001 = shalt.err (!%p18998_p9)
}
  0x44   :  { %101 = dma.hbm_to_vmem [thread:$0]  %s20121_s6, 128, %s99_s27, [#allocation11]  }
  0x45   :  { %s19002_s26 = scalar_lea.hbm %s20123_s8, 256 }
  0x46   :  { %p19003_p10 = scmp.ne.s32.totalorder %s20123_s8, %s19002_s26  ;;  %p19006_p11 = scmp.lt.u32.totalorder %s19002_s26, %s20123_s8 }
  0x48   :  { %p19008_p12 = pnand %p19006_p11, %p19003_p10 }
  0x4a   :  { %19011 = shalt.err (!%p19008_p12)
}
  0x4b   :  { %s19012_s22 = scalar_lea.vmem %s121_s29, 256  ;;  %p19017_p0 = scmp.lt.s32.totalorder %s121_s29, %s121_s29 }
  0x4c   :  { %p19013_p13 = scmp.ne.s32.totalorder %s121_s29, %s19012_s22  ;;  %p19018_p1 = scmp.lt.s32.totalorder %s19012_s22, %s19012_s22 }
  0x4e   :  { %p19019_p2 = por %p19018_p1, %p19017_p0 }
  0x50   :  { %p19020_p3 = pnand %p19019_p2, %p19013_p13 }
  0x52   :  { %19023 = shalt.err (!%p19020_p3)
}
  0x53   :  { %123 = dma.hbm_to_vmem [thread:$0]  %s20123_s8, 256, %s121_s29, [#allocation14]  }
  0x54   :  { %s19356_s24 = smov [#allocation16]   ;;  %s19357_s25 = smov [#allocation19]  }
  0x55   :  { %s142_s23 = sshll.u32 %s19356_s24, 4  ;;  %s164_s4 = sshll.u32 %s19357_s25, 4  ;;  %s143_s23 = int_to_ptr.vmem [resolvable:$true] %s142_s23  ;;  %s165_s4 = int_to_ptr.vmem [resolvable:$true] %s164_s4 }
  0x56   :  { %s19024_s30 = scalar_lea.hbm %s20125_s10, 80 }
  0x57   :  { %p19025_p4 = scmp.ne.s32.totalorder %s20125_s10, %s19024_s30  ;;  %p19028_p5 = scmp.lt.u32.totalorder %s19024_s30, %s20125_s10 }
  0x59   :  { %p19030_p6 = pnand %p19028_p5, %p19025_p4 }
  0x5b   :  { %19033 = shalt.err (!%p19030_p6)
}
  0x5c   :  { %s19034_s8 = scalar_lea.vmem %s143_s23, 80  ;;  %s19038_s29 = scalar_lea.vmem %s143_s23, 96 }
  0x5d   :  { %p19035_p7 = scmp.ne.s32.totalorder %s143_s23, %s19034_s8  ;;  %p19039_p8 = scmp.lt.s32.totalorder %s143_s23, %s143_s23 }
  0x5e   :  { %p19040_p9 = scmp.lt.s32.totalorder %s19038_s29, %s19034_s8 }
  0x60   :  { %p19041_p10 = por %p19040_p9, %p19039_p8 }
  0x62   :  { %p19042_p11 = pnand %p19041_p10, %p19035_p7 }
  0x64   :  { %19045 = shalt.err (!%p19042_p11)
}
  0x65   :  { %145 = dma.hbm_to_vmem [thread:$0]  %s20125_s10, 80, %s143_s23, [#allocation17]  }
  0x66   :  { %s19046_s27 = scalar_lea.hbm %s20127_s12, 32 }
  0x67   :  { %p19047_p12 = scmp.ne.s32.totalorder %s20127_s12, %s19046_s27  ;;  %p19050_p13 = scmp.lt.u32.totalorder %s19046_s27, %s20127_s12 }
  0x69   :  { %p19052_p0 = pnand %p19050_p13, %p19047_p12 }
  0x6b   :  { %19055 = shalt.err (!%p19052_p0)
}
  0x6c   :  { %s19056_s30 = scalar_lea.vmem %s165_s4, 32  ;;  %p19061_p2 = scmp.lt.s32.totalorder %s165_s4, %s165_s4 }
  0x6d   :  { %p19057_p1 = scmp.ne.s32.totalorder %s165_s4, %s19056_s30  ;;  %p19062_p3 = scmp.lt.s32.totalorder %s19056_s30, %s19056_s30 }
  0x6f   :  { %p19063_p4 = por %p19062_p3, %p19061_p2 }
  0x71   :  { %p19064_p5 = pnand %p19063_p4, %p19057_p1 }
  0x73   :  { %19067 = shalt.err (!%p19064_p5)
}
  0x74   :  { %167 = dma.hbm_to_vmem [thread:$0]  %s20127_s12, 32, %s165_s4, [#allocation20]  }
  0x75   :  { %s19358_s2 = smov [#allocation22]   ;;  %s19359_s28 = smov [#allocation25]  }
  0x76   :  { %s186_s26 = sshll.u32 %s19358_s2, 4  ;;  %s208_s0 = sshll.u32 %s19359_s28, 4  ;;  %s187_s26 = int_to_ptr.vmem [resolvable:$true] %s186_s26  ;;  %s209_s0 = int_to_ptr.vmem [resolvable:$true] %s208_s0 }
  0x77   :  { %s19068_s20 = scalar_lea.hbm %s20129_s14, 16 }
  0x78   :  { %p19069_p6 = scmp.ne.s32.totalorder %s20129_s14, %s19068_s20  ;;  %p19072_p7 = scmp.lt.u32.totalorder %s19068_s20, %s20129_s14 }
  0x7a   :  { %p19074_p8 = pnand %p19072_p7, %p19069_p6 }
  0x7c   :  { %19077 = shalt.err (!%p19074_p8)
}
  0x7d   :  { %s19078_s12 = scalar_lea.vmem %s187_s26, 16  ;;  %s19082_s4 = scalar_lea.vmem %s187_s26, 32 }
  0x7e   :  { %p19079_p9 = scmp.ne.s32.totalorder %s187_s26, %s19078_s12  ;;  %p19083_p10 = scmp.lt.s32.totalorder %s187_s26, %s187_s26 }
  0x7f   :  { %p19084_p11 = scmp.lt.s32.totalorder %s19082_s4, %s19078_s12 }
  0x81   :  { %p19085_p12 = por %p19084_p11, %p19083_p10 }
  0x83   :  { %p19086_p13 = pnand %p19085_p12, %p19079_p9 }
  0x85   :  { %19089 = shalt.err (!%p19086_p13)
}
  0x86   :  { %189 = dma.hbm_to_vmem [thread:$0]  %s20129_s14, 16, %s187_s26, [#allocation23]  }
  0x87   :  { %s19090_s30 = scalar_lea.hbm %s20131_s16, 16 }
  0x88   :  { %p19091_p0 = scmp.ne.s32.totalorder %s20131_s16, %s19090_s30  ;;  %p19094_p1 = scmp.lt.u32.totalorder %s19090_s30, %s20131_s16 }
  0x8a   :  { %p19096_p2 = pnand %p19094_p1, %p19091_p0 }
  0x8c   :  { %19099 = shalt.err (!%p19096_p2)
}
  0x8d   :  { %s19100_s8 = scalar_lea.vmem %s209_s0, 16  ;;  %s19104_s29 = scalar_lea.vmem %s209_s0, 32 }
  0x8e   :  { %p19101_p3 = scmp.ne.s32.totalorder %s209_s0, %s19100_s8  ;;  %p19105_p4 = scmp.lt.s32.totalorder %s209_s0, %s209_s0 }
  0x8f   :  { %p19106_p5 = scmp.lt.s32.totalorder %s19104_s29, %s19100_s8 }
  0x91   :  { %p19107_p6 = por %p19106_p5, %p19105_p4 }
  0x93   :  { %p19108_p7 = pnand %p19107_p6, %p19101_p3 }
  0x95   :  { %19111 = shalt.err (!%p19108_p7)
}
  0x96   :  { %211 = dma.hbm_to_vmem [thread:$0]  %s20131_s16, 16, %s209_s0, [#allocation26]  }
  0x97   :  { %s19360_s20 = smov [#allocation2]   ;;  %s20143_s27 = sld [smem:[#allocation41_spill]] }
  0x98   :  { %s41_s1 = sshll.u32 %s19360_s20, 4  ;;  %s42_s1 = int_to_ptr.vmem [resolvable:$true] %s41_s1 }
  0x9d   :  { %s19112_s12 = scalar_lea.hbm %s20143_s27, 2048 }
  0x9e   :  { %p19113_p8 = scmp.ne.s32.totalorder %s20143_s27, %s19112_s12  ;;  %p19116_p9 = scmp.lt.u32.totalorder %s19112_s12, %s20143_s27 }
  0xa0   :  { %p19118_p10 = pnand %p19116_p9, %p19113_p8 }
  0xa2   :  { %19121 = shalt.err (!%p19118_p10)
}
  0xa3   :  { %s19122_s3 = scalar_lea.vmem %s42_s1, 2048  ;;  %p19127_p12 = scmp.lt.s32.totalorder %s42_s1, %s42_s1 }
  0xa4   :  { %p19123_p11 = scmp.ne.s32.totalorder %s42_s1, %s19122_s3  ;;  %p19128_p13 = scmp.lt.s32.totalorder %s19122_s3, %s19122_s3 }
  0xa6   :  { %p19129_p0 = por %p19128_p13, %p19127_p12 }
  0xa8   :  { %p19130_p1 = pnand %p19129_p0, %p19123_p11 }
  0xaa   :  { %19133 = shalt.err (!%p19130_p1)
}
  0xab   :  { %s19361_s16 = smov 128   ;;  %s19362_s0 = smov 8  }
  0xac   :  { %47 = dma.hbm_to_vmem [thread:$0]  %s20143_s27, 2048, %s42_s1, [#allocation3], %s19361_s16, %s19361_s16, %s19362_s0  }
  0xad   :  { %s19363_s23 = smov [#allocation6]   ;;  %s19364_s28 = smov [#allocation9]  }
  0xae   :  { %s63_s2 = sshll.u32 %s19363_s23, 4  ;;  %s85_s8 = sshll.u32 %s19364_s28, 4  ;;  %s64_s2 = int_to_ptr.vmem [resolvable:$true] %s63_s2  ;;  %s86_s8 = int_to_ptr.vmem [resolvable:$true] %s85_s8 }
  0xaf   :  { %s20144_s26 = sld [smem:[#allocation43_spill]] }
  0xb5   :  { %s19134_s20 = scalar_lea.hbm %s20144_s26, 4096 }
  0xb6   :  { %p19135_p2 = scmp.ne.s32.totalorder %s20144_s26, %s19134_s20  ;;  %p19138_p3 = scmp.lt.u32.totalorder %s19134_s20, %s20144_s26 }
  0xb8   :  { %p19140_p4 = pnand %p19138_p3, %p19135_p2 }
  0xba   :  { %19143 = shalt.err (!%p19140_p4)
}
  0xbb   :  { %s19144_s1 = scalar_lea.vmem %s64_s2, 4096  ;;  %p19149_p6 = scmp.lt.s32.totalorder %s64_s2, %s64_s2 }
  0xbc   :  { %p19145_p5 = scmp.ne.s32.totalorder %s64_s2, %s19144_s1  ;;  %p19150_p7 = scmp.lt.s32.totalorder %s19144_s1, %s19144_s1 }
  0xbe   :  { %p19151_p8 = por %p19150_p7, %p19149_p6 }
  0xc0   :  { %p19152_p9 = pnand %p19151_p8, %p19145_p5 }
  0xc2   :  { %19155 = shalt.err (!%p19152_p9)
}
  0xc3   :  { %69 = dma.hbm_to_vmem [thread:$0]  %s20144_s26, 4096, %s64_s2, [#allocation5], %s19361_s16, %s19361_s16, %s19362_s0  }
  0xc4   :  { %s19156_s3 = scalar_lea.hbm %s20120_s5, 16384 }
  0xc5   :  { %p19157_p10 = scmp.ne.s32.totalorder %s20120_s5, %s19156_s3  ;;  %p19160_p11 = scmp.lt.u32.totalorder %s19156_s3, %s20120_s5 }
  0xc7   :  { %p19162_p12 = pnand %p19160_p11, %p19157_p10 }
  0xc9   :  { %19165 = shalt.err (!%p19162_p12)
}
  0xca   :  { %s19166_s29 = scalar_lea.vmem %s86_s8, 16384  ;;  %p19171_p0 = scmp.lt.s32.totalorder %s86_s8, %s86_s8 }
  0xcb   :  { %p19167_p13 = scmp.ne.s32.totalorder %s86_s8, %s19166_s29  ;;  %p19172_p1 = scmp.lt.s32.totalorder %s19166_s29, %s19166_s29 }
  0xcd   :  { %p19173_p2 = por %p19172_p1, %p19171_p0 }
  0xcf   :  { %p19174_p3 = pnand %p19173_p2, %p19167_p13 }
  0xd1   :  { %19177 = shalt.err (!%p19174_p3)
}
  0xd2   :  { %s19365_s2 = smov 512   ;;  %s19366_s14 = smov 32  }
  0xd3   :  { %91 = dma.hbm_to_vmem [thread:$0]  %s20120_s5, 16384, %s86_s8, [#allocation8], %s19365_s2, %s19365_s2, %s19366_s14  }
  0xd4   :  { %s19367_s22 = smov [#allocation12]   ;;  %s19178_s1 = scalar_lea.hbm %s20122_s7, 131072 }
  0xd5   :  { %s107_s6 = sshll.u32 %s19367_s22, 4  ;;  %p19179_p4 = scmp.ne.s32.totalorder %s20122_s7, %s19178_s1  ;;  %s108_s6 = int_to_ptr.vmem [resolvable:$true] %s107_s6 }
  0xd6   :  { %p19182_p5 = scmp.lt.u32.totalorder %s19178_s1, %s20122_s7 }
  0xd8   :  { %p19184_p6 = pnand %p19182_p5, %p19179_p4 }
  0xda   :  { %19187 = shalt.err (!%p19184_p6)
}
  0xdb   :  { %s19188_s3 = scalar_lea.vmem %s108_s6, 131072  ;;  %p19193_p8 = scmp.lt.s32.totalorder %s108_s6, %s108_s6 }
  0xdc   :  { %p19189_p7 = scmp.ne.s32.totalorder %s108_s6, %s19188_s3  ;;  %p19194_p9 = scmp.lt.s32.totalorder %s19188_s3, %s19188_s3 }
  0xde   :  { %p19195_p10 = por %p19194_p9, %p19193_p8 }
  0xe0   :  { %p19196_p11 = pnand %p19195_p10, %p19189_p7 }
  0xe2   :  { %19199 = shalt.err (!%p19196_p11)
}
  0xe3   :  { %s19368_s5 = smov 1024   ;;  %s19369_s8 = smov 64  }
  0xe4   :  { %113 = dma.hbm_to_vmem [thread:$0]  %s20122_s7, 131072, %s108_s6, [#allocation11], %s19368_s5, %s19368_s5, %s19369_s8  }
  0xe5   :  { %s19370_s23 = smov [#allocation15]   ;;  %s19200_s14 = scalar_lea.hbm %s20124_s9, 81920 }
  0xe6   :  { %s129_s28 = sshll.u32 %s19370_s23, 4  ;;  %p19201_p12 = scmp.ne.s32.totalorder %s20124_s9, %s19200_s14  ;;  %s130_s28 = int_to_ptr.vmem [resolvable:$true] %s129_s28 }
  0xe7   :  { %p19204_p13 = scmp.lt.u32.totalorder %s19200_s14, %s20124_s9 }
  0xe9   :  { %p19206_p0 = pnand %p19204_p13, %p19201_p12 }
  0xeb   :  { %19209 = shalt.err (!%p19206_p0)
}
  0xec   :  { %s19210_s4 = scalar_lea.vmem %s130_s28, 81920  ;;  %p19215_p2 = scmp.lt.s32.totalorder %s130_s28, %s130_s28 }
  0xed   :  { %p19211_p1 = scmp.ne.s32.totalorder %s130_s28, %s19210_s4  ;;  %p19216_p3 = scmp.lt.s32.totalorder %s19210_s4, %s19210_s4 }
  0xef   :  { %p19217_p4 = por %p19216_p3, %p19215_p2 }
  0xf1   :  { %p19218_p5 = pnand %p19217_p4, %p19211_p1 }
  0xf3   :  { %19221 = shalt.err (!%p19218_p5)
}
  0xf4   :  { %s19371_s7 = smov 320   ;;  %s19372_s6 = smov 20  }
  0xf5   :  { %135 = dma.hbm_to_vmem [thread:$0]  %s20124_s9, 81920, %s130_s28, [#allocation14], %s19371_s7, %s19371_s7, %s19372_s6  }
  0xf6   :  { %s19373_s24 = smov [#allocation18]   ;;  %s19374_s21 = smov [#allocation21]  }
  0xf7   :  { %s151_s25 = sshll.u32 %s19373_s24, 4  ;;  %s173_s3 = sshll.u32 %s19374_s21, 4  ;;  %s152_s25 = int_to_ptr.vmem [resolvable:$true] %s151_s25  ;;  %s174_s3 = int_to_ptr.vmem [resolvable:$true] %s173_s3 }
  0xf8   :  { %s19222_s10 = scalar_lea.hbm %s20126_s11, 10240 }
  0xf9   :  { %p19223_p6 = scmp.ne.s32.totalorder %s20126_s11, %s19222_s10  ;;  %p19226_p7 = scmp.lt.u32.totalorder %s19222_s10, %s20126_s11 }
  0xfb   :  { %p19228_p8 = pnand %p19226_p7, %p19223_p6 }
  0xfd   :  { %19231 = shalt.err (!%p19228_p8)
}
  0xfe   :  { %s19232_s9 = scalar_lea.vmem %s152_s25, 10240  ;;  %p19237_p10 = scmp.lt.s32.totalorder %s152_s25, %s152_s25 }
  0xff   :  { %p19233_p9 = scmp.ne.s32.totalorder %s152_s25, %s19232_s9  ;;  %p19238_p11 = scmp.lt.s32.totalorder %s19232_s9, %s19232_s9 }
 0x101   :  { %p19239_p12 = por %p19238_p11, %p19237_p10 }
 0x103   :  { %p19240_p13 = pnand %p19239_p12, %p19233_p9 }
 0x105   :  { %19243 = shalt.err (!%p19240_p13)
}
 0x106   :  { %157 = dma.hbm_to_vmem [thread:$0]  %s20126_s11, 10240, %s152_s25, [#allocation17], %s19361_s16, %s19361_s16, %s19362_s0  }
 0x107   :  { %s19244_s12 = scalar_lea.hbm %s20128_s13, 2048 }
 0x108   :  { %p19245_p0 = scmp.ne.s32.totalorder %s20128_s13, %s19244_s12  ;;  %p19248_p1 = scmp.lt.u32.totalorder %s19244_s12, %s20128_s13 }
 0x10a   :  { %p19250_p2 = pnand %p19248_p1, %p19245_p0 }
 0x10c   :  { %19253 = shalt.err (!%p19250_p2)
}
 0x10d   :  { %s19254_s27 = scalar_lea.vmem %s174_s3, 2048  ;;  %p19259_p4 = scmp.lt.s32.totalorder %s174_s3, %s174_s3 }
 0x10e   :  { %p19255_p3 = scmp.ne.s32.totalorder %s174_s3, %s19254_s27  ;;  %p19260_p5 = scmp.lt.s32.totalorder %s19254_s27, %s19254_s27 }
 0x110   :  { %p19261_p6 = por %p19260_p5, %p19259_p4 }
 0x112   :  { %p19262_p7 = pnand %p19261_p6, %p19255_p3 }
 0x114   :  { %19265 = shalt.err (!%p19262_p7)
}
 0x115   :  { %s19375_s11 = smov 4   ;;  %s19376_s24 = smov [#allocation24]  }
 0x116   :  { %179 = dma.hbm_to_vmem [thread:$0]  %s20128_s13, 2048, %s174_s3, [#allocation20], %s19369_s8, %s19369_s8, %s19375_s11  }
 0x117   :  { %s195_s25 = sshll.u32 %s19376_s24, 4  ;;  %s19377_s21 = smov [#allocation27]   ;;  %s196_s25 = int_to_ptr.vmem [resolvable:$true] %s195_s25 }
 0x118   :  { %s217_s5 = sshll.u32 %s19377_s21, 4  ;;  %s19266_s23 = scalar_lea.hbm %s20130_s15, 1024  ;;  %s19675_s5 = int_to_ptr.vmem [resolvable:$true] %s217_s5 }
 0x119   :  { %p19267_p8 = scmp.ne.s32.totalorder %s20130_s15, %s19266_s23  ;;  %p19270_p9 = scmp.lt.u32.totalorder %s19266_s23, %s20130_s15 }
 0x11b   :  { %p19272_p10 = pnand %p19270_p9, %p19267_p8 }
 0x11d   :  { %19275 = shalt.err (!%p19272_p10)
}
 0x11e   :  { %s19276_s13 = scalar_lea.vmem %s196_s25, 1024  ;;  %p19281_p12 = scmp.lt.s32.totalorder %s196_s25, %s196_s25 }
 0x11f   :  { %p19277_p11 = scmp.ne.s32.totalorder %s196_s25, %s19276_s13  ;;  %p19282_p13 = scmp.lt.s32.totalorder %s19276_s13, %s19276_s13 }
 0x121   :  { %p19283_p0 = por %p19282_p13, %p19281_p12 }
 0x123   :  { %p19284_p1 = pnand %p19283_p0, %p19277_p11 }
 0x125   :  { %19287 = shalt.err (!%p19284_p1)
}
 0x126   :  { %201 = dma.hbm_to_vmem [thread:$0]  %s20130_s15, 1024, %s196_s25, [#allocation23], %s19369_s8, %s19369_s8, %s19375_s11  }
 0x127   :  { %s19288_s22 = scalar_lea.hbm %s20132_s17, 1024 }
 0x128   :  { %p19289_p2 = scmp.ne.s32.totalorder %s20132_s17, %s19288_s22  ;;  %p19292_p3 = scmp.lt.u32.totalorder %s19288_s22, %s20132_s17 }
 0x12a   :  { %p19294_p4 = pnand %p19292_p3, %p19289_p2 }
 0x12c   :  { %19297 = shalt.err (!%p19294_p4)
}
 0x12d   :  { %s19298_s1 = scalar_lea.vmem %s19675_s5, 1024  ;;  %p19303_p6 = scmp.lt.s32.totalorder %s19675_s5, %s19675_s5 }
 0x12e   :  { %p19299_p5 = scmp.ne.s32.totalorder %s19675_s5, %s19298_s1  ;;  %p19304_p7 = scmp.lt.s32.totalorder %s19298_s1, %s19298_s1 }
 0x130   :  { %p19305_p8 = por %p19304_p7, %p19303_p6 }
 0x132   :  { %p19306_p9 = pnand %p19305_p8, %p19299_p5 }
 0x134   :  { %19309 = shalt.err (!%p19306_p9)
}
 0x135   :  { %223 = dma.hbm_to_vmem [thread:$0]  %s20132_s17, 1024, %s19675_s5, [#allocation26], %s19369_s8, %s19369_s8, %s19375_s11  }
 0x136   :  { %s19378_s16 = smov [#allocation28]   ;;  %s19310_s21 = scalar_lea.hbm %s20133_s18, 16 }
 0x137   :  { %s230_s0 = sshll.u32 %s19378_s16, 4  ;;  %p19311_p10 = scmp.ne.s32.totalorder %s20133_s18, %s19310_s21  ;;  %s231_s0 = int_to_ptr.vmem [resolvable:$true] %s230_s0 }
 0x138   :  { %p19314_p11 = scmp.lt.u32.totalorder %s19310_s21, %s20133_s18 }
 0x13a   :  { %p19316_p12 = pnand %p19314_p11, %p19311_p10 }
 0x13c   :  { %19319 = shalt.err (!%p19316_p12)
}
 0x13d   :  { %s19320_s2 = scalar_lea.vmem %s231_s0, 16  ;;  %s19324_s17 = scalar_lea.vmem %s231_s0, 32 }
 0x13e   :  { %p19321_p13 = scmp.ne.s32.totalorder %s231_s0, %s19320_s2  ;;  %p19325_p0 = scmp.lt.s32.totalorder %s231_s0, %s231_s0 }
 0x13f   :  { %p19326_p1 = scmp.lt.s32.totalorder %s19324_s17, %s19320_s2 }
 0x141   :  { %p19327_p2 = por %p19326_p1, %p19325_p0 }
 0x143   :  { %p19328_p3 = pnand %p19327_p2, %p19321_p13 }
 0x145   :  { %19331 = shalt.err (!%p19328_p3)
}
 0x146   :  { %233 = dma.hbm_to_vmem [thread:$0]  %s20133_s18, 16, %s231_s0, [#allocation29]  }
 0x147   :  { %19332 = dma.done.wait [#allocation3], 2048  }
 0x148   :  { %19333 = vsyncadd [#allocation3], 4294965248 }
 0x149   :  { %19334 = dma.done.wait [#allocation5], 4128  }
 0x14a   :  { %19335 = vsyncadd [#allocation5], 4294963168 }
 0x14b   :  { %19336 = dma.done.wait [#allocation8], 16416  }
 0x14c   :  { %19337 = vsyncadd [#allocation8], 4294950880 }
 0x14d   :  { %19338 = dma.done.wait [#allocation11], 131200  }
 0x14e   :  { %19339 = vsyncadd [#allocation11], 4294836096 }
 0x14f   :  { %19340 = dma.done.wait [#allocation14], 82176  }
 0x150   :  { %19341 = vsyncadd [#allocation14], 4294885120 }
 0x151   :  { %19342 = dma.done.wait [#allocation17], 10320  }
 0x152   :  { %19343 = vsyncadd [#allocation17], 4294956976 }
 0x153   :  { %19344 = dma.done.wait [#allocation20], 2080  }
 0x154   :  { %19345 = vsyncadd [#allocation20], 4294965216 }
 0x155   :  { %19346 = dma.done.wait [#allocation23], 1040  }
 0x156   :  { %19347 = vsyncadd [#allocation23], 4294966256 }
 0x157   :  { %19348 = dma.done.wait [#allocation26], 1040  }
 0x158   :  { %19349 = vsyncadd [#allocation26], 4294966256 }
 0x159   :  { %19350 = dma.done.wait [#allocation29], 16  }
 0x15a   :  { %19351 = vsyncadd [#allocation29], 4294967280  ;;  %v19379_v0 = vmov 0   ;;  %v17813_v1 = vld [vmem:[#allocation2 + $0x4] ss:$8 sps:$4 sm:$0xff]   ;;  %s20145_s14 = sld [smem:[#allocation40_spill]] }
 0x15b   :  { %430 = vmatprep.mubr.bf16.mxu0 %v19379_v0  ;;  %v17815_v2 = vld [vmem:[#allocation2] ss:$8 sps:$4 sm:$0xff]   ;;  %398 = vmatprep.subr.bf16.mxu0 %v17813_v1  ;;  %v17816_v3 = vld [vmem:[#allocation2 + $0x14] ss:$8 sps:$4 sm:$0xff]   ;;  %v17818_v4 = vld [vmem:[#allocation2 + $0x10] ss:$8 sps:$4 sm:$0xff]  }
 0x15c   :  { %399 = vmatpush1.bf16.msra.mxu0 %v17815_v2  ;;  %v17819_v5 = vld [vmem:[#allocation2 + $0x24] ss:$8 sps:$4 sm:$0xff]   ;;  %v17821_v6 = vld [vmem:[#allocation2 + $0x20] ss:$8 sps:$4 sm:$0xff]   ;;  %v17822_v7 = vld [vmem:[#allocation2 + $0x34] ss:$8 sps:$4 sm:$0xff]  }
 0x15d   :  { %400 = vmatprep.subr.bf16.mxu0 %v17816_v3  ;;  %v17824_v8 = vld [vmem:[#allocation2 + $0x30] ss:$8 sps:$4 sm:$0xff]   ;;  %v17825_v9 = vld [vmem:[#allocation2 + $0x44] ss:$8 sps:$4 sm:$0xff]   ;;  %v17827_v13 = vld [vmem:[#allocation2 + $0x40] ss:$8 sps:$4 sm:$0xff]  }
 0x15e   :  { %v17837_v10 = vld [vmem:[#allocation6 + $0x4] ss:$8 sps:$4 sm:$0xff]   ;;  %v17839_v11 = vld [vmem:[#allocation6] ss:$8 sps:$4 sm:$0xff]   ;;  %v17840_v12 = vld [vmem:[#allocation6 + $0x14] ss:$8 sps:$4 sm:$0xff]  }
 0x15f   :  { %647 = vmatprep.subr.bf16.mxu1 %v17837_v10  ;;  %v17842_v14 = vld [vmem:[#allocation6 + $0x10] ss:$8 sps:$4 sm:$0xff]   ;;  %v17843_v15 = vld [vmem:[#allocation6 + $0x24] ss:$8 sps:$4 sm:$0xff]   ;;  %v17845_v18 = vld [vmem:[#allocation6 + $0x20] ss:$8 sps:$4 sm:$0xff]  }
 0x160   :  { %401 = vmatpush1.bf16.msra.mxu0 %v17818_v4  ;;  %648 = vmatpush1.bf16.msra.mxu1 %v17839_v11  ;;  %v17828_v16 = vld [vmem:[#allocation2 + $0x54] ss:$8 sps:$4 sm:$0xff]   ;;  %v17830_v17 = vld [vmem:[#allocation2 + $0x50] ss:$8 sps:$4 sm:$0xff]   ;;  %v17831_v20 = vld [vmem:[#allocation2 + $0x64] ss:$8 sps:$4 sm:$0xff]  }
 0x161   :  { %402 = vmatprep.subr.bf16.mxu0 %v17819_v5  ;;  %649 = vmatprep.subr.bf16.mxu1 %v17840_v12  ;;  %v17846_v19 = vld [vmem:[#allocation6 + $0x34] ss:$8 sps:$4 sm:$0xff]   ;;  %v17848_v22 = vld [vmem:[#allocation6 + $0x30] ss:$8 sps:$4 sm:$0xff]   ;;  %v17849_v23 = vld [vmem:[#allocation6 + $0x44] ss:$8 sps:$4 sm:$0xff]  }
 0x162   :  { %v17833_v21 = vld [vmem:[#allocation2 + $0x60] ss:$8 sps:$4 sm:$0xff]   ;;  %v17834_v24 = vld [vmem:[#allocation2 + $0x74] ss:$8 sps:$4 sm:$0xff]   ;;  %v17836_v25 = vld [vmem:[#allocation2 + $0x70] ss:$8 sps:$4 sm:$0xff]  }
 0x163   :  { %v17851_v26 = vld [vmem:[#allocation6 + $0x40] ss:$8 sps:$4 sm:$0xff]   ;;  %v17852_v27 = vld [vmem:[#allocation6 + $0x54] ss:$8 sps:$4 sm:$0xff]   ;;  %v17854_v29 = vld [vmem:[#allocation6 + $0x50] ss:$8 sps:$4 sm:$0xff]  }
 0x164   :  { %403 = vmatpush1.bf16.msra.mxu0 %v17821_v6  ;;  %650 = vmatpush1.bf16.msra.mxu1 %v17842_v14  ;;  %v289_v28 = vld [vmem:[%s20145_s14] sm:$0xf]  ;;  %v17855_v30 = vld [vmem:[#allocation6 + $0x64] ss:$8 sps:$4 sm:$0xff]   ;;  %v17860_v33 = vld [vmem:[#allocation6 + $0x70] ss:$8 sps:$4 sm:$0xff]  }
 0x165   :  { %404 = vmatprep.subr.bf16.mxu0 %v17822_v7  ;;  %651 = vmatprep.subr.bf16.mxu1 %v17843_v15  ;;  %v17857_v31 = vld [vmem:[#allocation6 + $0x60] ss:$8 sps:$4 sm:$0xff]   ;;  %v17858_v32 = vld [vmem:[#allocation6 + $0x74] ss:$8 sps:$4 sm:$0xff]   ;;  %v17861_v34 = vld [vmem:[#allocation6 + $0x84] ss:$8 sps:$4 sm:$0xff]  }
 0x166   :  { %v17863_v35 = vld [vmem:[#allocation6 + $0x80] ss:$8 sps:$4 sm:$0xff]   ;;  %v17864_v36 = vld [vmem:[#allocation6 + $0x94] ss:$8 sps:$4 sm:$0xff]   ;;  %v17866_v37 = vld [vmem:[#allocation6 + $0x90] ss:$8 sps:$4 sm:$0xff]  }
 0x167   :  { %v17867_v38 = vld [vmem:[#allocation6 + $0xa4] ss:$8 sps:$4 sm:$0xff]   ;;  %v17869_v39 = vld [vmem:[#allocation6 + $0xa0] ss:$8 sps:$4 sm:$0xff]   ;;  %v17870_v40 = vld [vmem:[#allocation6 + $0xb4] ss:$8 sps:$4 sm:$0xff]  }
 0x168   :  { %405 = vmatpush1.bf16.msra.mxu0 %v17824_v8  ;;  %652 = vmatpush1.bf16.msra.mxu1 %v17845_v18  ;;  %v17872_v41 = vld [vmem:[#allocation6 + $0xb0] ss:$8 sps:$4 sm:$0xff]   ;;  %v17873_v42 = vld [vmem:[#allocation6 + $0xc4] ss:$8 sps:$4 sm:$0xff]   ;;  %v17875_v43 = vld [vmem:[#allocation6 + $0xc0] ss:$8 sps:$4 sm:$0xff]  }
 0x169   :  { %406 = vmatprep.subr.bf16.mxu0 %v17825_v9  ;;  %653 = vmatprep.subr.bf16.mxu1 %v17846_v19  ;;  %v17876_v44 = vld [vmem:[#allocation6 + $0xd4] ss:$8 sps:$4 sm:$0xff]   ;;  %v17878_v45 = vld [vmem:[#allocation6 + $0xd0] ss:$8 sps:$4 sm:$0xff]   ;;  %v17879_v46 = vld [vmem:[#allocation6 + $0xe4] ss:$8 sps:$4 sm:$0xff]  }
 0x16a   :  { %v17881_v47 = vld [vmem:[#allocation6 + $0xe0] ss:$8 sps:$4 sm:$0xff]   ;;  %v17882_v48 = vld [vmem:[#allocation6 + $0xf4] ss:$8 sps:$4 sm:$0xff]   ;;  %v17884_v49 = vld [vmem:[#allocation6 + $0xf0] ss:$8 sps:$4 sm:$0xff]  }
 0x16b   :  { %v692_v50 = vld [vmem:[#allocation9] sm:$0xff]  ;;  %v19728_v52 = vld [vmem:[#allocation9 + $0x8] sm:$0xff]  ;;  %vm19381_vm0 = vmmov 0  }
 0x16c   :  { %407 = vmatpush1.bf16.msra.mxu0 %v17827_v13  ;;  %654 = vmatpush1.bf16.msra.mxu1 %v17848_v22  ;;  %v696_v51 = vld [vmem:[#allocation9 + $0x20] sm:$0xff]  ;;  %v19730_v55 = vld [vmem:[#allocation9 + $0x28] sm:$0xff] }
 0x16d   :  { %408 = vmatprep.subr.bf16.mxu0 %v17828_v16  ;;  %655 = vmatprep.subr.bf16.mxu1 %v17849_v23  ;;  %v15438_v53 = vcombine.low %v692_v50, %v696_v51  ;;  %v15439_v54 = vcombine.high %v692_v50, %v696_v51  ;;  %v700_v56 = vld [vmem:[#allocation9 + $0x40] sm:$0xff]  ;;  %v15440_v58 = vcombine.low %v19728_v52, %v19730_v55  ;;  %v306_v51 = vld [vmem:[#allocation4] sm:$0x3] }
 0x16e   :  { %v704_v57 = vld [vmem:[#allocation9 + $0x60] sm:$0xff]  ;;  %v15441_v59 = vcombine.high %v19728_v52, %v19730_v55  ;;  %v741_v55 = vld [vmem:[#allocation9 + $0x188] sm:$0xff] }
 0x16f   :  { %v15447_v60 = vcombine.high %v700_v56, %v704_v57  ;;  %v15446_v61 = vcombine.low %v700_v56, %v704_v57  ;;  %v708_v62 = vld [vmem:[#allocation9 + $0x80] sm:$0xff] }
 0x170   :  { %409 = vmatpush1.bf16.msra.mxu0 %v17830_v17  ;;  %656 = vmatpush1.bf16.msra.mxu1 %v17851_v26  ;;  %v712_v63 = vld [vmem:[#allocation9 + $0xa0] sm:$0xff] }
 0x171   :  { %410 = vmatprep.subr.bf16.mxu0 %v17831_v20  ;;  %657 = vmatprep.subr.bf16.mxu1 %v17852_v27  ;;  %v15455_v1 = vcombine.high %v708_v62, %v712_v63  ;;  %v15454_v2 = vcombine.low %v708_v62, %v712_v63  ;;  %v716_v3 = vld [vmem:[#allocation9 + $0xc0] sm:$0xff]  ;;  %v701_v62 = vld [vmem:[#allocation9 + $0x48] sm:$0xff] }
 0x172   :  { %v720_v4 = vld [vmem:[#allocation9 + $0xe0] sm:$0xff]  ;;  %v705_v63 = vld [vmem:[#allocation9 + $0x68] sm:$0xff] }
 0x173   :  { %v15463_v5 = vcombine.high %v716_v3, %v720_v4  ;;  %v15462_v6 = vcombine.low %v716_v3, %v720_v4  ;;  %v724_v7 = vld [vmem:[#allocation9 + $0x100] sm:$0xff] }
 0x174   :  { %411 = vmatpush1.bf16.msra.mxu0 %v17833_v21  ;;  %658 = vmatpush1.bf16.msra.mxu1 %v17854_v29  ;;  %v728_v8 = vld [vmem:[#allocation9 + $0x120] sm:$0xff] }
 0x175   :  { %412 = vmatprep.subr.bf16.mxu0 %v17834_v24  ;;  %659 = vmatprep.subr.bf16.mxu1 %v17855_v30  ;;  %v15471_v9 = vcombine.high %v724_v7, %v728_v8  ;;  %v15470_v10 = vcombine.low %v724_v7, %v728_v8  ;;  %v732_v11 = vld [vmem:[#allocation9 + $0x140] sm:$0xff]  ;;  %v15449_v8 = vcombine.high %v701_v62, %v705_v63 }
 0x176   :  { %v736_v12 = vld [vmem:[#allocation9 + $0x160] sm:$0xff] }
 0x177   :  { %v15479_v13 = vcombine.high %v732_v11, %v736_v12  ;;  %v15478_v14 = vcombine.low %v732_v11, %v736_v12  ;;  %v740_v15 = vld [vmem:[#allocation9 + $0x180] sm:$0xff]  ;;  %v721_v11 = vld [vmem:[#allocation9 + $0xe8] sm:$0xff] }
 0x178   :  { %413 = vmatpush1.bf16.msra.mxu0 %v17836_v25  ;;  %660 = vmatpush1.bf16.msra.mxu1 %v17857_v31  ;;  %v744_v16 = vld [vmem:[#allocation9 + $0x1a0] sm:$0xff] }
 0x179   :  { %661 = vmatprep.subr.bf16.mxu1 %v17858_v32  ;;  %1502 = vmatprep.subr.bf16.mxu0 %v15439_v54  ;;  %v15487_v17 = vcombine.high %v740_v15, %v744_v16  ;;  %v15486_v18 = vcombine.low %v740_v15, %v744_v16  ;;  %v748_v19 = vld [vmem:[#allocation9 + $0x1c0] sm:$0xff]  ;;  %v729_v15 = vld [vmem:[#allocation9 + $0x128] sm:$0xff] }
 0x17a   :  { %v752_v20 = vld [vmem:[#allocation9 + $0x1e0] sm:$0xff] }
 0x17b   :  { %431 = vmatmul.mubr.bf16.vlgmr.msra.gmra.mrb[0].mxu0 %v289_v28  ;;  %v15495_v21 = vcombine.high %v748_v19, %v752_v20  ;;  %v15494_v22 = vcombine.low %v748_v19, %v752_v20  ;;  %v756_v23 = vld [vmem:[#allocation9 + $0x200] sm:$0xff]  ;;  %v737_v19 = vld [vmem:[#allocation9 + $0x168] sm:$0xff] }
 0x17c   :  { %662 = vmatpush1.bf16.msra.mxu1 %v17860_v33  ;;  %1503 = vmatpush1.bf16.msra.mxu0 %v15438_v53  ;;  %v760_v24 = vld [vmem:[#allocation9 + $0x220] sm:$0xff] }
 0x17d   :  { %663 = vmatprep.subr.bf16.mxu1 %v17861_v34  ;;  %1504 = vmatprep.subr.bf16.mxu0 %v15447_v60  ;;  %v15503_v25 = vcombine.high %v756_v23, %v760_v24  ;;  %v15502_v26 = vcombine.low %v756_v23, %v760_v24  ;;  %v764_v27 = vld [vmem:[#allocation9 + $0x240] sm:$0xff]  ;;  %v749_v23 = vld [vmem:[#allocation9 + $0x1c8] sm:$0xff] }
 0x17e   :  { %v768_v28 = vld [vmem:[#allocation9 + $0x260] sm:$0xff]  ;;  %v753_v24 = vld [vmem:[#allocation9 + $0x1e8] sm:$0xff] }
 0x17f   :  { %v15511_v29 = vcombine.high %v764_v27, %v768_v28  ;;  %v15510_v30 = vcombine.low %v764_v27, %v768_v28  ;;  %v772_v31 = vld [vmem:[#allocation9 + $0x280] sm:$0xff]  ;;  %v757_v27 = vld [vmem:[#allocation9 + $0x208] sm:$0xff] }
 0x180   :  { %664 = vmatpush1.bf16.msra.mxu1 %v17863_v35  ;;  %1505 = vmatpush1.bf16.msra.mxu0 %v15446_v61  ;;  %v776_v32 = vld [vmem:[#allocation9 + $0x2a0] sm:$0xff]  ;;  %v761_v28 = vld [vmem:[#allocation9 + $0x228] sm:$0xff] }
 0x181   :  { %665 = vmatprep.subr.bf16.mxu1 %v17864_v36  ;;  %1506 = vmatprep.subr.bf16.mxu0 %v15455_v1  ;;  %v15519_v33 = vcombine.high %v772_v31, %v776_v32  ;;  %v15518_v34 = vcombine.low %v772_v31, %v776_v32  ;;  %v780_v35 = vld [vmem:[#allocation9 + $0x2c0] sm:$0xff]  ;;  %v765_v31 = vld [vmem:[#allocation9 + $0x248] sm:$0xff] }
 0x182   :  { %v784_v36 = vld [vmem:[#allocation9 + $0x2e0] sm:$0xff]  ;;  %v769_v32 = vld [vmem:[#allocation9 + $0x268] sm:$0xff] }
 0x184   :  { %666 = vmatpush1.bf16.msra.mxu1 %v17866_v37  ;;  %1507 = vmatpush1.bf16.msra.mxu0 %v15454_v2  ;;  %v15527_v37 = vcombine.high %v780_v35, %v784_v36 }
 0x185   :  { %667 = vmatprep.subr.bf16.mxu1 %v17867_v38  ;;  %1508 = vmatprep.subr.bf16.mxu0 %v15463_v5  ;;  %v15526_v38 = vcombine.low %v780_v35, %v784_v36  ;;  %v709_v5 = vld [vmem:[#allocation9 + $0x88] sm:$0xff] }
 0x186   :  { %v773_v35 = vld [vmem:[#allocation9 + $0x288] sm:$0xff] }
 0x187   :  { %v777_v36 = vld [vmem:[#allocation9 + $0x2a8] sm:$0xff] }
 0x188   :  { %668 = vmatpush1.bf16.msra.mxu1 %v17869_v39  ;;  %1509 = vmatpush1.bf16.msra.mxu0 %v15462_v6  ;;  %v788_v39 = vld [vmem:[#allocation9 + $0x300] sm:$0xff]  ;;  %v713_v6 = vld [vmem:[#allocation9 + $0xa8] sm:$0xff] }
 0x189   :  { %669 = vmatprep.subr.bf16.mxu1 %v17870_v40  ;;  %1510 = vmatprep.subr.bf16.mxu0 %v15471_v9  ;;  %v792_v40 = vld [vmem:[#allocation9 + $0x320] sm:$0xff]  ;;  %v15448_v9 = vcombine.low %v701_v62, %v705_v63  ;;  %v15457_v12 = vcombine.high %v709_v5, %v713_v6  ;;  %v809_v63 = vld [vmem:[#allocation9 + $0x3a8] sm:$0xff] }
 0x18c   :  { %670 = vmatpush1.bf16.msra.mxu1 %v17872_v41  ;;  %1511 = vmatpush1.bf16.msra.mxu0 %v15470_v10  ;;  %v15535_v41 = vcombine.high %v788_v39, %v792_v40  ;;  %v717_v10 = vld [vmem:[#allocation9 + $0xc8] sm:$0xff] }
 0x18d   :  { %671 = vmatprep.subr.bf16.mxu1 %v17873_v42  ;;  %1512 = vmatprep.subr.bf16.mxu0 %v15479_v13  ;;  %v15534_v42 = vcombine.low %v788_v39, %v792_v40  ;;  %v15456_v13 = vcombine.low %v709_v5, %v713_v6  ;;  %v15465_v16 = vcombine.high %v717_v10, %v721_v11  ;;  %v781_v39 = vld [vmem:[#allocation9 + $0x2c8] sm:$0xff]  ;;  %v816_v5 = vld [vmem:[#allocation9 + $0x3e0] sm:$0xff] }
 0x18e   :  { %v785_v40 = vld [vmem:[#allocation9 + $0x2e8] sm:$0xff] }
 0x18f   :  { %v813_v6 = vld [vmem:[#allocation9 + $0x3c8] sm:$0xff] }
 0x190   :  { %672 = vmatpush1.bf16.msra.mxu1 %v17875_v43  ;;  %1513 = vmatpush1.bf16.msra.mxu0 %v15478_v14  ;;  %v796_v43 = vld [vmem:[#allocation9 + $0x340] sm:$0xff]  ;;  %v725_v14 = vld [vmem:[#allocation9 + $0x108] sm:$0xff] }
 0x191   :  { %673 = vmatprep.subr.bf16.mxu1 %v17876_v44  ;;  %1514 = vmatprep.subr.bf16.mxu0 %v15487_v17  ;;  %v800_v44 = vld [vmem:[#allocation9 + $0x360] sm:$0xff]  ;;  %v15464_v17 = vcombine.low %v717_v10, %v721_v11  ;;  %v15473_v20 = vcombine.high %v725_v14, %v729_v15  ;;  %v15472_v52 = vcombine.low %v725_v14, %v729_v15  ;;  %v695_v14 = vld [vmem:[#allocation9 + $0x18] sm:$0xff] }
 0x194   :  { %674 = vmatpush1.bf16.msra.mxu1 %v17878_v45  ;;  %1515 = vmatpush1.bf16.msra.mxu0 %v15486_v18  ;;  %v15543_v45 = vcombine.high %v796_v43, %v800_v44  ;;  %v733_v18 = vld [vmem:[#allocation9 + $0x148] sm:$0xff] }
 0x195   :  { %675 = vmatprep.subr.bf16.mxu1 %v17879_v46  ;;  %1516 = vmatprep.subr.bf16.mxu0 %v15495_v21  ;;  %v15542_v46 = vcombine.low %v796_v43, %v800_v44  ;;  %v15481_v21 = vcombine.high %v733_v18, %v737_v19  ;;  %v789_v43 = vld [vmem:[#allocation9 + $0x308] sm:$0xff] }
 0x196   :  { %v793_v44 = vld [vmem:[#allocation9 + $0x328] sm:$0xff] }
 0x198   :  { %676 = vmatpush1.bf16.msra.mxu1 %v17881_v47  ;;  %1517 = vmatpush1.bf16.msra.mxu0 %v15494_v22  ;;  %v308_v47 = vlaneseq  ;;  %v15480_v22 = vcombine.low %v733_v18, %v737_v19 }
 0x199   :  { %677 = vmatprep.subr.bf16.mxu1 %v17882_v48  ;;  %1518 = vmatprep.subr.bf16.mxu0 %v15503_v25 }
 0x19a   :  { %v19736_v48 = vshrl.u32 %v308_v47, 7  ;;  %v797_v47 = vld [vmem:[#allocation9 + $0x348] sm:$0xff] }
 0x19c   :  { %678 = vmatpush1.bf16.msra.mxu1 %v17884_v49  ;;  %1519 = vmatpush1.bf16.msra.mxu0 %v15502_v26  ;;  %v19739_v49 = vsub.s32 0, %v19736_v48  ;;  %v19742_v50 = vsub.s32 1, %v19736_v48 }
 0x19d   :  { %1543 = vmatprep.subr.bf16.mxu1 %v15441_v59  ;;  %1520 = vmatprep.subr.bf16.mxu0 %v15511_v29  ;;  %v15497_v29 = vcombine.high %v749_v23, %v753_v24 }
 0x19e   :  { %v311_v53 = vrot.slane %v306_v51, %v19739_v49  ;;  %v315_v54 = vrot.slane %v306_v51, %v19742_v50  ;;  %v801_v51 = vld [vmem:[#allocation9 + $0x368] sm:$0xff] }
 0x1a0   :  { %1521 = vmatpush1.bf16.msra.mxu0 %v15510_v30  ;;  %v15496_v30 = vcombine.low %v749_v23, %v753_v24 }
 0x1a1   :  { %1522 = vmatprep.subr.bf16.mxu0 %v15519_v33  ;;  %v15505_v33 = vcombine.high %v757_v27, %v761_v28 }
 0x1a4   :  { %1523 = vmatpush1.bf16.msra.mxu0 %v15518_v34  ;;  %v15504_v34 = vcombine.low %v757_v27, %v761_v28  ;;  %v702_v28 = vld [vmem:[#allocation9 + $0x50] sm:$0xff] }
 0x1a5   :  { %1524 = vmatprep.subr.bf16.mxu0 %v15527_v37  ;;  %v15513_v37 = vcombine.high %v765_v31, %v769_v32 }
 0x1a8   :  { %1525 = vmatpush1.bf16.msra.mxu0 %v15526_v38  ;;  %v15512_v38 = vcombine.low %v765_v31, %v769_v32  ;;  %v707_v31 = vld [vmem:[#allocation9 + $0x78] sm:$0xff] }
 0x1a9   :  { %1526 = vmatprep.subr.bf16.mxu0 %v15535_v41  ;;  %v15521_v41 = vcombine.high %v773_v35, %v777_v36 }
 0x1ac   :  { %1527 = vmatpush1.bf16.msra.mxu0 %v15534_v42  ;;  %v15520_v42 = vcombine.low %v773_v35, %v777_v36 }
 0x1ad   :  { %1528 = vmatprep.subr.bf16.mxu0 %v15543_v45  ;;  %v15529_v45 = vcombine.high %v781_v39, %v785_v40 }
 0x1b0   :  { %1529 = vmatpush1.bf16.msra.mxu0 %v15542_v46  ;;  %v15528_v46 = vcombine.low %v781_v39, %v785_v40  ;;  %v715_v39 = vld [vmem:[#allocation9 + $0xb8] sm:$0xff] }
 0x24e   :  { %v432_v56 = vpop.f32.mrb[0].mxu0 }
 0x24f   :  { %v433_v57 = vadd.f32 %v432_v56, %v311_v53  ;;  %v434_v59 = vpop.f32.mrb[1].mxu0  ;;  %v15537_v53 = vcombine.high %v789_v43, %v793_v44  ;;  %v15545_v56 = vcombine.high %v797_v47, %v801_v51 }
 0x250   :  { %v435_v60 = vadd.f32 %v434_v59, %v315_v54  ;;  %v436_v61 = vpop.f32.mrb[2].mxu0  ;;  %v15536_v54 = vcombine.low %v789_v43, %v793_v44  ;;  %v804_v59 = vld [vmem:[#allocation9 + $0x380] sm:$0xff]  ;;  %v718_v44 = vld [vmem:[#allocation9 + $0xd0] sm:$0xff] }
 0x251   :  { %v439_v1 = vmax.f32 %v433_v57, 0.0  ;;  %v437_v2 = vpop.f32.mrb[3].mxu0  ;;  %v15544_v57 = vcombine.low %v797_v47, %v801_v51  ;;  %v805_v61 = vld [vmem:[#allocation9 + $0x388] sm:$0xff]  ;;  %v723_v47 = vld [vmem:[#allocation9 + $0xf8] sm:$0xff] }
 0x252   :  { %v440_v3 = vmax.f32 %v435_v60, 0.0  ;;  %v808_v60 = vld [vmem:[#allocation9 + $0x3a0] sm:$0xff]  ;;  %v15552_v2 = vcombine.low %v805_v61, %v809_v63 }
 0x253   :  { %v441_v7 = vpack.c.bf16 %v439_v1, %v439_v1  ;;  %v15551_v62 = vcombine.high %v804_v59, %v808_v60  ;;  %v15550_v1 = vcombine.low %v804_v59, %v808_v60  ;;  %v730_v59 = vld [vmem:[#allocation9 + $0x130] sm:$0xff]  ;;  %v727_v60 = vld [vmem:[#allocation9 + $0x118] sm:$0xff] }
 0x254   :  { %v442_v4 = vpack.c.bf16 %v440_v3, %v440_v3  ;;  %v15553_v3 = vcombine.high %v805_v61, %v809_v63  ;;  %v731_v61 = vld [vmem:[#allocation9 + $0x138] sm:$0xff] }
 0x255   :  { %1530 = vmatprep.subr.bf16.mxu0 %v15551_v62 }
 0x256   :  { %679 = vmatprep.mubr.bf16.mxu1 %v442_v4  ;;  %1531 = vmatpush1.bf16.msra.mxu0 %v15550_v1  ;;  %v812_v4 = vld [vmem:[#allocation9 + $0x3c0] sm:$0xff] }
 0x257   :  { %680 = vmatmul.mubr.bf16.vlgmr.msra.gmra.mrb[0].mxu1 %v441_v7  ;;  %v15559_v7 = vcombine.high %v812_v4, %v816_v5 }
 0x258   :  { %1544 = vmatpush1.bf16.msra.mxu1 %v15440_v58  ;;  %v745_v58 = vld [vmem:[#allocation9 + $0x1a8] sm:$0xff] }
 0x259   :  { %1545 = vmatprep.subr.bf16.mxu1 %v15449_v8  ;;  %v15489_v25 = vcombine.high %v741_v55, %v745_v58  ;;  %v15488_v26 = vcombine.low %v741_v55, %v745_v58  ;;  %v817_v8 = vld [vmem:[#allocation9 + $0x3e8] sm:$0xff]  ;;  %1532 = vmatprep.subr.bf16.mxu0 %v15559_v7 }
 0x25a   :  { %v15560_v10 = vcombine.low %v813_v6, %v817_v8  ;;  %v15561_v11 = vcombine.high %v813_v6, %v817_v8  ;;  %v739_v6 = vld [vmem:[#allocation9 + $0x178] sm:$0xff]  ;;  %v15476_v8 = vcombine.low %v727_v60, %v731_v61 }
 0x25c   :  { %1546 = vmatpush1.bf16.msra.mxu1 %v15448_v9  ;;  %v15558_v9 = vcombine.low %v812_v4, %v816_v5  ;;  %v738_v4 = vld [vmem:[#allocation9 + $0x170] sm:$0xff]  ;;  %v735_v5 = vld [vmem:[#allocation9 + $0x158] sm:$0xff] }
 0x25d   :  { %1547 = vmatprep.subr.bf16.mxu1 %v15457_v12  ;;  %v694_v12 = vld [vmem:[#allocation9 + $0x10] sm:$0xff] }
 0x25e   :  { %1533 = vmatpush1.bf16.msra.mxu0 %v15558_v9 }
 0x260   :  { %1548 = vmatpush1.bf16.msra.mxu1 %v15456_v13  ;;  %v698_v13 = vld [vmem:[#allocation9 + $0x30] sm:$0xff] }
 0x261   :  { %1549 = vmatprep.subr.bf16.mxu1 %v15465_v16  ;;  %v15443_v15 = vcombine.high %v694_v12, %v698_v13  ;;  %v699_v16 = vld [vmem:[#allocation9 + $0x38] sm:$0xff] }
 0x262   :  { %v15444_v18 = vcombine.low %v695_v14, %v699_v16  ;;  %v15445_v19 = vcombine.high %v695_v14, %v699_v16  ;;  %v747_v14 = vld [vmem:[#allocation9 + $0x1b8] sm:$0xff]  ;;  %v15484_v16 = vcombine.low %v735_v5, %v739_v6 }
 0x263   :  { %1584 = vmatprep.subr.bf16.mxu0 %v15443_v15 }
 0x264   :  { %1550 = vmatpush1.bf16.msra.mxu1 %v15464_v17  ;;  %v15442_v17 = vcombine.low %v694_v12, %v698_v13  ;;  %v746_v12 = vld [vmem:[#allocation9 + $0x1b0] sm:$0xff]  ;;  %v743_v13 = vld [vmem:[#allocation9 + $0x198] sm:$0xff] }
 0x265   :  { %1551 = vmatprep.subr.bf16.mxu1 %v15473_v20  ;;  %v475_v20 = vld [vmem:[#allocation7] sm:$0x3] }
 0x266   :  { %v484_v55 = vrot.slane %v475_v20, %v19742_v50 }
 0x268   :  { %1552 = vmatpush1.bf16.msra.mxu1 %v15472_v52  ;;  %v480_v52 = vrot.slane %v475_v20, %v19739_v49  ;;  %v754_v20 = vld [vmem:[#allocation9 + $0x1f0] sm:$0xff] }
 0x269   :  { %1553 = vmatprep.subr.bf16.mxu1 %v15481_v21 }
 0x26c   :  { %1554 = vmatpush1.bf16.msra.mxu1 %v15480_v22 }
 0x26d   :  { %1555 = vmatprep.subr.bf16.mxu1 %v15489_v25 }
 0x270   :  { %1556 = vmatpush1.bf16.msra.mxu1 %v15488_v26 }
 0x271   :  { %1557 = vmatprep.subr.bf16.mxu1 %v15497_v29  ;;  %v706_v29 = vld [vmem:[#allocation9 + $0x70] sm:$0xff] }
 0x272   :  { %v15451_v35 = vcombine.high %v702_v28, %v706_v29  ;;  %v15450_v40 = vcombine.low %v702_v28, %v706_v29 }
 0x274   :  { %1558 = vmatpush1.bf16.msra.mxu1 %v15496_v30  ;;  %v703_v30 = vld [vmem:[#allocation9 + $0x58] sm:$0xff] }
 0x275   :  { %1559 = vmatprep.subr.bf16.mxu1 %v15505_v33  ;;  %v15453_v36 = vcombine.high %v703_v30, %v707_v31 }
 0x278   :  { %1560 = vmatpush1.bf16.msra.mxu1 %v15504_v34  ;;  %v710_v34 = vld [vmem:[#allocation9 + $0x90] sm:$0xff] }
 0x279   :  { %1561 = vmatprep.subr.bf16.mxu1 %v15513_v37  ;;  %v714_v37 = vld [vmem:[#allocation9 + $0xb0] sm:$0xff] }
 0x27a   :  { %v15458_v51 = vcombine.low %v710_v34, %v714_v37 }
 0x27c   :  { %1562 = vmatpush1.bf16.msra.mxu1 %v15512_v38  ;;  %v711_v38 = vld [vmem:[#allocation9 + $0x98] sm:$0xff] }
 0x27d   :  { %1563 = vmatprep.subr.bf16.mxu1 %v15521_v41  ;;  %v15452_v41 = vcombine.low %v703_v30, %v707_v31  ;;  %v15461_v43 = vcombine.high %v711_v38, %v715_v39 }
 0x280   :  { %1564 = vmatpush1.bf16.msra.mxu1 %v15520_v42  ;;  %v15459_v42 = vcombine.high %v710_v34, %v714_v37  ;;  %v770_v34 = vld [vmem:[#allocation9 + $0x270] sm:$0xff] }
 0x281   :  { %1565 = vmatprep.subr.bf16.mxu1 %v15529_v45  ;;  %v722_v45 = vld [vmem:[#allocation9 + $0xf0] sm:$0xff] }
 0x282   :  { %v15466_v62 = vcombine.low %v718_v44, %v722_v45 }
 0x284   :  { %1566 = vmatpush1.bf16.msra.mxu1 %v15528_v46  ;;  %v719_v46 = vld [vmem:[#allocation9 + $0xd8] sm:$0xff] }
 0x285   :  { %1567 = vmatprep.subr.bf16.mxu1 %v15537_v53  ;;  %v15460_v53 = vcombine.low %v711_v38, %v715_v39  ;;  %v15468_v63 = vcombine.low %v719_v46, %v723_v47 }
 0x288   :  { %1568 = vmatpush1.bf16.msra.mxu1 %v15536_v54  ;;  %v15467_v54 = vcombine.high %v718_v44, %v722_v45  ;;  %v779_v44 = vld [vmem:[#allocation9 + $0x2b8] sm:$0xff] }
 0x289   :  { %1569 = vmatprep.subr.bf16.mxu1 %v15545_v56  ;;  %v15469_v56 = vcombine.high %v719_v46, %v723_v47 }
 0x28c   :  { %1570 = vmatpush1.bf16.msra.mxu1 %v15544_v57  ;;  %v726_v57 = vld [vmem:[#allocation9 + $0x110] sm:$0xff] }
 0x28d   :  { %1571 = vmatprep.subr.bf16.mxu1 %v15553_v3  ;;  %v15475_v1 = vcombine.high %v726_v57, %v730_v59  ;;  %v734_v3 = vld [vmem:[#allocation9 + $0x150] sm:$0xff]  ;;  %v15474_v7 = vcombine.low %v726_v57, %v730_v59  ;;  %v787_v57 = vld [vmem:[#allocation9 + $0x2f8] sm:$0xff] }
 0x28e   :  { %v15483_v9 = vcombine.high %v734_v3, %v738_v4  ;;  %v15482_v15 = vcombine.low %v734_v3, %v738_v4  ;;  %v795_v3 = vld [vmem:[#allocation9 + $0x338] sm:$0xff] }
 0x290   :  { %1572 = vmatpush1.bf16.msra.mxu1 %v15552_v2  ;;  %v15477_v2 = vcombine.high %v727_v60, %v731_v61 }
 0x291   :  { %1573 = vmatprep.subr.bf16.mxu1 %v15561_v11  ;;  %v742_v11 = vld [vmem:[#allocation9 + $0x190] sm:$0xff] }
 0x294   :  { %1574 = vmatpush1.bf16.msra.mxu1 %v15560_v10  ;;  %v15485_v10 = vcombine.high %v735_v5, %v739_v6 }
 0x295   :  { %1625 = vmatprep.subr.bf16.mxu1 %v15445_v19  ;;  %v750_v19 = vld [vmem:[#allocation9 + $0x1d0] sm:$0xff] }
 0x296   :  { %v15498_v28 = vcombine.low %v750_v19, %v754_v20 }
 0x32a   :  { %v681_v58 = vpop.f32.mrb[0].mxu1 }
 0x32b   :  { %v682_v21 = vadd.f32 %v681_v58, %v480_v52  ;;  %v683_v22 = vpop.f32.mrb[1].mxu1  ;;  %v751_v52 = vld [vmem:[#allocation9 + $0x1d8] sm:$0xff]  ;;  %v15490_v58 = vcombine.low %v742_v11, %v746_v12 }
 0x32c   :  { %v684_v23 = vadd.f32 %v683_v22, %v484_v55  ;;  %v685_v24 = vpop.f32.mrb[2].mxu1  ;;  %v755_v55 = vld [vmem:[#allocation9 + $0x1f8] sm:$0xff]  ;;  %v15499_v22 = vcombine.high %v750_v19, %v754_v20 }
 0x32d   :  { %v688_v25 = vmax.f32 %v682_v21, 0.0  ;;  %v686_v26 = vpop.f32.mrb[3].mxu1  ;;  %v15492_v21 = vcombine.low %v743_v13, %v747_v14  ;;  %v758_v24 = vld [vmem:[#allocation9 + $0x210] sm:$0xff]  ;;  %v15500_v29 = vcombine.low %v751_v52, %v755_v55  ;;  %v811_v19 = vld [vmem:[#allocation9 + $0x3b8] sm:$0xff] }
 0x32e   :  { %v689_v27 = vmax.f32 %v684_v23, 0.0  ;;  %v15501_v23 = vcombine.high %v751_v52, %v755_v55  ;;  %v759_v26 = vld [vmem:[#allocation9 + $0x218] sm:$0xff] }
 0x32f   :  { %v19751_v33 = vpack.c.bf16 %v688_v25, %v688_v25  ;;  %v762_v25 = vld [vmem:[#allocation9 + $0x230] sm:$0xff] }
 0x330   :  { %v691_v32 = vpack.c.bf16 %v689_v27, %v689_v27  ;;  %v763_v27 = vld [vmem:[#allocation9 + $0x238] sm:$0xff]  ;;  %v15507_v30 = vcombine.high %v758_v24, %v762_v25  ;;  %v15506_v37 = vcombine.low %v758_v24, %v762_v25 }
 0x331   :  { %v15509_v31 = vcombine.high %v759_v26, %v763_v27  ;;  %v15508_v38 = vcombine.low %v759_v26, %v763_v27  ;;  %v819_v24 = vld [vmem:[#allocation9 + $0x3f8] sm:$0xff] }
 0x332   :  { %1534 = vmatprep.mubr.bf16.mxu0 %v691_v32  ;;  %1575 = vmatprep.mubr.bf16.mxu1 %v691_v32 }
 0x333   :  { %1535 = vmatmul.mubr.bf16.vlgmr.msra.gmra.mrb[4].mxu0 %v19751_v33  ;;  %1576 = vmatmul.mubr.bf16.vlgmr.msra.gmra.mrb[4].mxu1 %v19751_v33 }
 0x334   :  { %1585 = vmatpush1.bf16.msra.mxu0 %v15442_v17  ;;  %1626 = vmatpush1.bf16.msra.mxu1 %v15444_v18  ;;  %v15491_v17 = vcombine.high %v742_v11, %v746_v12  ;;  %v15493_v18 = vcombine.high %v743_v13, %v747_v14  ;;  %v803_v11 = vld [vmem:[#allocation9 + $0x378] sm:$0xff] }
 0x335   :  { %1616 = vmatprep.mubr.bf16.mxu0 %v691_v32  ;;  %1657 = vmatprep.mubr.bf16.mxu1 %v691_v32  ;;  %v766_v32 = vld [vmem:[#allocation9 + $0x250] sm:$0xff] }
 0x336   :  { %1586 = vmatprep.subr.bf16.mxu0 %v15451_v35  ;;  %1627 = vmatprep.subr.bf16.mxu1 %v15453_v36  ;;  %v767_v35 = vld [vmem:[#allocation9 + $0x258] sm:$0xff]  ;;  %v15515_v39 = vcombine.high %v766_v32, %v770_v34  ;;  %v15514_v45 = vcombine.low %v766_v32, %v770_v34  ;;  %v1683_v32 = vld [vmem:[#allocation12 + $0x48] sm:$0xff] }
 0x337   :  { %v771_v36 = vld [vmem:[#allocation9 + $0x278] sm:$0xff] }
 0x338   :  { %1587 = vmatpush1.bf16.msra.mxu0 %v15450_v40  ;;  %1628 = vmatpush1.bf16.msra.mxu1 %v15452_v41  ;;  %v15517_v40 = vcombine.high %v767_v35, %v771_v36  ;;  %v774_v41 = vld [vmem:[#allocation9 + $0x290] sm:$0xff]  ;;  %v15516_v46 = vcombine.low %v767_v35, %v771_v36 }
 0x339   :  { %1588 = vmatprep.subr.bf16.mxu0 %v15459_v42  ;;  %1629 = vmatprep.subr.bf16.mxu1 %v15461_v43  ;;  %v778_v42 = vld [vmem:[#allocation9 + $0x2b0] sm:$0xff]  ;;  %v775_v43 = vld [vmem:[#allocation9 + $0x298] sm:$0xff] }
 0x33a   :  { %v15523_v47 = vcombine.high %v774_v41, %v778_v42  ;;  %v15522_v59 = vcombine.low %v774_v41, %v778_v42  ;;  %v15524_v60 = vcombine.low %v775_v43, %v779_v44  ;;  %v1699_v41 = vld [vmem:[#allocation12 + $0xc8] sm:$0xff] }
 0x33c   :  { %1589 = vmatpush1.bf16.msra.mxu0 %v15458_v51  ;;  %1630 = vmatpush1.bf16.msra.mxu1 %v15460_v53  ;;  %v15525_v51 = vcombine.high %v775_v43, %v779_v44  ;;  %v782_v53 = vld [vmem:[#allocation9 + $0x2d0] sm:$0xff] }
 0x33d   :  { %1590 = vmatprep.subr.bf16.mxu0 %v15467_v54  ;;  %1631 = vmatprep.subr.bf16.mxu1 %v15469_v56  ;;  %v786_v54 = vld [vmem:[#allocation9 + $0x2f0] sm:$0xff]  ;;  %v783_v56 = vld [vmem:[#allocation9 + $0x2d8] sm:$0xff] }
 0x33e   :  { %v15531_v61 = vcombine.high %v782_v53, %v786_v54  ;;  %v15530_v4 = vcombine.low %v782_v53, %v786_v54  ;;  %v15532_v5 = vcombine.low %v783_v56, %v787_v57  ;;  %v1715_v53 = vld [vmem:[#allocation12 + $0x148] sm:$0xff] }
 0x340   :  { %1591 = vmatpush1.bf16.msra.mxu0 %v15466_v62  ;;  %1632 = vmatpush1.bf16.msra.mxu1 %v15468_v63  ;;  %v15533_v62 = vcombine.high %v783_v56, %v787_v57  ;;  %v790_v63 = vld [vmem:[#allocation9 + $0x310] sm:$0xff] }
 0x341   :  { %1592 = vmatprep.subr.bf16.mxu0 %v15475_v1  ;;  %1633 = vmatprep.subr.bf16.mxu1 %v15477_v2  ;;  %v794_v1 = vld [vmem:[#allocation9 + $0x330] sm:$0xff]  ;;  %v791_v2 = vld [vmem:[#allocation9 + $0x318] sm:$0xff] }
 0x342   :  { %v15539_v6 = vcombine.high %v790_v63, %v794_v1  ;;  %v15538_v12 = vcombine.low %v790_v63, %v794_v1  ;;  %v15540_v13 = vcombine.low %v791_v2, %v795_v3  ;;  %v1731_v63 = vld [vmem:[#allocation12 + $0x1c8] sm:$0xff] }
 0x344   :  { %1593 = vmatpush1.bf16.msra.mxu0 %v15474_v7  ;;  %1634 = vmatpush1.bf16.msra.mxu1 %v15476_v8  ;;  %v15541_v7 = vcombine.high %v791_v2, %v795_v3  ;;  %v798_v8 = vld [vmem:[#allocation9 + $0x350] sm:$0xff] }
 0x345   :  { %1594 = vmatprep.subr.bf16.mxu0 %v15483_v9  ;;  %1635 = vmatprep.subr.bf16.mxu1 %v15485_v10  ;;  %v802_v9 = vld [vmem:[#allocation9 + $0x370] sm:$0xff]  ;;  %v799_v10 = vld [vmem:[#allocation9 + $0x358] sm:$0xff] }
 0x346   :  { %v15547_v14 = vcombine.high %v798_v8, %v802_v9  ;;  %v15546_v20 = vcombine.low %v798_v8, %v802_v9  ;;  %v15548_v52 = vcombine.low %v799_v10, %v803_v11 }
 0x348   :  { %1595 = vmatpush1.bf16.msra.mxu0 %v15482_v15  ;;  %1636 = vmatpush1.bf16.msra.mxu1 %v15484_v16  ;;  %v15549_v15 = vcombine.high %v799_v10, %v803_v11  ;;  %v806_v16 = vld [vmem:[#allocation9 + $0x390] sm:$0xff] }
 0x349   :  { %1596 = vmatprep.subr.bf16.mxu0 %v15491_v17  ;;  %1637 = vmatprep.subr.bf16.mxu1 %v15493_v18  ;;  %v810_v17 = vld [vmem:[#allocation9 + $0x3b0] sm:$0xff]  ;;  %v807_v18 = vld [vmem:[#allocation9 + $0x398] sm:$0xff] }
 0x34a   :  { %v15555_v55 = vcombine.high %v806_v16, %v810_v17  ;;  %v15554_v25 = vcombine.low %v806_v16, %v810_v17  ;;  %v15556_v26 = vcombine.low %v807_v18, %v811_v19 }
 0x34c   :  { %1597 = vmatpush1.bf16.msra.mxu0 %v15490_v58  ;;  %1638 = vmatpush1.bf16.msra.mxu1 %v15492_v21  ;;  %v15557_v58 = vcombine.high %v807_v18, %v811_v19  ;;  %v814_v21 = vld [vmem:[#allocation9 + $0x3d0] sm:$0xff] }
 0x34d   :  { %1598 = vmatprep.subr.bf16.mxu0 %v15499_v22  ;;  %1639 = vmatprep.subr.bf16.mxu1 %v15501_v23  ;;  %v818_v22 = vld [vmem:[#allocation9 + $0x3f0] sm:$0xff]  ;;  %v815_v23 = vld [vmem:[#allocation9 + $0x3d8] sm:$0xff] }
 0x34e   :  { %v15563_v27 = vcombine.high %v814_v21, %v818_v22  ;;  %v15562_v34 = vcombine.low %v814_v21, %v818_v22  ;;  %v15564_v35 = vcombine.low %v815_v23, %v819_v24 }
 0x350   :  { %1599 = vmatpush1.bf16.msra.mxu0 %v15498_v28  ;;  %1640 = vmatpush1.bf16.msra.mxu1 %v15500_v29  ;;  %v15565_v28 = vcombine.high %v815_v23, %v819_v24  ;;  %v1674_v29 = vld [vmem:[#allocation12] sm:$0xff] }
 0x351   :  { %1600 = vmatprep.subr.bf16.mxu0 %v15507_v30  ;;  %1641 = vmatprep.subr.bf16.mxu1 %v15509_v31  ;;  %v1682_v30 = vld [vmem:[#allocation12 + $0x40] sm:$0xff]  ;;  %v1675_v31 = vld [vmem:[#allocation12 + $0x8] sm:$0xff] }
 0x352   :  { %v15567_v36 = vcombine.high %v1674_v29, %v1682_v30  ;;  %v15566_v42 = vcombine.low %v1674_v29, %v1682_v30  ;;  %v15568_v43 = vcombine.low %v1675_v31, %v1683_v32 }
 0x354   :  { %1601 = vmatpush1.bf16.msra.mxu0 %v15506_v37  ;;  %1642 = vmatpush1.bf16.msra.mxu1 %v15508_v38  ;;  %v15569_v37 = vcombine.high %v1675_v31, %v1683_v32  ;;  %v1690_v38 = vld [vmem:[#allocation12 + $0x80] sm:$0xff] }
 0x355   :  { %1602 = vmatprep.subr.bf16.mxu0 %v15515_v39  ;;  %1643 = vmatprep.subr.bf16.mxu1 %v15517_v40  ;;  %v1698_v39 = vld [vmem:[#allocation12 + $0xc0] sm:$0xff]  ;;  %v1691_v40 = vld [vmem:[#allocation12 + $0x88] sm:$0xff] }
 0x356   :  { %v15583_v44 = vcombine.high %v1690_v38, %v1698_v39  ;;  %v15582_v54 = vcombine.low %v1690_v38, %v1698_v39  ;;  %v15584_v56 = vcombine.low %v1691_v40, %v1699_v41  ;;  %v1802_v31 = vld [vmem:[#allocation12 + $0x400] sm:$0xff] }
 0x357   :  { %v19757_v38 = vld [vmem:[#allocation12 + $0x800] sm:$0xff] }
 0x358   :  { %1603 = vmatpush1.bf16.msra.mxu0 %v15514_v45  ;;  %1644 = vmatpush1.bf16.msra.mxu1 %v15516_v46  ;;  %v15585_v45 = vcombine.high %v1691_v40, %v1699_v41  ;;  %v1706_v46 = vld [vmem:[#allocation12 + $0x100] sm:$0xff]  ;;  %v19761_v40 = vld [vmem:[#allocation12 + $0x808] sm:$0xff] }
 0x359   :  { %1604 = vmatprep.subr.bf16.mxu0 %v15523_v47  ;;  %1645 = vmatprep.subr.bf16.mxu1 %v15525_v51  ;;  %v1714_v47 = vld [vmem:[#allocation12 + $0x140] sm:$0xff]  ;;  %v1707_v51 = vld [vmem:[#allocation12 + $0x108] sm:$0xff] }
 0x35a   :  { %v15599_v57 = vcombine.high %v1706_v46, %v1714_v47  ;;  %v15598_v1 = vcombine.low %v1706_v46, %v1714_v47  ;;  %v15600_v2 = vcombine.low %v1707_v51, %v1715_v53  ;;  %v19759_v39 = vld [vmem:[#allocation12 + $0x840] sm:$0xff] }
 0x35c   :  { %1605 = vmatpush1.bf16.msra.mxu0 %v15522_v59  ;;  %1646 = vmatpush1.bf16.msra.mxu1 %v15524_v60  ;;  %v15601_v59 = vcombine.high %v1707_v51, %v1715_v53  ;;  %v1722_v60 = vld [vmem:[#allocation12 + $0x180] sm:$0xff] }
 0x35d   :  { %1606 = vmatprep.subr.bf16.mxu0 %v15531_v61  ;;  %1647 = vmatprep.subr.bf16.mxu1 %v15533_v62  ;;  %v1730_v61 = vld [vmem:[#allocation12 + $0x1c0] sm:$0xff]  ;;  %v1723_v62 = vld [vmem:[#allocation12 + $0x188] sm:$0xff] }
 0x35e   :  { %v15615_v3 = vcombine.high %v1722_v60, %v1730_v61  ;;  %v15614_v8 = vcombine.low %v1722_v60, %v1730_v61  ;;  %v15616_v9 = vcombine.low %v1723_v62, %v1731_v63  ;;  %v1818_v51 = vld [vmem:[#allocation12 + $0x480] sm:$0xff] }
 0x35f   :  { %v1826_v53 = vld [vmem:[#allocation12 + $0x4c0] sm:$0xff] }
 0x360   :  { %1607 = vmatpush1.bf16.msra.mxu0 %v15530_v4  ;;  %1648 = vmatpush1.bf16.msra.mxu1 %v15532_v5  ;;  %v1738_v4 = vld [vmem:[#allocation12 + $0x200] sm:$0xff]  ;;  %v15711_v60 = vcombine.high %v1818_v51, %v1826_v53 }
 0x361   :  { %1608 = vmatprep.subr.bf16.mxu0 %v15539_v6  ;;  %1649 = vmatprep.subr.bf16.mxu1 %v15541_v7  ;;  %v1746_v5 = vld [vmem:[#allocation12 + $0x240] sm:$0xff]  ;;  %v1739_v6 = vld [vmem:[#allocation12 + $0x208] sm:$0xff] }
 0x362   :  { %v1747_v7 = vld [vmem:[#allocation12 + $0x248] sm:$0xff]  ;;  %v15631_v10 = vcombine.high %v1738_v4, %v1746_v5  ;;  %v15630_v16 = vcombine.low %v1738_v4, %v1746_v5 }
 0x363   :  { %v15633_v11 = vcombine.high %v1739_v6, %v1747_v7  ;;  %v15632_v17 = vcombine.low %v1739_v6, %v1747_v7  ;;  %v1850_v6 = vld [vmem:[#allocation12 + $0x580] sm:$0xff] }
 0x364   :  { %1609 = vmatpush1.bf16.msra.mxu0 %v15538_v12  ;;  %1650 = vmatpush1.bf16.msra.mxu1 %v15540_v13  ;;  %v1754_v12 = vld [vmem:[#allocation12 + $0x280] sm:$0xff] }
 0x365   :  { %1610 = vmatprep.subr.bf16.mxu0 %v15547_v14  ;;  %1651 = vmatprep.subr.bf16.mxu1 %v15549_v15  ;;  %v1762_v13 = vld [vmem:[#allocation12 + $0x2c0] sm:$0xff]  ;;  %v1755_v14 = vld [vmem:[#allocation12 + $0x288] sm:$0xff] }
 0x366   :  { %v1763_v15 = vld [vmem:[#allocation12 + $0x2c8] sm:$0xff]  ;;  %v15647_v18 = vcombine.high %v1754_v12, %v1762_v13  ;;  %v15646_v21 = vcombine.low %v1754_v12, %v1762_v13  ;;  %v1858_v7 = vld [vmem:[#allocation12 + $0x5c0] sm:$0xff] }
 0x367   :  { %v15649_v19 = vcombine.high %v1755_v14, %v1763_v15  ;;  %v15648_v22 = vcombine.low %v1755_v14, %v1763_v15  ;;  %v15743_v12 = vcombine.high %v1850_v6, %v1858_v7  ;;  %v1866_v14 = vld [vmem:[#allocation12 + $0x600] sm:$0xff] }
 0x368   :  { %1611 = vmatpush1.bf16.msra.mxu0 %v15546_v20  ;;  %1652 = vmatpush1.bf16.msra.mxu1 %v15548_v52  ;;  %v1770_v20 = vld [vmem:[#allocation12 + $0x300] sm:$0xff] }
 0x369   :  { %1612 = vmatprep.subr.bf16.mxu0 %v15555_v55  ;;  %1653 = vmatprep.subr.bf16.mxu1 %v15557_v58  ;;  %v1778_v52 = vld [vmem:[#allocation12 + $0x340] sm:$0xff]  ;;  %v1771_v55 = vld [vmem:[#allocation12 + $0x308] sm:$0xff] }
 0x36a   :  { %v1779_v58 = vld [vmem:[#allocation12 + $0x348] sm:$0xff]  ;;  %v15663_v23 = vcombine.high %v1770_v20, %v1778_v52  ;;  %v15662_v29 = vcombine.low %v1770_v20, %v1778_v52  ;;  %v1874_v15 = vld [vmem:[#allocation12 + $0x640] sm:$0xff] }
 0x36b   :  { %v15665_v24 = vcombine.high %v1771_v55, %v1779_v58  ;;  %v15664_v30 = vcombine.low %v1771_v55, %v1779_v58  ;;  %v15759_v20 = vcombine.high %v1866_v14, %v1874_v15  ;;  %v1882_v55 = vld [vmem:[#allocation12 + $0x680] sm:$0xff] }
 0x36c   :  { %1613 = vmatpush1.bf16.msra.mxu0 %v15554_v25  ;;  %1654 = vmatpush1.bf16.msra.mxu1 %v15556_v26  ;;  %v1786_v25 = vld [vmem:[#allocation12 + $0x380] sm:$0xff] }
 0x36d   :  { %1614 = vmatprep.subr.bf16.mxu0 %v15563_v27  ;;  %1655 = vmatprep.subr.bf16.mxu1 %v15565_v28  ;;  %v1794_v26 = vld [vmem:[#allocation12 + $0x3c0] sm:$0xff]  ;;  %v1787_v27 = vld [vmem:[#allocation12 + $0x388] sm:$0xff] }
 0x36e   :  { %v1795_v28 = vld [vmem:[#allocation12 + $0x3c8] sm:$0xff]  ;;  %v15679_v32 = vcombine.high %v1786_v25, %v1794_v26  ;;  %v15678_v41 = vcombine.low %v1786_v25, %v1794_v26  ;;  %v1890_v58 = vld [vmem:[#allocation12 + $0x6c0] sm:$0xff] }
 0x36f   :  { %v15775_v25 = vcombine.high %v1882_v55, %v1890_v58 }
 0x370   :  { %1615 = vmatpush1.bf16.msra.mxu0 %v15562_v34  ;;  %1656 = vmatpush1.bf16.msra.mxu1 %v15564_v35  ;;  %v15681_v34 = vcombine.high %v1787_v27, %v1795_v28  ;;  %v1810_v35 = vld [vmem:[#allocation12 + $0x440] sm:$0xff] }
 0x371   :  { %7902 = vmatprep.subr.bf16.mxu0 %v15567_v36  ;;  %8066 = vmatprep.subr.bf16.mxu1 %v15569_v37  ;;  %v1803_v36 = vld [vmem:[#allocation12 + $0x408] sm:$0xff]  ;;  %v15695_v46 = vcombine.high %v1802_v31, %v1810_v35 }
 0x372   :  { %v1811_v37 = vld [vmem:[#allocation12 + $0x448] sm:$0xff] }
 0x373   :  { %1617 = vmatmul.mubr.bf16.vlgmr.msra.gmra.mrb[8].mxu0 %v19751_v33  ;;  %1658 = vmatmul.mubr.bf16.vlgmr.msra.gmra.mrb[8].mxu1 %v19751_v33  ;;  %v15617_v33 = vcombine.high %v1723_v62, %v1731_v63  ;;  %v15697_v47 = vcombine.high %v1803_v36, %v1811_v37  ;;  %v1834_v62 = vld [vmem:[#allocation12 + $0x500] sm:$0xff] }
 0x374   :  { %7903 = vmatpush1.bf16.msra.mxu0 %v15566_v42  ;;  %8067 = vmatpush1.bf16.msra.mxu1 %v15568_v43  ;;  %v19763_v42 = vld [vmem:[#allocation12 + $0x848] sm:$0xff]  ;;  %v15680_v43 = vcombine.low %v1787_v27, %v1795_v28  ;;  %v1842_v63 = vld [vmem:[#allocation12 + $0x540] sm:$0xff] }
 0x375   :  { %7904 = vmatprep.subr.bf16.mxu0 %v15583_v44  ;;  %8068 = vmatprep.subr.bf16.mxu1 %v15585_v45  ;;  %v15822_v44 = vcombine.low %v19757_v38, %v19759_v39  ;;  %v15824_v45 = vcombine.low %v19761_v40, %v19763_v42  ;;  %v15727_v4 = vcombine.high %v1834_v62, %v1842_v63  ;;  %v1898_v27 = vld [vmem:[#allocation12 + $0x700] sm:$0xff] }
 0x376   :  { %v1906_v28 = vld [vmem:[#allocation12 + $0x740] sm:$0xff] }
 0x378   :  { %7905 = vmatpush1.bf16.msra.mxu0 %v15582_v54  ;;  %8069 = vmatpush1.bf16.msra.mxu1 %v15584_v56  ;;  %v1819_v54 = vld [vmem:[#allocation12 + $0x488] sm:$0xff] }
 0x379   :  { %7906 = vmatprep.subr.bf16.mxu0 %v15599_v57  ;;  %8070 = vmatprep.subr.bf16.mxu1 %v15601_v59  ;;  %v1827_v56 = vld [vmem:[#allocation12 + $0x4c8] sm:$0xff]  ;;  %v15694_v57 = vcombine.low %v1802_v31, %v1810_v35  ;;  %v15696_v59 = vcombine.low %v1803_v36, %v1811_v37  ;;  %v15774_v31 = vcombine.low %v1882_v55, %v1890_v58  ;;  %v1914_v36 = vld [vmem:[#allocation12 + $0x780] sm:$0xff] }
 0x37a   :  { %v15713_v61 = vcombine.high %v1819_v54, %v1827_v56  ;;  %v1922_v37 = vld [vmem:[#allocation12 + $0x7c0] sm:$0xff]  ;;  %v1963_v55 = vld [vmem:[#allocation12 + $0x908] sm:$0xff] }
 0x37b   :  { %v1971_v58 = vld [vmem:[#allocation12 + $0x948] sm:$0xff] }
 0x37c   :  { %7907 = vmatpush1.bf16.msra.mxu0 %v15598_v1  ;;  %8071 = vmatpush1.bf16.msra.mxu1 %v15600_v2  ;;  %v1835_v1 = vld [vmem:[#allocation12 + $0x508] sm:$0xff] }
 0x37d   :  { %7908 = vmatprep.subr.bf16.mxu0 %v15615_v3  ;;  %8072 = vmatprep.subr.bf16.mxu1 %v15617_v33  ;;  %v1843_v2 = vld [vmem:[#allocation12 + $0x548] sm:$0xff]  ;;  %v15710_v3 = vcombine.low %v1818_v51, %v1826_v53  ;;  %v15712_v33 = vcombine.low %v1819_v54, %v1827_v56  ;;  %v15807_v51 = vcombine.high %v1914_v36, %v1922_v37 }
 0x37e   :  { %v15729_v5 = vcombine.high %v1835_v1, %v1843_v2  ;;  %v15806_v54 = vcombine.low %v1914_v36, %v1922_v37  ;;  %v2010_v37 = vld [vmem:[#allocation12 + $0xa80] sm:$0xff] }
 0x380   :  { %7909 = vmatpush1.bf16.msra.mxu0 %v15614_v8  ;;  %8073 = vmatpush1.bf16.msra.mxu1 %v15616_v9  ;;  %v1851_v8 = vld [vmem:[#allocation12 + $0x588] sm:$0xff] }
 0x381   :  { %7910 = vmatprep.subr.bf16.mxu0 %v15631_v10  ;;  %8074 = vmatprep.subr.bf16.mxu1 %v15633_v11  ;;  %v1859_v9 = vld [vmem:[#allocation12 + $0x5c8] sm:$0xff]  ;;  %v15726_v10 = vcombine.low %v1834_v62, %v1842_v63  ;;  %v15728_v11 = vcombine.low %v1835_v1, %v1843_v2 }
 0x382   :  { %v15745_v13 = vcombine.high %v1851_v8, %v1859_v9 }
 0x384   :  { %7911 = vmatpush1.bf16.msra.mxu0 %v15630_v16  ;;  %8075 = vmatpush1.bf16.msra.mxu1 %v15632_v17  ;;  %v1867_v16 = vld [vmem:[#allocation12 + $0x608] sm:$0xff] }
 0x385   :  { %7912 = vmatprep.subr.bf16.mxu0 %v15647_v18  ;;  %8076 = vmatprep.subr.bf16.mxu1 %v15649_v19  ;;  %v1875_v17 = vld [vmem:[#allocation12 + $0x648] sm:$0xff]  ;;  %v15742_v18 = vcombine.low %v1850_v6, %v1858_v7  ;;  %v15744_v19 = vcombine.low %v1851_v8, %v1859_v9  ;;  %v1946_v9 = vld [vmem:[#allocation12 + $0x880] sm:$0xff] }
 0x386   :  { %v15761_v52 = vcombine.high %v1867_v16, %v1875_v17 }
 0x388   :  { %7913 = vmatpush1.bf16.msra.mxu0 %v15646_v21  ;;  %8077 = vmatpush1.bf16.msra.mxu1 %v15648_v22  ;;  %v1883_v21 = vld [vmem:[#allocation12 + $0x688] sm:$0xff] }
 0x389   :  { %7914 = vmatprep.subr.bf16.mxu0 %v15663_v23  ;;  %8078 = vmatprep.subr.bf16.mxu1 %v15665_v24  ;;  %v1891_v22 = vld [vmem:[#allocation12 + $0x6c8] sm:$0xff]  ;;  %v15758_v23 = vcombine.low %v1866_v14, %v1874_v15  ;;  %v15760_v24 = vcombine.low %v1867_v16, %v1875_v17 }
 0x38a   :  { %v15777_v26 = vcombine.high %v1883_v21, %v1891_v22  ;;  %v1947_v14 = vld [vmem:[#allocation12 + $0x888] sm:$0xff] }
 0x38b   :  { %v1955_v15 = vld [vmem:[#allocation12 + $0x8c8] sm:$0xff] }
 0x38c   :  { %7915 = vmatpush1.bf16.msra.mxu0 %v15662_v29  ;;  %8079 = vmatpush1.bf16.msra.mxu1 %v15664_v30  ;;  %v1899_v29 = vld [vmem:[#allocation12 + $0x708] sm:$0xff] }
 0x38d   :  { %7916 = vmatprep.subr.bf16.mxu0 %v15679_v32  ;;  %8080 = vmatprep.subr.bf16.mxu1 %v15681_v34  ;;  %v1907_v30 = vld [vmem:[#allocation12 + $0x748] sm:$0xff]  ;;  %v15776_v32 = vcombine.low %v1883_v21, %v1891_v22  ;;  %v15791_v34 = vcombine.high %v1898_v27, %v1906_v28 }
 0x38e   :  { %v15793_v35 = vcombine.high %v1899_v29, %v1907_v30 }
 0x390   :  { %7917 = vmatpush1.bf16.msra.mxu0 %v15678_v41  ;;  %8081 = vmatpush1.bf16.msra.mxu1 %v15680_v43  ;;  %v1915_v41 = vld [vmem:[#allocation12 + $0x788] sm:$0xff] }
 0x391   :  { %7918 = vmatprep.subr.bf16.mxu0 %v15695_v46  ;;  %8082 = vmatprep.subr.bf16.mxu1 %v15697_v47  ;;  %v1923_v43 = vld [vmem:[#allocation12 + $0x7c8] sm:$0xff]  ;;  %v15790_v46 = vcombine.low %v1898_v27, %v1906_v28  ;;  %v15792_v47 = vcombine.low %v1899_v29, %v1907_v30  ;;  %v1986_v27 = vld [vmem:[#allocation12 + $0x9c0] sm:$0xff] }
 0x392   :  { %v15809_v53 = vcombine.high %v1915_v41, %v1923_v43  ;;  %v15808_v56 = vcombine.low %v1915_v41, %v1923_v43  ;;  %v1979_v28 = vld [vmem:[#allocation12 + $0x988] sm:$0xff]  ;;  %v2018_v41 = vld [vmem:[#allocation12 + $0xac0] sm:$0xff] }
 0x393   :  { %v1987_v29 = vld [vmem:[#allocation12 + $0x9c8] sm:$0xff] }
 0x394   :  { %7919 = vmatpush1.bf16.msra.mxu0 %v15694_v57  ;;  %8083 = vmatpush1.bf16.msra.mxu1 %v15696_v59  ;;  %v15823_v57 = vcombine.high %v19757_v38, %v19759_v39  ;;  %v15825_v59 = vcombine.high %v19761_v40, %v19763_v42  ;;  %v15856_v39 = vcombine.low %v1963_v55, %v1971_v58  ;;  %v1995_v30 = vld [vmem:[#allocation12 + $0xa08] sm:$0xff] }
 0x395   :  { %7920 = vmatprep.subr.bf16.mxu0 %v15711_v60  ;;  %8084 = vmatprep.subr.bf16.mxu1 %v15713_v61  ;;  %v19773_v60 = vld [vmem:[#allocation10] sm:$0xff]  ;;  %v19776_v61 = vsub.s32 3, %v19736_v48  ;;  %v15873_v42 = vcombine.high %v1979_v28, %v1987_v29  ;;  %v2011_v43 = vld [vmem:[#allocation12 + $0xa88] sm:$0xff] }
 0x396   :  { %v825_v62 = vrot.slane %v19773_v60, %v19739_v49  ;;  %v829_v63 = vrot.slane %v19773_v60, %v19742_v50 }
 0x397   :  { %v837_v1 = vrot.slane %v19773_v60, %v19776_v61 }
 0x398   :  { %7921 = vmatpush1.bf16.msra.mxu0 %v15710_v3  ;;  %8085 = vmatpush1.bf16.msra.mxu1 %v15712_v33 }
 0x399   :  { %7922 = vmatprep.subr.bf16.mxu0 %v15727_v4  ;;  %8086 = vmatprep.subr.bf16.mxu1 %v15729_v5 }
 0x39c   :  { %7923 = vmatpush1.bf16.msra.mxu0 %v15726_v10  ;;  %8087 = vmatpush1.bf16.msra.mxu1 %v15728_v11 }
 0x39d   :  { %7924 = vmatprep.subr.bf16.mxu0 %v15743_v12  ;;  %8088 = vmatprep.subr.bf16.mxu1 %v15745_v13  ;;  %v1954_v13 = vld [vmem:[#allocation12 + $0x8c0] sm:$0xff] }
 0x39e   :  { %v15838_v22 = vcombine.low %v1946_v9, %v1954_v13 }
 0x3a0   :  { %7925 = vmatpush1.bf16.msra.mxu0 %v15742_v18  ;;  %8089 = vmatpush1.bf16.msra.mxu1 %v15744_v19  ;;  %v1962_v18 = vld [vmem:[#allocation12 + $0x900] sm:$0xff]  ;;  %v15839_v19 = vcombine.high %v1946_v9, %v1954_v13 }
 0x3a1   :  { %7926 = vmatprep.subr.bf16.mxu0 %v15759_v20  ;;  %8090 = vmatprep.subr.bf16.mxu1 %v15761_v52  ;;  %v15841_v20 = vcombine.high %v1947_v14, %v1955_v15  ;;  %v1970_v52 = vld [vmem:[#allocation12 + $0x940] sm:$0xff] }
 0x3a2   :  { %v15854_v38 = vcombine.low %v1962_v18, %v1970_v52  ;;  %v2066_v13 = vld [vmem:[#allocation12 + $0xc40] sm:$0xff] }
 0x3a4   :  { %7927 = vmatpush1.bf16.msra.mxu0 %v15758_v23  ;;  %8091 = vmatpush1.bf16.msra.mxu1 %v15760_v24  ;;  %v15840_v23 = vcombine.low %v1947_v14, %v1955_v15  ;;  %v15855_v24 = vcombine.high %v1962_v18, %v1970_v52  ;;  %v2059_v14 = vld [vmem:[#allocation12 + $0xc08] sm:$0xff] }
 0x3a5   :  { %7928 = vmatprep.subr.bf16.mxu0 %v15775_v25  ;;  %8092 = vmatprep.subr.bf16.mxu1 %v15777_v26  ;;  %v15857_v25 = vcombine.high %v1963_v55, %v1971_v58  ;;  %v1978_v26 = vld [vmem:[#allocation12 + $0x980] sm:$0xff]  ;;  %v2067_v15 = vld [vmem:[#allocation12 + $0xc48] sm:$0xff] }
 0x3a6   :  { %v15871_v40 = vcombine.high %v1978_v26, %v1986_v27  ;;  %v15953_v52 = vcombine.high %v2059_v14, %v2067_v15  ;;  %v2074_v55 = vld [vmem:[#allocation12 + $0xc80] sm:$0xff] }
 0x3a7   :  { %v2082_v58 = vld [vmem:[#allocation12 + $0xcc0] sm:$0xff] }
 0x3a8   :  { %7929 = vmatpush1.bf16.msra.mxu0 %v15774_v31  ;;  %8093 = vmatpush1.bf16.msra.mxu1 %v15776_v32  ;;  %v2003_v31 = vld [vmem:[#allocation12 + $0xa48] sm:$0xff]  ;;  %v15870_v32 = vcombine.low %v1978_v26, %v1986_v27  ;;  %v15967_v26 = vcombine.high %v2074_v55, %v2082_v58 }
 0x3a9   :  { %7930 = vmatprep.subr.bf16.mxu0 %v15791_v34  ;;  %8094 = vmatprep.subr.bf16.mxu1 %v15793_v35  ;;  %v15872_v34 = vcombine.low %v1979_v28, %v1987_v29  ;;  %v15889_v36 = vcombine.high %v1995_v30, %v2003_v31  ;;  %v2090_v28 = vld [vmem:[#allocation12 + $0xd00] sm:$0xff] }
 0x3aa   :  { %v2098_v29 = vld [vmem:[#allocation12 + $0xd40] sm:$0xff] }
 0x3ac   :  { %7931 = vmatpush1.bf16.msra.mxu0 %v15790_v46  ;;  %8095 = vmatpush1.bf16.msra.mxu1 %v15792_v47  ;;  %v2019_v46 = vld [vmem:[#allocation12 + $0xac8] sm:$0xff] }
 0x3ad   :  { %7932 = vmatprep.subr.bf16.mxu0 %v15807_v51  ;;  %8096 = vmatprep.subr.bf16.mxu1 %v15809_v53  ;;  %v15888_v51 = vcombine.low %v1995_v30, %v2003_v31  ;;  %v15903_v53 = vcombine.high %v2010_v37, %v2018_v41  ;;  %v2106_v30 = vld [vmem:[#allocation12 + $0xd80] sm:$0xff] }
 0x3ae   :  { %v2114_v31 = vld [vmem:[#allocation12 + $0xdc0] sm:$0xff] }
 0x3b0   :  { %7933 = vmatpush1.bf16.msra.mxu0 %v15806_v54  ;;  %8097 = vmatpush1.bf16.msra.mxu1 %v15808_v56  ;;  %v15905_v54 = vcombine.high %v2011_v43, %v2019_v46  ;;  %v2026_v56 = vld [vmem:[#allocation12 + $0xb00] sm:$0xff] }
 0x3b1   :  { %7943 = vmatprep.subr.bf16.mxu0 %v15823_v57  ;;  %8107 = vmatprep.subr.bf16.mxu1 %v15825_v59  ;;  %v2034_v57 = vld [vmem:[#allocation12 + $0xb40] sm:$0xff]  ;;  %v2027_v59 = vld [vmem:[#allocation12 + $0xb08] sm:$0xff] }
 0x406   :  { %v1536_v2 = vpop.f32.mrb[4].mxu0  ;;  %v19784_v3 = vpop.f32.mrb[4].mxu1 }
 0x407   :  { %v1537_v33 = vadd.f32 %v1536_v2, %v825_v62  ;;  %v1538_v4 = vpop.f32.mrb[5].mxu0  ;;  %v1579_v5 = vpop.f32.mrb[5].mxu1  ;;  %v2035_v62 = vld [vmem:[#allocation12 + $0xb48] sm:$0xff]  ;;  %v15919_v2 = vcombine.high %v2026_v56, %v2034_v57 }
 0x408   :  { %v1539_v6 = vadd.f32 %v1538_v4, %v829_v63  ;;  %v1540_v7 = vpop.f32.mrb[6].mxu0  ;;  %v1581_v8 = vpop.f32.mrb[6].mxu1  ;;  %v1580_v10 = vadd.f32 %v1579_v5, %v837_v1  ;;  %v15902_v63 = vcombine.low %v2010_v37, %v2018_v41  ;;  %v15904_v1 = vcombine.low %v2011_v43, %v2019_v46  ;;  %v2042_v4 = vld [vmem:[#allocation12 + $0xb80] sm:$0xff] }
 0x409   :  { %v1541_v11 = vpop.f32.mrb[7].mxu0  ;;  %v1582_v12 = vpop.f32.mrb[7].mxu1  ;;  %v19788_v17 = vpack.c.bf16 %v1537_v33, %v1537_v33  ;;  %v15921_v33 = vcombine.high %v2027_v59, %v2035_v62  ;;  %v2050_v5 = vld [vmem:[#allocation12 + $0xbc0] sm:$0xff]  ;;  %v2051_v7 = vld [vmem:[#allocation12 + $0xbc8] sm:$0xff]  ;;  %v15918_v8 = vcombine.low %v2026_v56, %v2034_v57  ;;  %v15920_v9 = vcombine.low %v2027_v59, %v2035_v62 }
 0x40a   :  { %v19786_v16 = vpack.c.bf16 %v1539_v6, %v1539_v6  ;;  %v19792_v21 = vpack.c.bf16 %v1580_v10, %v1580_v10  ;;  %v2043_v6 = vld [vmem:[#allocation12 + $0xb88] sm:$0xff]  ;;  %v15935_v10 = vcombine.high %v2042_v4, %v2050_v5  ;;  %v2058_v12 = vld [vmem:[#allocation12 + $0xc00] sm:$0xff]  ;;  %v15934_v18 = vcombine.low %v2042_v4, %v2050_v5 }
 0x40b   :  { %v15937_v11 = vcombine.high %v2043_v6, %v2051_v7  ;;  %v15999_v37 = vcombine.high %v2106_v30, %v2114_v31  ;;  %v2122_v43 = vld [vmem:[#allocation12 + $0xe00] sm:$0xff] }
 0x40c   :  { %7934 = vmatprep.mubr.bf16.mxu0 %v19786_v16  ;;  %8098 = vmatprep.mubr.bf16.mxu1 %v19786_v16  ;;  %v2130_v46 = vld [vmem:[#allocation12 + $0xe40] sm:$0xff] }
 0x40d   :  { %7935 = vmatmul.mubr.bf16.vlgmr.msra.gmra.mrb[12].mxu0 %v19788_v17  ;;  %8099 = vmatmul.mubr.bf16.vlgmr.msra.gmra.mrb[12].mxu1 %v19788_v17  ;;  %v16015_v56 = vcombine.high %v2122_v43, %v2130_v46  ;;  %v2138_v59 = vld [vmem:[#allocation12 + $0xe80] sm:$0xff] }
 0x40e   :  { %7944 = vmatpush1.bf16.msra.mxu0 %v15822_v44  ;;  %8108 = vmatpush1.bf16.msra.mxu1 %v15824_v45  ;;  %v1994_v44 = vld [vmem:[#allocation12 + $0xa00] sm:$0xff] }
 0x40f   :  { %7975 = vmatprep.mubr.bf16.mxu0 %v19792_v21  ;;  %8139 = vmatprep.mubr.bf16.mxu1 %v19792_v21  ;;  %v2002_v45 = vld [vmem:[#allocation12 + $0xa40] sm:$0xff] }
 0x410   :  { %7945 = vmatprep.subr.bf16.mxu0 %v15839_v19  ;;  %8109 = vmatprep.subr.bf16.mxu1 %v15841_v20  ;;  %v15887_v35 = vcombine.high %v1994_v44, %v2002_v45  ;;  %v15886_v47 = vcombine.low %v1994_v44, %v2002_v45  ;;  %v15936_v19 = vcombine.low %v2043_v6, %v2051_v7  ;;  %v2146_v62 = vld [vmem:[#allocation12 + $0xec0] sm:$0xff] }
 0x411   :  { %v15951_v20 = vcombine.high %v2058_v12, %v2066_v13  ;;  %v15983_v44 = vcombine.high %v2090_v28, %v2098_v29  ;;  %v16031_v4 = vcombine.high %v2138_v59, %v2146_v62  ;;  %v2154_v6 = vld [vmem:[#allocation12 + $0xf00] sm:$0xff] }
 0x412   :  { %7946 = vmatpush1.bf16.msra.mxu0 %v15838_v22  ;;  %8110 = vmatpush1.bf16.msra.mxu1 %v15840_v23  ;;  %v2075_v22 = vld [vmem:[#allocation12 + $0xc88] sm:$0xff]  ;;  %v2162_v7 = vld [vmem:[#allocation12 + $0xf40] sm:$0xff] }
 0x413   :  { %7947 = vmatprep.subr.bf16.mxu0 %v15855_v24  ;;  %8111 = vmatprep.subr.bf16.mxu1 %v15857_v25  ;;  %v2083_v23 = vld [vmem:[#allocation12 + $0xcc8] sm:$0xff]  ;;  %v15950_v24 = vcombine.low %v2058_v12, %v2066_v13  ;;  %v15952_v25 = vcombine.low %v2059_v14, %v2067_v15  ;;  %v19805_v12 = vsub.s32 2, %v19736_v48  ;;  %v16047_v13 = vcombine.high %v2154_v6, %v2162_v7  ;;  %v2170_v15 = vld [vmem:[#allocation12 + $0xf80] sm:$0xff] }
 0x414   :  { %v15969_v27 = vcombine.high %v2075_v22, %v2083_v23 }
 0x416   :  { %7948 = vmatpush1.bf16.msra.mxu0 %v15854_v38  ;;  %8112 = vmatpush1.bf16.msra.mxu1 %v15856_v39  ;;  %v2091_v38 = vld [vmem:[#allocation12 + $0xd08] sm:$0xff] }
 0x417   :  { %7949 = vmatprep.subr.bf16.mxu0 %v15871_v40  ;;  %8113 = vmatprep.subr.bf16.mxu1 %v15873_v42  ;;  %v2099_v39 = vld [vmem:[#allocation12 + $0xd48] sm:$0xff]  ;;  %v15966_v40 = vcombine.low %v2074_v55, %v2082_v58  ;;  %v15968_v42 = vcombine.low %v2075_v22, %v2083_v23  ;;  %v16046_v55 = vcombine.low %v2154_v6, %v2162_v7  ;;  %v2234_v7 = vld [vmem:[#allocation12 + $0x1180] sm:$0xff] }
 0x418   :  { %v15985_v45 = vcombine.high %v2091_v38, %v2099_v39  ;;  %v833_v22 = vrot.slane %v19773_v60, %v19805_v12 }
 0x41a   :  { %7950 = vmatpush1.bf16.msra.mxu0 %v15870_v32  ;;  %8114 = vmatpush1.bf16.msra.mxu1 %v15872_v34  ;;  %v2107_v32 = vld [vmem:[#allocation12 + $0xd88] sm:$0xff] }
 0x41b   :  { %7951 = vmatprep.subr.bf16.mxu0 %v15887_v35  ;;  %8115 = vmatprep.subr.bf16.mxu1 %v15889_v36  ;;  %v2115_v34 = vld [vmem:[#allocation12 + $0xdc8] sm:$0xff]  ;;  %v15982_v35 = vcombine.low %v2090_v28, %v2098_v29  ;;  %v15984_v36 = vcombine.low %v2091_v38, %v2099_v39 }
 0x41c   :  { %v16001_v41 = vcombine.high %v2107_v32, %v2115_v34  ;;  %v2187_v28 = vld [vmem:[#allocation12 + $0x1008] sm:$0xff] }
 0x41d   :  { %v2195_v29 = vld [vmem:[#allocation12 + $0x1048] sm:$0xff] }
 0x41e   :  { %7952 = vmatpush1.bf16.msra.mxu0 %v15886_v47  ;;  %8116 = vmatpush1.bf16.msra.mxu1 %v15888_v51  ;;  %v2123_v47 = vld [vmem:[#allocation12 + $0xe08] sm:$0xff] }
 0x41f   :  { %7953 = vmatprep.subr.bf16.mxu0 %v15903_v53  ;;  %8117 = vmatprep.subr.bf16.mxu1 %v15905_v54  ;;  %v2131_v51 = vld [vmem:[#allocation12 + $0xe48] sm:$0xff]  ;;  %v15998_v53 = vcombine.low %v2106_v30, %v2114_v31  ;;  %v16000_v54 = vcombine.low %v2107_v32, %v2115_v34  ;;  %v16081_v32 = vcombine.high %v2187_v28, %v2195_v29 }
 0x420   :  { %v16017_v57 = vcombine.high %v2123_v47, %v2131_v51 }
 0x422   :  { %7954 = vmatpush1.bf16.msra.mxu0 %v15902_v63  ;;  %8118 = vmatpush1.bf16.msra.mxu1 %v15904_v1  ;;  %v2139_v63 = vld [vmem:[#allocation12 + $0xe88] sm:$0xff] }
 0x423   :  { %7955 = vmatprep.subr.bf16.mxu0 %v15919_v2  ;;  %8119 = vmatprep.subr.bf16.mxu1 %v15921_v33  ;;  %v2147_v1 = vld [vmem:[#allocation12 + $0xec8] sm:$0xff]  ;;  %v16014_v2 = vcombine.low %v2122_v43, %v2130_v46  ;;  %v16016_v33 = vcombine.low %v2123_v47, %v2131_v51  ;;  %v2210_v46 = vld [vmem:[#allocation12 + $0x10c0] sm:$0xff] }
 0x424   :  { %v16033_v5 = vcombine.high %v2139_v63, %v2147_v1  ;;  %v2203_v47 = vld [vmem:[#allocation12 + $0x1088] sm:$0xff] }
 0x425   :  { %v2211_v51 = vld [vmem:[#allocation12 + $0x10c8] sm:$0xff] }
 0x426   :  { %7956 = vmatpush1.bf16.msra.mxu0 %v15918_v8  ;;  %8120 = vmatpush1.bf16.msra.mxu1 %v15920_v9  ;;  %v2155_v8 = vld [vmem:[#allocation12 + $0xf08] sm:$0xff] }
 0x427   :  { %7957 = vmatprep.subr.bf16.mxu0 %v15935_v10  ;;  %8121 = vmatprep.subr.bf16.mxu1 %v15937_v11  ;;  %v2163_v9 = vld [vmem:[#allocation12 + $0xf48] sm:$0xff]  ;;  %v16030_v10 = vcombine.low %v2138_v59, %v2146_v62  ;;  %v16032_v11 = vcombine.low %v2139_v63, %v2147_v1  ;;  %v16097_v59 = vcombine.high %v2203_v47, %v2211_v51  ;;  %v2218_v62 = vld [vmem:[#allocation12 + $0x1100] sm:$0xff] }
 0x428   :  { %v16049_v14 = vcombine.high %v2155_v8, %v2163_v9  ;;  %v16048_v58 = vcombine.low %v2155_v8, %v2163_v9  ;;  %v2226_v63 = vld [vmem:[#allocation12 + $0x1140] sm:$0xff]  ;;  %v2219_v1 = vld [vmem:[#allocation12 + $0x1108] sm:$0xff] }
 0x429   :  { %v2242_v8 = vld [vmem:[#allocation12 + $0x11c0] sm:$0xff]  ;;  %v2235_v9 = vld [vmem:[#allocation12 + $0x1188] sm:$0xff] }
 0x42a   :  { %7958 = vmatpush1.bf16.msra.mxu0 %v15934_v18  ;;  %8122 = vmatpush1.bf16.msra.mxu1 %v15936_v19  ;;  %v19808_v18 = vsub.s32 5, %v19736_v48  ;;  %v2178_v19 = vld [vmem:[#allocation12 + $0xfc0] sm:$0xff] }
 0x42b   :  { %7959 = vmatprep.subr.bf16.mxu0 %v15951_v20  ;;  %8123 = vmatprep.subr.bf16.mxu1 %v15953_v52  ;;  %v2171_v20 = vld [vmem:[#allocation12 + $0xf88] sm:$0xff]  ;;  %v16063_v23 = vcombine.high %v2170_v15, %v2178_v19 }
 0x42c   :  { %v2179_v52 = vld [vmem:[#allocation12 + $0xfc8] sm:$0xff] }
 0x42e   :  { %7960 = vmatpush1.bf16.msra.mxu0 %v15950_v24  ;;  %8124 = vmatpush1.bf16.msra.mxu1 %v15952_v25  ;;  %v16065_v24 = vcombine.high %v2171_v20, %v2179_v52  ;;  %v2186_v25 = vld [vmem:[#allocation12 + $0x1000] sm:$0xff] }
 0x42f   :  { %7961 = vmatprep.subr.bf16.mxu0 %v15967_v26  ;;  %8125 = vmatprep.subr.bf16.mxu1 %v15969_v27  ;;  %v845_v26 = vrot.slane %v19773_v60, %v19808_v18  ;;  %v2194_v27 = vld [vmem:[#allocation12 + $0x1040] sm:$0xff] }
 0x430   :  { %v16079_v31 = vcombine.high %v2186_v25, %v2194_v27 }
 0x432   :  { %7962 = vmatpush1.bf16.msra.mxu0 %v15966_v40  ;;  %8126 = vmatpush1.bf16.msra.mxu1 %v15968_v42  ;;  %v16062_v40 = vcombine.low %v2170_v15, %v2178_v19  ;;  %v16064_v42 = vcombine.low %v2171_v20, %v2179_v52  ;;  %v2250_v19 = vld [vmem:[#allocation12 + $0x1200] sm:$0xff]  ;;  %v2251_v52 = vld [vmem:[#allocation12 + $0x1208] sm:$0xff] }
 0x433   :  { %7963 = vmatprep.subr.bf16.mxu0 %v15983_v44  ;;  %8127 = vmatprep.subr.bf16.mxu1 %v15985_v45  ;;  %v1578_v44 = vadd.f32 %v19784_v3, %v833_v22  ;;  %v2258_v20 = vld [vmem:[#allocation12 + $0x1240] sm:$0xff] }
 0x435   :  { %v19821_v3 = vpack.c.bf16 %v1578_v44, %v1578_v44 }
 0x436   :  { %7964 = vmatpush1.bf16.msra.mxu0 %v15982_v35  ;;  %8128 = vmatpush1.bf16.msra.mxu1 %v15984_v36 }
 0x437   :  { %7965 = vmatprep.subr.bf16.mxu0 %v15999_v37  ;;  %8129 = vmatprep.subr.bf16.mxu1 %v16001_v41  ;;  %v2202_v37 = vld [vmem:[#allocation12 + $0x1080] sm:$0xff] }
 0x43a   :  { %7966 = vmatpush1.bf16.msra.mxu0 %v15998_v53  ;;  %8130 = vmatpush1.bf16.msra.mxu1 %v16000_v54  ;;  %v16078_v53 = vcombine.low %v2186_v25, %v2194_v27  ;;  %v16080_v54 = vcombine.low %v2187_v28, %v2195_v29  ;;  %v2266_v25 = vld [vmem:[#allocation12 + $0x1280] sm:$0xff]  ;;  %v2267_v27 = vld [vmem:[#allocation12 + $0x1288] sm:$0xff]  ;;  %v16142_v29 = vcombine.low %v2250_v19, %v2258_v20 }
 0x43b   :  { %7967 = vmatprep.subr.bf16.mxu0 %v16015_v56  ;;  %8131 = vmatprep.subr.bf16.mxu1 %v16017_v57  ;;  %v16095_v57 = vcombine.high %v2202_v37, %v2210_v46  ;;  %v2275_v28 = vld [vmem:[#allocation12 + $0x12c8] sm:$0xff] }
 0x43c   :  { %v16161_v44 = vcombine.high %v2267_v27, %v2275_v28 }
 0x43e   :  { %7968 = vmatpush1.bf16.msra.mxu0 %v16014_v2  ;;  %8132 = vmatpush1.bf16.msra.mxu1 %v16016_v33  ;;  %v2227_v2 = vld [vmem:[#allocation12 + $0x1148] sm:$0xff]  ;;  %v16094_v33 = vcombine.low %v2202_v37, %v2210_v46  ;;  %v2306_v46 = vld [vmem:[#allocation12 + $0x13c0] sm:$0xff] }
 0x43f   :  { %7969 = vmatprep.subr.bf16.mxu0 %v16031_v4  ;;  %8133 = vmatprep.subr.bf16.mxu1 %v16033_v5  ;;  %v16096_v4 = vcombine.low %v2203_v47, %v2211_v51  ;;  %v16111_v5 = vcombine.high %v2218_v62, %v2226_v63  ;;  %v16113_v6 = vcombine.high %v2219_v1, %v2227_v2  ;;  %v2299_v47 = vld [vmem:[#allocation12 + $0x1388] sm:$0xff] }
 0x440   :  { %v2307_v51 = vld [vmem:[#allocation12 + $0x13c8] sm:$0xff] }
 0x442   :  { %7970 = vmatpush1.bf16.msra.mxu0 %v16030_v10  ;;  %8134 = vmatpush1.bf16.msra.mxu1 %v16032_v11  ;;  %v2243_v10 = vld [vmem:[#allocation12 + $0x11c8] sm:$0xff]  ;;  %v16110_v11 = vcombine.low %v2218_v62, %v2226_v63  ;;  %v2314_v62 = vld [vmem:[#allocation12 + $0x1400] sm:$0xff] }
 0x443   :  { %7971 = vmatprep.subr.bf16.mxu0 %v16047_v13  ;;  %8135 = vmatprep.subr.bf16.mxu1 %v16049_v14  ;;  %v16112_v13 = vcombine.low %v2219_v1, %v2227_v2  ;;  %v16127_v14 = vcombine.high %v2234_v7, %v2242_v8  ;;  %v16129_v15 = vcombine.high %v2235_v9, %v2243_v10  ;;  %v2322_v63 = vld [vmem:[#allocation12 + $0x1440] sm:$0xff]  ;;  %v2315_v1 = vld [vmem:[#allocation12 + $0x1408] sm:$0xff] }
 0x444   :  { %v16128_v22 = vcombine.low %v2235_v9, %v2243_v10  ;;  %v2323_v2 = vld [vmem:[#allocation12 + $0x1448] sm:$0xff] }
 0x445   :  { %v2331_v9 = vld [vmem:[#allocation12 + $0x1488] sm:$0xff] }
 0x446   :  { %v19814_v38 = vpop.f32.mrb[8].mxu0  ;;  %v19816_v39 = vpop.f32.mrb[8].mxu1  ;;  %7972 = vmatpush1.bf16.msra.mxu0 %v16046_v55  ;;  %8136 = vmatpush1.bf16.msra.mxu1 %v16048_v58  ;;  %v2259_v55 = vld [vmem:[#allocation12 + $0x1248] sm:$0xff]  ;;  %v16126_v58 = vcombine.low %v2234_v7, %v2242_v8  ;;  %v2330_v7 = vld [vmem:[#allocation12 + $0x1480] sm:$0xff] }
 0x447   :  { %v1620_v45 = vpop.f32.mrb[9].mxu0  ;;  %v19819_v30 = vpop.f32.mrb[9].mxu1  ;;  %7973 = vmatprep.subr.bf16.mxu0 %v16063_v23  ;;  %8137 = vmatprep.subr.bf16.mxu1 %v16065_v24  ;;  %v16143_v23 = vcombine.high %v2250_v19, %v2258_v20  ;;  %v16145_v24 = vcombine.high %v2251_v52, %v2259_v55  ;;  %v2338_v8 = vld [vmem:[#allocation12 + $0x14c0] sm:$0xff]  ;;  %v2339_v10 = vld [vmem:[#allocation12 + $0x14c8] sm:$0xff] }
 0x448   :  { %v1621_v34 = vadd.f32 %v1620_v45, %v845_v26  ;;  %v1622_v35 = vpop.f32.mrb[10].mxu0  ;;  %v1663_v36 = vpop.f32.mrb[10].mxu1  ;;  %v2274_v26 = vld [vmem:[#allocation12 + $0x12c0] sm:$0xff] }
 0x449   :  { %v1623_v41 = vpop.f32.mrb[11].mxu0  ;;  %v1664_v43 = vpop.f32.mrb[11].mxu1  ;;  %v2282_v45 = vld [vmem:[#allocation12 + $0x1300] sm:$0xff]  ;;  %v16158_v35 = vcombine.low %v2266_v25, %v2274_v26  ;;  %v16160_v36 = vcombine.low %v2267_v27, %v2275_v28  ;;  %v2363_v27 = vld [vmem:[#allocation12 + $0x1588] sm:$0xff] }
 0x44a   :  { %7974 = vmatpush1.bf16.msra.mxu0 %v16062_v40  ;;  %8138 = vmatpush1.bf16.msra.mxu1 %v16064_v42  ;;  %v19823_v56 = vpack.c.bf16 %v1621_v34, %v1621_v34  ;;  %v16144_v40 = vcombine.low %v2251_v52, %v2259_v55  ;;  %v16159_v42 = vcombine.high %v2266_v25, %v2274_v26  ;;  %v2291_v34 = vld [vmem:[#allocation12 + $0x1348] sm:$0xff]  ;;  %v2298_v43 = vld [vmem:[#allocation12 + $0x1380] sm:$0xff] }
 0x44b   :  { %7984 = vmatprep.subr.bf16.mxu0 %v16079_v31  ;;  %8148 = vmatprep.subr.bf16.mxu1 %v16081_v32  ;;  %v2290_v31 = vld [vmem:[#allocation12 + $0x1340] sm:$0xff]  ;;  %v2283_v32 = vld [vmem:[#allocation12 + $0x1308] sm:$0xff] }
 0x44c   :  { %v16175_v37 = vcombine.high %v2282_v45, %v2290_v31  ;;  %v16177_v41 = vcombine.high %v2283_v32, %v2291_v34  ;;  %v2346_v19 = vld [vmem:[#allocation12 + $0x1500] sm:$0xff]  ;;  %v2347_v52 = vld [vmem:[#allocation12 + $0x1508] sm:$0xff] }
 0x44d   :  { %7976 = vmatmul.mubr.bf16.vlgmr.msra.gmra.mrb[12].mxu0 %v19821_v3  ;;  %8140 = vmatmul.mubr.bf16.vlgmr.msra.gmra.mrb[12].mxu1 %v19821_v3  ;;  %v2354_v20 = vld [vmem:[#allocation12 + $0x1540] sm:$0xff]  ;;  %v2355_v55 = vld [vmem:[#allocation12 + $0x1548] sm:$0xff] }
 0x44e   :  { %7985 = vmatpush1.bf16.msra.mxu0 %v16078_v53  ;;  %8016 = vmatprep.mubr.bf16.mxu0 %v19823_v56  ;;  %v16174_v53 = vcombine.low %v2282_v45, %v2290_v31  ;;  %v2362_v25 = vld [vmem:[#allocation12 + $0x1580] sm:$0xff]  ;;  %v2371_v28 = vld [vmem:[#allocation12 + $0x15c8] sm:$0xff] }
 0x44f   :  { %8149 = vmatpush1.bf16.msra.mxu1 %v16080_v54  ;;  %8180 = vmatprep.mubr.bf16.mxu1 %v19823_v56  ;;  %v16176_v54 = vcombine.low %v2283_v32, %v2291_v34  ;;  %v2370_v26 = vld [vmem:[#allocation12 + $0x15c0] sm:$0xff]  ;;  %v2379_v32 = vld [vmem:[#allocation12 + $0x1608] sm:$0xff] }
 0x450   :  { %7986 = vmatprep.subr.bf16.mxu0 %v16095_v57  ;;  %8150 = vmatprep.subr.bf16.mxu1 %v16097_v59  ;;  %v16191_v57 = vcombine.high %v2298_v43, %v2306_v46  ;;  %v16193_v59 = vcombine.high %v2299_v47, %v2307_v51  ;;  %v2378_v45 = vld [vmem:[#allocation12 + $0x1600] sm:$0xff]  ;;  %v2387_v34 = vld [vmem:[#allocation12 + $0x1648] sm:$0xff] }
 0x451   :  { %v2386_v31 = vld [vmem:[#allocation12 + $0x1640] sm:$0xff] }
 0x452   :  { %7987 = vmatpush1.bf16.msra.mxu0 %v16094_v33  ;;  %v16190_v33 = vcombine.low %v2298_v43, %v2306_v46  ;;  %v2394_v43 = vld [vmem:[#allocation12 + $0x1680] sm:$0xff] }
 0x453   :  { %8151 = vmatpush1.bf16.msra.mxu1 %v16096_v4  ;;  %7988 = vmatprep.subr.bf16.mxu0 %v16111_v5  ;;  %v16192_v4 = vcombine.low %v2299_v47, %v2307_v51  ;;  %v16207_v5 = vcombine.high %v2314_v62, %v2322_v63  ;;  %v2402_v46 = vld [vmem:[#allocation12 + $0x16c0] sm:$0xff]  ;;  %v2395_v47 = vld [vmem:[#allocation12 + $0x1688] sm:$0xff] }
 0x454   :  { %8152 = vmatprep.subr.bf16.mxu1 %v16113_v6  ;;  %v16209_v6 = vcombine.high %v2315_v1, %v2323_v2  ;;  %v2403_v51 = vld [vmem:[#allocation12 + $0x16c8] sm:$0xff] }
 0x456   :  { %7989 = vmatpush1.bf16.msra.mxu0 %v16110_v11  ;;  %v16206_v11 = vcombine.low %v2314_v62, %v2322_v63  ;;  %v2410_v62 = vld [vmem:[#allocation12 + $0x1700] sm:$0xff] }
 0x457   :  { %8153 = vmatpush1.bf16.msra.mxu1 %v16112_v13  ;;  %7990 = vmatprep.subr.bf16.mxu0 %v16127_v14  ;;  %v16208_v13 = vcombine.low %v2315_v1, %v2323_v2  ;;  %v16223_v14 = vcombine.high %v2330_v7, %v2338_v8  ;;  %v2418_v63 = vld [vmem:[#allocation12 + $0x1740] sm:$0xff]  ;;  %v2411_v1 = vld [vmem:[#allocation12 + $0x1708] sm:$0xff] }
 0x458   :  { %8154 = vmatprep.subr.bf16.mxu1 %v16129_v15  ;;  %v16225_v15 = vcombine.high %v2331_v9, %v2339_v10  ;;  %v2419_v2 = vld [vmem:[#allocation12 + $0x1748] sm:$0xff] }
 0x45a   :  { %7991 = vmatpush1.bf16.msra.mxu0 %v16126_v58  ;;  %v16222_v58 = vcombine.low %v2330_v7, %v2338_v8  ;;  %v16305_v7 = vcombine.high %v2411_v1, %v2419_v2  ;;  %v2426_v8 = vld [vmem:[#allocation12 + $0x1780] sm:$0xff] }
 0x45b   :  { %8155 = vmatpush1.bf16.msra.mxu1 %v16128_v22  ;;  %7992 = vmatprep.subr.bf16.mxu0 %v16143_v23  ;;  %v16224_v22 = vcombine.low %v2331_v9, %v2339_v10  ;;  %v16239_v23 = vcombine.high %v2346_v19, %v2354_v20  ;;  %v2434_v9 = vld [vmem:[#allocation12 + $0x17c0] sm:$0xff]  ;;  %v19833_v10 = vsub.s32 7, %v19736_v48 }
 0x45c   :  { %8156 = vmatprep.subr.bf16.mxu1 %v16145_v24  ;;  %v16241_v24 = vcombine.high %v2347_v52, %v2355_v55 }
 0x45e   :  { %7993 = vmatpush1.bf16.msra.mxu0 %v16142_v29  ;;  %v16238_v29 = vcombine.low %v2346_v19, %v2354_v20  ;;  %v16304_v19 = vcombine.low %v2411_v1, %v2419_v2  ;;  %v16319_v20 = vcombine.high %v2426_v8, %v2434_v9 }
 0x45f   :  { %8157 = vmatpush1.bf16.msra.mxu1 %v16144_v40  ;;  %7994 = vmatprep.subr.bf16.mxu0 %v16159_v42  ;;  %v16240_v40 = vcombine.low %v2347_v52, %v2355_v55  ;;  %v16255_v42 = vcombine.high %v2362_v25, %v2370_v26  ;;  %v2442_v55 = vld [vmem:[#allocation12 + $0x1800] sm:$0xff] }
 0x460   :  { %8158 = vmatprep.subr.bf16.mxu1 %v16161_v44  ;;  %v16257_v44 = vcombine.high %v2363_v27, %v2371_v28 }
 0x462   :  { %7995 = vmatpush1.bf16.msra.mxu0 %v16158_v35  ;;  %v16254_v35 = vcombine.low %v2362_v25, %v2370_v26  ;;  %v16318_v25 = vcombine.low %v2426_v8, %v2434_v9  ;;  %v2515_v8 = vld [vmem:[#allocation12 + $0x1a48] sm:$0xff] }
 0x463   :  { %8159 = vmatpush1.bf16.msra.mxu1 %v16160_v36  ;;  %7996 = vmatprep.subr.bf16.mxu0 %v16175_v37  ;;  %v16256_v36 = vcombine.low %v2363_v27, %v2371_v28  ;;  %v16271_v37 = vcombine.high %v2378_v45, %v2386_v31 }
 0x464   :  { %8160 = vmatprep.subr.bf16.mxu1 %v16177_v41  ;;  %v16273_v41 = vcombine.high %v2379_v32, %v2387_v34 }
 0x466   :  { %7997 = vmatpush1.bf16.msra.mxu0 %v16174_v53  ;;  %v16270_v53 = vcombine.low %v2378_v45, %v2386_v31  ;;  %v2459_v31 = vld [vmem:[#allocation12 + $0x1888] sm:$0xff] }
 0x467   :  { %8161 = vmatpush1.bf16.msra.mxu1 %v16176_v54  ;;  %7998 = vmatprep.subr.bf16.mxu0 %v16191_v57  ;;  %v16272_v54 = vcombine.low %v2379_v32, %v2387_v34  ;;  %v16287_v57 = vcombine.high %v2394_v43, %v2402_v46 }
 0x468   :  { %8162 = vmatprep.subr.bf16.mxu1 %v16193_v59  ;;  %v16289_v59 = vcombine.high %v2395_v47, %v2403_v51 }
 0x46a   :  { %7999 = vmatpush1.bf16.msra.mxu0 %v16190_v33  ;;  %v16286_v33 = vcombine.low %v2394_v43, %v2402_v46  ;;  %v2483_v43 = vld [vmem:[#allocation12 + $0x1948] sm:$0xff] }
 0x46b   :  { %8163 = vmatpush1.bf16.msra.mxu1 %v16192_v4  ;;  %8000 = vmatprep.subr.bf16.mxu0 %v16207_v5  ;;  %v19830_v4 = vsub.s32 4, %v19736_v48  ;;  %v16288_v5 = vcombine.low %v2395_v47, %v2403_v51 }
 0x46c   :  { %8164 = vmatprep.subr.bf16.mxu1 %v16209_v6  ;;  %v16303_v6 = vcombine.high %v2410_v62, %v2418_v63 }
 0x46e   :  { %8001 = vmatpush1.bf16.msra.mxu0 %v16206_v11  ;;  %v2427_v11 = vld [vmem:[#allocation12 + $0x1788] sm:$0xff] }
 0x46f   :  { %8165 = vmatpush1.bf16.msra.mxu1 %v16208_v13  ;;  %8002 = vmatprep.subr.bf16.mxu0 %v16223_v14  ;;  %v2435_v13 = vld [vmem:[#allocation12 + $0x17c8] sm:$0xff]  ;;  %v16302_v14 = vcombine.low %v2410_v62, %v2418_v63 }
 0x470   :  { %8166 = vmatprep.subr.bf16.mxu1 %v16225_v15  ;;  %v841_v15 = vrot.slane %v19773_v60, %v19830_v4  ;;  %v16321_v52 = vcombine.high %v2427_v11, %v2435_v13  ;;  %v16320_v27 = vcombine.low %v2427_v11, %v2435_v13  ;;  %v2499_v62 = vld [vmem:[#allocation12 + $0x19c8] sm:$0xff] }
 0x472   :  { %8003 = vmatpush1.bf16.msra.mxu0 %v16222_v58  ;;  %v2450_v58 = vld [vmem:[#allocation12 + $0x1840] sm:$0xff]  ;;  %v1619_v26 = vadd.f32 %v19814_v38, %v841_v15 }
 0x473   :  { %8167 = vmatpush1.bf16.msra.mxu1 %v16224_v22  ;;  %8004 = vmatprep.subr.bf16.mxu0 %v16239_v23  ;;  %v853_v22 = vrot.slane %v19773_v60, %v19833_v10  ;;  %v2443_v23 = vld [vmem:[#allocation12 + $0x1808] sm:$0xff]  ;;  %v16335_v28 = vcombine.high %v2442_v55, %v2450_v58  ;;  %v16334_v45 = vcombine.low %v2442_v55, %v2450_v58  ;;  %v2522_v15 = vld [vmem:[#allocation12 + $0x1a80] sm:$0xff] }
 0x474   :  { %8168 = vmatprep.subr.bf16.mxu1 %v16241_v24  ;;  %v2451_v24 = vld [vmem:[#allocation12 + $0x1848] sm:$0xff]  ;;  %v19841_v32 = vpack.c.bf16 %v1619_v26, %v1619_v26 }
 0x475   :  { %v2467_v60 = vld [vmem:[#allocation12 + $0x18c8] sm:$0xff]  ;;  %v16336_v34 = vcombine.low %v2443_v23, %v2451_v24 }
 0x476   :  { %8005 = vmatpush1.bf16.msra.mxu0 %v16238_v29  ;;  %v16337_v29 = vcombine.high %v2443_v23, %v2451_v24  ;;  %v16352_v47 = vcombine.low %v2459_v31, %v2467_v60  ;;  %v2538_v24 = vld [vmem:[#allocation12 + $0x1b00] sm:$0xff]  ;;  %v2539_v26 = vld [vmem:[#allocation12 + $0x1b08] sm:$0xff] }
 0x477   :  { %8169 = vmatpush1.bf16.msra.mxu1 %v16240_v40  ;;  %8006 = vmatprep.subr.bf16.mxu0 %v16255_v42  ;;  %v1662_v40 = vadd.f32 %v19819_v30, %v853_v22  ;;  %v2458_v42 = vld [vmem:[#allocation12 + $0x1880] sm:$0xff]  ;;  %v16353_v30 = vcombine.high %v2459_v31, %v2467_v60  ;;  %v2555_v31 = vld [vmem:[#allocation12 + $0x1b88] sm:$0xff] }
 0x478   :  { %8170 = vmatprep.subr.bf16.mxu1 %v16257_v44  ;;  %v2466_v44 = vld [vmem:[#allocation12 + $0x18c0] sm:$0xff]  ;;  %v2563_v60 = vld [vmem:[#allocation12 + $0x1bc8] sm:$0xff] }
 0x479   :  { %v16351_v38 = vcombine.high %v2458_v42, %v2466_v44  ;;  %v16350_v46 = vcombine.low %v2458_v42, %v2466_v44  ;;  %v2554_v44 = vld [vmem:[#allocation12 + $0x1b80] sm:$0xff] }
 0x47a   :  { %8007 = vmatpush1.bf16.msra.mxu0 %v16254_v35  ;;  %v2474_v35 = vld [vmem:[#allocation12 + $0x1900] sm:$0xff] }
 0x47b   :  { %8171 = vmatpush1.bf16.msra.mxu1 %v16256_v36  ;;  %8008 = vmatprep.subr.bf16.mxu0 %v16271_v37  ;;  %v2482_v36 = vld [vmem:[#allocation12 + $0x1940] sm:$0xff]  ;;  %v19843_v37 = vpack.c.bf16 %v1662_v40, %v1662_v40 }
 0x47c   :  { %8172 = vmatprep.subr.bf16.mxu1 %v16273_v41  ;;  %v2475_v41 = vld [vmem:[#allocation12 + $0x1908] sm:$0xff]  ;;  %v16367_v51 = vcombine.high %v2474_v35, %v2482_v36  ;;  %v16366_v63 = vcombine.low %v2474_v35, %v2482_v36  ;;  %v16449_v36 = vcombine.high %v2555_v31, %v2563_v60 }
 0x47d   :  { %v16368_v1 = vcombine.low %v2475_v41, %v2483_v43 }
 0x47e   :  { %8009 = vmatpush1.bf16.msra.mxu0 %v16270_v53  ;;  %v16369_v53 = vcombine.high %v2475_v41, %v2483_v43  ;;  %v2578_v41 = vld [vmem:[#allocation12 + $0x1c40] sm:$0xff]  ;;  %v2571_v43 = vld [vmem:[#allocation12 + $0x1c08] sm:$0xff] }
 0x47f   :  { %8173 = vmatpush1.bf16.msra.mxu1 %v16272_v54  ;;  %8010 = vmatprep.subr.bf16.mxu0 %v16287_v57  ;;  %v2490_v54 = vld [vmem:[#allocation12 + $0x1980] sm:$0xff] }
 0x480   :  { %8174 = vmatprep.subr.bf16.mxu1 %v16289_v59  ;;  %v2498_v57 = vld [vmem:[#allocation12 + $0x19c0] sm:$0xff]  ;;  %v2491_v59 = vld [vmem:[#allocation12 + $0x1988] sm:$0xff] }
 0x481   :  { %v16383_v2 = vcombine.high %v2490_v54, %v2498_v57  ;;  %v16382_v9 = vcombine.low %v2490_v54, %v2498_v57  ;;  %v16384_v11 = vcombine.low %v2491_v59, %v2499_v62  ;;  %v2586_v57 = vld [vmem:[#allocation12 + $0x1c80] sm:$0xff] }
 0x482   :  { %8011 = vmatpush1.bf16.msra.mxu0 %v16286_v33  ;;  %v16385_v33 = vcombine.high %v2491_v59, %v2499_v62  ;;  %v2594_v59 = vld [vmem:[#allocation12 + $0x1cc0] sm:$0xff]  ;;  %v2587_v62 = vld [vmem:[#allocation12 + $0x1c88] sm:$0xff] }
 0x483   :  { %8175 = vmatpush1.bf16.msra.mxu1 %v16288_v5  ;;  %8012 = vmatprep.subr.bf16.mxu0 %v16303_v6  ;;  %v2506_v5 = vld [vmem:[#allocation12 + $0x1a00] sm:$0xff] }
 0x484   :  { %8176 = vmatprep.subr.bf16.mxu1 %v16305_v7  ;;  %v2514_v6 = vld [vmem:[#allocation12 + $0x1a40] sm:$0xff]  ;;  %v2507_v7 = vld [vmem:[#allocation12 + $0x1a08] sm:$0xff] }
 0x485   :  { %v16399_v13 = vcombine.high %v2506_v5, %v2514_v6  ;;  %v16398_v55 = vcombine.low %v2506_v5, %v2514_v6  ;;  %v16400_v58 = vcombine.low %v2507_v7, %v2515_v8  ;;  %v2602_v6 = vld [vmem:[#allocation12 + $0x1d00] sm:$0xff] }
 0x486   :  { %8013 = vmatpush1.bf16.msra.mxu0 %v16302_v14  ;;  %v16401_v14 = vcombine.high %v2507_v7, %v2515_v8  ;;  %v2610_v7 = vld [vmem:[#allocation12 + $0x1d40] sm:$0xff]  ;;  %v2603_v8 = vld [vmem:[#allocation12 + $0x1d08] sm:$0xff] }
 0x487   :  { %8177 = vmatpush1.bf16.msra.mxu1 %v16304_v19  ;;  %8014 = vmatprep.subr.bf16.mxu0 %v16319_v20  ;;  %v2530_v19 = vld [vmem:[#allocation12 + $0x1ac0] sm:$0xff]  ;;  %v2523_v20 = vld [vmem:[#allocation12 + $0x1a88] sm:$0xff] }
 0x488   :  { %8178 = vmatprep.subr.bf16.mxu1 %v16321_v52  ;;  %v2531_v52 = vld [vmem:[#allocation12 + $0x1ac8] sm:$0xff]  ;;  %v16415_v22 = vcombine.high %v2522_v15, %v2530_v19 }
 0x489   :  { %v16417_v23 = vcombine.high %v2523_v20, %v2531_v52 }
 0x48a   :  { %8015 = vmatpush1.bf16.msra.mxu0 %v16318_v25  ;;  %v2546_v25 = vld [vmem:[#allocation12 + $0x1b40] sm:$0xff] }
 0x48b   :  { %8179 = vmatpush1.bf16.msra.mxu1 %v16320_v27  ;;  %8025 = vmatprep.subr.bf16.mxu0 %v16335_v28  ;;  %v2547_v27 = vld [vmem:[#allocation12 + $0x1b48] sm:$0xff]  ;;  %v16414_v28 = vcombine.low %v2522_v15, %v2530_v19  ;;  %v16431_v40 = vcombine.high %v2538_v24, %v2546_v25  ;;  %v2618_v19 = vld [vmem:[#allocation12 + $0x1d80] sm:$0xff] }
 0x48c   :  { %8189 = vmatprep.subr.bf16.mxu1 %v16337_v29  ;;  %v16416_v29 = vcombine.low %v2523_v20, %v2531_v52  ;;  %v16433_v42 = vcombine.high %v2539_v26, %v2547_v27  ;;  %v2626_v20 = vld [vmem:[#allocation12 + $0x1dc0] sm:$0xff]  ;;  %v2619_v52 = vld [vmem:[#allocation12 + $0x1d88] sm:$0xff] }
 0x48d   :  { %8017 = vmatmul.mubr.bf16.vlgmr.msra.gmra.mrb[12].mxu0 %v19841_v32 }
 0x48e   :  { %8181 = vmatmul.mubr.bf16.vlgmr.msra.gmra.mrb[12].mxu1 %v19841_v32  ;;  %8026 = vmatpush1.bf16.msra.mxu0 %v16334_v45  ;;  %v2562_v45 = vld [vmem:[#allocation12 + $0x1bc0] sm:$0xff] }
 0x48f   :  { %8057 = vmatprep.mubr.bf16.mxu0 %v19843_v37  ;;  %8190 = vmatpush1.bf16.msra.mxu1 %v16336_v34  ;;  %v16430_v34 = vcombine.low %v2538_v24, %v2546_v25  ;;  %v16447_v35 = vcombine.high %v2554_v44, %v2562_v45  ;;  %v2634_v25 = vld [vmem:[#allocation12 + $0x1e00] sm:$0xff] }
 0x490   :  { %8221 = vmatprep.mubr.bf16.mxu1 %v19843_v37  ;;  %8027 = vmatprep.subr.bf16.mxu0 %v16351_v38  ;;  %v16432_v38 = vcombine.low %v2539_v26, %v2547_v27  ;;  %v2642_v26 = vld [vmem:[#allocation12 + $0x1e40] sm:$0xff]  ;;  %v2635_v27 = vld [vmem:[#allocation12 + $0x1e08] sm:$0xff] }
 0x491   :  { %8191 = vmatprep.subr.bf16.mxu1 %v16353_v30  ;;  %v2570_v30 = vld [vmem:[#allocation12 + $0x1c00] sm:$0xff] }
 0x492   :  { %8028 = vmatpush1.bf16.msra.mxu0 %v16350_v46  ;;  %v2579_v46 = vld [vmem:[#allocation12 + $0x1c48] sm:$0xff] }
 0x493   :  { %8192 = vmatpush1.bf16.msra.mxu1 %v16352_v47  ;;  %8029 = vmatprep.subr.bf16.mxu0 %v16367_v51  ;;  %v16446_v47 = vcombine.low %v2554_v44, %v2562_v45  ;;  %v16448_v51 = vcombine.low %v2555_v31, %v2563_v60  ;;  %v16465_v54 = vcombine.high %v2571_v43, %v2579_v46  ;;  %v2650_v45 = vld [vmem:[#allocation12 + $0x1e80] sm:$0xff]  ;;  %v2651_v60 = vld [vmem:[#allocation12 + $0x1e88] sm:$0xff] }
 0x494   :  { %8193 = vmatprep.subr.bf16.mxu1 %v16369_v53  ;;  %v16463_v53 = vcombine.high %v2570_v30, %v2578_v41  ;;  %v2658_v31 = vld [vmem:[#allocation12 + $0x1ec0] sm:$0xff] }
 0x496   :  { %8030 = vmatpush1.bf16.msra.mxu0 %v16366_v63  ;;  %v2595_v63 = vld [vmem:[#allocation12 + $0x1cc8] sm:$0xff] }
 0x497   :  { %8194 = vmatpush1.bf16.msra.mxu1 %v16368_v1  ;;  %8031 = vmatprep.subr.bf16.mxu0 %v16383_v2  ;;  %v16462_v1 = vcombine.low %v2570_v30, %v2578_v41  ;;  %v16464_v2 = vcombine.low %v2571_v43, %v2579_v46  ;;  %v16481_v5 = vcombine.high %v2587_v62, %v2595_v63  ;;  %v2666_v41 = vld [vmem:[#allocation12 + $0x1f00] sm:$0xff]  ;;  %v2667_v46 = vld [vmem:[#allocation12 + $0x1f08] sm:$0xff] }
 0x498   :  { %8195 = vmatprep.subr.bf16.mxu1 %v16385_v33  ;;  %v16479_v33 = vcombine.high %v2586_v57, %v2594_v59  ;;  %v2674_v43 = vld [vmem:[#allocation12 + $0x1f40] sm:$0xff] }
 0x49a   :  { %8032 = vmatpush1.bf16.msra.mxu0 %v16382_v9  ;;  %v2611_v9 = vld [vmem:[#allocation12 + $0x1d48] sm:$0xff] }
 0x49b   :  { %8196 = vmatpush1.bf16.msra.mxu1 %v16384_v11  ;;  %8033 = vmatprep.subr.bf16.mxu0 %v16399_v13  ;;  %v16478_v11 = vcombine.low %v2586_v57, %v2594_v59  ;;  %v16480_v13 = vcombine.low %v2587_v62, %v2595_v63  ;;  %v16497_v15 = vcombine.high %v2603_v8, %v2611_v9  ;;  %v2682_v62 = vld [vmem:[#allocation12 + $0x1f80] sm:$0xff] }
 0x49c   :  { %8197 = vmatprep.subr.bf16.mxu1 %v16401_v14  ;;  %v16495_v14 = vcombine.high %v2602_v6, %v2610_v7  ;;  %v16559_v57 = vcombine.high %v2666_v41, %v2674_v43  ;;  %v2690_v63 = vld [vmem:[#allocation12 + $0x1fc0] sm:$0xff] }
 0x49e   :  { %8034 = vmatpush1.bf16.msra.mxu0 %v16398_v55  ;;  %v2627_v55 = vld [vmem:[#allocation12 + $0x1dc8] sm:$0xff] }
 0x49f   :  { %8198 = vmatpush1.bf16.msra.mxu1 %v16400_v58  ;;  %8035 = vmatprep.subr.bf16.mxu0 %v16415_v22  ;;  %v16494_v58 = vcombine.low %v2602_v6, %v2610_v7  ;;  %v16496_v22 = vcombine.low %v2603_v8, %v2611_v9  ;;  %v16513_v24 = vcombine.high %v2619_v52, %v2627_v55  ;;  %v1676_v9 = vld [vmem:[#allocation12 + $0x10] sm:$0xff] }
 0x4a0   :  { %8199 = vmatprep.subr.bf16.mxu1 %v16417_v23  ;;  %v16511_v23 = vcombine.high %v2618_v19, %v2626_v20 }
 0x4a2   :  { %8036 = vmatpush1.bf16.msra.mxu0 %v16414_v28  ;;  %v2643_v28 = vld [vmem:[#allocation12 + $0x1e48] sm:$0xff] }
 0x4a3   :  { %8200 = vmatpush1.bf16.msra.mxu1 %v16416_v29  ;;  %8037 = vmatprep.subr.bf16.mxu0 %v16431_v40  ;;  %v16510_v29 = vcombine.low %v2618_v19, %v2626_v20  ;;  %v16512_v40 = vcombine.low %v2619_v52, %v2627_v55  ;;  %v16529_v44 = vcombine.high %v2635_v27, %v2643_v28 }
 0x4a4   :  { %8201 = vmatprep.subr.bf16.mxu1 %v16433_v42  ;;  %v16527_v42 = vcombine.high %v2634_v25, %v2642_v26 }
 0x4a6   :  { %8038 = vmatpush1.bf16.msra.mxu0 %v16430_v34  ;;  %v2659_v34 = vld [vmem:[#allocation12 + $0x1ec8] sm:$0xff] }
 0x4a7   :  { %8202 = vmatpush1.bf16.msra.mxu1 %v16432_v38  ;;  %8039 = vmatprep.subr.bf16.mxu0 %v16447_v35  ;;  %v16526_v38 = vcombine.low %v2634_v25, %v2642_v26  ;;  %v16528_v35 = vcombine.low %v2635_v27, %v2643_v28  ;;  %v16545_v30 = vcombine.high %v2651_v60, %v2659_v34  ;;  %v1701_v25 = vld [vmem:[#allocation12 + $0xd8] sm:$0xff] }
 0x4a8   :  { %8203 = vmatprep.subr.bf16.mxu1 %v16449_v36  ;;  %v16543_v36 = vcombine.high %v2650_v45, %v2658_v31 }
 0x4aa   :  { %8040 = vmatpush1.bf16.msra.mxu0 %v16446_v47  ;;  %v2675_v47 = vld [vmem:[#allocation12 + $0x1f48] sm:$0xff] }
 0x4ab   :  { %8204 = vmatpush1.bf16.msra.mxu1 %v16448_v51  ;;  %8041 = vmatprep.subr.bf16.mxu0 %v16463_v53  ;;  %v16542_v51 = vcombine.low %v2650_v45, %v2658_v31  ;;  %v19850_v53 = vsub.s32 6, %v19736_v48  ;;  %v16561_v59 = vcombine.high %v2667_v46, %v2675_v47  ;;  %v16560_v7 = vcombine.low %v2667_v46, %v2675_v47 }
 0x4ac   :  { %8205 = vmatprep.subr.bf16.mxu1 %v16465_v54  ;;  %v16544_v54 = vcombine.low %v2651_v60, %v2659_v34  ;;  %v16575_v48 = vcombine.high %v2682_v62, %v2690_v63 }
 0x4ae   :  { %8042 = vmatpush1.bf16.msra.mxu0 %v16462_v1  ;;  %v2683_v1 = vld [vmem:[#allocation12 + $0x1f88] sm:$0xff] }
 0x4af   :  { %8206 = vmatpush1.bf16.msra.mxu1 %v16464_v2  ;;  %8043 = vmatprep.subr.bf16.mxu0 %v16479_v33  ;;  %v2691_v2 = vld [vmem:[#allocation12 + $0x1fc8] sm:$0xff]  ;;  %v16558_v33 = vcombine.low %v2666_v41, %v2674_v43 }
 0x4b0   :  { %8207 = vmatprep.subr.bf16.mxu1 %v16481_v5  ;;  %v18933_v5 = vld [vmem:[#allocation10] sm:$0xff]  ;;  %v16577_v8 = vcombine.high %v2683_v1, %v2691_v2  ;;  %v16576_v20 = vcombine.low %v2683_v1, %v2691_v2 }
 0x4b1   :  { %v849_v6 = vrot.slane %v18933_v5, %v19850_v53  ;;  %v1764_v5 = vld [vmem:[#allocation12 + $0x2d0] sm:$0xff] }
 0x4b2   :  { %8044 = vmatpush1.bf16.msra.mxu0 %v16478_v11  ;;  %v1684_v11 = vld [vmem:[#allocation12 + $0x50] sm:$0xff] }
 0x4b3   :  { %8208 = vmatpush1.bf16.msra.mxu1 %v16480_v13  ;;  %8045 = vmatprep.subr.bf16.mxu0 %v16495_v14  ;;  %v1677_v13 = vld [vmem:[#allocation12 + $0x18] sm:$0xff]  ;;  %v1660_v19 = vadd.f32 %v19816_v39, %v849_v6  ;;  %v15571_v52 = vcombine.high %v1676_v9, %v1684_v11  ;;  %v1708_v39 = vld [vmem:[#allocation12 + $0x110] sm:$0xff] }
 0x4b4   :  { %8209 = vmatprep.subr.bf16.mxu1 %v16497_v15  ;;  %v1685_v14 = vld [vmem:[#allocation12 + $0x58] sm:$0xff]  ;;  %v16574_v15 = vcombine.low %v2682_v62, %v2690_v63 }
 0x4b5   :  { %v15573_v55 = vcombine.high %v1677_v13, %v1685_v14  ;;  %v19854_v26 = vpack.c.bf16 %v1660_v19, %v1660_v19  ;;  %v15572_v27 = vcombine.low %v1677_v13, %v1685_v14  ;;  %v1757_v6 = vld [vmem:[#allocation12 + $0x298] sm:$0xff]  ;;  %v1772_v13 = vld [vmem:[#allocation12 + $0x310] sm:$0xff] }
 0x4b6   :  { %8046 = vmatpush1.bf16.msra.mxu0 %v16494_v58  ;;  %v1692_v58 = vld [vmem:[#allocation12 + $0x90] sm:$0xff]  ;;  %v1781_v19 = vld [vmem:[#allocation12 + $0x358] sm:$0xff] }
 0x4b7   :  { %8210 = vmatpush1.bf16.msra.mxu1 %v16496_v22  ;;  %8047 = vmatprep.subr.bf16.mxu0 %v16511_v23  ;;  %v1700_v22 = vld [vmem:[#allocation12 + $0xd0] sm:$0xff]  ;;  %v15570_v23 = vcombine.low %v1676_v9, %v1684_v11 }
 0x4b8   :  { %8211 = vmatprep.subr.bf16.mxu1 %v16513_v24  ;;  %v1693_v24 = vld [vmem:[#allocation12 + $0x98] sm:$0xff]  ;;  %v15587_v28 = vcombine.high %v1692_v58, %v1700_v22  ;;  %v15586_v45 = vcombine.low %v1692_v58, %v1700_v22  ;;  %v1780_v14 = vld [vmem:[#allocation12 + $0x350] sm:$0xff] }
 0x4b9   :  { %v15588_v31 = vcombine.low %v1693_v24, %v1701_v25  ;;  %v1788_v22 = vld [vmem:[#allocation12 + $0x390] sm:$0xff] }
 0x4ba   :  { %8048 = vmatpush1.bf16.msra.mxu0 %v16510_v29  ;;  %v1716_v29 = vld [vmem:[#allocation12 + $0x150] sm:$0xff] }
 0x4bb   :  { %8212 = vmatpush1.bf16.msra.mxu1 %v16512_v40  ;;  %8049 = vmatprep.subr.bf16.mxu0 %v16527_v42  ;;  %v15589_v40 = vcombine.high %v1693_v24, %v1701_v25  ;;  %v1709_v42 = vld [vmem:[#allocation12 + $0x118] sm:$0xff]  ;;  %v15603_v60 = vcombine.high %v1708_v39, %v1716_v29  ;;  %v15602_v41 = vcombine.low %v1708_v39, %v1716_v29 }
 0x4bc   :  { %8213 = vmatprep.subr.bf16.mxu1 %v16529_v44  ;;  %v1717_v44 = vld [vmem:[#allocation12 + $0x158] sm:$0xff] }
 0x4bd   :  { %v15605_v34 = vcombine.high %v1709_v42, %v1717_v44  ;;  %v15604_v43 = vcombine.low %v1709_v42, %v1717_v44  ;;  %v1789_v24 = vld [vmem:[#allocation12 + $0x398] sm:$0xff]  ;;  %v1812_v42 = vld [vmem:[#allocation12 + $0x450] sm:$0xff] }
 0x4be   :  { %8050 = vmatpush1.bf16.msra.mxu0 %v16526_v38  ;;  %v1724_v38 = vld [vmem:[#allocation12 + $0x190] sm:$0xff]  ;;  %v1797_v25 = vld [vmem:[#allocation12 + $0x3d8] sm:$0xff] }
 0x4bf   :  { %8214 = vmatpush1.bf16.msra.mxu1 %v16528_v35  ;;  %8051 = vmatprep.subr.bf16.mxu0 %v16543_v36  ;;  %v1732_v35 = vld [vmem:[#allocation12 + $0x1d0] sm:$0xff]  ;;  %v1725_v36 = vld [vmem:[#allocation12 + $0x198] sm:$0xff]  ;;  %v15685_v29 = vcombine.high %v1789_v24, %v1797_v25 }
 0x4c0   :  { %8215 = vmatprep.subr.bf16.mxu1 %v16545_v30  ;;  %v1733_v30 = vld [vmem:[#allocation12 + $0x1d8] sm:$0xff]  ;;  %v15619_v46 = vcombine.high %v1724_v38, %v1732_v35  ;;  %v15618_v62 = vcombine.low %v1724_v38, %v1732_v35  ;;  %v1820_v35 = vld [vmem:[#allocation12 + $0x490] sm:$0xff] }
 0x4c1   :  { %v15621_v47 = vcombine.high %v1725_v36, %v1733_v30  ;;  %v15620_v63 = vcombine.low %v1725_v36, %v1733_v30  ;;  %v1805_v44 = vld [vmem:[#allocation12 + $0x418] sm:$0xff]  ;;  %v1828_v36 = vld [vmem:[#allocation12 + $0x4d0] sm:$0xff] }
 0x4c2   :  { %8052 = vmatpush1.bf16.msra.mxu0 %v16542_v51  ;;  %v1740_v51 = vld [vmem:[#allocation12 + $0x210] sm:$0xff]  ;;  %v1821_v30 = vld [vmem:[#allocation12 + $0x498] sm:$0xff] }
 0x4c3   :  { %8216 = vmatpush1.bf16.msra.mxu1 %v16544_v54  ;;  %8053 = vmatprep.subr.bf16.mxu0 %v16559_v57  ;;  %v1748_v54 = vld [vmem:[#allocation12 + $0x250] sm:$0xff]  ;;  %v1741_v57 = vld [vmem:[#allocation12 + $0x218] sm:$0xff] }
 0x4c4   :  { %8217 = vmatprep.subr.bf16.mxu1 %v16561_v59  ;;  %v1749_v59 = vld [vmem:[#allocation12 + $0x258] sm:$0xff]  ;;  %v15635_v1 = vcombine.high %v1740_v51, %v1748_v54 }
 0x4c5   :  { %v15637_v2 = vcombine.high %v1741_v57, %v1749_v59 }
 0x4c6   :  { %8054 = vmatpush1.bf16.msra.mxu0 %v16558_v33  ;;  %v1756_v33 = vld [vmem:[#allocation12 + $0x290] sm:$0xff] }
 0x4c7   :  { %8218 = vmatpush1.bf16.msra.mxu1 %v16560_v7  ;;  %8055 = vmatprep.subr.bf16.mxu0 %v16575_v48  ;;  %v1765_v7 = vld [vmem:[#allocation12 + $0x2d8] sm:$0xff]  ;;  %v15634_v48 = vcombine.low %v1740_v51, %v1748_v54  ;;  %v15651_v9 = vcombine.high %v1756_v33, %v1764_v5  ;;  %v1836_v54 = vld [vmem:[#allocation12 + $0x510] sm:$0xff] }
 0x4c8   :  { %8219 = vmatprep.subr.bf16.mxu1 %v16577_v8  ;;  %v15636_v8 = vcombine.low %v1741_v57, %v1749_v59  ;;  %v15653_v11 = vcombine.high %v1757_v6, %v1765_v7  ;;  %v1844_v57 = vld [vmem:[#allocation12 + $0x550] sm:$0xff]  ;;  %v1837_v59 = vld [vmem:[#allocation12 + $0x518] sm:$0xff] }
 0x4ca   :  { %8056 = vmatpush1.bf16.msra.mxu0 %v16574_v15  ;;  %v1773_v15 = vld [vmem:[#allocation12 + $0x318] sm:$0xff] }
 0x4cb   :  { %8220 = vmatpush1.bf16.msra.mxu1 %v16576_v20  ;;  %8230 = vmatprep.subr.bf16.mxu0 %v15571_v52  ;;  %v15650_v20 = vcombine.low %v1756_v33, %v1764_v5  ;;  %v15652_v52 = vcombine.low %v1757_v6, %v1765_v7  ;;  %v15669_v58 = vcombine.high %v1773_v15, %v1781_v19  ;;  %v1852_v5 = vld [vmem:[#allocation12 + $0x590] sm:$0xff]  ;;  %v1853_v7 = vld [vmem:[#allocation12 + $0x598] sm:$0xff] }
 0x4cc   :  { %8394 = vmatprep.subr.bf16.mxu1 %v15573_v55  ;;  %v15667_v55 = vcombine.high %v1772_v13, %v1780_v14  ;;  %v1860_v6 = vld [vmem:[#allocation12 + $0x5d0] sm:$0xff] }
 0x4cd   :  { %8058 = vmatmul.mubr.bf16.vlgmr.msra.gmra.mrb[12].mxu0 %v19854_v26 }
 0x4ce   :  { %8222 = vmatmul.mubr.bf16.vlgmr.msra.gmra.mrb[12].mxu1 %v19854_v26  ;;  %8231 = vmatpush1.bf16.msra.mxu0 %v15570_v23  ;;  %v1796_v23 = vld [vmem:[#allocation12 + $0x3d0] sm:$0xff] }
 0x4cf   :  { %8262 = vmatprep.mubr.bf16.mxu0 %v19786_v16  ;;  %8395 = vmatpush1.bf16.msra.mxu1 %v15572_v27  ;;  %v15666_v27 = vcombine.low %v1772_v13, %v1780_v14  ;;  %v15683_v39 = vcombine.high %v1788_v22, %v1796_v23  ;;  %v1868_v14 = vld [vmem:[#allocation12 + $0x610] sm:$0xff] }
 0x4d0   :  { %8426 = vmatprep.mubr.bf16.mxu1 %v19786_v16  ;;  %8232 = vmatprep.subr.bf16.mxu0 %v15587_v28  ;;  %v15668_v28 = vcombine.low %v1773_v15, %v1781_v19  ;;  %v1876_v15 = vld [vmem:[#allocation12 + $0x650] sm:$0xff]  ;;  %v1869_v19 = vld [vmem:[#allocation12 + $0x618] sm:$0xff] }
 0x4d1   :  { %8396 = vmatprep.subr.bf16.mxu1 %v15589_v40  ;;  %v1804_v40 = vld [vmem:[#allocation12 + $0x410] sm:$0xff] }
 0x4d2   :  { %8233 = vmatpush1.bf16.msra.mxu0 %v15586_v45  ;;  %v1813_v45 = vld [vmem:[#allocation12 + $0x458] sm:$0xff] }
 0x4d3   :  { %8397 = vmatpush1.bf16.msra.mxu1 %v15588_v31  ;;  %8234 = vmatprep.subr.bf16.mxu0 %v15603_v60  ;;  %v15682_v31 = vcombine.low %v1788_v22, %v1796_v23  ;;  %v15684_v60 = vcombine.low %v1789_v24, %v1797_v25  ;;  %v15701_v38 = vcombine.high %v1805_v44, %v1813_v45  ;;  %v1884_v23 = vld [vmem:[#allocation12 + $0x690] sm:$0xff]  ;;  %v1885_v25 = vld [vmem:[#allocation12 + $0x698] sm:$0xff] }
 0x4d4   :  { %8398 = vmatprep.subr.bf16.mxu1 %v15605_v34  ;;  %v15699_v34 = vcombine.high %v1804_v40, %v1812_v42  ;;  %v1892_v24 = vld [vmem:[#allocation12 + $0x6d0] sm:$0xff] }
 0x4d6   :  { %8235 = vmatpush1.bf16.msra.mxu0 %v15602_v41  ;;  %v1829_v41 = vld [vmem:[#allocation12 + $0x4d8] sm:$0xff] }
 0x4d7   :  { %8399 = vmatpush1.bf16.msra.mxu1 %v15604_v43  ;;  %8236 = vmatprep.subr.bf16.mxu0 %v15619_v46  ;;  %v15698_v43 = vcombine.low %v1804_v40, %v1812_v42  ;;  %v15700_v46 = vcombine.low %v1805_v44, %v1813_v45  ;;  %v15717_v51 = vcombine.high %v1821_v30, %v1829_v41  ;;  %v1900_v42 = vld [vmem:[#allocation12 + $0x710] sm:$0xff]  ;;  %v1901_v45 = vld [vmem:[#allocation12 + $0x718] sm:$0xff] }
 0x4d8   :  { %8400 = vmatprep.subr.bf16.mxu1 %v15621_v47  ;;  %v15715_v47 = vcombine.high %v1820_v35, %v1828_v36  ;;  %v1908_v44 = vld [vmem:[#allocation12 + $0x750] sm:$0xff] }
 0x4da   :  { %8237 = vmatpush1.bf16.msra.mxu0 %v15618_v62  ;;  %v1845_v62 = vld [vmem:[#allocation12 + $0x558] sm:$0xff] }
 0x4db   :  { %8401 = vmatpush1.bf16.msra.mxu1 %v15620_v63  ;;  %8238 = vmatprep.subr.bf16.mxu0 %v15635_v1  ;;  %v15714_v63 = vcombine.low %v1820_v35, %v1828_v36  ;;  %v15716_v1 = vcombine.low %v1821_v30, %v1829_v41  ;;  %v15733_v33 = vcombine.high %v1837_v59, %v1845_v62  ;;  %v1916_v36 = vld [vmem:[#allocation12 + $0x790] sm:$0xff]  ;;  %v1917_v41 = vld [vmem:[#allocation12 + $0x798] sm:$0xff] }
 0x4dc   :  { %8402 = vmatprep.subr.bf16.mxu1 %v15637_v2  ;;  %v15731_v2 = vcombine.high %v1836_v54, %v1844_v57  ;;  %v1924_v30 = vld [vmem:[#allocation12 + $0x7d0] sm:$0xff] }
 0x4de   :  { %8239 = vmatpush1.bf16.msra.mxu0 %v15634_v48  ;;  %v1861_v48 = vld [vmem:[#allocation12 + $0x5d8] sm:$0xff] }
 0x4df   :  { %8403 = vmatpush1.bf16.msra.mxu1 %v15636_v8  ;;  %8240 = vmatprep.subr.bf16.mxu0 %v15651_v9  ;;  %v15730_v8 = vcombine.low %v1836_v54, %v1844_v57  ;;  %v15732_v9 = vcombine.low %v1837_v59, %v1845_v62  ;;  %v15749_v13 = vcombine.high %v1853_v7, %v1861_v48  ;;  %v1932_v57 = vld [vmem:[#allocation12 + $0x810] sm:$0xff]  ;;  %v1933_v62 = vld [vmem:[#allocation12 + $0x818] sm:$0xff] }
 0x4e0   :  { %8404 = vmatprep.subr.bf16.mxu1 %v15653_v11  ;;  %v15747_v11 = vcombine.high %v1852_v5, %v1860_v6  ;;  %v1940_v59 = vld [vmem:[#allocation12 + $0x850] sm:$0xff] }
 0x4e2   :  { %8241 = vmatpush1.bf16.msra.mxu0 %v15650_v20  ;;  %v1877_v20 = vld [vmem:[#allocation12 + $0x658] sm:$0xff] }
 0x4e3   :  { %8405 = vmatpush1.bf16.msra.mxu1 %v15652_v52  ;;  %8242 = vmatprep.subr.bf16.mxu0 %v15667_v55  ;;  %v15746_v52 = vcombine.low %v1852_v5, %v1860_v6  ;;  %v15748_v55 = vcombine.low %v1853_v7, %v1861_v48  ;;  %v15765_v22 = vcombine.high %v1869_v19, %v1877_v20  ;;  %v1948_v6 = vld [vmem:[#allocation12 + $0x890] sm:$0xff] }
 0x4e4   :  { %8406 = vmatprep.subr.bf16.mxu1 %v15669_v58  ;;  %v15763_v58 = vcombine.high %v1868_v14, %v1876_v15  ;;  %v1956_v7 = vld [vmem:[#allocation12 + $0x8d0] sm:$0xff]  ;;  %v15826_v48 = vcombine.low %v1932_v57, %v1940_v59 }
 0x4e6   :  { %8243 = vmatpush1.bf16.msra.mxu0 %v15666_v27  ;;  %v1893_v27 = vld [vmem:[#allocation12 + $0x6d8] sm:$0xff] }
 0x4e7   :  { %8407 = vmatpush1.bf16.msra.mxu1 %v15668_v28  ;;  %8244 = vmatprep.subr.bf16.mxu0 %v15683_v39  ;;  %v15762_v28 = vcombine.low %v1868_v14, %v1876_v15  ;;  %v15764_v39 = vcombine.low %v1869_v19, %v1877_v20  ;;  %v15781_v40 = vcombine.high %v1885_v25, %v1893_v27  ;;  %v1964_v14 = vld [vmem:[#allocation12 + $0x910] sm:$0xff]  ;;  %v1965_v20 = vld [vmem:[#allocation12 + $0x918] sm:$0xff] }
 0x4e8   :  { %8408 = vmatprep.subr.bf16.mxu1 %v15685_v29  ;;  %v15779_v29 = vcombine.high %v1884_v23, %v1892_v24  ;;  %v1972_v15 = vld [vmem:[#allocation12 + $0x950] sm:$0xff] }
 0x4ea   :  { %8245 = vmatpush1.bf16.msra.mxu0 %v15682_v31  ;;  %v1909_v31 = vld [vmem:[#allocation12 + $0x758] sm:$0xff] }
 0x4eb   :  { %8409 = vmatpush1.bf16.msra.mxu1 %v15684_v60  ;;  %8246 = vmatprep.subr.bf16.mxu0 %v15699_v34  ;;  %v15778_v60 = vcombine.low %v1884_v23, %v1892_v24  ;;  %v15780_v34 = vcombine.low %v1885_v25, %v1893_v27  ;;  %v15797_v35 = vcombine.high %v1901_v45, %v1909_v31  ;;  %v1980_v24 = vld [vmem:[#allocation12 + $0x990] sm:$0xff]  ;;  %v1981_v27 = vld [vmem:[#allocation12 + $0x998] sm:$0xff] }
 0x4ec   :  { %8410 = vmatprep.subr.bf16.mxu1 %v15701_v38  ;;  %v15795_v38 = vcombine.high %v1900_v42, %v1908_v44  ;;  %v1988_v25 = vld [vmem:[#allocation12 + $0x9d0] sm:$0xff] }
 0x4ee   :  { %8247 = vmatpush1.bf16.msra.mxu0 %v15698_v43  ;;  %v1925_v43 = vld [vmem:[#allocation12 + $0x7d8] sm:$0xff] }
 0x4ef   :  { %8411 = vmatpush1.bf16.msra.mxu1 %v15700_v46  ;;  %8248 = vmatprep.subr.bf16.mxu0 %v15715_v47  ;;  %v15794_v46 = vcombine.low %v1900_v42, %v1908_v44  ;;  %v15796_v47 = vcombine.low %v1901_v45, %v1909_v31  ;;  %v15813_v54 = vcombine.high %v1917_v41, %v1925_v43  ;;  %v1996_v44 = vld [vmem:[#allocation12 + $0xa10] sm:$0xff]  ;;  %v1997_v31 = vld [vmem:[#allocation12 + $0xa18] sm:$0xff] }
 0x4f0   :  { %8412 = vmatprep.subr.bf16.mxu1 %v15717_v51  ;;  %v15811_v51 = vcombine.high %v1916_v36, %v1924_v30  ;;  %v2004_v45 = vld [vmem:[#allocation12 + $0xa50] sm:$0xff] }
 0x4f2   :  { %8249 = vmatpush1.bf16.msra.mxu0 %v15714_v63  ;;  %v1941_v63 = vld [vmem:[#allocation12 + $0x858] sm:$0xff] }
 0x4f3   :  { %8413 = vmatpush1.bf16.msra.mxu1 %v15716_v1  ;;  %8250 = vmatprep.subr.bf16.mxu0 %v15731_v2  ;;  %v15810_v1 = vcombine.low %v1916_v36, %v1924_v30  ;;  %v15812_v2 = vcombine.low %v1917_v41, %v1925_v43  ;;  %v15829_v5 = vcombine.high %v1933_v62, %v1941_v63  ;;  %v2012_v30 = vld [vmem:[#allocation12 + $0xa90] sm:$0xff]  ;;  %v2013_v43 = vld [vmem:[#allocation12 + $0xa98] sm:$0xff] }
 0x4f4   :  { %8414 = vmatprep.subr.bf16.mxu1 %v15733_v33  ;;  %v15827_v33 = vcombine.high %v1932_v57, %v1940_v59  ;;  %v2020_v41 = vld [vmem:[#allocation12 + $0xad0] sm:$0xff] }
 0x4f5   :  { %v2028_v59 = vld [vmem:[#allocation12 + $0xb10] sm:$0xff] }
 0x4f6   :  { %8251 = vmatpush1.bf16.msra.mxu0 %v15730_v8  ;;  %v1949_v8 = vld [vmem:[#allocation12 + $0x898] sm:$0xff] }
 0x4f7   :  { %8415 = vmatpush1.bf16.msra.mxu1 %v15732_v9  ;;  %8252 = vmatprep.subr.bf16.mxu0 %v15747_v11  ;;  %v1957_v9 = vld [vmem:[#allocation12 + $0x8d8] sm:$0xff]  ;;  %v15828_v11 = vcombine.low %v1933_v62, %v1941_v63  ;;  %v2036_v62 = vld [vmem:[#allocation12 + $0xb50] sm:$0xff] }
 0x4f8   :  { %8416 = vmatprep.subr.bf16.mxu1 %v15749_v13  ;;  %v15843_v13 = vcombine.high %v1948_v6, %v1956_v7  ;;  %v15845_v19 = vcombine.high %v1949_v8, %v1957_v9  ;;  %v2029_v63 = vld [vmem:[#allocation12 + $0xb18] sm:$0xff] }
 0x4fa   :  { %8253 = vmatpush1.bf16.msra.mxu0 %v15746_v52  ;;  %v1973_v52 = vld [vmem:[#allocation12 + $0x958] sm:$0xff] }
 0x4fb   :  { %8417 = vmatpush1.bf16.msra.mxu1 %v15748_v55  ;;  %8254 = vmatprep.subr.bf16.mxu0 %v15763_v58  ;;  %v15842_v55 = vcombine.low %v1948_v6, %v1956_v7  ;;  %v15844_v58 = vcombine.low %v1949_v8, %v1957_v9  ;;  %v15861_v23 = vcombine.high %v1965_v20, %v1973_v52  ;;  %v2044_v7 = vld [vmem:[#allocation12 + $0xb90] sm:$0xff]  ;;  %v2045_v8 = vld [vmem:[#allocation12 + $0xb98] sm:$0xff] }
 0x4fc   :  { %8418 = vmatprep.subr.bf16.mxu1 %v15765_v22  ;;  %v15859_v22 = vcombine.high %v1964_v14, %v1972_v15  ;;  %v2053_v9 = vld [vmem:[#allocation12 + $0xbd8] sm:$0xff] }
 0x4fe   :  { %8255 = vmatpush1.bf16.msra.mxu0 %v15762_v28  ;;  %v1989_v28 = vld [vmem:[#allocation12 + $0x9d8] sm:$0xff] }
 0x4ff   :  { %8419 = vmatpush1.bf16.msra.mxu1 %v15764_v39  ;;  %8256 = vmatprep.subr.bf16.mxu0 %v15779_v29  ;;  %v15858_v39 = vcombine.low %v1964_v14, %v1972_v15  ;;  %v15860_v29 = vcombine.low %v1965_v20, %v1973_v52  ;;  %v15877_v42 = vcombine.high %v1981_v27, %v1989_v28  ;;  %v2068_v20 = vld [vmem:[#allocation12 + $0xc50] sm:$0xff]  ;;  %v2061_v52 = vld [vmem:[#allocation12 + $0xc18] sm:$0xff] }
 0x500   :  { %8420 = vmatprep.subr.bf16.mxu1 %v15781_v40  ;;  %v15875_v40 = vcombine.high %v1980_v24, %v1988_v25  ;;  %v15941_v15 = vcombine.high %v2045_v8, %v2053_v9 }
 0x502   :  { %8257 = vmatpush1.bf16.msra.mxu0 %v15778_v60  ;;  %v2005_v60 = vld [vmem:[#allocation12 + $0xa58] sm:$0xff] }
 0x503   :  { %8421 = vmatpush1.bf16.msra.mxu1 %v15780_v34  ;;  %8258 = vmatprep.subr.bf16.mxu0 %v15795_v38  ;;  %v15874_v34 = vcombine.low %v1980_v24, %v1988_v25  ;;  %v15876_v38 = vcombine.low %v1981_v27, %v1989_v28  ;;  %v15893_v36 = vcombine.high %v1997_v31, %v2005_v60  ;;  %v2076_v25 = vld [vmem:[#allocation12 + $0xc90] sm:$0xff]  ;;  %v2077_v28 = vld [vmem:[#allocation12 + $0xc98] sm:$0xff] }
 0x504   :  { %8422 = vmatprep.subr.bf16.mxu1 %v15797_v35  ;;  %v15891_v35 = vcombine.high %v1996_v44, %v2004_v45  ;;  %v2084_v27 = vld [vmem:[#allocation12 + $0xcd0] sm:$0xff] }
 0x506   :  { %8259 = vmatpush1.bf16.msra.mxu0 %v15794_v46  ;;  %v2021_v46 = vld [vmem:[#allocation12 + $0xad8] sm:$0xff] }
 0x507   :  { %8423 = vmatpush1.bf16.msra.mxu1 %v15796_v47  ;;  %8260 = vmatprep.subr.bf16.mxu0 %v15811_v51  ;;  %v15890_v47 = vcombine.low %v1996_v44, %v2004_v45  ;;  %v15892_v51 = vcombine.low %v1997_v31, %v2005_v60  ;;  %v15909_v57 = vcombine.high %v2013_v43, %v2021_v46  ;;  %v2092_v45 = vld [vmem:[#allocation12 + $0xd10] sm:$0xff]  ;;  %v2093_v60 = vld [vmem:[#allocation12 + $0xd18] sm:$0xff] }
 0x508   :  { %8424 = vmatprep.subr.bf16.mxu1 %v15813_v54  ;;  %v15907_v54 = vcombine.high %v2012_v30, %v2020_v41  ;;  %v2100_v31 = vld [vmem:[#allocation12 + $0xd50] sm:$0xff] }
 0x50a   :  { %8261 = vmatpush1.bf16.msra.mxu0 %v15810_v1  ;;  %v2037_v1 = vld [vmem:[#allocation12 + $0xb58] sm:$0xff] }
 0x50b   :  { %8425 = vmatpush1.bf16.msra.mxu1 %v15812_v2  ;;  %8271 = vmatprep.subr.bf16.mxu0 %v15827_v33  ;;  %v15906_v2 = vcombine.low %v2012_v30, %v2020_v41  ;;  %v15908_v33 = vcombine.low %v2013_v43, %v2021_v46  ;;  %v15925_v6 = vcombine.high %v2029_v63, %v2037_v1  ;;  %v2108_v41 = vld [vmem:[#allocation12 + $0xd90] sm:$0xff]  ;;  %v2109_v46 = vld [vmem:[#allocation12 + $0xd98] sm:$0xff] }
 0x50c   :  { %8435 = vmatprep.subr.bf16.mxu1 %v15829_v5  ;;  %v15923_v5 = vcombine.high %v2028_v59, %v2036_v62  ;;  %v2116_v43 = vld [vmem:[#allocation12 + $0xdd0] sm:$0xff] }
 0x50d   :  { %8263 = vmatmul.mubr.bf16.vlgmr.msra.gmra.mrb[16].mxu0 %v19788_v17 }
 0x50e   :  { %8427 = vmatmul.mubr.bf16.vlgmr.msra.gmra.mrb[16].mxu1 %v19788_v17  ;;  %8272 = vmatpush1.bf16.msra.mxu0 %v15826_v48  ;;  %v2052_v48 = vld [vmem:[#allocation12 + $0xbd0] sm:$0xff] }
 0x50f   :  { %8303 = vmatprep.mubr.bf16.mxu0 %v19792_v21  ;;  %8436 = vmatpush1.bf16.msra.mxu1 %v15828_v11  ;;  %v15922_v11 = vcombine.low %v2028_v59, %v2036_v62  ;;  %v15939_v14 = vcombine.high %v2044_v7, %v2052_v48  ;;  %v2124_v62 = vld [vmem:[#allocation12 + $0xe10] sm:$0xff] }
 0x510   :  { %8467 = vmatprep.mubr.bf16.mxu1 %v19792_v21  ;;  %8273 = vmatprep.subr.bf16.mxu0 %v15843_v13  ;;  %v15924_v13 = vcombine.low %v2029_v63, %v2037_v1  ;;  %v2132_v63 = vld [vmem:[#allocation12 + $0xe50] sm:$0xff]  ;;  %v2125_v1 = vld [vmem:[#allocation12 + $0xe18] sm:$0xff] }
 0x511   :  { %8437 = vmatprep.subr.bf16.mxu1 %v15845_v19  ;;  %v2060_v19 = vld [vmem:[#allocation12 + $0xc10] sm:$0xff] }
 0x512   :  { %8274 = vmatpush1.bf16.msra.mxu0 %v15842_v55  ;;  %v2069_v55 = vld [vmem:[#allocation12 + $0xc58] sm:$0xff] }
 0x513   :  { %8438 = vmatpush1.bf16.msra.mxu1 %v15844_v58  ;;  %8275 = vmatprep.subr.bf16.mxu0 %v15859_v22  ;;  %v15938_v58 = vcombine.low %v2044_v7, %v2052_v48  ;;  %v15940_v22 = vcombine.low %v2045_v8, %v2053_v9  ;;  %v15957_v24 = vcombine.high %v2061_v52, %v2069_v55  ;;  %v2140_v48 = vld [vmem:[#allocation12 + $0xe90] sm:$0xff]  ;;  %v2141_v9 = vld [vmem:[#allocation12 + $0xe98] sm:$0xff] }
 0x514   :  { %8439 = vmatprep.subr.bf16.mxu1 %v15861_v23  ;;  %v15955_v23 = vcombine.high %v2060_v19, %v2068_v20  ;;  %v2148_v8 = vld [vmem:[#allocation12 + $0xed0] sm:$0xff] }
 0x516   :  { %8276 = vmatpush1.bf16.msra.mxu0 %v15858_v39  ;;  %v2085_v39 = vld [vmem:[#allocation12 + $0xcd8] sm:$0xff] }
 0x517   :  { %8440 = vmatpush1.bf16.msra.mxu1 %v15860_v29  ;;  %8277 = vmatprep.subr.bf16.mxu0 %v15875_v40  ;;  %v15954_v29 = vcombine.low %v2060_v19, %v2068_v20  ;;  %v15956_v40 = vcombine.low %v2061_v52, %v2069_v55  ;;  %v15973_v44 = vcombine.high %v2077_v28, %v2085_v39  ;;  %v2156_v20 = vld [vmem:[#allocation12 + $0xf10] sm:$0xff]  ;;  %v2157_v55 = vld [vmem:[#allocation12 + $0xf18] sm:$0xff] }
 0x518   :  { %8441 = vmatprep.subr.bf16.mxu1 %v15877_v42  ;;  %v15971_v42 = vcombine.high %v2076_v25, %v2084_v27  ;;  %v2164_v52 = vld [vmem:[#allocation12 + $0xf50] sm:$0xff] }
 0x51a   :  { %8278 = vmatpush1.bf16.msra.mxu0 %v15874_v34  ;;  %v2101_v34 = vld [vmem:[#allocation12 + $0xd58] sm:$0xff] }
 0x51b   :  { %8442 = vmatpush1.bf16.msra.mxu1 %v15876_v38  ;;  %8279 = vmatprep.subr.bf16.mxu0 %v15891_v35  ;;  %v15970_v38 = vcombine.low %v2076_v25, %v2084_v27  ;;  %v15972_v35 = vcombine.low %v2077_v28, %v2085_v39  ;;  %v15989_v30 = vcombine.high %v2093_v60, %v2101_v34  ;;  %v2172_v27 = vld [vmem:[#allocation12 + $0xf90] sm:$0xff]  ;;  %v2173_v39 = vld [vmem:[#allocation12 + $0xf98] sm:$0xff] }
 0x51c   :  { %8443 = vmatprep.subr.bf16.mxu1 %v15893_v36  ;;  %v15987_v36 = vcombine.high %v2092_v45, %v2100_v31  ;;  %v2180_v28 = vld [vmem:[#allocation12 + $0xfd0] sm:$0xff] }
 0x51e   :  { %8280 = vmatpush1.bf16.msra.mxu0 %v15890_v47  ;;  %v2117_v47 = vld [vmem:[#allocation12 + $0xdd8] sm:$0xff] }
 0x51f   :  { %8444 = vmatpush1.bf16.msra.mxu1 %v15892_v51  ;;  %8281 = vmatprep.subr.bf16.mxu0 %v15907_v54  ;;  %v15986_v51 = vcombine.low %v2092_v45, %v2100_v31  ;;  %v15988_v54 = vcombine.low %v2093_v60, %v2101_v34  ;;  %v16005_v59 = vcombine.high %v2109_v46, %v2117_v47  ;;  %v2188_v31 = vld [vmem:[#allocation12 + $0x1010] sm:$0xff]  ;;  %v2189_v34 = vld [vmem:[#allocation12 + $0x1018] sm:$0xff] }
 0x520   :  { %8445 = vmatprep.subr.bf16.mxu1 %v15909_v57  ;;  %v16003_v57 = vcombine.high %v2108_v41, %v2116_v43  ;;  %v2196_v60 = vld [vmem:[#allocation12 + $0x1050] sm:$0xff] }
 0x522   :  { %8282 = vmatpush1.bf16.msra.mxu0 %v15906_v2  ;;  %v2133_v2 = vld [vmem:[#allocation12 + $0xe58] sm:$0xff] }
 0x523   :  { %8446 = vmatpush1.bf16.msra.mxu1 %v15908_v33  ;;  %8283 = vmatprep.subr.bf16.mxu0 %v15923_v5  ;;  %v16002_v33 = vcombine.low %v2108_v41, %v2116_v43  ;;  %v16004_v5 = vcombine.low %v2109_v46, %v2117_v47  ;;  %v16021_v7 = vcombine.high %v2125_v1, %v2133_v2  ;;  %v2204_v43 = vld [vmem:[#allocation12 + $0x1090] sm:$0xff] }
 0x524   :  { %8447 = vmatprep.subr.bf16.mxu1 %v15925_v6  ;;  %v16019_v6 = vcombine.high %v2124_v62, %v2132_v63  ;;  %v2212_v46 = vld [vmem:[#allocation12 + $0x10d0] sm:$0xff]  ;;  %v16082_v47 = vcombine.low %v2188_v31, %v2196_v60 }
 0x526   :  { %8284 = vmatpush1.bf16.msra.mxu0 %v15922_v11  ;;  %v2149_v11 = vld [vmem:[#allocation12 + $0xed8] sm:$0xff] }
 0x527   :  { %8448 = vmatpush1.bf16.msra.mxu1 %v15924_v13  ;;  %8285 = vmatprep.subr.bf16.mxu0 %v15939_v14  ;;  %v16018_v13 = vcombine.low %v2124_v62, %v2132_v63  ;;  %v16020_v14 = vcombine.low %v2125_v1, %v2133_v2  ;;  %v16037_v19 = vcombine.high %v2141_v9, %v2149_v11  ;;  %v2220_v62 = vld [vmem:[#allocation12 + $0x1110] sm:$0xff]  ;;  %v2221_v2 = vld [vmem:[#allocation12 + $0x1118] sm:$0xff] }
 0x528   :  { %8449 = vmatprep.subr.bf16.mxu1 %v15941_v15  ;;  %v16035_v15 = vcombine.high %v2140_v48, %v2148_v8  ;;  %v2228_v63 = vld [vmem:[#allocation12 + $0x1150] sm:$0xff] }
 0x52a   :  { %8286 = vmatpush1.bf16.msra.mxu0 %v15938_v58  ;;  %v2165_v58 = vld [vmem:[#allocation12 + $0xf58] sm:$0xff] }
 0x52b   :  { %8450 = vmatpush1.bf16.msra.mxu1 %v15940_v22  ;;  %8287 = vmatprep.subr.bf16.mxu0 %v15955_v23  ;;  %v16034_v22 = vcombine.low %v2140_v48, %v2148_v8  ;;  %v16036_v23 = vcombine.low %v2141_v9, %v2149_v11  ;;  %v16053_v25 = vcombine.high %v2157_v55, %v2165_v58  ;;  %v2236_v8 = vld [vmem:[#allocation12 + $0x1190] sm:$0xff]  ;;  %v2237_v11 = vld [vmem:[#allocation12 + $0x1198] sm:$0xff] }
 0x52c   :  { %8451 = vmatprep.subr.bf16.mxu1 %v15957_v24  ;;  %v16051_v24 = vcombine.high %v2156_v20, %v2164_v52  ;;  %v2244_v9 = vld [vmem:[#allocation12 + $0x11d0] sm:$0xff] }
 0x52e   :  { %8288 = vmatpush1.bf16.msra.mxu0 %v15954_v29  ;;  %v2181_v29 = vld [vmem:[#allocation12 + $0xfd8] sm:$0xff] }
 0x52f   :  { %8452 = vmatpush1.bf16.msra.mxu1 %v15956_v40  ;;  %8289 = vmatprep.subr.bf16.mxu0 %v15971_v42  ;;  %v16050_v40 = vcombine.low %v2156_v20, %v2164_v52  ;;  %v16052_v42 = vcombine.low %v2157_v55, %v2165_v58  ;;  %v16069_v45 = vcombine.high %v2173_v39, %v2181_v29  ;;  %v2252_v52 = vld [vmem:[#allocation12 + $0x1210] sm:$0xff]  ;;  %v2253_v58 = vld [vmem:[#allocation12 + $0x1218] sm:$0xff] }
 0x530   :  { %8453 = vmatprep.subr.bf16.mxu1 %v15973_v44  ;;  %v16067_v44 = vcombine.high %v2172_v27, %v2180_v28  ;;  %v2260_v55 = vld [vmem:[#allocation12 + $0x1250] sm:$0xff] }
 0x532   :  { %8290 = vmatpush1.bf16.msra.mxu0 %v15970_v38  ;;  %v2197_v38 = vld [vmem:[#allocation12 + $0x1058] sm:$0xff] }
 0x533   :  { %8454 = vmatpush1.bf16.msra.mxu1 %v15972_v35  ;;  %8291 = vmatprep.subr.bf16.mxu0 %v15987_v36  ;;  %v16066_v35 = vcombine.low %v2172_v27, %v2180_v28  ;;  %v16068_v36 = vcombine.low %v2173_v39, %v2181_v29  ;;  %v16085_v41 = vcombine.high %v2189_v34, %v2197_v38  ;;  %v2268_v28 = vld [vmem:[#allocation12 + $0x1290] sm:$0xff]  ;;  %v2269_v29 = vld [vmem:[#allocation12 + $0x1298] sm:$0xff] }
 0x534   :  { %8455 = vmatprep.subr.bf16.mxu1 %v15989_v30  ;;  %v16083_v30 = vcombine.high %v2188_v31, %v2196_v60  ;;  %v2276_v39 = vld [vmem:[#allocation12 + $0x12d0] sm:$0xff] }
 0x535   :  { %v2284_v60 = vld [vmem:[#allocation12 + $0x1310] sm:$0xff] }
 0x536   :  { %8292 = vmatpush1.bf16.msra.mxu0 %v15986_v51  ;;  %v2205_v51 = vld [vmem:[#allocation12 + $0x1098] sm:$0xff] }
 0x537   :  { %8456 = vmatpush1.bf16.msra.mxu1 %v15988_v54  ;;  %8293 = vmatprep.subr.bf16.mxu0 %v16003_v57  ;;  %v2213_v54 = vld [vmem:[#allocation12 + $0x10d8] sm:$0xff]  ;;  %v16084_v57 = vcombine.low %v2189_v34, %v2197_v38  ;;  %v2292_v34 = vld [vmem:[#allocation12 + $0x1350] sm:$0xff] }
 0x538   :  { %8457 = vmatprep.subr.bf16.mxu1 %v16005_v59  ;;  %v16099_v59 = vcombine.high %v2204_v43, %v2212_v46  ;;  %v16101_v1 = vcombine.high %v2205_v51, %v2213_v54  ;;  %v2285_v38 = vld [vmem:[#allocation12 + $0x1318] sm:$0xff] }
 0x53a   :  { %8294 = vmatpush1.bf16.msra.mxu0 %v16002_v33  ;;  %v2229_v33 = vld [vmem:[#allocation12 + $0x1158] sm:$0xff] }
 0x53b   :  { %8458 = vmatpush1.bf16.msra.mxu1 %v16004_v5  ;;  %8295 = vmatprep.subr.bf16.mxu0 %v16019_v6  ;;  %v16098_v5 = vcombine.low %v2204_v43, %v2212_v46  ;;  %v16100_v6 = vcombine.low %v2205_v51, %v2213_v54  ;;  %v16117_v48 = vcombine.high %v2221_v2, %v2229_v33  ;;  %v2300_v46 = vld [vmem:[#allocation12 + $0x1390] sm:$0xff]  ;;  %v2301_v51 = vld [vmem:[#allocation12 + $0x1398] sm:$0xff] }
 0x53c   :  { %8459 = vmatprep.subr.bf16.mxu1 %v16021_v7  ;;  %v16115_v7 = vcombine.high %v2220_v62, %v2228_v63  ;;  %v2309_v54 = vld [vmem:[#allocation12 + $0x13d8] sm:$0xff] }
 0x53e   :  { %8296 = vmatpush1.bf16.msra.mxu0 %v16018_v13  ;;  %v2245_v13 = vld [vmem:[#allocation12 + $0x11d8] sm:$0xff] }
 0x53f   :  { %8460 = vmatpush1.bf16.msra.mxu1 %v16020_v14  ;;  %8297 = vmatprep.subr.bf16.mxu0 %v16035_v15  ;;  %v16114_v14 = vcombine.low %v2220_v62, %v2228_v63  ;;  %v16116_v15 = vcombine.low %v2221_v2, %v2229_v33  ;;  %v16133_v20 = vcombine.high %v2237_v11, %v2245_v13  ;;  %v2324_v2 = vld [vmem:[#allocation12 + $0x1450] sm:$0xff]  ;;  %v2317_v33 = vld [vmem:[#allocation12 + $0x1418] sm:$0xff] }
 0x540   :  { %8461 = vmatprep.subr.bf16.mxu1 %v16037_v19  ;;  %v16131_v19 = vcombine.high %v2236_v8, %v2244_v9  ;;  %v16197_v63 = vcombine.high %v2301_v51, %v2309_v54 }
 0x542   :  { %8298 = vmatpush1.bf16.msra.mxu0 %v16034_v22  ;;  %v2261_v22 = vld [vmem:[#allocation12 + $0x1258] sm:$0xff] }
 0x543   :  { %8462 = vmatpush1.bf16.msra.mxu1 %v16036_v23  ;;  %8299 = vmatprep.subr.bf16.mxu0 %v16051_v24  ;;  %v16130_v23 = vcombine.low %v2236_v8, %v2244_v9  ;;  %v16132_v24 = vcombine.low %v2237_v11, %v2245_v13  ;;  %v16149_v27 = vcombine.high %v2253_v58, %v2261_v22  ;;  %v2332_v9 = vld [vmem:[#allocation12 + $0x1490] sm:$0xff]  ;;  %v2333_v13 = vld [vmem:[#allocation12 + $0x1498] sm:$0xff] }
 0x544   :  { %8463 = vmatprep.subr.bf16.mxu1 %v16053_v25  ;;  %v16147_v25 = vcombine.high %v2252_v52, %v2260_v55  ;;  %v2340_v11 = vld [vmem:[#allocation12 + $0x14d0] sm:$0xff] }
 0x546   :  { %8300 = vmatpush1.bf16.msra.mxu0 %v16050_v40  ;;  %v2277_v40 = vld [vmem:[#allocation12 + $0x12d8] sm:$0xff] }
 0x547   :  { %8464 = vmatpush1.bf16.msra.mxu1 %v16052_v42  ;;  %8301 = vmatprep.subr.bf16.mxu0 %v16067_v44  ;;  %v16146_v42 = vcombine.low %v2252_v52, %v2260_v55  ;;  %v16148_v44 = vcombine.low %v2253_v58, %v2261_v22  ;;  %v16165_v31 = vcombine.high %v2269_v29, %v2277_v40  ;;  %v2348_v55 = vld [vmem:[#allocation12 + $0x1510] sm:$0xff]  ;;  %v2349_v22 = vld [vmem:[#allocation12 + $0x1518] sm:$0xff] }
 0x548   :  { %8465 = vmatprep.subr.bf16.mxu1 %v16069_v45  ;;  %v16163_v45 = vcombine.high %v2268_v28, %v2276_v39  ;;  %v2356_v58 = vld [vmem:[#allocation12 + $0x1550] sm:$0xff] }
 0x54a   :  { %8302 = vmatpush1.bf16.msra.mxu0 %v16066_v35  ;;  %v2293_v35 = vld [vmem:[#allocation12 + $0x1358] sm:$0xff] }
 0x54b   :  { %8466 = vmatpush1.bf16.msra.mxu1 %v16068_v36  ;;  %8312 = vmatprep.subr.bf16.mxu0 %v16083_v30  ;;  %v16162_v36 = vcombine.low %v2268_v28, %v2276_v39  ;;  %v16164_v30 = vcombine.low %v2269_v29, %v2277_v40  ;;  %v16181_v43 = vcombine.high %v2285_v38, %v2293_v35  ;;  %v2364_v39 = vld [vmem:[#allocation12 + $0x1590] sm:$0xff]  ;;  %v2365_v40 = vld [vmem:[#allocation12 + $0x1598] sm:$0xff] }
 0x54c   :  { %8476 = vmatprep.subr.bf16.mxu1 %v16085_v41  ;;  %v16179_v41 = vcombine.high %v2284_v60, %v2292_v34  ;;  %v2372_v29 = vld [vmem:[#allocation12 + $0x15d0] sm:$0xff] }
 0x54d   :  { %8304 = vmatmul.mubr.bf16.vlgmr.msra.gmra.mrb[16].mxu0 %v19821_v3 }
 0x54e   :  { %8468 = vmatmul.mubr.bf16.vlgmr.msra.gmra.mrb[16].mxu1 %v19821_v3  ;;  %8313 = vmatpush1.bf16.msra.mxu0 %v16082_v47  ;;  %v2308_v47 = vld [vmem:[#allocation12 + $0x13d0] sm:$0xff] }
 0x54f   :  { %8344 = vmatprep.mubr.bf16.mxu0 %v19823_v56  ;;  %8477 = vmatpush1.bf16.msra.mxu1 %v16084_v57  ;;  %v16178_v57 = vcombine.low %v2284_v60, %v2292_v34  ;;  %v16195_v62 = vcombine.high %v2300_v46, %v2308_v47  ;;  %v2380_v34 = vld [vmem:[#allocation12 + $0x1610] sm:$0xff] }
 0x550   :  { %8508 = vmatprep.mubr.bf16.mxu1 %v19823_v56  ;;  %8314 = vmatprep.subr.bf16.mxu0 %v16099_v59  ;;  %v16180_v59 = vcombine.low %v2285_v38, %v2293_v35  ;;  %v2388_v38 = vld [vmem:[#allocation12 + $0x1650] sm:$0xff]  ;;  %v2381_v35 = vld [vmem:[#allocation12 + $0x1618] sm:$0xff] }
 0x551   :  { %8478 = vmatprep.subr.bf16.mxu1 %v16101_v1  ;;  %v2316_v1 = vld [vmem:[#allocation12 + $0x1410] sm:$0xff] }
 0x552   :  { %8315 = vmatpush1.bf16.msra.mxu0 %v16098_v5  ;;  %v2325_v5 = vld [vmem:[#allocation12 + $0x1458] sm:$0xff] }
 0x553   :  { %8479 = vmatpush1.bf16.msra.mxu1 %v16100_v6  ;;  %8316 = vmatprep.subr.bf16.mxu0 %v16115_v7  ;;  %v16194_v6 = vcombine.low %v2300_v46, %v2308_v47  ;;  %v16196_v7 = vcombine.low %v2301_v51, %v2309_v54  ;;  %v16213_v8 = vcombine.high %v2317_v33, %v2325_v5  ;;  %v2396_v47 = vld [vmem:[#allocation12 + $0x1690] sm:$0xff]  ;;  %v2397_v54 = vld [vmem:[#allocation12 + $0x1698] sm:$0xff] }
 0x554   :  { %8480 = vmatprep.subr.bf16.mxu1 %v16117_v48  ;;  %v16211_v48 = vcombine.high %v2316_v1, %v2324_v2  ;;  %v2404_v51 = vld [vmem:[#allocation12 + $0x16d0] sm:$0xff] }
 0x556   :  { %8317 = vmatpush1.bf16.msra.mxu0 %v16114_v14  ;;  %v2341_v14 = vld [vmem:[#allocation12 + $0x14d8] sm:$0xff] }
 0x557   :  { %8481 = vmatpush1.bf16.msra.mxu1 %v16116_v15  ;;  %8318 = vmatprep.subr.bf16.mxu0 %v16131_v19  ;;  %v16210_v15 = vcombine.low %v2316_v1, %v2324_v2  ;;  %v16212_v19 = vcombine.low %v2317_v33, %v2325_v5  ;;  %v16229_v52 = vcombine.high %v2333_v13, %v2341_v14  ;;  %v2412_v2 = vld [vmem:[#allocation12 + $0x1710] sm:$0xff]  ;;  %v2413_v5 = vld [vmem:[#allocation12 + $0x1718] sm:$0xff] }
 0x558   :  { %8482 = vmatprep.subr.bf16.mxu1 %v16133_v20  ;;  %v16227_v20 = vcombine.high %v2332_v9, %v2340_v11  ;;  %v2420_v33 = vld [vmem:[#allocation12 + $0x1750] sm:$0xff] }
 0x55a   :  { %8319 = vmatpush1.bf16.msra.mxu0 %v16130_v23  ;;  %v2357_v23 = vld [vmem:[#allocation12 + $0x1558] sm:$0xff] }
 0x55b   :  { %8483 = vmatpush1.bf16.msra.mxu1 %v16132_v24  ;;  %8320 = vmatprep.subr.bf16.mxu0 %v16147_v25  ;;  %v16226_v24 = vcombine.low %v2332_v9, %v2340_v11  ;;  %v16228_v25 = vcombine.low %v2333_v13, %v2341_v14  ;;  %v16245_v28 = vcombine.high %v2349_v22, %v2357_v23  ;;  %v2428_v11 = vld [vmem:[#allocation12 + $0x1790] sm:$0xff]  ;;  %v2429_v14 = vld [vmem:[#allocation12 + $0x1798] sm:$0xff] }
 0x55c   :  { %8484 = vmatprep.subr.bf16.mxu1 %v16149_v27  ;;  %v16243_v27 = vcombine.high %v2348_v55, %v2356_v58  ;;  %v2436_v13 = vld [vmem:[#allocation12 + $0x17d0] sm:$0xff] }
 0x55e   :  { %8321 = vmatpush1.bf16.msra.mxu0 %v16146_v42  ;;  %v2373_v42 = vld [vmem:[#allocation12 + $0x15d8] sm:$0xff] }
 0x55f   :  { %8485 = vmatpush1.bf16.msra.mxu1 %v16148_v44  ;;  %8322 = vmatprep.subr.bf16.mxu0 %v16163_v45  ;;  %v16242_v44 = vcombine.low %v2348_v55, %v2356_v58  ;;  %v16244_v45 = vcombine.low %v2349_v22, %v2357_v23  ;;  %v16261_v60 = vcombine.high %v2365_v40, %v2373_v42  ;;  %v2444_v58 = vld [vmem:[#allocation12 + $0x1810] sm:$0xff]  ;;  %v2445_v23 = vld [vmem:[#allocation12 + $0x1818] sm:$0xff] }
 0x560   :  { %8486 = vmatprep.subr.bf16.mxu1 %v16165_v31  ;;  %v16259_v31 = vcombine.high %v2364_v39, %v2372_v29  ;;  %v2452_v22 = vld [vmem:[#allocation12 + $0x1850] sm:$0xff] }
 0x562   :  { %8323 = vmatpush1.bf16.msra.mxu0 %v16162_v36  ;;  %v2389_v36 = vld [vmem:[#allocation12 + $0x1658] sm:$0xff] }
 0x563   :  { %8487 = vmatpush1.bf16.msra.mxu1 %v16164_v30  ;;  %8324 = vmatprep.subr.bf16.mxu0 %v16179_v41  ;;  %v16258_v30 = vcombine.low %v2364_v39, %v2372_v29  ;;  %v16260_v41 = vcombine.low %v2365_v40, %v2373_v42  ;;  %v16277_v46 = vcombine.high %v2381_v35, %v2389_v36  ;;  %v2460_v29 = vld [vmem:[#allocation12 + $0x1890] sm:$0xff] }
 0x564   :  { %8488 = vmatprep.subr.bf16.mxu1 %v16181_v43  ;;  %v16275_v43 = vcombine.high %v2380_v34, %v2388_v38  ;;  %v2468_v40 = vld [vmem:[#allocation12 + $0x18d0] sm:$0xff]  ;;  %v16338_v42 = vcombine.low %v2444_v58, %v2452_v22 }
 0x566   :  { %8325 = vmatpush1.bf16.msra.mxu0 %v16178_v57  ;;  %v2405_v57 = vld [vmem:[#allocation12 + $0x16d8] sm:$0xff] }
 0x567   :  { %8489 = vmatpush1.bf16.msra.mxu1 %v16180_v59  ;;  %8326 = vmatprep.subr.bf16.mxu0 %v16195_v62  ;;  %v16274_v59 = vcombine.low %v2380_v34, %v2388_v38  ;;  %v16276_v62 = vcombine.low %v2381_v35, %v2389_v36  ;;  %v16293_v1 = vcombine.high %v2397_v54, %v2405_v57  ;;  %v2476_v34 = vld [vmem:[#allocation12 + $0x1910] sm:$0xff]  ;;  %v2477_v36 = vld [vmem:[#allocation12 + $0x1918] sm:$0xff] }
 0x568   :  { %8490 = vmatprep.subr.bf16.mxu1 %v16197_v63  ;;  %v16291_v63 = vcombine.high %v2396_v47, %v2404_v51  ;;  %v2484_v38 = vld [vmem:[#allocation12 + $0x1950] sm:$0xff] }
 0x56a   :  { %8327 = vmatpush1.bf16.msra.mxu0 %v16194_v6  ;;  %v2421_v6 = vld [vmem:[#allocation12 + $0x1758] sm:$0xff] }
 0x56b   :  { %8491 = vmatpush1.bf16.msra.mxu1 %v16196_v7  ;;  %8328 = vmatprep.subr.bf16.mxu0 %v16211_v48  ;;  %v16290_v7 = vcombine.low %v2396_v47, %v2404_v51  ;;  %v16292_v48 = vcombine.low %v2397_v54, %v2405_v57  ;;  %v16309_v9 = vcombine.high %v2413_v5, %v2421_v6  ;;  %v2492_v51 = vld [vmem:[#allocation12 + $0x1990] sm:$0xff]  ;;  %v2493_v57 = vld [vmem:[#allocation12 + $0x1998] sm:$0xff] }
 0x56c   :  { %8492 = vmatprep.subr.bf16.mxu1 %v16213_v8  ;;  %v16307_v8 = vcombine.high %v2412_v2, %v2420_v33  ;;  %v2500_v54 = vld [vmem:[#allocation12 + $0x19d0] sm:$0xff] }
 0x56e   :  { %8329 = vmatpush1.bf16.msra.mxu0 %v16210_v15  ;;  %v2437_v15 = vld [vmem:[#allocation12 + $0x17d8] sm:$0xff] }
 0x56f   :  { %8493 = vmatpush1.bf16.msra.mxu1 %v16212_v19  ;;  %8330 = vmatprep.subr.bf16.mxu0 %v16227_v20  ;;  %v16306_v19 = vcombine.low %v2412_v2, %v2420_v33  ;;  %v16308_v20 = vcombine.low %v2413_v5, %v2421_v6  ;;  %v16325_v55 = vcombine.high %v2429_v14, %v2437_v15  ;;  %v2508_v33 = vld [vmem:[#allocation12 + $0x1a10] sm:$0xff]  ;;  %v2509_v6 = vld [vmem:[#allocation12 + $0x1a18] sm:$0xff] }
 0x570   :  { %8494 = vmatprep.subr.bf16.mxu1 %v16229_v52  ;;  %v16323_v52 = vcombine.high %v2428_v11, %v2436_v13  ;;  %v2516_v5 = vld [vmem:[#allocation12 + $0x1a50] sm:$0xff] }
 0x572   :  { %8331 = vmatpush1.bf16.msra.mxu0 %v16226_v24  ;;  %v2453_v24 = vld [vmem:[#allocation12 + $0x1858] sm:$0xff] }
 0x573   :  { %8495 = vmatpush1.bf16.msra.mxu1 %v16228_v25  ;;  %8332 = vmatprep.subr.bf16.mxu0 %v16243_v27  ;;  %v16322_v25 = vcombine.low %v2428_v11, %v2436_v13  ;;  %v16324_v27 = vcombine.low %v2429_v14, %v2437_v15  ;;  %v16341_v39 = vcombine.high %v2445_v23, %v2453_v24  ;;  %v2524_v13 = vld [vmem:[#allocation12 + $0x1a90] sm:$0xff]  ;;  %v2525_v15 = vld [vmem:[#allocation12 + $0x1a98] sm:$0xff] }
 0x574   :  { %8496 = vmatprep.subr.bf16.mxu1 %v16245_v28  ;;  %v16339_v28 = vcombine.high %v2444_v58, %v2452_v22  ;;  %v2532_v14 = vld [vmem:[#allocation12 + $0x1ad0] sm:$0xff] }
 0x575   :  { %v2540_v22 = vld [vmem:[#allocation12 + $0x1b10] sm:$0xff] }
 0x576   :  { %8333 = vmatpush1.bf16.msra.mxu0 %v16242_v44  ;;  %v2461_v44 = vld [vmem:[#allocation12 + $0x1898] sm:$0xff] }
 0x577   :  { %8497 = vmatpush1.bf16.msra.mxu1 %v16244_v45  ;;  %8334 = vmatprep.subr.bf16.mxu0 %v16259_v31  ;;  %v2469_v45 = vld [vmem:[#allocation12 + $0x18d8] sm:$0xff]  ;;  %v16340_v31 = vcombine.low %v2445_v23, %v2453_v24  ;;  %v2548_v23 = vld [vmem:[#allocation12 + $0x1b50] sm:$0xff] }
 0x578   :  { %8498 = vmatprep.subr.bf16.mxu1 %v16261_v60  ;;  %v16355_v60 = vcombine.high %v2460_v29, %v2468_v40  ;;  %v16357_v35 = vcombine.high %v2461_v44, %v2469_v45  ;;  %v2541_v24 = vld [vmem:[#allocation12 + $0x1b18] sm:$0xff] }
 0x57a   :  { %8335 = vmatpush1.bf16.msra.mxu0 %v16258_v30  ;;  %v2485_v30 = vld [vmem:[#allocation12 + $0x1958] sm:$0xff] }
 0x57b   :  { %8499 = vmatpush1.bf16.msra.mxu1 %v16260_v41  ;;  %8336 = vmatprep.subr.bf16.mxu0 %v16275_v43  ;;  %v16354_v41 = vcombine.low %v2460_v29, %v2468_v40  ;;  %v16356_v43 = vcombine.low %v2461_v44, %v2469_v45  ;;  %v16373_v47 = vcombine.high %v2477_v36, %v2485_v30  ;;  %v2564_v44 = vld [vmem:[#allocation12 + $0x1bd0] sm:$0xff] }
 0x57c   :  { %8500 = vmatprep.subr.bf16.mxu1 %v16277_v46  ;;  %v16371_v46 = vcombine.high %v2476_v34, %v2484_v38 }
 0x57e   :  { %8337 = vmatpush1.bf16.msra.mxu0 %v16274_v59  ;;  %v2501_v59 = vld [vmem:[#allocation12 + $0x19d8] sm:$0xff] }
 0x57f   :  { %8501 = vmatpush1.bf16.msra.mxu1 %v16276_v62  ;;  %8338 = vmatprep.subr.bf16.mxu0 %v16291_v63  ;;  %v16370_v62 = vcombine.low %v2476_v34, %v2484_v38  ;;  %v16372_v63 = vcombine.low %v2477_v36, %v2485_v30  ;;  %v16389_v2 = vcombine.high %v2493_v57, %v2501_v59  ;;  %v2565_v34 = vld [vmem:[#allocation12 + $0x1bd8] sm:$0xff] }
 0x580   :  { %8502 = vmatprep.subr.bf16.mxu1 %v16293_v1  ;;  %v16387_v1 = vcombine.high %v2492_v51, %v2500_v54  ;;  %v16434_v36 = vcombine.low %v2540_v22, %v2548_v23 }
 0x582   :  { %8339 = vmatpush1.bf16.msra.mxu0 %v16290_v7  ;;  %v2517_v7 = vld [vmem:[#allocation12 + $0x1a58] sm:$0xff] }
 0x583   :  { %8503 = vmatpush1.bf16.msra.mxu1 %v16292_v48  ;;  %8340 = vmatprep.subr.bf16.mxu0 %v16307_v8  ;;  %v16386_v48 = vcombine.low %v2492_v51, %v2500_v54  ;;  %v16388_v8 = vcombine.low %v2493_v57, %v2501_v59  ;;  %v16405_v11 = vcombine.high %v2509_v6, %v2517_v7  ;;  %v2572_v54 = vld [vmem:[#allocation12 + $0x1c10] sm:$0xff]  ;;  %v2573_v59 = vld [vmem:[#allocation12 + $0x1c18] sm:$0xff] }
 0x584   :  { %8504 = vmatprep.subr.bf16.mxu1 %v16309_v9  ;;  %v16403_v9 = vcombine.high %v2508_v33, %v2516_v5  ;;  %v2580_v57 = vld [vmem:[#allocation12 + $0x1c50] sm:$0xff] }
 0x586   :  { %8341 = vmatpush1.bf16.msra.mxu0 %v16306_v19  ;;  %v2533_v19 = vld [vmem:[#allocation12 + $0x1ad8] sm:$0xff] }
 0x587   :  { %8505 = vmatpush1.bf16.msra.mxu1 %v16308_v20  ;;  %8342 = vmatprep.subr.bf16.mxu0 %v16323_v52  ;;  %v16402_v20 = vcombine.low %v2508_v33, %v2516_v5  ;;  %v16404_v52 = vcombine.low %v2509_v6, %v2517_v7  ;;  %v16421_v58 = vcombine.high %v2525_v15, %v2533_v19  ;;  %v2588_v5 = vld [vmem:[#allocation12 + $0x1c90] sm:$0xff]  ;;  %v2589_v7 = vld [vmem:[#allocation12 + $0x1c98] sm:$0xff] }
 0x588   :  { %8506 = vmatprep.subr.bf16.mxu1 %v16325_v55  ;;  %v16419_v55 = vcombine.high %v2524_v13, %v2532_v14  ;;  %v2596_v6 = vld [vmem:[#allocation12 + $0x1cd0] sm:$0xff] }
 0x58a   :  { %8343 = vmatpush1.bf16.msra.mxu0 %v16322_v25  ;;  %v2549_v25 = vld [vmem:[#allocation12 + $0x1b58] sm:$0xff] }
 0x58b   :  { %8507 = vmatpush1.bf16.msra.mxu1 %v16324_v27  ;;  %8353 = vmatprep.subr.bf16.mxu0 %v16339_v28  ;;  %v16418_v27 = vcombine.low %v2524_v13, %v2532_v14  ;;  %v16420_v28 = vcombine.low %v2525_v15, %v2533_v19  ;;  %v16437_v40 = vcombine.high %v2541_v24, %v2549_v25  ;;  %v2604_v14 = vld [vmem:[#allocation12 + $0x1d10] sm:$0xff]  ;;  %v2605_v19 = vld [vmem:[#allocation12 + $0x1d18] sm:$0xff] }
 0x58c   :  { %8517 = vmatprep.subr.bf16.mxu1 %v16341_v39  ;;  %v16435_v39 = vcombine.high %v2540_v22, %v2548_v23  ;;  %v2612_v15 = vld [vmem:[#allocation12 + $0x1d50] sm:$0xff] }
 0x58d   :  { %8345 = vmatmul.mubr.bf16.vlgmr.msra.gmra.mrb[16].mxu0 %v19841_v32  ;;  %v2620_v23 = vld [vmem:[#allocation12 + $0x1d90] sm:$0xff] }
 0x58e   :  { %8509 = vmatmul.mubr.bf16.vlgmr.msra.gmra.mrb[16].mxu1 %v19841_v32  ;;  %8354 = vmatpush1.bf16.msra.mxu0 %v16338_v42  ;;  %v2556_v42 = vld [vmem:[#allocation12 + $0x1b90] sm:$0xff] }
 0x58f   :  { %8385 = vmatprep.mubr.bf16.mxu0 %v19843_v37  ;;  %8518 = vmatpush1.bf16.msra.mxu1 %v16340_v31 }
 0x590   :  { %8549 = vmatprep.mubr.bf16.mxu1 %v19843_v37  ;;  %8355 = vmatprep.subr.bf16.mxu0 %v16355_v60  ;;  %v2557_v60 = vld [vmem:[#allocation12 + $0x1b98] sm:$0xff] }
 0x591   :  { %8519 = vmatprep.subr.bf16.mxu1 %v16357_v35  ;;  %v16453_v51 = vcombine.high %v2557_v60, %v2565_v34 }
 0x592   :  { %8356 = vmatpush1.bf16.msra.mxu0 %v16354_v41 }
 0x593   :  { %8520 = vmatpush1.bf16.msra.mxu1 %v16356_v43  ;;  %8357 = vmatprep.subr.bf16.mxu0 %v16371_v46  ;;  %v16436_v43 = vcombine.low %v2541_v24, %v2549_v25  ;;  %v16451_v46 = vcombine.high %v2556_v42, %v2564_v44  ;;  %v2628_v24 = vld [vmem:[#allocation12 + $0x1dd0] sm:$0xff]  ;;  %v2621_v25 = vld [vmem:[#allocation12 + $0x1d98] sm:$0xff] }
 0x594   :  { %8521 = vmatprep.subr.bf16.mxu1 %v16373_v47 }
 0x596   :  { %8358 = vmatpush1.bf16.msra.mxu0 %v16370_v62  ;;  %v2581_v62 = vld [vmem:[#allocation12 + $0x1c58] sm:$0xff] }
 0x597   :  { %8522 = vmatpush1.bf16.msra.mxu1 %v16372_v63  ;;  %8359 = vmatprep.subr.bf16.mxu0 %v16387_v1  ;;  %v16450_v63 = vcombine.low %v2556_v42, %v2564_v44  ;;  %v16452_v1 = vcombine.low %v2557_v60, %v2565_v34  ;;  %v16469_v33 = vcombine.high %v2573_v59, %v2581_v62  ;;  %v2636_v44 = vld [vmem:[#allocation12 + $0x1e10] sm:$0xff]  ;;  %v2637_v34 = vld [vmem:[#allocation12 + $0x1e18] sm:$0xff] }
 0x598   :  { %8523 = vmatprep.subr.bf16.mxu1 %v16389_v2  ;;  %v16467_v2 = vcombine.high %v2572_v54, %v2580_v57  ;;  %v2644_v60 = vld [vmem:[#allocation12 + $0x1e50] sm:$0xff] }
 0x59a   :  { %8360 = vmatpush1.bf16.msra.mxu0 %v16386_v48  ;;  %v2597_v48 = vld [vmem:[#allocation12 + $0x1cd8] sm:$0xff] }
 0x59b   :  { %8524 = vmatpush1.bf16.msra.mxu1 %v16388_v8  ;;  %8361 = vmatprep.subr.bf16.mxu0 %v16403_v9  ;;  %v16466_v8 = vcombine.low %v2572_v54, %v2580_v57  ;;  %v16468_v9 = vcombine.low %v2573_v59, %v2581_v62  ;;  %v16485_v13 = vcombine.high %v2589_v7, %v2597_v48  ;;  %v2661_v54 = vld [vmem:[#allocation12 + $0x1ed8] sm:$0xff] }
 0x59c   :  { %8525 = vmatprep.subr.bf16.mxu1 %v16405_v11  ;;  %v16483_v11 = vcombine.high %v2588_v5, %v2596_v6  ;;  %v16530_v57 = vcombine.low %v2636_v44, %v2644_v60 }
 0x59e   :  { %8362 = vmatpush1.bf16.msra.mxu0 %v16402_v20  ;;  %v2613_v20 = vld [vmem:[#allocation12 + $0x1d58] sm:$0xff] }
 0x59f   :  { %8526 = vmatpush1.bf16.msra.mxu1 %v16404_v52  ;;  %8363 = vmatprep.subr.bf16.mxu0 %v16419_v55  ;;  %v16482_v52 = vcombine.low %v2588_v5, %v2596_v6  ;;  %v16484_v55 = vcombine.low %v2589_v7, %v2597_v48  ;;  %v16501_v22 = vcombine.high %v2605_v19, %v2613_v20  ;;  %v2677_v5 = vld [vmem:[#allocation12 + $0x1f58] sm:$0xff] }
 0x5a0   :  { %v19872_v29 = vpop.f32.mrb[12].mxu0  ;;  %8527 = vmatprep.subr.bf16.mxu1 %v16421_v58  ;;  %v16499_v58 = vcombine.high %v2604_v14, %v2612_v15 }
 0x5a1   :  { %v19874_v45 = vpop.f32.mrb[12].mxu1  ;;  %v19876_v31 = vpop.f32.mrb[13].mxu0 }
 0x5a2   :  { %v19878_v38 = vpop.f32.mrb[13].mxu1  ;;  %v8063_v35 = vpop.f32.mrb[14].mxu0  ;;  %8364 = vmatpush1.bf16.msra.mxu0 %v16418_v27  ;;  %v2629_v27 = vld [vmem:[#allocation12 + $0x1dd8] sm:$0xff] }
 0x5a3   :  { %v8227_v30 = vpop.f32.mrb[14].mxu1  ;;  %8528 = vmatpush1.bf16.msra.mxu1 %v16420_v28  ;;  %v8064_v41 = vpop.f32.mrb[15].mxu0  ;;  %8365 = vmatprep.subr.bf16.mxu0 %v16435_v39  ;;  %v16498_v28 = vcombine.low %v2604_v14, %v2612_v15  ;;  %v16500_v39 = vcombine.low %v2605_v19, %v2613_v20  ;;  %v16517_v42 = vcombine.high %v2621_v25, %v2629_v27  ;;  %v2645_v35 = vld [vmem:[#allocation12 + $0x1e58] sm:$0xff] }
 0x5a4   :  { %v8228_v47 = vpop.f32.mrb[15].mxu1  ;;  %8529 = vmatprep.subr.bf16.mxu1 %v16437_v40  ;;  %v16515_v40 = vcombine.high %v2620_v23, %v2628_v24  ;;  %v16516_v30 = vcombine.low %v2621_v25, %v2629_v27  ;;  %v16531_v41 = vcombine.high %v2636_v44, %v2644_v60  ;;  %v16532_v59 = vcombine.low %v2637_v34, %v2645_v35  ;;  %v2693_v14 = vld [vmem:[#allocation12 + $0x1fd8] sm:$0xff]  ;;  %v1695_v44 = vld [vmem:[#allocation12 + $0xa8] sm:$0xff] }
 0x5a5   :  { %v2660_v47 = vld [vmem:[#allocation12 + $0x1ed0] sm:$0xff]  ;;  %v1703_v60 = vld [vmem:[#allocation12 + $0xe8] sm:$0xff] }
 0x5a6   :  { %8366 = vmatpush1.bf16.msra.mxu0 %v16434_v36  ;;  %v16514_v36 = vcombine.low %v2620_v23, %v2628_v24  ;;  %v1687_v23 = vld [vmem:[#allocation12 + $0x68] sm:$0xff] }
 0x5a7   :  { %8530 = vmatpush1.bf16.msra.mxu1 %v16436_v43  ;;  %8367 = vmatprep.subr.bf16.mxu0 %v16451_v46  ;;  %v16533_v43 = vcombine.high %v2637_v34, %v2645_v35  ;;  %v2652_v46 = vld [vmem:[#allocation12 + $0x1e90] sm:$0xff] }
 0x5a8   :  { %8531 = vmatprep.subr.bf16.mxu1 %v16453_v51  ;;  %v2653_v51 = vld [vmem:[#allocation12 + $0x1e98] sm:$0xff]  ;;  %v16547_v62 = vcombine.high %v2652_v46, %v2660_v47  ;;  %v16546_v6 = vcombine.low %v2652_v46, %v2660_v47  ;;  %v1719_v46 = vld [vmem:[#allocation12 + $0x168] sm:$0xff] }
 0x5a9   :  { %v16548_v7 = vcombine.low %v2653_v51, %v2661_v54 }
 0x5aa   :  { %8368 = vmatpush1.bf16.msra.mxu0 %v16450_v63  ;;  %v16549_v63 = vcombine.high %v2653_v51, %v2661_v54  ;;  %v15592_v51 = vcombine.low %v1695_v44, %v1703_v60 }
 0x5ab   :  { %8532 = vmatpush1.bf16.msra.mxu1 %v16452_v1  ;;  %8369 = vmatprep.subr.bf16.mxu0 %v16467_v2  ;;  %v2668_v1 = vld [vmem:[#allocation12 + $0x1f10] sm:$0xff] }
 0x5ac   :  { %8533 = vmatprep.subr.bf16.mxu1 %v16469_v33  ;;  %v2676_v2 = vld [vmem:[#allocation12 + $0x1f50] sm:$0xff]  ;;  %v2669_v33 = vld [vmem:[#allocation12 + $0x1f18] sm:$0xff] }
 0x5ad   :  { %v16563_v48 = vcombine.high %v2668_v1, %v2676_v2  ;;  %v16562_v15 = vcombine.low %v2668_v1, %v2676_v2  ;;  %v16564_v19 = vcombine.low %v2669_v33, %v2677_v5  ;;  %v1735_v1 = vld [vmem:[#allocation12 + $0x1e8] sm:$0xff] }
 0x5ae   :  { %8370 = vmatpush1.bf16.msra.mxu0 %v16466_v8  ;;  %v16565_v8 = vcombine.high %v2669_v33, %v2677_v5 }
 0x5af   :  { %8534 = vmatpush1.bf16.msra.mxu1 %v16468_v9  ;;  %8371 = vmatprep.subr.bf16.mxu0 %v16483_v11  ;;  %v2684_v9 = vld [vmem:[#allocation12 + $0x1f90] sm:$0xff] }
 0x5b0   :  { %8535 = vmatprep.subr.bf16.mxu1 %v16485_v13  ;;  %v2692_v11 = vld [vmem:[#allocation12 + $0x1fd0] sm:$0xff]  ;;  %v2685_v13 = vld [vmem:[#allocation12 + $0x1f98] sm:$0xff] }
 0x5b1   :  { %v16579_v20 = vcombine.high %v2684_v9, %v2692_v11  ;;  %v16578_v24 = vcombine.low %v2684_v9, %v2692_v11  ;;  %v16580_v25 = vcombine.low %v2685_v13, %v2693_v14  ;;  %v1751_v9 = vld [vmem:[#allocation12 + $0x268] sm:$0xff] }
 0x5b2   :  { %8372 = vmatpush1.bf16.msra.mxu0 %v16482_v52  ;;  %v16581_v52 = vcombine.high %v2685_v13, %v2693_v14 }
 0x5b3   :  { %8536 = vmatpush1.bf16.msra.mxu1 %v16484_v55  ;;  %8373 = vmatprep.subr.bf16.mxu0 %v16499_v58  ;;  %v1678_v55 = vld [vmem:[#allocation12 + $0x20] sm:$0xff] }
 0x5b4   :  { %8537 = vmatprep.subr.bf16.mxu1 %v16501_v22  ;;  %v1686_v58 = vld [vmem:[#allocation12 + $0x60] sm:$0xff]  ;;  %v1679_v22 = vld [vmem:[#allocation12 + $0x28] sm:$0xff] }
 0x5b5   :  { %v15575_v27 = vcombine.high %v1678_v55, %v1686_v58  ;;  %v15576_v34 = vcombine.low %v1679_v22, %v1687_v23 }
 0x5b6   :  { %8374 = vmatpush1.bf16.msra.mxu0 %v16498_v28  ;;  %v15577_v28 = vcombine.high %v1679_v22, %v1687_v23 }
 0x5b7   :  { %8538 = vmatpush1.bf16.msra.mxu1 %v16500_v39  ;;  %8375 = vmatprep.subr.bf16.mxu0 %v16515_v40  ;;  %v1694_v39 = vld [vmem:[#allocation12 + $0xa0] sm:$0xff] }
 0x5b8   :  { %8539 = vmatprep.subr.bf16.mxu1 %v16517_v42  ;;  %v1702_v40 = vld [vmem:[#allocation12 + $0xe0] sm:$0xff]  ;;  %v15574_v42 = vcombine.low %v1678_v55, %v1686_v58  ;;  %v1767_v55 = vld [vmem:[#allocation12 + $0x2e8] sm:$0xff] }
 0x5b9   :  { %v15591_v35 = vcombine.high %v1694_v39, %v1702_v40  ;;  %v15590_v47 = vcombine.low %v1694_v39, %v1702_v40  ;;  %v1783_v39 = vld [vmem:[#allocation12 + $0x368] sm:$0xff] }
 0x5ba   :  { %8376 = vmatpush1.bf16.msra.mxu0 %v16514_v36  ;;  %v1710_v36 = vld [vmem:[#allocation12 + $0x120] sm:$0xff] }
 0x5bb   :  { %8540 = vmatpush1.bf16.msra.mxu1 %v16516_v30  ;;  %8377 = vmatprep.subr.bf16.mxu0 %v16531_v41  ;;  %v1718_v30 = vld [vmem:[#allocation12 + $0x160] sm:$0xff]  ;;  %v15593_v41 = vcombine.high %v1695_v44, %v1703_v60 }
 0x5bc   :  { %8541 = vmatprep.subr.bf16.mxu1 %v16533_v43  ;;  %v1711_v43 = vld [vmem:[#allocation12 + $0x128] sm:$0xff]  ;;  %v15607_v54 = vcombine.high %v1710_v36, %v1718_v30  ;;  %v15606_v2 = vcombine.low %v1710_v36, %v1718_v30 }
 0x5bd   :  { %v15608_v33 = vcombine.low %v1711_v43, %v1719_v46  ;;  %v1791_v36 = vld [vmem:[#allocation12 + $0x3a8] sm:$0xff] }
 0x5be   :  { %8378 = vmatpush1.bf16.msra.mxu0 %v16530_v57  ;;  %v15609_v57 = vcombine.high %v1711_v43, %v1719_v46  ;;  %v1799_v30 = vld [vmem:[#allocation12 + $0x3e8] sm:$0xff] }
 0x5bf   :  { %8542 = vmatpush1.bf16.msra.mxu1 %v16532_v59  ;;  %8379 = vmatprep.subr.bf16.mxu0 %v16547_v62  ;;  %v1726_v59 = vld [vmem:[#allocation12 + $0x1a0] sm:$0xff] }
 0x5c0   :  { %8543 = vmatprep.subr.bf16.mxu1 %v16549_v63  ;;  %v1734_v62 = vld [vmem:[#allocation12 + $0x1e0] sm:$0xff]  ;;  %v1727_v63 = vld [vmem:[#allocation12 + $0x1a8] sm:$0xff] }
 0x5c1   :  { %v15623_v5 = vcombine.high %v1726_v59, %v1734_v62  ;;  %v15622_v11 = vcombine.low %v1726_v59, %v1734_v62  ;;  %v15624_v13 = vcombine.low %v1727_v63, %v1735_v1  ;;  %v1815_v59 = vld [vmem:[#allocation12 + $0x468] sm:$0xff] }
 0x5c2   :  { %8380 = vmatpush1.bf16.msra.mxu0 %v16546_v6  ;;  %v15625_v6 = vcombine.high %v1727_v63, %v1735_v1  ;;  %v15688_v63 = vcombine.low %v1791_v36, %v1799_v30 }
 0x5c3   :  { %8544 = vmatpush1.bf16.msra.mxu1 %v16548_v7  ;;  %8381 = vmatprep.subr.bf16.mxu0 %v16563_v48  ;;  %v1742_v7 = vld [vmem:[#allocation12 + $0x220] sm:$0xff] }
 0x5c4   :  { %8545 = vmatprep.subr.bf16.mxu1 %v16565_v8  ;;  %v1750_v48 = vld [vmem:[#allocation12 + $0x260] sm:$0xff]  ;;  %v1743_v8 = vld [vmem:[#allocation12 + $0x228] sm:$0xff] }
 0x5c5   :  { %v15639_v14 = vcombine.high %v1742_v7, %v1750_v48  ;;  %v15638_v58 = vcombine.low %v1742_v7, %v1750_v48  ;;  %v15640_v22 = vcombine.low %v1743_v8, %v1751_v9  ;;  %v1831_v7 = vld [vmem:[#allocation12 + $0x4e8] sm:$0xff] }
 0x5c6   :  { %8382 = vmatpush1.bf16.msra.mxu0 %v16562_v15  ;;  %v15641_v15 = vcombine.high %v1743_v8, %v1751_v9 }
 0x5c7   :  { %8546 = vmatpush1.bf16.msra.mxu1 %v16564_v19  ;;  %8383 = vmatprep.subr.bf16.mxu0 %v16579_v20  ;;  %v1758_v19 = vld [vmem:[#allocation12 + $0x2a0] sm:$0xff] }
 0x5c8   :  { %8547 = vmatprep.subr.bf16.mxu1 %v16581_v52  ;;  %v1766_v20 = vld [vmem:[#allocation12 + $0x2e0] sm:$0xff]  ;;  %v1759_v52 = vld [vmem:[#allocation12 + $0x2a8] sm:$0xff] }
 0x5c9   :  { %v15655_v23 = vcombine.high %v1758_v19, %v1766_v20  ;;  %v15654_v40 = vcombine.low %v1758_v19, %v1766_v20  ;;  %v1847_v19 = vld [vmem:[#allocation12 + $0x568] sm:$0xff] }
 0x5ca   :  { %8384 = vmatpush1.bf16.msra.mxu0 %v16578_v24  ;;  %v15657_v24 = vcombine.high %v1759_v52, %v1767_v55 }
 0x5cb   :  { %8548 = vmatpush1.bf16.msra.mxu1 %v16580_v25  ;;  %8558 = vmatprep.subr.bf16.mxu0 %v15575_v27  ;;  %v1774_v25 = vld [vmem:[#allocation12 + $0x320] sm:$0xff] }
 0x5cc   :  { %8722 = vmatprep.subr.bf16.mxu1 %v15577_v28  ;;  %v1782_v27 = vld [vmem:[#allocation12 + $0x360] sm:$0xff]  ;;  %v1775_v28 = vld [vmem:[#allocation12 + $0x328] sm:$0xff] }
 0x5cd   :  { %8386 = vmatmul.mubr.bf16.vlgmr.msra.gmra.mrb[16].mxu0 %v19854_v26  ;;  %v15671_v44 = vcombine.high %v1774_v25, %v1782_v27  ;;  %v15673_v60 = vcombine.high %v1775_v28, %v1783_v39  ;;  %v15672_v43 = vcombine.low %v1775_v28, %v1783_v39 }
 0x5ce   :  { %8550 = vmatmul.mubr.bf16.vlgmr.msra.gmra.mrb[16].mxu1 %v19854_v26  ;;  %8559 = vmatpush1.bf16.msra.mxu0 %v15574_v42  ;;  %v15656_v42 = vcombine.low %v1759_v52, %v1767_v55 }
 0x5cf   :  { %8590 = vmatprep.mubr.bf16.mxu0 %v19786_v16  ;;  %8723 = vmatpush1.bf16.msra.mxu1 %v15576_v34  ;;  %v1790_v34 = vld [vmem:[#allocation12 + $0x3a0] sm:$0xff] }
 0x5d0   :  { %8754 = vmatprep.mubr.bf16.mxu1 %v19786_v16  ;;  %8560 = vmatprep.subr.bf16.mxu0 %v15591_v35  ;;  %v1798_v35 = vld [vmem:[#allocation12 + $0x3e0] sm:$0xff] }
 0x5d1   :  { %8724 = vmatprep.subr.bf16.mxu1 %v15593_v41  ;;  %v15670_v41 = vcombine.low %v1774_v25, %v1782_v27  ;;  %v15687_v46 = vcombine.high %v1790_v34, %v1798_v35  ;;  %v15686_v62 = vcombine.low %v1790_v34, %v1798_v35  ;;  %v1863_v25 = vld [vmem:[#allocation12 + $0x5e8] sm:$0xff] }
 0x5d2   :  { %8561 = vmatpush1.bf16.msra.mxu0 %v15590_v47  ;;  %v15689_v47 = vcombine.high %v1791_v36, %v1799_v30  ;;  %v1879_v34 = vld [vmem:[#allocation12 + $0x668] sm:$0xff] }
 0x5d3   :  { %8725 = vmatpush1.bf16.msra.mxu1 %v15592_v51  ;;  %8562 = vmatprep.subr.bf16.mxu0 %v15607_v54  ;;  %v1806_v51 = vld [vmem:[#allocation12 + $0x420] sm:$0xff] }
 0x5d4   :  { %8726 = vmatprep.subr.bf16.mxu1 %v15609_v57  ;;  %v1814_v54 = vld [vmem:[#allocation12 + $0x460] sm:$0xff]  ;;  %v1807_v57 = vld [vmem:[#allocation12 + $0x428] sm:$0xff] }
 0x5d5   :  { %v15703_v1 = vcombine.high %v1806_v51, %v1814_v54  ;;  %v15702_v48 = vcombine.low %v1806_v51, %v1814_v54  ;;  %v15704_v8 = vcombine.low %v1807_v57, %v1815_v59  ;;  %v1895_v51 = vld [vmem:[#allocation12 + $0x6e8] sm:$0xff] }
 0x5d6   :  { %8563 = vmatpush1.bf16.msra.mxu0 %v15606_v2  ;;  %v15705_v2 = vcombine.high %v1807_v57, %v1815_v59 }
 0x5d7   :  { %8727 = vmatpush1.bf16.msra.mxu1 %v15608_v33  ;;  %8564 = vmatprep.subr.bf16.mxu0 %v15623_v5  ;;  %v1822_v33 = vld [vmem:[#allocation12 + $0x4a0] sm:$0xff] }
 0x5d8   :  { %8728 = vmatprep.subr.bf16.mxu1 %v15625_v6  ;;  %v1830_v5 = vld [vmem:[#allocation12 + $0x4e0] sm:$0xff]  ;;  %v1823_v6 = vld [vmem:[#allocation12 + $0x4a8] sm:$0xff] }
 0x5d9   :  { %v15719_v9 = vcombine.high %v1822_v33, %v1830_v5  ;;  %v15718_v20 = vcombine.low %v1822_v33, %v1830_v5  ;;  %v15720_v52 = vcombine.low %v1823_v6, %v1831_v7  ;;  %v1911_v33 = vld [vmem:[#allocation12 + $0x768] sm:$0xff] }
 0x5da   :  { %8565 = vmatpush1.bf16.msra.mxu0 %v15622_v11  ;;  %v15721_v11 = vcombine.high %v1823_v6, %v1831_v7 }
 0x5db   :  { %8729 = vmatpush1.bf16.msra.mxu1 %v15624_v13  ;;  %8566 = vmatprep.subr.bf16.mxu0 %v15639_v14  ;;  %v1838_v13 = vld [vmem:[#allocation12 + $0x520] sm:$0xff] }
 0x5dc   :  { %8730 = vmatprep.subr.bf16.mxu1 %v15641_v15  ;;  %v1846_v14 = vld [vmem:[#allocation12 + $0x560] sm:$0xff]  ;;  %v1839_v15 = vld [vmem:[#allocation12 + $0x528] sm:$0xff] }
 0x5dd   :  { %v15735_v55 = vcombine.high %v1838_v13, %v1846_v14  ;;  %v15734_v27 = vcombine.low %v1838_v13, %v1846_v14  ;;  %v15736_v28 = vcombine.low %v1839_v15, %v1847_v19  ;;  %v1927_v13 = vld [vmem:[#allocation12 + $0x7e8] sm:$0xff] }
 0x5de   :  { %8567 = vmatpush1.bf16.msra.mxu0 %v15638_v58  ;;  %v15737_v58 = vcombine.high %v1839_v15, %v1847_v19 }
 0x5df   :  { %8731 = vmatpush1.bf16.msra.mxu1 %v15640_v22  ;;  %8568 = vmatprep.subr.bf16.mxu0 %v15655_v23  ;;  %v1854_v22 = vld [vmem:[#allocation12 + $0x5a0] sm:$0xff] }
 0x5e0   :  { %8732 = vmatprep.subr.bf16.mxu1 %v15657_v24  ;;  %v1862_v23 = vld [vmem:[#allocation12 + $0x5e0] sm:$0xff]  ;;  %v1855_v24 = vld [vmem:[#allocation12 + $0x5a8] sm:$0xff] }
 0x5e1   :  { %v15751_v39 = vcombine.high %v1854_v22, %v1862_v23  ;;  %v15750_v35 = vcombine.low %v1854_v22, %v1862_v23  ;;  %v15752_v36 = vcombine.low %v1855_v24, %v1863_v25  ;;  %v1943_v22 = vld [vmem:[#allocation12 + $0x868] sm:$0xff] }
 0x5e2   :  { %8569 = vmatpush1.bf16.msra.mxu0 %v15654_v40  ;;  %v15753_v40 = vcombine.high %v1855_v24, %v1863_v25 }
 0x5e3   :  { %8733 = vmatpush1.bf16.msra.mxu1 %v15656_v42  ;;  %8570 = vmatprep.subr.bf16.mxu0 %v15671_v44  ;;  %v1870_v42 = vld [vmem:[#allocation12 + $0x620] sm:$0xff] }
 0x5e4   :  { %8734 = vmatprep.subr.bf16.mxu1 %v15673_v60  ;;  %v1878_v44 = vld [vmem:[#allocation12 + $0x660] sm:$0xff]  ;;  %v1871_v60 = vld [vmem:[#allocation12 + $0x628] sm:$0xff] }
 0x5e5   :  { %v15767_v30 = vcombine.high %v1870_v42, %v1878_v44  ;;  %v15766_v54 = vcombine.low %v1870_v42, %v1878_v44  ;;  %v15768_v57 = vcombine.low %v1871_v60, %v1879_v34  ;;  %v1951_v42 = vld [vmem:[#allocation12 + $0x8a8] sm:$0xff] }
 0x5e6   :  { %8571 = vmatpush1.bf16.msra.mxu0 %v15670_v41  ;;  %v15769_v41 = vcombine.high %v1871_v60, %v1879_v34  ;;  %v1959_v44 = vld [vmem:[#allocation12 + $0x8e8] sm:$0xff] }
 0x5e7   :  { %8735 = vmatpush1.bf16.msra.mxu1 %v15672_v43  ;;  %8572 = vmatprep.subr.bf16.mxu0 %v15687_v46  ;;  %v1886_v43 = vld [vmem:[#allocation12 + $0x6a0] sm:$0xff] }
 0x5e8   :  { %8736 = vmatprep.subr.bf16.mxu1 %v15689_v47  ;;  %v1894_v46 = vld [vmem:[#allocation12 + $0x6e0] sm:$0xff]  ;;  %v1887_v47 = vld [vmem:[#allocation12 + $0x6a8] sm:$0xff] }
 0x5e9   :  { %v15783_v59 = vcombine.high %v1886_v43, %v1894_v46  ;;  %v15782_v5 = vcombine.low %v1886_v43, %v1894_v46  ;;  %v15784_v6 = vcombine.low %v1887_v47, %v1895_v51  ;;  %v1975_v43 = vld [vmem:[#allocation12 + $0x968] sm:$0xff] }
 0x5ea   :  { %8573 = vmatpush1.bf16.msra.mxu0 %v15686_v62  ;;  %v15785_v62 = vcombine.high %v1887_v47, %v1895_v51  ;;  %v15848_v47 = vcombine.low %v1951_v42, %v1959_v44 }
 0x5eb   :  { %8737 = vmatpush1.bf16.msra.mxu1 %v15688_v63  ;;  %8574 = vmatprep.subr.bf16.mxu0 %v15703_v1  ;;  %v1902_v63 = vld [vmem:[#allocation12 + $0x720] sm:$0xff] }
 0x5ec   :  { %8738 = vmatprep.subr.bf16.mxu1 %v15705_v2  ;;  %v1910_v1 = vld [vmem:[#allocation12 + $0x760] sm:$0xff]  ;;  %v1903_v2 = vld [vmem:[#allocation12 + $0x728] sm:$0xff] }
 0x5ed   :  { %v15799_v7 = vcombine.high %v1902_v63, %v1910_v1  ;;  %v15798_v14 = vcombine.low %v1902_v63, %v1910_v1  ;;  %v15800_v15 = vcombine.low %v1903_v2, %v1911_v33  ;;  %v1991_v63 = vld [vmem:[#allocation12 + $0x9e8] sm:$0xff] }
 0x5ee   :  { %8575 = vmatpush1.bf16.msra.mxu0 %v15702_v48  ;;  %v15801_v48 = vcombine.high %v1903_v2, %v1911_v33 }
 0x5ef   :  { %8739 = vmatpush1.bf16.msra.mxu1 %v15704_v8  ;;  %8576 = vmatprep.subr.bf16.mxu0 %v15719_v9  ;;  %v1918_v8 = vld [vmem:[#allocation12 + $0x7a0] sm:$0xff] }
 0x5f0   :  { %8740 = vmatprep.subr.bf16.mxu1 %v15721_v11  ;;  %v1926_v9 = vld [vmem:[#allocation12 + $0x7e0] sm:$0xff]  ;;  %v1919_v11 = vld [vmem:[#allocation12 + $0x7a8] sm:$0xff] }
 0x5f1   :  { %v15815_v19 = vcombine.high %v1918_v8, %v1926_v9  ;;  %v15814_v23 = vcombine.low %v1918_v8, %v1926_v9  ;;  %v15816_v24 = vcombine.low %v1919_v11, %v1927_v13  ;;  %v2007_v8 = vld [vmem:[#allocation12 + $0xa68] sm:$0xff] }
 0x5f2   :  { %8577 = vmatpush1.bf16.msra.mxu0 %v15718_v20  ;;  %v15817_v20 = vcombine.high %v1919_v11, %v1927_v13 }
 0x5f3   :  { %8741 = vmatpush1.bf16.msra.mxu1 %v15720_v52  ;;  %8578 = vmatprep.subr.bf16.mxu0 %v15735_v55  ;;  %v1934_v52 = vld [vmem:[#allocation12 + $0x820] sm:$0xff] }
 0x5f4   :  { %8742 = vmatprep.subr.bf16.mxu1 %v15737_v58  ;;  %v1942_v55 = vld [vmem:[#allocation12 + $0x860] sm:$0xff]  ;;  %v1935_v58 = vld [vmem:[#allocation12 + $0x828] sm:$0xff] }
 0x5f5   :  { %v15831_v25 = vcombine.high %v1934_v52, %v1942_v55  ;;  %v15832_v60 = vcombine.low %v1935_v58, %v1943_v22 }
 0x5f6   :  { %8579 = vmatpush1.bf16.msra.mxu0 %v15734_v27  ;;  %v15833_v27 = vcombine.high %v1935_v58, %v1943_v22 }
 0x5f7   :  { %8743 = vmatpush1.bf16.msra.mxu1 %v15736_v28  ;;  %8580 = vmatprep.subr.bf16.mxu0 %v15751_v39  ;;  %v1950_v28 = vld [vmem:[#allocation12 + $0x8a0] sm:$0xff] }
 0x5f8   :  { %8744 = vmatprep.subr.bf16.mxu1 %v15753_v40  ;;  %v1958_v39 = vld [vmem:[#allocation12 + $0x8e0] sm:$0xff]  ;;  %v15830_v40 = vcombine.low %v1934_v52, %v1942_v55  ;;  %v2023_v52 = vld [vmem:[#allocation12 + $0xae8] sm:$0xff] }
 0x5f9   :  { %v15847_v34 = vcombine.high %v1950_v28, %v1958_v39  ;;  %v15846_v46 = vcombine.low %v1950_v28, %v1958_v39  ;;  %v2039_v28 = vld [vmem:[#allocation12 + $0xb68] sm:$0xff] }
 0x5fa   :  { %8581 = vmatpush1.bf16.msra.mxu0 %v15750_v35  ;;  %v1966_v35 = vld [vmem:[#allocation12 + $0x920] sm:$0xff] }
 0x5fb   :  { %8745 = vmatpush1.bf16.msra.mxu1 %v15752_v36  ;;  %8582 = vmatprep.subr.bf16.mxu0 %v15767_v30  ;;  %v1974_v36 = vld [vmem:[#allocation12 + $0x960] sm:$0xff]  ;;  %v15849_v30 = vcombine.high %v1951_v42, %v1959_v44 }
 0x5fc   :  { %8746 = vmatprep.subr.bf16.mxu1 %v15769_v41  ;;  %v1967_v41 = vld [vmem:[#allocation12 + $0x928] sm:$0xff]  ;;  %v15863_v51 = vcombine.high %v1966_v35, %v1974_v36  ;;  %v15862_v1 = vcombine.low %v1966_v35, %v1974_v36 }
 0x5fd   :  { %v15864_v2 = vcombine.low %v1967_v41, %v1975_v43  ;;  %v2047_v35 = vld [vmem:[#allocation12 + $0xba8] sm:$0xff] }
 0x5fe   :  { %8583 = vmatpush1.bf16.msra.mxu0 %v15766_v54  ;;  %v15865_v54 = vcombine.high %v1967_v41, %v1975_v43  ;;  %v2055_v36 = vld [vmem:[#allocation12 + $0xbe8] sm:$0xff] }
 0x5ff   :  { %8747 = vmatpush1.bf16.msra.mxu1 %v15768_v57  ;;  %8584 = vmatprep.subr.bf16.mxu0 %v15783_v59  ;;  %v1982_v57 = vld [vmem:[#allocation12 + $0x9a0] sm:$0xff] }
 0x600   :  { %8748 = vmatprep.subr.bf16.mxu1 %v15785_v62  ;;  %v1990_v59 = vld [vmem:[#allocation12 + $0x9e0] sm:$0xff]  ;;  %v1983_v62 = vld [vmem:[#allocation12 + $0x9a8] sm:$0xff] }
 0x601   :  { %v15879_v33 = vcombine.high %v1982_v57, %v1990_v59  ;;  %v15878_v9 = vcombine.low %v1982_v57, %v1990_v59  ;;  %v15880_v11 = vcombine.low %v1983_v62, %v1991_v63  ;;  %v2071_v57 = vld [vmem:[#allocation12 + $0xc68] sm:$0xff] }
 0x602   :  { %8585 = vmatpush1.bf16.msra.mxu0 %v15782_v5  ;;  %v15881_v5 = vcombine.high %v1983_v62, %v1991_v63  ;;  %v15944_v62 = vcombine.low %v2047_v35, %v2055_v36 }
 0x603   :  { %8749 = vmatpush1.bf16.msra.mxu1 %v15784_v6  ;;  %8586 = vmatprep.subr.bf16.mxu0 %v15799_v7  ;;  %v1998_v6 = vld [vmem:[#allocation12 + $0xa20] sm:$0xff] }
 0x604   :  { %8750 = vmatprep.subr.bf16.mxu1 %v15801_v48  ;;  %v2006_v7 = vld [vmem:[#allocation12 + $0xa60] sm:$0xff]  ;;  %v1999_v48 = vld [vmem:[#allocation12 + $0xa28] sm:$0xff] }
 0x605   :  { %v15895_v13 = vcombine.high %v1998_v6, %v2006_v7  ;;  %v15894_v55 = vcombine.low %v1998_v6, %v2006_v7  ;;  %v15896_v58 = vcombine.low %v1999_v48, %v2007_v8  ;;  %v2087_v6 = vld [vmem:[#allocation12 + $0xce8] sm:$0xff] }
 0x606   :  { %8587 = vmatpush1.bf16.msra.mxu0 %v15798_v14  ;;  %v15897_v14 = vcombine.high %v1999_v48, %v2007_v8 }
 0x607   :  { %8751 = vmatpush1.bf16.msra.mxu1 %v15800_v15  ;;  %8588 = vmatprep.subr.bf16.mxu0 %v15815_v19  ;;  %v2014_v15 = vld [vmem:[#allocation12 + $0xaa0] sm:$0xff] }
 0x608   :  { %8752 = vmatprep.subr.bf16.mxu1 %v15817_v20  ;;  %v2022_v19 = vld [vmem:[#allocation12 + $0xae0] sm:$0xff]  ;;  %v2015_v20 = vld [vmem:[#allocation12 + $0xaa8] sm:$0xff] }
 0x609   :  { %v15911_v22 = vcombine.high %v2014_v15, %v2022_v19  ;;  %v15910_v39 = vcombine.low %v2014_v15, %v2022_v19  ;;  %v2103_v15 = vld [vmem:[#allocation12 + $0xd68] sm:$0xff] }
 0x60a   :  { %8589 = vmatpush1.bf16.msra.mxu0 %v15814_v23  ;;  %v15913_v23 = vcombine.high %v2015_v20, %v2023_v52 }
 0x60b   :  { %8753 = vmatpush1.bf16.msra.mxu1 %v15816_v24  ;;  %8599 = vmatprep.subr.bf16.mxu0 %v15831_v25  ;;  %v2030_v24 = vld [vmem:[#allocation12 + $0xb20] sm:$0xff] }
 0x60c   :  { %8763 = vmatprep.subr.bf16.mxu1 %v15833_v27  ;;  %v2038_v25 = vld [vmem:[#allocation12 + $0xb60] sm:$0xff]  ;;  %v2031_v27 = vld [vmem:[#allocation12 + $0xb28] sm:$0xff] }
 0x60d   :  { %8591 = vmatmul.mubr.bf16.vlgmr.msra.gmra.mrb[20].mxu0 %v19788_v17  ;;  %v15927_v42 = vcombine.high %v2030_v24, %v2038_v25  ;;  %v15929_v44 = vcombine.high %v2031_v27, %v2039_v28  ;;  %v15928_v41 = vcombine.low %v2031_v27, %v2039_v28 }
 0x60e   :  { %8755 = vmatmul.mubr.bf16.vlgmr.msra.gmra.mrb[20].mxu1 %v19788_v17  ;;  %8600 = vmatpush1.bf16.msra.mxu0 %v15830_v40  ;;  %v15912_v40 = vcombine.low %v2015_v20, %v2023_v52 }
 0x60f   :  { %8631 = vmatprep.mubr.bf16.mxu0 %v19792_v21  ;;  %8764 = vmatpush1.bf16.msra.mxu1 %v15832_v60  ;;  %v2046_v60 = vld [vmem:[#allocation12 + $0xba0] sm:$0xff] }
 0x610   :  { %8795 = vmatprep.mubr.bf16.mxu1 %v19792_v21  ;;  %8601 = vmatprep.subr.bf16.mxu0 %v15847_v34  ;;  %v2054_v34 = vld [vmem:[#allocation12 + $0xbe0] sm:$0xff] }
 0x611   :  { %8765 = vmatprep.subr.bf16.mxu1 %v15849_v30  ;;  %v15926_v30 = vcombine.low %v2030_v24, %v2038_v25  ;;  %v15943_v43 = vcombine.high %v2046_v60, %v2054_v34  ;;  %v15942_v59 = vcombine.low %v2046_v60, %v2054_v34  ;;  %v2119_v24 = vld [vmem:[#allocation12 + $0xde8] sm:$0xff] }
 0x612   :  { %8602 = vmatpush1.bf16.msra.mxu0 %v15846_v46  ;;  %v15945_v46 = vcombine.high %v2047_v35, %v2055_v36  ;;  %v2135_v60 = vld [vmem:[#allocation12 + $0xe68] sm:$0xff] }
 0x613   :  { %8766 = vmatpush1.bf16.msra.mxu1 %v15848_v47  ;;  %8603 = vmatprep.subr.bf16.mxu0 %v15863_v51  ;;  %v2062_v47 = vld [vmem:[#allocation12 + $0xc20] sm:$0xff] }
 0x614   :  { %8767 = vmatprep.subr.bf16.mxu1 %v15865_v54  ;;  %v2070_v51 = vld [vmem:[#allocation12 + $0xc60] sm:$0xff]  ;;  %v2063_v54 = vld [vmem:[#allocation12 + $0xc28] sm:$0xff] }
 0x615   :  { %v15959_v63 = vcombine.high %v2062_v47, %v2070_v51  ;;  %v15958_v7 = vcombine.low %v2062_v47, %v2070_v51  ;;  %v15960_v48 = vcombine.low %v2063_v54, %v2071_v57  ;;  %v2151_v47 = vld [vmem:[#allocation12 + $0xee8] sm:$0xff] }
 0x616   :  { %8604 = vmatpush1.bf16.msra.mxu0 %v15862_v1  ;;  %v15961_v1 = vcombine.high %v2063_v54, %v2071_v57 }
 0x617   :  { %8768 = vmatpush1.bf16.msra.mxu1 %v15864_v2  ;;  %8605 = vmatprep.subr.bf16.mxu0 %v15879_v33  ;;  %v2078_v2 = vld [vmem:[#allocation12 + $0xca0] sm:$0xff] }
 0x618   :  { %8769 = vmatprep.subr.bf16.mxu1 %v15881_v5  ;;  %v2086_v33 = vld [vmem:[#allocation12 + $0xce0] sm:$0xff]  ;;  %v2079_v5 = vld [vmem:[#allocation12 + $0xca8] sm:$0xff] }
 0x619   :  { %v15975_v8 = vcombine.high %v2078_v2, %v2086_v33  ;;  %v15974_v19 = vcombine.low %v2078_v2, %v2086_v33  ;;  %v15976_v20 = vcombine.low %v2079_v5, %v2087_v6  ;;  %v2167_v2 = vld [vmem:[#allocation12 + $0xf68] sm:$0xff] }
 0x61a   :  { %8606 = vmatpush1.bf16.msra.mxu0 %v15878_v9  ;;  %v15977_v9 = vcombine.high %v2079_v5, %v2087_v6 }
 0x61b   :  { %8770 = vmatpush1.bf16.msra.mxu1 %v15880_v11  ;;  %8607 = vmatprep.subr.bf16.mxu0 %v15895_v13  ;;  %v2094_v11 = vld [vmem:[#allocation12 + $0xd20] sm:$0xff] }
 0x61c   :  { %8771 = vmatprep.subr.bf16.mxu1 %v15897_v14  ;;  %v2102_v13 = vld [vmem:[#allocation12 + $0xd60] sm:$0xff]  ;;  %v2095_v14 = vld [vmem:[#allocation12 + $0xd28] sm:$0xff] }
 0x61d   :  { %v15991_v52 = vcombine.high %v2094_v11, %v2102_v13  ;;  %v15990_v25 = vcombine.low %v2094_v11, %v2102_v13  ;;  %v15992_v27 = vcombine.low %v2095_v14, %v2103_v15  ;;  %v2183_v11 = vld [vmem:[#allocation12 + $0xfe8] sm:$0xff] }
 0x61e   :  { %8608 = vmatpush1.bf16.msra.mxu0 %v15894_v55  ;;  %v15993_v55 = vcombine.high %v2095_v14, %v2103_v15 }
 0x61f   :  { %8772 = vmatpush1.bf16.msra.mxu1 %v15896_v58  ;;  %8609 = vmatprep.subr.bf16.mxu0 %v15911_v22  ;;  %v2110_v58 = vld [vmem:[#allocation12 + $0xda0] sm:$0xff] }
 0x620   :  { %8773 = vmatprep.subr.bf16.mxu1 %v15913_v23  ;;  %v2118_v22 = vld [vmem:[#allocation12 + $0xde0] sm:$0xff]  ;;  %v2111_v23 = vld [vmem:[#allocation12 + $0xda8] sm:$0xff] }
 0x621   :  { %v16007_v28 = vcombine.high %v2110_v58, %v2118_v22  ;;  %v16006_v34 = vcombine.low %v2110_v58, %v2118_v22  ;;  %v16008_v35 = vcombine.low %v2111_v23, %v2119_v24  ;;  %v2199_v58 = vld [vmem:[#allocation12 + $0x1068] sm:$0xff] }
 0x622   :  { %8610 = vmatpush1.bf16.msra.mxu0 %v15910_v39  ;;  %v16009_v39 = vcombine.high %v2111_v23, %v2119_v24 }
 0x623   :  { %8774 = vmatpush1.bf16.msra.mxu1 %v15912_v40  ;;  %8611 = vmatprep.subr.bf16.mxu0 %v15927_v42  ;;  %v2126_v40 = vld [vmem:[#allocation12 + $0xe20] sm:$0xff] }
 0x624   :  { %8775 = vmatprep.subr.bf16.mxu1 %v15929_v44  ;;  %v2134_v42 = vld [vmem:[#allocation12 + $0xe60] sm:$0xff]  ;;  %v2127_v44 = vld [vmem:[#allocation12 + $0xe28] sm:$0xff] }
 0x625   :  { %v16023_v36 = vcombine.high %v2126_v40, %v2134_v42  ;;  %v16022_v51 = vcombine.low %v2126_v40, %v2134_v42  ;;  %v16024_v54 = vcombine.low %v2127_v44, %v2135_v60  ;;  %v2207_v40 = vld [vmem:[#allocation12 + $0x10a8] sm:$0xff] }
 0x626   :  { %8612 = vmatpush1.bf16.msra.mxu0 %v15926_v30  ;;  %v16025_v30 = vcombine.high %v2127_v44, %v2135_v60  ;;  %v2215_v42 = vld [vmem:[#allocation12 + $0x10e8] sm:$0xff] }
 0x627   :  { %8776 = vmatpush1.bf16.msra.mxu1 %v15928_v41  ;;  %8613 = vmatprep.subr.bf16.mxu0 %v15943_v43  ;;  %v2142_v41 = vld [vmem:[#allocation12 + $0xea0] sm:$0xff] }
 0x628   :  { %8777 = vmatprep.subr.bf16.mxu1 %v15945_v46  ;;  %v2150_v43 = vld [vmem:[#allocation12 + $0xee0] sm:$0xff]  ;;  %v2143_v46 = vld [vmem:[#allocation12 + $0xea8] sm:$0xff] }
 0x629   :  { %v16039_v57 = vcombine.high %v2142_v41, %v2150_v43  ;;  %v16038_v33 = vcombine.low %v2142_v41, %v2150_v43  ;;  %v16040_v5 = vcombine.low %v2143_v46, %v2151_v47  ;;  %v2231_v41 = vld [vmem:[#allocation12 + $0x1168] sm:$0xff] }
 0x62a   :  { %8614 = vmatpush1.bf16.msra.mxu0 %v15942_v59  ;;  %v16041_v59 = vcombine.high %v2143_v46, %v2151_v47  ;;  %v16104_v46 = vcombine.low %v2207_v40, %v2215_v42 }
 0x62b   :  { %8778 = vmatpush1.bf16.msra.mxu1 %v15944_v62  ;;  %8615 = vmatprep.subr.bf16.mxu0 %v15959_v63  ;;  %v2158_v62 = vld [vmem:[#allocation12 + $0xf20] sm:$0xff] }
 0x62c   :  { %8779 = vmatprep.subr.bf16.mxu1 %v15961_v1  ;;  %v2166_v63 = vld [vmem:[#allocation12 + $0xf60] sm:$0xff]  ;;  %v2159_v1 = vld [vmem:[#allocation12 + $0xf28] sm:$0xff] }
 0x62d   :  { %v16055_v6 = vcombine.high %v2158_v62, %v2166_v63  ;;  %v16054_v13 = vcombine.low %v2158_v62, %v2166_v63  ;;  %v16056_v14 = vcombine.low %v2159_v1, %v2167_v2  ;;  %v2247_v62 = vld [vmem:[#allocation12 + $0x11e8] sm:$0xff] }
 0x62e   :  { %8616 = vmatpush1.bf16.msra.mxu0 %v15958_v7  ;;  %v16057_v7 = vcombine.high %v2159_v1, %v2167_v2 }
 0x62f   :  { %8780 = vmatpush1.bf16.msra.mxu1 %v15960_v48  ;;  %8617 = vmatprep.subr.bf16.mxu0 %v15975_v8  ;;  %v2174_v48 = vld [vmem:[#allocation12 + $0xfa0] sm:$0xff] }
 0x630   :  { %8781 = vmatprep.subr.bf16.mxu1 %v15977_v9  ;;  %v2182_v8 = vld [vmem:[#allocation12 + $0xfe0] sm:$0xff]  ;;  %v2175_v9 = vld [vmem:[#allocation12 + $0xfa8] sm:$0xff] }
 0x631   :  { %v16071_v15 = vcombine.high %v2174_v48, %v2182_v8  ;;  %v16070_v22 = vcombine.low %v2174_v48, %v2182_v8  ;;  %v16072_v23 = vcombine.low %v2175_v9, %v2183_v11  ;;  %v2263_v48 = vld [vmem:[#allocation12 + $0x1268] sm:$0xff] }
 0x632   :  { %8618 = vmatpush1.bf16.msra.mxu0 %v15974_v19  ;;  %v16073_v19 = vcombine.high %v2175_v9, %v2183_v11 }
 0x633   :  { %8782 = vmatpush1.bf16.msra.mxu1 %v15976_v20  ;;  %8619 = vmatprep.subr.bf16.mxu0 %v15991_v52  ;;  %v2190_v20 = vld [vmem:[#allocation12 + $0x1020] sm:$0xff] }
 0x634   :  { %8783 = vmatprep.subr.bf16.mxu1 %v15993_v55  ;;  %v2198_v52 = vld [vmem:[#allocation12 + $0x1060] sm:$0xff]  ;;  %v2191_v55 = vld [vmem:[#allocation12 + $0x1028] sm:$0xff] }
 0x635   :  { %v16087_v24 = vcombine.high %v2190_v20, %v2198_v52  ;;  %v16088_v44 = vcombine.low %v2191_v55, %v2199_v58 }
 0x636   :  { %8620 = vmatpush1.bf16.msra.mxu0 %v15990_v25  ;;  %v16089_v25 = vcombine.high %v2191_v55, %v2199_v58 }
 0x637   :  { %8784 = vmatpush1.bf16.msra.mxu1 %v15992_v27  ;;  %8621 = vmatprep.subr.bf16.mxu0 %v16007_v28  ;;  %v2206_v27 = vld [vmem:[#allocation12 + $0x10a0] sm:$0xff] }
 0x638   :  { %8785 = vmatprep.subr.bf16.mxu1 %v16009_v39  ;;  %v2214_v28 = vld [vmem:[#allocation12 + $0x10e0] sm:$0xff]  ;;  %v16086_v39 = vcombine.low %v2190_v20, %v2198_v52  ;;  %v2279_v20 = vld [vmem:[#allocation12 + $0x12e8] sm:$0xff] }
 0x639   :  { %v16103_v60 = vcombine.high %v2206_v27, %v2214_v28  ;;  %v16102_v43 = vcombine.low %v2206_v27, %v2214_v28  ;;  %v2295_v27 = vld [vmem:[#allocation12 + $0x1368] sm:$0xff] }
 0x63a   :  { %8622 = vmatpush1.bf16.msra.mxu0 %v16006_v34  ;;  %v2222_v34 = vld [vmem:[#allocation12 + $0x1120] sm:$0xff] }
 0x63b   :  { %8786 = vmatpush1.bf16.msra.mxu1 %v16008_v35  ;;  %8623 = vmatprep.subr.bf16.mxu0 %v16023_v36  ;;  %v2230_v35 = vld [vmem:[#allocation12 + $0x1160] sm:$0xff]  ;;  %v16105_v36 = vcombine.high %v2207_v40, %v2215_v42 }
 0x63c   :  { %8787 = vmatprep.subr.bf16.mxu1 %v16025_v30  ;;  %v2223_v30 = vld [vmem:[#allocation12 + $0x1128] sm:$0xff]  ;;  %v16119_v47 = vcombine.high %v2222_v34, %v2230_v35  ;;  %v16118_v63 = vcombine.low %v2222_v34, %v2230_v35 }
 0x63d   :  { %v16120_v1 = vcombine.low %v2223_v30, %v2231_v41  ;;  %v2303_v34 = vld [vmem:[#allocation12 + $0x13a8] sm:$0xff] }
 0x63e   :  { %8624 = vmatpush1.bf16.msra.mxu0 %v16022_v51  ;;  %v16121_v51 = vcombine.high %v2223_v30, %v2231_v41  ;;  %v2311_v35 = vld [vmem:[#allocation12 + $0x13e8] sm:$0xff] }
 0x63f   :  { %8788 = vmatpush1.bf16.msra.mxu1 %v16024_v54  ;;  %8625 = vmatprep.subr.bf16.mxu0 %v16039_v57  ;;  %v2238_v54 = vld [vmem:[#allocation12 + $0x11a0] sm:$0xff] }
 0x640   :  { %8789 = vmatprep.subr.bf16.mxu1 %v16041_v59  ;;  %v2246_v57 = vld [vmem:[#allocation12 + $0x11e0] sm:$0xff]  ;;  %v2239_v59 = vld [vmem:[#allocation12 + $0x11a8] sm:$0xff] }
 0x641   :  { %v16135_v2 = vcombine.high %v2238_v54, %v2246_v57  ;;  %v16134_v8 = vcombine.low %v2238_v54, %v2246_v57  ;;  %v16136_v9 = vcombine.low %v2239_v59, %v2247_v62  ;;  %v2327_v54 = vld [vmem:[#allocation12 + $0x1468] sm:$0xff] }
 0x642   :  { %8626 = vmatpush1.bf16.msra.mxu0 %v16038_v33  ;;  %v16137_v33 = vcombine.high %v2239_v59, %v2247_v62  ;;  %v16200_v59 = vcombine.low %v2303_v34, %v2311_v35 }
 0x643   :  { %8790 = vmatpush1.bf16.msra.mxu1 %v16040_v5  ;;  %8627 = vmatprep.subr.bf16.mxu0 %v16055_v6  ;;  %v2254_v5 = vld [vmem:[#allocation12 + $0x1220] sm:$0xff] }
 0x644   :  { %8791 = vmatprep.subr.bf16.mxu1 %v16057_v7  ;;  %v2262_v6 = vld [vmem:[#allocation12 + $0x1260] sm:$0xff]  ;;  %v2255_v7 = vld [vmem:[#allocation12 + $0x1228] sm:$0xff] }
 0x645   :  { %v16151_v11 = vcombine.high %v2254_v5, %v2262_v6  ;;  %v16150_v52 = vcombine.low %v2254_v5, %v2262_v6  ;;  %v16152_v55 = vcombine.low %v2255_v7, %v2263_v48  ;;  %v2343_v5 = vld [vmem:[#allocation12 + $0x14e8] sm:$0xff] }
 0x646   :  { %8628 = vmatpush1.bf16.msra.mxu0 %v16054_v13  ;;  %v16153_v13 = vcombine.high %v2255_v7, %v2263_v48 }
 0x647   :  { %8792 = vmatpush1.bf16.msra.mxu1 %v16056_v14  ;;  %8629 = vmatprep.subr.bf16.mxu0 %v16071_v15  ;;  %v2270_v14 = vld [vmem:[#allocation12 + $0x12a0] sm:$0xff] }
 0x648   :  { %8793 = vmatprep.subr.bf16.mxu1 %v16073_v19  ;;  %v2278_v15 = vld [vmem:[#allocation12 + $0x12e0] sm:$0xff]  ;;  %v2271_v19 = vld [vmem:[#allocation12 + $0x12a8] sm:$0xff] }
 0x649   :  { %v16167_v58 = vcombine.high %v2270_v14, %v2278_v15  ;;  %v16166_v28 = vcombine.low %v2270_v14, %v2278_v15  ;;  %v2359_v14 = vld [vmem:[#allocation12 + $0x1568] sm:$0xff] }
 0x64a   :  { %8630 = vmatpush1.bf16.msra.mxu0 %v16070_v22  ;;  %v16169_v22 = vcombine.high %v2271_v19, %v2279_v20 }
 0x64b   :  { %8794 = vmatpush1.bf16.msra.mxu1 %v16072_v23  ;;  %8640 = vmatprep.subr.bf16.mxu0 %v16087_v24  ;;  %v2286_v23 = vld [vmem:[#allocation12 + $0x1320] sm:$0xff] }
 0x64c   :  { %8804 = vmatprep.subr.bf16.mxu1 %v16089_v25  ;;  %v2294_v24 = vld [vmem:[#allocation12 + $0x1360] sm:$0xff]  ;;  %v2287_v25 = vld [vmem:[#allocation12 + $0x1328] sm:$0xff] }
 0x64d   :  { %8632 = vmatmul.mubr.bf16.vlgmr.msra.gmra.mrb[20].mxu0 %v19821_v3  ;;  %v16183_v40 = vcombine.high %v2286_v23, %v2294_v24  ;;  %v16185_v42 = vcombine.high %v2287_v25, %v2295_v27  ;;  %v16184_v30 = vcombine.low %v2287_v25, %v2295_v27 }
 0x64e   :  { %8796 = vmatmul.mubr.bf16.vlgmr.msra.gmra.mrb[20].mxu1 %v19821_v3  ;;  %8641 = vmatpush1.bf16.msra.mxu0 %v16086_v39  ;;  %v16168_v39 = vcombine.low %v2271_v19, %v2279_v20 }
 0x64f   :  { %8672 = vmatprep.mubr.bf16.mxu0 %v19823_v56  ;;  %8805 = vmatpush1.bf16.msra.mxu1 %v16088_v44  ;;  %v2302_v44 = vld [vmem:[#allocation12 + $0x13a0] sm:$0xff] }
 0x650   :  { %8836 = vmatprep.mubr.bf16.mxu1 %v19823_v56  ;;  %8642 = vmatprep.subr.bf16.mxu0 %v16103_v60  ;;  %v2310_v60 = vld [vmem:[#allocation12 + $0x13e0] sm:$0xff] }
 0x651   :  { %8806 = vmatprep.subr.bf16.mxu1 %v16105_v36  ;;  %v16182_v36 = vcombine.low %v2286_v23, %v2294_v24  ;;  %v16199_v41 = vcombine.high %v2302_v44, %v2310_v60  ;;  %v16198_v57 = vcombine.low %v2302_v44, %v2310_v60  ;;  %v2375_v23 = vld [vmem:[#allocation12 + $0x15e8] sm:$0xff] }
 0x652   :  { %8643 = vmatpush1.bf16.msra.mxu0 %v16102_v43  ;;  %v16201_v43 = vcombine.high %v2303_v34, %v2311_v35  ;;  %v2391_v44 = vld [vmem:[#allocation12 + $0x1668] sm:$0xff] }
 0x653   :  { %8807 = vmatpush1.bf16.msra.mxu1 %v16104_v46  ;;  %8644 = vmatprep.subr.bf16.mxu0 %v16119_v47  ;;  %v2318_v46 = vld [vmem:[#allocation12 + $0x1420] sm:$0xff] }
 0x654   :  { %8808 = vmatprep.subr.bf16.mxu1 %v16121_v51  ;;  %v2326_v47 = vld [vmem:[#allocation12 + $0x1460] sm:$0xff]  ;;  %v2319_v51 = vld [vmem:[#allocation12 + $0x1428] sm:$0xff] }
 0x655   :  { %v16215_v62 = vcombine.high %v2318_v46, %v2326_v47  ;;  %v16214_v6 = vcombine.low %v2318_v46, %v2326_v47  ;;  %v16216_v7 = vcombine.low %v2319_v51, %v2327_v54  ;;  %v2407_v46 = vld [vmem:[#allocation12 + $0x16e8] sm:$0xff] }
 0x656   :  { %8645 = vmatpush1.bf16.msra.mxu0 %v16118_v63  ;;  %v16217_v63 = vcombine.high %v2319_v51, %v2327_v54 }
 0x657   :  { %8809 = vmatpush1.bf16.msra.mxu1 %v16120_v1  ;;  %8646 = vmatprep.subr.bf16.mxu0 %v16135_v2  ;;  %v2334_v1 = vld [vmem:[#allocation12 + $0x14a0] sm:$0xff] }
 0x658   :  { %8810 = vmatprep.subr.bf16.mxu1 %v16137_v33  ;;  %v2342_v2 = vld [vmem:[#allocation12 + $0x14e0] sm:$0xff]  ;;  %v2335_v33 = vld [vmem:[#allocation12 + $0x14a8] sm:$0xff] }
 0x659   :  { %v16231_v48 = vcombine.high %v2334_v1, %v2342_v2  ;;  %v16230_v15 = vcombine.low %v2334_v1, %v2342_v2  ;;  %v16232_v19 = vcombine.low %v2335_v33, %v2343_v5  ;;  %v2423_v1 = vld [vmem:[#allocation12 + $0x1768] sm:$0xff] }
 0x65a   :  { %8647 = vmatpush1.bf16.msra.mxu0 %v16134_v8  ;;  %v16233_v8 = vcombine.high %v2335_v33, %v2343_v5 }
 0x65b   :  { %8811 = vmatpush1.bf16.msra.mxu1 %v16136_v9  ;;  %8648 = vmatprep.subr.bf16.mxu0 %v16151_v11  ;;  %v2350_v9 = vld [vmem:[#allocation12 + $0x1520] sm:$0xff] }
 0x65c   :  { %8812 = vmatprep.subr.bf16.mxu1 %v16153_v13  ;;  %v2358_v11 = vld [vmem:[#allocation12 + $0x1560] sm:$0xff]  ;;  %v2351_v13 = vld [vmem:[#allocation12 + $0x1528] sm:$0xff] }
 0x65d   :  { %v16247_v20 = vcombine.high %v2350_v9, %v2358_v11  ;;  %v16246_v24 = vcombine.low %v2350_v9, %v2358_v11  ;;  %v16248_v25 = vcombine.low %v2351_v13, %v2359_v14  ;;  %v2439_v9 = vld [vmem:[#allocation12 + $0x17e8] sm:$0xff] }
 0x65e   :  { %8649 = vmatpush1.bf16.msra.mxu0 %v16150_v52  ;;  %v16249_v52 = vcombine.high %v2351_v13, %v2359_v14 }
 0x65f   :  { %8813 = vmatpush1.bf16.msra.mxu1 %v16152_v55  ;;  %8650 = vmatprep.subr.bf16.mxu0 %v16167_v58  ;;  %v2366_v55 = vld [vmem:[#allocation12 + $0x15a0] sm:$0xff] }
 0x660   :  { %8814 = vmatprep.subr.bf16.mxu1 %v16169_v22  ;;  %v2374_v58 = vld [vmem:[#allocation12 + $0x15e0] sm:$0xff]  ;;  %v2367_v22 = vld [vmem:[#allocation12 + $0x15a8] sm:$0xff] }
 0x661   :  { %v16263_v27 = vcombine.high %v2366_v55, %v2374_v58  ;;  %v16262_v60 = vcombine.low %v2366_v55, %v2374_v58  ;;  %v16264_v34 = vcombine.low %v2367_v22, %v2375_v23  ;;  %v2455_v55 = vld [vmem:[#allocation12 + $0x1868] sm:$0xff] }
 0x662   :  { %8651 = vmatpush1.bf16.msra.mxu0 %v16166_v28  ;;  %v16265_v28 = vcombine.high %v2367_v22, %v2375_v23 }
 0x663   :  { %8815 = vmatpush1.bf16.msra.mxu1 %v16168_v39  ;;  %8652 = vmatprep.subr.bf16.mxu0 %v16183_v40  ;;  %v2382_v39 = vld [vmem:[#allocation12 + $0x1620] sm:$0xff] }
 0x664   :  { %8816 = vmatprep.subr.bf16.mxu1 %v16185_v42  ;;  %v2390_v40 = vld [vmem:[#allocation12 + $0x1660] sm:$0xff]  ;;  %v2383_v42 = vld [vmem:[#allocation12 + $0x1628] sm:$0xff] }
 0x665   :  { %v16279_v35 = vcombine.high %v2382_v39, %v2390_v40  ;;  %v16278_v47 = vcombine.low %v2382_v39, %v2390_v40  ;;  %v16280_v51 = vcombine.low %v2383_v42, %v2391_v44  ;;  %v2463_v39 = vld [vmem:[#allocation12 + $0x18a8] sm:$0xff] }
 0x666   :  { %8653 = vmatpush1.bf16.msra.mxu0 %v16182_v36  ;;  %v16281_v36 = vcombine.high %v2383_v42, %v2391_v44  ;;  %v2471_v40 = vld [vmem:[#allocation12 + $0x18e8] sm:$0xff] }
 0x667   :  { %8817 = vmatpush1.bf16.msra.mxu1 %v16184_v30  ;;  %8654 = vmatprep.subr.bf16.mxu0 %v16199_v41  ;;  %v2398_v30 = vld [vmem:[#allocation12 + $0x16a0] sm:$0xff] }
 0x668   :  { %8818 = vmatprep.subr.bf16.mxu1 %v16201_v43  ;;  %v2406_v41 = vld [vmem:[#allocation12 + $0x16e0] sm:$0xff]  ;;  %v2399_v43 = vld [vmem:[#allocation12 + $0x16a8] sm:$0xff] }
 0x669   :  { %v16295_v54 = vcombine.high %v2398_v30, %v2406_v41  ;;  %v16294_v2 = vcombine.low %v2398_v30, %v2406_v41  ;;  %v16296_v33 = vcombine.low %v2399_v43, %v2407_v46  ;;  %v2487_v30 = vld [vmem:[#allocation12 + $0x1968] sm:$0xff] }
 0x66a   :  { %8655 = vmatpush1.bf16.msra.mxu0 %v16198_v57  ;;  %v16297_v57 = vcombine.high %v2399_v43, %v2407_v46  ;;  %v16360_v43 = vcombine.low %v2463_v39, %v2471_v40 }
 0x66b   :  { %8819 = vmatpush1.bf16.msra.mxu1 %v16200_v59  ;;  %8656 = vmatprep.subr.bf16.mxu0 %v16215_v62  ;;  %v2414_v59 = vld [vmem:[#allocation12 + $0x1720] sm:$0xff] }
 0x66c   :  { %8820 = vmatprep.subr.bf16.mxu1 %v16217_v63  ;;  %v2422_v62 = vld [vmem:[#allocation12 + $0x1760] sm:$0xff]  ;;  %v2415_v63 = vld [vmem:[#allocation12 + $0x1728] sm:$0xff] }
 0x66d   :  { %v16311_v5 = vcombine.high %v2414_v59, %v2422_v62  ;;  %v16310_v11 = vcombine.low %v2414_v59, %v2422_v62  ;;  %v16312_v13 = vcombine.low %v2415_v63, %v2423_v1  ;;  %v2503_v59 = vld [vmem:[#allocation12 + $0x19e8] sm:$0xff] }
 0x66e   :  { %8657 = vmatpush1.bf16.msra.mxu0 %v16214_v6  ;;  %v16313_v6 = vcombine.high %v2415_v63, %v2423_v1 }
 0x66f   :  { %8821 = vmatpush1.bf16.msra.mxu1 %v16216_v7  ;;  %8658 = vmatprep.subr.bf16.mxu0 %v16231_v48  ;;  %v2430_v7 = vld [vmem:[#allocation12 + $0x17a0] sm:$0xff] }
 0x670   :  { %8822 = vmatprep.subr.bf16.mxu1 %v16233_v8  ;;  %v2438_v48 = vld [vmem:[#allocation12 + $0x17e0] sm:$0xff]  ;;  %v2431_v8 = vld [vmem:[#allocation12 + $0x17a8] sm:$0xff] }
 0x671   :  { %v16327_v14 = vcombine.high %v2430_v7, %v2438_v48  ;;  %v16326_v58 = vcombine.low %v2430_v7, %v2438_v48  ;;  %v16328_v22 = vcombine.low %v2431_v8, %v2439_v9  ;;  %v2519_v7 = vld [vmem:[#allocation12 + $0x1a68] sm:$0xff] }
 0x672   :  { %8659 = vmatpush1.bf16.msra.mxu0 %v16230_v15  ;;  %v16329_v15 = vcombine.high %v2431_v8, %v2439_v9 }
 0x673   :  { %8823 = vmatpush1.bf16.msra.mxu1 %v16232_v19  ;;  %8660 = vmatprep.subr.bf16.mxu0 %v16247_v20  ;;  %v2446_v19 = vld [vmem:[#allocation12 + $0x1820] sm:$0xff] }
 0x674   :  { %8824 = vmatprep.subr.bf16.mxu1 %v16249_v52  ;;  %v2454_v20 = vld [vmem:[#allocation12 + $0x1860] sm:$0xff]  ;;  %v2447_v52 = vld [vmem:[#allocation12 + $0x1828] sm:$0xff] }
 0x675   :  { %v16343_v23 = vcombine.high %v2446_v19, %v2454_v20  ;;  %v16344_v42 = vcombine.low %v2447_v52, %v2455_v55 }
 0x676   :  { %8661 = vmatpush1.bf16.msra.mxu0 %v16246_v24  ;;  %v16345_v24 = vcombine.high %v2447_v52, %v2455_v55 }
 0x677   :  { %8825 = vmatpush1.bf16.msra.mxu1 %v16248_v25  ;;  %8662 = vmatprep.subr.bf16.mxu0 %v16263_v27  ;;  %v2462_v25 = vld [vmem:[#allocation12 + $0x18a0] sm:$0xff] }
 0x678   :  { %8826 = vmatprep.subr.bf16.mxu1 %v16265_v28  ;;  %v2470_v27 = vld [vmem:[#allocation12 + $0x18e0] sm:$0xff]  ;;  %v16342_v28 = vcombine.low %v2446_v19, %v2454_v20  ;;  %v2535_v19 = vld [vmem:[#allocation12 + $0x1ae8] sm:$0xff] }
 0x679   :  { %v16359_v44 = vcombine.high %v2462_v25, %v2470_v27  ;;  %v16358_v41 = vcombine.low %v2462_v25, %v2470_v27  ;;  %v2551_v25 = vld [vmem:[#allocation12 + $0x1b68] sm:$0xff] }
 0x67a   :  { %8663 = vmatpush1.bf16.msra.mxu0 %v16262_v60  ;;  %v2478_v60 = vld [vmem:[#allocation12 + $0x1920] sm:$0xff] }
 0x67b   :  { %8827 = vmatpush1.bf16.msra.mxu1 %v16264_v34  ;;  %8664 = vmatprep.subr.bf16.mxu0 %v16279_v35  ;;  %v2486_v34 = vld [vmem:[#allocation12 + $0x1960] sm:$0xff]  ;;  %v16361_v35 = vcombine.high %v2463_v39, %v2471_v40 }
 0x67c   :  { %8828 = vmatprep.subr.bf16.mxu1 %v16281_v36  ;;  %v2479_v36 = vld [vmem:[#allocation12 + $0x1928] sm:$0xff]  ;;  %v16375_v46 = vcombine.high %v2478_v60, %v2486_v34  ;;  %v16374_v62 = vcombine.low %v2478_v60, %v2486_v34  ;;  %v2566_v60 = vld [vmem:[#allocation12 + $0x1be0] sm:$0xff] }
 0x67d   :  { %v16376_v63 = vcombine.low %v2479_v36, %v2487_v30 }
 0x67e   :  { %8665 = vmatpush1.bf16.msra.mxu0 %v16278_v47  ;;  %v16377_v47 = vcombine.high %v2479_v36, %v2487_v30  ;;  %v2559_v36 = vld [vmem:[#allocation12 + $0x1ba8] sm:$0xff] }
 0x67f   :  { %8829 = vmatpush1.bf16.msra.mxu1 %v16280_v51  ;;  %8666 = vmatprep.subr.bf16.mxu0 %v16295_v54  ;;  %v2494_v51 = vld [vmem:[#allocation12 + $0x19a0] sm:$0xff]  ;;  %v2567_v30 = vld [vmem:[#allocation12 + $0x1be8] sm:$0xff] }
 0x680   :  { %8830 = vmatprep.subr.bf16.mxu1 %v16297_v57  ;;  %v2502_v54 = vld [vmem:[#allocation12 + $0x19e0] sm:$0xff]  ;;  %v2495_v57 = vld [vmem:[#allocation12 + $0x19a8] sm:$0xff] }
 0x681   :  { %v16391_v1 = vcombine.high %v2494_v51, %v2502_v54  ;;  %v16390_v48 = vcombine.low %v2494_v51, %v2502_v54  ;;  %v16392_v8 = vcombine.low %v2495_v57, %v2503_v59 }
 0x682   :  { %8667 = vmatpush1.bf16.msra.mxu0 %v16294_v2  ;;  %v16393_v2 = vcombine.high %v2495_v57, %v2503_v59 }
 0x683   :  { %8831 = vmatpush1.bf16.msra.mxu1 %v16296_v33  ;;  %8668 = vmatprep.subr.bf16.mxu0 %v16311_v5  ;;  %v2510_v33 = vld [vmem:[#allocation12 + $0x1a20] sm:$0xff] }
 0x684   :  { %8832 = vmatprep.subr.bf16.mxu1 %v16313_v6  ;;  %v2518_v5 = vld [vmem:[#allocation12 + $0x1a60] sm:$0xff]  ;;  %v2511_v6 = vld [vmem:[#allocation12 + $0x1a28] sm:$0xff] }
 0x685   :  { %v16407_v9 = vcombine.high %v2510_v33, %v2518_v5  ;;  %v16406_v20 = vcombine.low %v2510_v33, %v2518_v5  ;;  %v16408_v52 = vcombine.low %v2511_v6, %v2519_v7  ;;  %v2583_v33 = vld [vmem:[#allocation12 + $0x1c68] sm:$0xff] }
 0x686   :  { %8669 = vmatpush1.bf16.msra.mxu0 %v16310_v11  ;;  %v16409_v11 = vcombine.high %v2511_v6, %v2519_v7  ;;  %v16456_v6 = vcombine.low %v2559_v36, %v2567_v30 }
 0x687   :  { %8833 = vmatpush1.bf16.msra.mxu1 %v16312_v13  ;;  %8670 = vmatprep.subr.bf16.mxu0 %v16327_v14  ;;  %v2526_v13 = vld [vmem:[#allocation12 + $0x1aa0] sm:$0xff] }
 0x688   :  { %8834 = vmatprep.subr.bf16.mxu1 %v16329_v15  ;;  %v2534_v14 = vld [vmem:[#allocation12 + $0x1ae0] sm:$0xff]  ;;  %v2527_v15 = vld [vmem:[#allocation12 + $0x1aa8] sm:$0xff] }
 0x689   :  { %v16423_v55 = vcombine.high %v2526_v13, %v2534_v14  ;;  %v16422_v27 = vcombine.low %v2526_v13, %v2534_v14  ;;  %v2599_v13 = vld [vmem:[#allocation12 + $0x1ce8] sm:$0xff] }
 0x68a   :  { %8671 = vmatpush1.bf16.msra.mxu0 %v16326_v58  ;;  %v16425_v58 = vcombine.high %v2527_v15, %v2535_v19 }
 0x68b   :  { %8835 = vmatpush1.bf16.msra.mxu1 %v16328_v22  ;;  %8681 = vmatprep.subr.bf16.mxu0 %v16343_v23  ;;  %v2542_v22 = vld [vmem:[#allocation12 + $0x1b20] sm:$0xff] }
 0x68c   :  { %8845 = vmatprep.subr.bf16.mxu1 %v16345_v24  ;;  %v2550_v23 = vld [vmem:[#allocation12 + $0x1b60] sm:$0xff]  ;;  %v2543_v24 = vld [vmem:[#allocation12 + $0x1b28] sm:$0xff] }
 0x68d   :  { %8673 = vmatmul.mubr.bf16.vlgmr.msra.gmra.mrb[20].mxu0 %v19841_v32  ;;  %v16439_v39 = vcombine.high %v2542_v22, %v2550_v23  ;;  %v16440_v54 = vcombine.low %v2543_v24, %v2551_v25 }
 0x68e   :  { %8837 = vmatmul.mubr.bf16.vlgmr.msra.gmra.mrb[20].mxu1 %v19841_v32  ;;  %8682 = vmatpush1.bf16.msra.mxu0 %v16342_v28  ;;  %v16424_v28 = vcombine.low %v2527_v15, %v2535_v19 }
 0x68f   :  { %8713 = vmatprep.mubr.bf16.mxu0 %v19843_v37  ;;  %8846 = vmatpush1.bf16.msra.mxu1 %v16344_v42  ;;  %v16441_v42 = vcombine.high %v2543_v24, %v2551_v25 }
 0x690   :  { %8877 = vmatprep.mubr.bf16.mxu1 %v19843_v37  ;;  %8683 = vmatprep.subr.bf16.mxu0 %v16359_v44  ;;  %v2558_v44 = vld [vmem:[#allocation12 + $0x1ba0] sm:$0xff] }
 0x691   :  { %8847 = vmatprep.subr.bf16.mxu1 %v16361_v35  ;;  %v16455_v57 = vcombine.high %v2558_v44, %v2566_v60  ;;  %v16454_v5 = vcombine.low %v2558_v44, %v2566_v60  ;;  %v2631_v44 = vld [vmem:[#allocation12 + $0x1de8] sm:$0xff] }
 0x692   :  { %8684 = vmatpush1.bf16.msra.mxu0 %v16358_v41 }
 0x693   :  { %8848 = vmatpush1.bf16.msra.mxu1 %v16360_v43  ;;  %8685 = vmatprep.subr.bf16.mxu0 %v16375_v46  ;;  %v16438_v46 = vcombine.low %v2542_v22, %v2550_v23  ;;  %v2615_v22 = vld [vmem:[#allocation12 + $0x1d68] sm:$0xff] }
 0x694   :  { %8849 = vmatprep.subr.bf16.mxu1 %v16377_v47 }
 0x696   :  { %8686 = vmatpush1.bf16.msra.mxu0 %v16374_v62  ;;  %v16457_v62 = vcombine.high %v2559_v36, %v2567_v30 }
 0x697   :  { %8850 = vmatpush1.bf16.msra.mxu1 %v16376_v63  ;;  %8687 = vmatprep.subr.bf16.mxu0 %v16391_v1  ;;  %v2574_v63 = vld [vmem:[#allocation12 + $0x1c20] sm:$0xff] }
 0x698   :  { %8851 = vmatprep.subr.bf16.mxu1 %v16393_v2  ;;  %v2582_v1 = vld [vmem:[#allocation12 + $0x1c60] sm:$0xff]  ;;  %v2575_v2 = vld [vmem:[#allocation12 + $0x1c28] sm:$0xff] }
 0x699   :  { %v16471_v7 = vcombine.high %v2574_v63, %v2582_v1  ;;  %v16470_v14 = vcombine.low %v2574_v63, %v2582_v1  ;;  %v16472_v15 = vcombine.low %v2575_v2, %v2583_v33  ;;  %v2654_v1 = vld [vmem:[#allocation12 + $0x1ea0] sm:$0xff] }
 0x69a   :  { %8688 = vmatpush1.bf16.msra.mxu0 %v16390_v48  ;;  %v16473_v48 = vcombine.high %v2575_v2, %v2583_v33  ;;  %v2662_v2 = vld [vmem:[#allocation12 + $0x1ee0] sm:$0xff]  ;;  %v2655_v33 = vld [vmem:[#allocation12 + $0x1ea8] sm:$0xff] }
 0x69b   :  { %8852 = vmatpush1.bf16.msra.mxu1 %v16392_v8  ;;  %8689 = vmatprep.subr.bf16.mxu0 %v16407_v9  ;;  %v2590_v8 = vld [vmem:[#allocation12 + $0x1ca0] sm:$0xff] }
 0x69c   :  { %8853 = vmatprep.subr.bf16.mxu1 %v16409_v11  ;;  %v2598_v9 = vld [vmem:[#allocation12 + $0x1ce0] sm:$0xff]  ;;  %v2591_v11 = vld [vmem:[#allocation12 + $0x1ca8] sm:$0xff] }
 0x69d   :  { %v16487_v19 = vcombine.high %v2590_v8, %v2598_v9  ;;  %v16486_v23 = vcombine.low %v2590_v8, %v2598_v9  ;;  %v16488_v24 = vcombine.low %v2591_v11, %v2599_v13  ;;  %v2670_v9 = vld [vmem:[#allocation12 + $0x1f20] sm:$0xff] }
 0x69e   :  { %8690 = vmatpush1.bf16.msra.mxu0 %v16406_v20  ;;  %v16489_v20 = vcombine.high %v2591_v11, %v2599_v13  ;;  %v2678_v11 = vld [vmem:[#allocation12 + $0x1f60] sm:$0xff]  ;;  %v2671_v13 = vld [vmem:[#allocation12 + $0x1f28] sm:$0xff] }
 0x69f   :  { %8854 = vmatpush1.bf16.msra.mxu1 %v16408_v52  ;;  %8691 = vmatprep.subr.bf16.mxu0 %v16423_v55  ;;  %v2606_v52 = vld [vmem:[#allocation12 + $0x1d20] sm:$0xff] }
 0x6a0   :  { %v19896_v40 = vpop.f32.mrb[16].mxu0  ;;  %8855 = vmatprep.subr.bf16.mxu1 %v16425_v58  ;;  %v2614_v55 = vld [vmem:[#allocation12 + $0x1d60] sm:$0xff]  ;;  %v2607_v58 = vld [vmem:[#allocation12 + $0x1d28] sm:$0xff] }
 0x6a1   :  { %v19898_v34 = vpop.f32.mrb[16].mxu1  ;;  %v19900_v35 = vpop.f32.mrb[17].mxu0  ;;  %v16503_v25 = vcombine.high %v2606_v52, %v2614_v55  ;;  %v16502_v60 = vcombine.low %v2606_v52, %v2614_v55  ;;  %v16504_v36 = vcombine.low %v2607_v58, %v2615_v22  ;;  %v2686_v55 = vld [vmem:[#allocation12 + $0x1fa0] sm:$0xff] }
 0x6a2   :  { %v19902_v41 = vpop.f32.mrb[17].mxu1  ;;  %v8391_v43 = vpop.f32.mrb[18].mxu0  ;;  %8692 = vmatpush1.bf16.msra.mxu0 %v16422_v27  ;;  %v16505_v27 = vcombine.high %v2607_v58, %v2615_v22  ;;  %v2694_v58 = vld [vmem:[#allocation12 + $0x1fe0] sm:$0xff]  ;;  %v2687_v22 = vld [vmem:[#allocation12 + $0x1fa8] sm:$0xff] }
 0x6a3   :  { %v8555_v47 = vpop.f32.mrb[18].mxu1  ;;  %8856 = vmatpush1.bf16.msra.mxu1 %v16424_v28  ;;  %v8392_v51 = vpop.f32.mrb[19].mxu0  ;;  %8693 = vmatprep.subr.bf16.mxu0 %v16439_v39  ;;  %v2622_v28 = vld [vmem:[#allocation12 + $0x1da0] sm:$0xff] }
 0x6a4   :  { %v8556_v59 = vpop.f32.mrb[19].mxu1  ;;  %8857 = vmatprep.subr.bf16.mxu1 %v16441_v42  ;;  %v2630_v39 = vld [vmem:[#allocation12 + $0x1de0] sm:$0xff]  ;;  %v2623_v42 = vld [vmem:[#allocation12 + $0x1da8] sm:$0xff] }
 0x6a5   :  { %v16519_v30 = vcombine.high %v2622_v28, %v2630_v39  ;;  %v16521_v43 = vcombine.high %v2623_v42, %v2631_v44  ;;  %v2646_v47 = vld [vmem:[#allocation12 + $0x1e60] sm:$0xff]  ;;  %v2639_v51 = vld [vmem:[#allocation12 + $0x1e28] sm:$0xff]  ;;  %v16520_v59 = vcombine.low %v2623_v42, %v2631_v44  ;;  %v1688_v42 = vld [vmem:[#allocation12 + $0x70] sm:$0xff] }
 0x6a6   :  { %8694 = vmatpush1.bf16.msra.mxu0 %v16438_v46  ;;  %v2638_v46 = vld [vmem:[#allocation12 + $0x1e20] sm:$0xff]  ;;  %v1681_v44 = vld [vmem:[#allocation12 + $0x38] sm:$0xff] }
 0x6a7   :  { %8858 = vmatpush1.bf16.msra.mxu1 %v16440_v54  ;;  %8695 = vmatprep.subr.bf16.mxu0 %v16455_v57  ;;  %v2647_v54 = vld [vmem:[#allocation12 + $0x1e68] sm:$0xff]  ;;  %v16518_v57 = vcombine.low %v2622_v28, %v2630_v39  ;;  %v1680_v39 = vld [vmem:[#allocation12 + $0x30] sm:$0xff] }
 0x6a8   :  { %8859 = vmatprep.subr.bf16.mxu1 %v16457_v62  ;;  %v16535_v62 = vcombine.high %v2638_v46, %v2646_v47  ;;  %v16537_v63 = vcombine.high %v2639_v51, %v2647_v54 }
 0x6aa   :  { %8696 = vmatpush1.bf16.msra.mxu0 %v16454_v5  ;;  %v2663_v5 = vld [vmem:[#allocation12 + $0x1ee8] sm:$0xff] }
 0x6ab   :  { %8860 = vmatpush1.bf16.msra.mxu1 %v16456_v6  ;;  %8697 = vmatprep.subr.bf16.mxu0 %v16471_v7  ;;  %v16534_v6 = vcombine.low %v2638_v46, %v2646_v47  ;;  %v16536_v7 = vcombine.low %v2639_v51, %v2647_v54  ;;  %v16553_v8 = vcombine.high %v2655_v33, %v2663_v5  ;;  %v1696_v47 = vld [vmem:[#allocation12 + $0xb0] sm:$0xff] }
 0x6ac   :  { %8861 = vmatprep.subr.bf16.mxu1 %v16473_v48  ;;  %v16551_v48 = vcombine.high %v2654_v1, %v2662_v2  ;;  %v1704_v51 = vld [vmem:[#allocation12 + $0xf0] sm:$0xff]  ;;  %v15578_v54 = vcombine.low %v1680_v39, %v1688_v42 }
 0x6ae   :  { %8698 = vmatpush1.bf16.msra.mxu0 %v16470_v14  ;;  %v2679_v14 = vld [vmem:[#allocation12 + $0x1f68] sm:$0xff] }
 0x6af   :  { %8862 = vmatpush1.bf16.msra.mxu1 %v16472_v15  ;;  %8699 = vmatprep.subr.bf16.mxu0 %v16487_v19  ;;  %v16550_v15 = vcombine.low %v2654_v1, %v2662_v2  ;;  %v16552_v19 = vcombine.low %v2655_v33, %v2663_v5  ;;  %v16569_v52 = vcombine.high %v2671_v13, %v2679_v14  ;;  %v1712_v1 = vld [vmem:[#allocation12 + $0x130] sm:$0xff]  ;;  %v1713_v5 = vld [vmem:[#allocation12 + $0x138] sm:$0xff] }
 0x6b0   :  { %8863 = vmatprep.subr.bf16.mxu1 %v16489_v20  ;;  %v16567_v20 = vcombine.high %v2670_v9, %v2678_v11  ;;  %v1720_v2 = vld [vmem:[#allocation12 + $0x170] sm:$0xff] }
 0x6b2   :  { %8700 = vmatpush1.bf16.msra.mxu0 %v16486_v23  ;;  %v2695_v23 = vld [vmem:[#allocation12 + $0x1fe8] sm:$0xff] }
 0x6b3   :  { %8864 = vmatpush1.bf16.msra.mxu1 %v16488_v24  ;;  %8701 = vmatprep.subr.bf16.mxu0 %v16503_v25  ;;  %v16566_v24 = vcombine.low %v2670_v9, %v2678_v11  ;;  %v16568_v25 = vcombine.low %v2671_v13, %v2679_v14  ;;  %v16585_v28 = vcombine.high %v2687_v22, %v2695_v23  ;;  %v1728_v11 = vld [vmem:[#allocation12 + $0x1b0] sm:$0xff]  ;;  %v1729_v14 = vld [vmem:[#allocation12 + $0x1b8] sm:$0xff] }
 0x6b4   :  { %8865 = vmatprep.subr.bf16.mxu1 %v16505_v27  ;;  %v16583_v27 = vcombine.high %v2686_v55, %v2694_v58  ;;  %v1736_v13 = vld [vmem:[#allocation12 + $0x1f0] sm:$0xff] }
 0x6b6   :  { %8702 = vmatpush1.bf16.msra.mxu0 %v16502_v60  ;;  %v1689_v60 = vld [vmem:[#allocation12 + $0x78] sm:$0xff] }
 0x6b7   :  { %8866 = vmatpush1.bf16.msra.mxu1 %v16504_v36  ;;  %8703 = vmatprep.subr.bf16.mxu0 %v16519_v30  ;;  %v16582_v36 = vcombine.low %v2686_v55, %v2694_v58  ;;  %v16584_v30 = vcombine.low %v2687_v22, %v2695_v23  ;;  %v15581_v46 = vcombine.high %v1681_v44, %v1689_v60  ;;  %v1744_v58 = vld [vmem:[#allocation12 + $0x230] sm:$0xff]  ;;  %v1745_v23 = vld [vmem:[#allocation12 + $0x238] sm:$0xff] }
 0x6b8   :  { %8867 = vmatprep.subr.bf16.mxu1 %v16521_v43  ;;  %v15579_v43 = vcombine.high %v1680_v39, %v1688_v42  ;;  %v1752_v22 = vld [vmem:[#allocation12 + $0x270] sm:$0xff] }
 0x6b9   :  { %v1760_v39 = vld [vmem:[#allocation12 + $0x2b0] sm:$0xff] }
 0x6ba   :  { %8704 = vmatpush1.bf16.msra.mxu0 %v16518_v57  ;;  %v1697_v57 = vld [vmem:[#allocation12 + $0xb8] sm:$0xff]  ;;  %v1768_v42 = vld [vmem:[#allocation12 + $0x2f0] sm:$0xff] }
 0x6bb   :  { %8868 = vmatpush1.bf16.msra.mxu1 %v16520_v59  ;;  %8705 = vmatprep.subr.bf16.mxu0 %v16535_v62  ;;  %v1705_v59 = vld [vmem:[#allocation12 + $0xf8] sm:$0xff]  ;;  %v15580_v62 = vcombine.low %v1681_v44, %v1689_v60 }
 0x6bc   :  { %8869 = vmatprep.subr.bf16.mxu1 %v16537_v63  ;;  %v15595_v63 = vcombine.high %v1696_v47, %v1704_v51  ;;  %v15597_v33 = vcombine.high %v1697_v57, %v1705_v59  ;;  %v1761_v44 = vld [vmem:[#allocation12 + $0x2b8] sm:$0xff] }
 0x6bd   :  { %v1769_v60 = vld [vmem:[#allocation12 + $0x2f8] sm:$0xff] }
 0x6be   :  { %8706 = vmatpush1.bf16.msra.mxu0 %v16534_v6  ;;  %v1721_v6 = vld [vmem:[#allocation12 + $0x178] sm:$0xff] }
 0x6bf   :  { %8870 = vmatpush1.bf16.msra.mxu1 %v16536_v7  ;;  %8707 = vmatprep.subr.bf16.mxu0 %v16551_v48  ;;  %v15594_v7 = vcombine.low %v1696_v47, %v1704_v51  ;;  %v15596_v48 = vcombine.low %v1697_v57, %v1705_v59  ;;  %v15613_v9 = vcombine.high %v1713_v5, %v1721_v6  ;;  %v1776_v47 = vld [vmem:[#allocation12 + $0x330] sm:$0xff]  ;;  %v1785_v57 = vld [vmem:[#allocation12 + $0x378] sm:$0xff] }
 0x6c0   :  { %8871 = vmatprep.subr.bf16.mxu1 %v16553_v8  ;;  %v15611_v8 = vcombine.high %v1712_v1, %v1720_v2  ;;  %v1784_v51 = vld [vmem:[#allocation12 + $0x370] sm:$0xff]  ;;  %v15658_v59 = vcombine.low %v1760_v39, %v1768_v42 }
 0x6c2   :  { %8708 = vmatpush1.bf16.msra.mxu0 %v16550_v15  ;;  %v1737_v15 = vld [vmem:[#allocation12 + $0x1f8] sm:$0xff] }
 0x6c3   :  { %8872 = vmatpush1.bf16.msra.mxu1 %v16552_v19  ;;  %8709 = vmatprep.subr.bf16.mxu0 %v16567_v20  ;;  %v15610_v19 = vcombine.low %v1712_v1, %v1720_v2  ;;  %v15612_v20 = vcombine.low %v1713_v5, %v1721_v6  ;;  %v15629_v55 = vcombine.high %v1729_v14, %v1737_v15  ;;  %v1792_v2 = vld [vmem:[#allocation12 + $0x3b0] sm:$0xff]  ;;  %v1793_v5 = vld [vmem:[#allocation12 + $0x3b8] sm:$0xff] }
 0x6c4   :  { %8873 = vmatprep.subr.bf16.mxu1 %v16569_v52  ;;  %v15627_v52 = vcombine.high %v1728_v11, %v1736_v13  ;;  %v1801_v6 = vld [vmem:[#allocation12 + $0x3f8] sm:$0xff] }
 0x6c6   :  { %8710 = vmatpush1.bf16.msra.mxu0 %v16566_v24  ;;  %v1753_v24 = vld [vmem:[#allocation12 + $0x278] sm:$0xff] }
 0x6c7   :  { %8874 = vmatpush1.bf16.msra.mxu1 %v16568_v25  ;;  %8711 = vmatprep.subr.bf16.mxu0 %v16583_v27  ;;  %v15628_v25 = vcombine.low %v1729_v14, %v1737_v15  ;;  %v15643_v27 = vcombine.high %v1744_v58, %v1752_v22  ;;  %v1809_v14 = vld [vmem:[#allocation12 + $0x438] sm:$0xff] }
 0x6c8   :  { %8875 = vmatprep.subr.bf16.mxu1 %v16585_v28  ;;  %v15645_v28 = vcombine.high %v1745_v23, %v1753_v24  ;;  %v1817_v15 = vld [vmem:[#allocation12 + $0x478] sm:$0xff] }
 0x6ca   :  { %8712 = vmatpush1.bf16.msra.mxu0 %v16582_v36  ;;  %v15642_v36 = vcombine.low %v1744_v58, %v1752_v22  ;;  %v1824_v58 = vld [vmem:[#allocation12 + $0x4b0] sm:$0xff] }
 0x6cb   :  { %8876 = vmatpush1.bf16.msra.mxu1 %v16584_v30  ;;  %8886 = vmatprep.subr.bf16.mxu0 %v15579_v43  ;;  %v15644_v30 = vcombine.low %v1745_v23, %v1753_v24  ;;  %v15659_v43 = vcombine.high %v1760_v39, %v1768_v42  ;;  %v1832_v22 = vld [vmem:[#allocation12 + $0x4f0] sm:$0xff]  ;;  %v1825_v23 = vld [vmem:[#allocation12 + $0x4b8] sm:$0xff] }
 0x6cc   :  { %9050 = vmatprep.subr.bf16.mxu1 %v15581_v46  ;;  %v15661_v46 = vcombine.high %v1761_v44, %v1769_v60  ;;  %v1833_v24 = vld [vmem:[#allocation12 + $0x4f8] sm:$0xff]  ;;  %v1840_v39 = vld [vmem:[#allocation12 + $0x530] sm:$0xff] }
 0x6cd   :  { %8714 = vmatmul.mubr.bf16.vlgmr.msra.gmra.mrb[20].mxu0 %v19854_v26  ;;  %v1848_v42 = vld [vmem:[#allocation12 + $0x570] sm:$0xff] }
 0x6ce   :  { %8878 = vmatmul.mubr.bf16.vlgmr.msra.gmra.mrb[20].mxu1 %v19854_v26  ;;  %8887 = vmatpush1.bf16.msra.mxu0 %v15578_v54  ;;  %v1777_v54 = vld [vmem:[#allocation12 + $0x338] sm:$0xff] }
 0x6cf   :  { %8918 = vmatprep.mubr.bf16.mxu0 %v19786_v16  ;;  %9051 = vmatpush1.bf16.msra.mxu1 %v15580_v62  ;;  %v15660_v62 = vcombine.low %v1761_v44, %v1769_v60  ;;  %v15677_v1 = vcombine.high %v1777_v54, %v1785_v57  ;;  %v1841_v44 = vld [vmem:[#allocation12 + $0x538] sm:$0xff] }
 0x6d0   :  { %9082 = vmatprep.mubr.bf16.mxu1 %v19786_v16  ;;  %8888 = vmatprep.subr.bf16.mxu0 %v15595_v63  ;;  %v15626_v16 = vcombine.low %v1728_v11, %v1736_v13  ;;  %v15675_v63 = vcombine.high %v1776_v47, %v1784_v51  ;;  %v1808_v11 = vld [vmem:[#allocation12 + $0x430] sm:$0xff]  ;;  %v1849_v60 = vld [vmem:[#allocation12 + $0x578] sm:$0xff] }
 0x6d1   :  { %9052 = vmatprep.subr.bf16.mxu1 %v15597_v33  ;;  %v1800_v33 = vld [vmem:[#allocation12 + $0x3f0] sm:$0xff] }
 0x6d2   :  { %8889 = vmatpush1.bf16.msra.mxu0 %v15594_v7  ;;  %v15674_v7 = vcombine.low %v1776_v47, %v1784_v51  ;;  %v1816_v13 = vld [vmem:[#allocation12 + $0x470] sm:$0xff] }
 0x6d3   :  { %9053 = vmatpush1.bf16.msra.mxu1 %v15596_v48  ;;  %8890 = vmatprep.subr.bf16.mxu0 %v15611_v8  ;;  %v15676_v48 = vcombine.low %v1777_v54, %v1785_v57  ;;  %v15691_v8 = vcombine.high %v1792_v2, %v1800_v33  ;;  %v1856_v47 = vld [vmem:[#allocation12 + $0x5b0] sm:$0xff]  ;;  %v1857_v54 = vld [vmem:[#allocation12 + $0x5b8] sm:$0xff] }
 0x6d4   :  { %9054 = vmatprep.subr.bf16.mxu1 %v15613_v9  ;;  %v15693_v9 = vcombine.high %v1793_v5, %v1801_v6  ;;  %v1864_v51 = vld [vmem:[#allocation12 + $0x5f0] sm:$0xff]  ;;  %v1865_v57 = vld [vmem:[#allocation12 + $0x5f8] sm:$0xff] }
 0x6d6   :  { %8891 = vmatpush1.bf16.msra.mxu0 %v15610_v19  ;;  %v15690_v19 = vcombine.low %v1792_v2, %v1800_v33  ;;  %v1872_v2 = vld [vmem:[#allocation12 + $0x630] sm:$0xff] }
 0x6d7   :  { %9055 = vmatpush1.bf16.msra.mxu1 %v15612_v20  ;;  %8892 = vmatprep.subr.bf16.mxu0 %v15627_v52  ;;  %v15692_v20 = vcombine.low %v1793_v5, %v1801_v6  ;;  %v15707_v52 = vcombine.high %v1808_v11, %v1816_v13  ;;  %v1880_v33 = vld [vmem:[#allocation12 + $0x670] sm:$0xff]  ;;  %v1873_v5 = vld [vmem:[#allocation12 + $0x638] sm:$0xff] }
 0x6d8   :  { %9056 = vmatprep.subr.bf16.mxu1 %v15629_v55  ;;  %v15709_v55 = vcombine.high %v1809_v14, %v1817_v15  ;;  %v1881_v6 = vld [vmem:[#allocation12 + $0x678] sm:$0xff] }
 0x6da   :  { %8893 = vmatpush1.bf16.msra.mxu0 %v15626_v16  ;;  %v15706_v16 = vcombine.low %v1808_v11, %v1816_v13  ;;  %v1888_v11 = vld [vmem:[#allocation12 + $0x6b0] sm:$0xff] }
 0x6db   :  { %9057 = vmatpush1.bf16.msra.mxu1 %v15628_v25  ;;  %8894 = vmatprep.subr.bf16.mxu0 %v15643_v27  ;;  %v15708_v25 = vcombine.low %v1809_v14, %v1817_v15  ;;  %v15723_v27 = vcombine.high %v1824_v58, %v1832_v22  ;;  %v1896_v13 = vld [vmem:[#allocation12 + $0x6f0] sm:$0xff]  ;;  %v1889_v14 = vld [vmem:[#allocation12 + $0x6b8] sm:$0xff] }
 0x6dc   :  { %9058 = vmatprep.subr.bf16.mxu1 %v15645_v28  ;;  %v15725_v28 = vcombine.high %v1825_v23, %v1833_v24  ;;  %v1897_v15 = vld [vmem:[#allocation12 + $0x6f8] sm:$0xff] }
 0x6de   :  { %8895 = vmatpush1.bf16.msra.mxu0 %v15642_v36  ;;  %v15722_v36 = vcombine.low %v1824_v58, %v1832_v22  ;;  %v1904_v58 = vld [vmem:[#allocation12 + $0x730] sm:$0xff] }
 0x6df   :  { %9059 = vmatpush1.bf16.msra.mxu1 %v15644_v30  ;;  %8896 = vmatprep.subr.bf16.mxu0 %v15659_v43  ;;  %v15724_v30 = vcombine.low %v1825_v23, %v1833_v24  ;;  %v15739_v43 = vcombine.high %v1840_v39, %v1848_v42  ;;  %v1912_v22 = vld [vmem:[#allocation12 + $0x770] sm:$0xff]  ;;  %v1905_v23 = vld [vmem:[#allocation12 + $0x738] sm:$0xff] }
 0x6e0   :  { %9060 = vmatprep.subr.bf16.mxu1 %v15661_v46  ;;  %v15741_v46 = vcombine.high %v1841_v44, %v1849_v60  ;;  %v1913_v24 = vld [vmem:[#allocation12 + $0x778] sm:$0xff] }
 0x6e2   :  { %8897 = vmatpush1.bf16.msra.mxu0 %v15658_v59  ;;  %v15738_v59 = vcombine.low %v1840_v39, %v1848_v42  ;;  %v1920_v39 = vld [vmem:[#allocation12 + $0x7b0] sm:$0xff] }
 0x6e3   :  { %9061 = vmatpush1.bf16.msra.mxu1 %v15660_v62  ;;  %8898 = vmatprep.subr.bf16.mxu0 %v15675_v63  ;;  %v15740_v62 = vcombine.low %v1841_v44, %v1849_v60  ;;  %v15755_v63 = vcombine.high %v1856_v47, %v1864_v51  ;;  %v1928_v42 = vld [vmem:[#allocation12 + $0x7f0] sm:$0xff]  ;;  %v1921_v44 = vld [vmem:[#allocation12 + $0x7b8] sm:$0xff] }
 0x6e4   :  { %9062 = vmatprep.subr.bf16.mxu1 %v15677_v1  ;;  %v15757_v1 = vcombine.high %v1857_v54, %v1865_v57  ;;  %v1929_v60 = vld [vmem:[#allocation12 + $0x7f8] sm:$0xff] }
 0x6e6   :  { %8899 = vmatpush1.bf16.msra.mxu0 %v15674_v7  ;;  %v15754_v7 = vcombine.low %v1856_v47, %v1864_v51  ;;  %v1936_v47 = vld [vmem:[#allocation12 + $0x830] sm:$0xff] }
 0x6e7   :  { %9063 = vmatpush1.bf16.msra.mxu1 %v15676_v48  ;;  %8900 = vmatprep.subr.bf16.mxu0 %v15691_v8  ;;  %v15756_v48 = vcombine.low %v1857_v54, %v1865_v57  ;;  %v15771_v8 = vcombine.high %v1872_v2, %v1880_v33  ;;  %v1944_v51 = vld [vmem:[#allocation12 + $0x870] sm:$0xff]  ;;  %v1937_v54 = vld [vmem:[#allocation12 + $0x838] sm:$0xff] }
 0x6e8   :  { %9064 = vmatprep.subr.bf16.mxu1 %v15693_v9  ;;  %v15773_v9 = vcombine.high %v1873_v5, %v1881_v6  ;;  %v1945_v57 = vld [vmem:[#allocation12 + $0x878] sm:$0xff] }
 0x6ea   :  { %8901 = vmatpush1.bf16.msra.mxu0 %v15690_v19  ;;  %v15770_v19 = vcombine.low %v1872_v2, %v1880_v33  ;;  %v1952_v2 = vld [vmem:[#allocation12 + $0x8b0] sm:$0xff] }
 0x6eb   :  { %9065 = vmatpush1.bf16.msra.mxu1 %v15692_v20  ;;  %8902 = vmatprep.subr.bf16.mxu0 %v15707_v52  ;;  %v15772_v20 = vcombine.low %v1873_v5, %v1881_v6  ;;  %v15787_v52 = vcombine.high %v1888_v11, %v1896_v13  ;;  %v1960_v33 = vld [vmem:[#allocation12 + $0x8f0] sm:$0xff]  ;;  %v15834_v5 = vcombine.low %v1936_v47, %v1944_v51  ;;  %v1953_v6 = vld [vmem:[#allocation12 + $0x8b8] sm:$0xff] }
 0x6ec   :  { %9066 = vmatprep.subr.bf16.mxu1 %v15709_v55  ;;  %v15789_v55 = vcombine.high %v1889_v14, %v1897_v15 }
 0x6ee   :  { %8903 = vmatpush1.bf16.msra.mxu0 %v15706_v16  ;;  %v15786_v16 = vcombine.low %v1888_v11, %v1896_v13  ;;  %v1976_v11 = vld [vmem:[#allocation12 + $0x970] sm:$0xff] }
 0x6ef   :  { %9067 = vmatpush1.bf16.msra.mxu1 %v15708_v25  ;;  %8904 = vmatprep.subr.bf16.mxu0 %v15723_v27  ;;  %v15788_v25 = vcombine.low %v1889_v14, %v1897_v15  ;;  %v15803_v27 = vcombine.high %v1904_v58, %v1912_v22  ;;  %v1969_v14 = vld [vmem:[#allocation12 + $0x938] sm:$0xff] }
 0x6f0   :  { %9068 = vmatprep.subr.bf16.mxu1 %v15725_v28  ;;  %v15805_v28 = vcombine.high %v1905_v23, %v1913_v24  ;;  %v1977_v15 = vld [vmem:[#allocation12 + $0x978] sm:$0xff] }
 0x6f2   :  { %8905 = vmatpush1.bf16.msra.mxu0 %v15722_v36  ;;  %v15802_v36 = vcombine.low %v1904_v58, %v1912_v22  ;;  %v1984_v58 = vld [vmem:[#allocation12 + $0x9b0] sm:$0xff] }
 0x6f3   :  { %9069 = vmatpush1.bf16.msra.mxu1 %v15724_v30  ;;  %8906 = vmatprep.subr.bf16.mxu0 %v15739_v43  ;;  %v15804_v30 = vcombine.low %v1905_v23, %v1913_v24  ;;  %v15819_v43 = vcombine.high %v1920_v39, %v1928_v42  ;;  %v1992_v22 = vld [vmem:[#allocation12 + $0x9f0] sm:$0xff]  ;;  %v1985_v23 = vld [vmem:[#allocation12 + $0x9b8] sm:$0xff] }
 0x6f4   :  { %9070 = vmatprep.subr.bf16.mxu1 %v15741_v46  ;;  %v15821_v46 = vcombine.high %v1921_v44, %v1929_v60  ;;  %v1993_v24 = vld [vmem:[#allocation12 + $0x9f8] sm:$0xff] }
 0x6f6   :  { %8907 = vmatpush1.bf16.msra.mxu0 %v15738_v59  ;;  %v15818_v59 = vcombine.low %v1920_v39, %v1928_v42  ;;  %v2008_v39 = vld [vmem:[#allocation12 + $0xa70] sm:$0xff]  ;;  %v2001_v42 = vld [vmem:[#allocation12 + $0xa38] sm:$0xff] }
 0x6f7   :  { %9071 = vmatpush1.bf16.msra.mxu1 %v15740_v62  ;;  %8908 = vmatprep.subr.bf16.mxu0 %v15755_v63  ;;  %v15820_v62 = vcombine.low %v1921_v44, %v1929_v60  ;;  %v15835_v63 = vcombine.high %v1936_v47, %v1944_v51  ;;  %v2009_v44 = vld [vmem:[#allocation12 + $0xa78] sm:$0xff]  ;;  %v15884_v60 = vcombine.low %v1985_v23, %v1993_v24 }
 0x6f8   :  { %9072 = vmatprep.subr.bf16.mxu1 %v15757_v1  ;;  %v15837_v1 = vcombine.high %v1937_v54, %v1945_v57  ;;  %v2017_v47 = vld [vmem:[#allocation12 + $0xab8] sm:$0xff] }
 0x6f9   :  { %v2025_v51 = vld [vmem:[#allocation12 + $0xaf8] sm:$0xff] }
 0x6fa   :  { %8909 = vmatpush1.bf16.msra.mxu0 %v15754_v7  ;;  %v1961_v7 = vld [vmem:[#allocation12 + $0x8f8] sm:$0xff] }
 0x6fb   :  { %9073 = vmatpush1.bf16.msra.mxu1 %v15756_v48  ;;  %8910 = vmatprep.subr.bf16.mxu0 %v15771_v8  ;;  %v15836_v48 = vcombine.low %v1937_v54, %v1945_v57  ;;  %v15851_v8 = vcombine.high %v1952_v2, %v1960_v33  ;;  %v15853_v13 = vcombine.high %v1953_v6, %v1961_v7 }
 0x6fc   :  { %9074 = vmatprep.subr.bf16.mxu1 %v15773_v9  ;;  %v1968_v9 = vld [vmem:[#allocation12 + $0x930] sm:$0xff]  ;;  %v15900_v57 = vcombine.low %v2001_v42, %v2009_v44 }
 0x6fe   :  { %8911 = vmatpush1.bf16.msra.mxu0 %v15770_v19  ;;  %v15850_v19 = vcombine.low %v1952_v2, %v1960_v33  ;;  %v2033_v2 = vld [vmem:[#allocation12 + $0xb38] sm:$0xff] }
 0x6ff   :  { %9075 = vmatpush1.bf16.msra.mxu1 %v15772_v20  ;;  %8912 = vmatprep.subr.bf16.mxu0 %v15787_v52  ;;  %v15852_v20 = vcombine.low %v1953_v6, %v1961_v7  ;;  %v15867_v52 = vcombine.high %v1968_v9, %v1976_v11  ;;  %v2041_v33 = vld [vmem:[#allocation12 + $0xb78] sm:$0xff]  ;;  %v15916_v6 = vcombine.low %v2017_v47, %v2025_v51 }
 0x700   :  { %9076 = vmatprep.subr.bf16.mxu1 %v15789_v55  ;;  %v15869_v55 = vcombine.high %v1969_v14, %v1977_v15 }
 0x702   :  { %8913 = vmatpush1.bf16.msra.mxu0 %v15786_v16  ;;  %v15866_v16 = vcombine.low %v1968_v9, %v1976_v11  ;;  %v2056_v9 = vld [vmem:[#allocation12 + $0xbf0] sm:$0xff]  ;;  %v2049_v11 = vld [vmem:[#allocation12 + $0xbb8] sm:$0xff] }
 0x703   :  { %9077 = vmatpush1.bf16.msra.mxu1 %v15788_v25  ;;  %8914 = vmatprep.subr.bf16.mxu0 %v15803_v27  ;;  %v15883_v25 = vcombine.high %v1984_v58, %v1992_v22  ;;  %v15885_v27 = vcombine.high %v1985_v23, %v1993_v24 }
 0x704   :  { %9078 = vmatprep.subr.bf16.mxu1 %v15805_v28  ;;  %v2000_v28 = vld [vmem:[#allocation12 + $0xa30] sm:$0xff] }
 0x705   :  { %v15898_v54 = vcombine.low %v2000_v28, %v2008_v39 }
 0x706   :  { %8915 = vmatpush1.bf16.msra.mxu0 %v15802_v36  ;;  %v15899_v36 = vcombine.high %v2000_v28, %v2008_v39  ;;  %v2081_v28 = vld [vmem:[#allocation12 + $0xcb8] sm:$0xff] }
 0x707   :  { %9079 = vmatpush1.bf16.msra.mxu1 %v15804_v30  ;;  %8916 = vmatprep.subr.bf16.mxu0 %v15819_v43  ;;  %v15901_v30 = vcombine.high %v2001_v42, %v2009_v44  ;;  %v2016_v43 = vld [vmem:[#allocation12 + $0xab0] sm:$0xff]  ;;  %v2089_v39 = vld [vmem:[#allocation12 + $0xcf8] sm:$0xff] }
 0x708   :  { %9080 = vmatprep.subr.bf16.mxu1 %v15821_v46  ;;  %v2024_v46 = vld [vmem:[#allocation12 + $0xaf0] sm:$0xff] }
 0x70a   :  { %8917 = vmatpush1.bf16.msra.mxu0 %v15818_v59  ;;  %v15915_v59 = vcombine.high %v2016_v43, %v2024_v46 }
 0x70b   :  { %9081 = vmatpush1.bf16.msra.mxu1 %v15820_v62  ;;  %8927 = vmatprep.subr.bf16.mxu0 %v15835_v63  ;;  %v15917_v62 = vcombine.high %v2017_v47, %v2025_v51  ;;  %v2032_v63 = vld [vmem:[#allocation12 + $0xb30] sm:$0xff]  ;;  %v15980_v51 = vcombine.low %v2081_v28, %v2089_v39 }
 0x70c   :  { %9091 = vmatprep.subr.bf16.mxu1 %v15837_v1  ;;  %v2040_v1 = vld [vmem:[#allocation12 + $0xb70] sm:$0xff] }
 0x70d   :  { %8919 = vmatmul.mubr.bf16.vlgmr.msra.gmra.mrb[24].mxu0 %v19788_v17  ;;  %v15931_v7 = vcombine.high %v2032_v63, %v2040_v1 }
 0x70e   :  { %9083 = vmatmul.mubr.bf16.vlgmr.msra.gmra.mrb[24].mxu1 %v19788_v17  ;;  %8928 = vmatpush1.bf16.msra.mxu0 %v15834_v5  ;;  %v15868_v17 = vcombine.low %v1969_v14, %v1977_v15  ;;  %v15914_v5 = vcombine.low %v2016_v43, %v2024_v46  ;;  %v15930_v14 = vcombine.low %v2032_v63, %v2040_v1  ;;  %v2097_v43 = vld [vmem:[#allocation12 + $0xd38] sm:$0xff] }
 0x70f   :  { %8959 = vmatprep.mubr.bf16.mxu0 %v19792_v21  ;;  %9092 = vmatpush1.bf16.msra.mxu1 %v15836_v48  ;;  %v15933_v48 = vcombine.high %v2033_v2, %v2041_v33  ;;  %v15932_v15 = vcombine.low %v2033_v2, %v2041_v33  ;;  %v2105_v46 = vld [vmem:[#allocation12 + $0xd78] sm:$0xff] }
 0x710   :  { %9123 = vmatprep.mubr.bf16.mxu1 %v19792_v21  ;;  %8929 = vmatprep.subr.bf16.mxu0 %v15851_v8  ;;  %v15882_v21 = vcombine.low %v1984_v58, %v1992_v22  ;;  %v2048_v8 = vld [vmem:[#allocation12 + $0xbb0] sm:$0xff]  ;;  %v2065_v58 = vld [vmem:[#allocation12 + $0xc38] sm:$0xff]  ;;  %v15996_v33 = vcombine.low %v2097_v43, %v2105_v46 }
 0x711   :  { %9093 = vmatprep.subr.bf16.mxu1 %v15853_v13  ;;  %v2057_v13 = vld [vmem:[#allocation12 + $0xbf8] sm:$0xff]  ;;  %v15946_v23 = vcombine.low %v2048_v8, %v2056_v9 }
 0x712   :  { %8930 = vmatpush1.bf16.msra.mxu0 %v15850_v19  ;;  %v15947_v19 = vcombine.high %v2048_v8, %v2056_v9  ;;  %v2073_v22 = vld [vmem:[#allocation12 + $0xc78] sm:$0xff]  ;;  %v15948_v24 = vcombine.low %v2049_v11, %v2057_v13 }
 0x713   :  { %9094 = vmatpush1.bf16.msra.mxu1 %v15852_v20  ;;  %8931 = vmatprep.subr.bf16.mxu0 %v15867_v52  ;;  %v15949_v20 = vcombine.high %v2049_v11, %v2057_v13  ;;  %v2064_v52 = vld [vmem:[#allocation12 + $0xc30] sm:$0xff]  ;;  %v15964_v44 = vcombine.low %v2065_v58, %v2073_v22  ;;  %v2113_v63 = vld [vmem:[#allocation12 + $0xdb8] sm:$0xff] }
 0x714   :  { %9095 = vmatprep.subr.bf16.mxu1 %v15869_v55  ;;  %v2072_v55 = vld [vmem:[#allocation12 + $0xc70] sm:$0xff]  ;;  %v2121_v1 = vld [vmem:[#allocation12 + $0xdf8] sm:$0xff] }
 0x715   :  { %v15962_v42 = vcombine.low %v2064_v52, %v2072_v55  ;;  %v2129_v8 = vld [vmem:[#allocation12 + $0xe38] sm:$0xff]  ;;  %v16012_v13 = vcombine.low %v2113_v63, %v2121_v1 }
 0x716   :  { %8932 = vmatpush1.bf16.msra.mxu0 %v15866_v16  ;;  %v15963_v16 = vcombine.high %v2064_v52, %v2072_v55  ;;  %v2137_v9 = vld [vmem:[#allocation12 + $0xe78] sm:$0xff] }
 0x717   :  { %9096 = vmatpush1.bf16.msra.mxu1 %v15868_v17  ;;  %8933 = vmatprep.subr.bf16.mxu0 %v15883_v25  ;;  %v15965_v17 = vcombine.high %v2065_v58, %v2073_v22  ;;  %v2080_v25 = vld [vmem:[#allocation12 + $0xcb0] sm:$0xff]  ;;  %v2145_v52 = vld [vmem:[#allocation12 + $0xeb8] sm:$0xff]  ;;  %v16028_v22 = vcombine.low %v2129_v8, %v2137_v9 }
 0x718   :  { %9097 = vmatprep.subr.bf16.mxu1 %v15885_v27  ;;  %v2088_v27 = vld [vmem:[#allocation12 + $0xcf0] sm:$0xff]  ;;  %v2153_v55 = vld [vmem:[#allocation12 + $0xef8] sm:$0xff] }
 0x719   :  { %v15978_v47 = vcombine.low %v2080_v25, %v2088_v27 }
 0x71a   :  { %8934 = vmatpush1.bf16.msra.mxu0 %v15882_v21  ;;  %v15979_v21 = vcombine.high %v2080_v25, %v2088_v27  ;;  %v2161_v25 = vld [vmem:[#allocation12 + $0xf38] sm:$0xff] }
 0x71b   :  { %9098 = vmatpush1.bf16.msra.mxu1 %v15884_v60  ;;  %8935 = vmatprep.subr.bf16.mxu0 %v15899_v36  ;;  %v15981_v60 = vcombine.high %v2081_v28, %v2089_v39  ;;  %v2096_v36 = vld [vmem:[#allocation12 + $0xd30] sm:$0xff]  ;;  %v2169_v27 = vld [vmem:[#allocation12 + $0xf78] sm:$0xff]  ;;  %v16044_v39 = vcombine.low %v2145_v52, %v2153_v55 }
 0x71c   :  { %9099 = vmatprep.subr.bf16.mxu1 %v15901_v30  ;;  %v2104_v30 = vld [vmem:[#allocation12 + $0xd70] sm:$0xff] }
 0x71d   :  { %v15994_v2 = vcombine.low %v2096_v36, %v2104_v30 }
 0x71e   :  { %8936 = vmatpush1.bf16.msra.mxu0 %v15898_v54  ;;  %v15995_v54 = vcombine.high %v2096_v36, %v2104_v30  ;;  %v2177_v36 = vld [vmem:[#allocation12 + $0xfb8] sm:$0xff] }
 0x71f   :  { %9100 = vmatpush1.bf16.msra.mxu1 %v15900_v57  ;;  %8937 = vmatprep.subr.bf16.mxu0 %v15915_v59  ;;  %v15997_v57 = vcombine.high %v2097_v43, %v2105_v46  ;;  %v2112_v59 = vld [vmem:[#allocation12 + $0xdb0] sm:$0xff]  ;;  %v2185_v30 = vld [vmem:[#allocation12 + $0xff8] sm:$0xff]  ;;  %v16060_v46 = vcombine.low %v2161_v25, %v2169_v27 }
 0x720   :  { %9101 = vmatprep.subr.bf16.mxu1 %v15917_v62  ;;  %v2120_v62 = vld [vmem:[#allocation12 + $0xdf0] sm:$0xff] }
 0x721   :  { %v16010_v11 = vcombine.low %v2112_v59, %v2120_v62 }
 0x722   :  { %8938 = vmatpush1.bf16.msra.mxu0 %v15914_v5  ;;  %v16011_v5 = vcombine.high %v2112_v59, %v2120_v62  ;;  %v2193_v59 = vld [vmem:[#allocation12 + $0x1038] sm:$0xff] }
 0x723   :  { %9102 = vmatpush1.bf16.msra.mxu1 %v15916_v6  ;;  %8939 = vmatprep.subr.bf16.mxu0 %v15931_v7  ;;  %v16013_v6 = vcombine.high %v2113_v63, %v2121_v1  ;;  %v2128_v7 = vld [vmem:[#allocation12 + $0xe30] sm:$0xff]  ;;  %v2201_v62 = vld [vmem:[#allocation12 + $0x1078] sm:$0xff]  ;;  %v16076_v1 = vcombine.low %v2177_v36, %v2185_v30 }
 0x724   :  { %9103 = vmatprep.subr.bf16.mxu1 %v15933_v48  ;;  %v2136_v48 = vld [vmem:[#allocation12 + $0xe70] sm:$0xff] }
 0x725   :  { %v16026_v58 = vcombine.low %v2128_v7, %v2136_v48 }
 0x726   :  { %8940 = vmatpush1.bf16.msra.mxu0 %v15930_v14  ;;  %v16027_v14 = vcombine.high %v2128_v7, %v2136_v48  ;;  %v2209_v48 = vld [vmem:[#allocation12 + $0x10b8] sm:$0xff] }
 0x727   :  { %9104 = vmatpush1.bf16.msra.mxu1 %v15932_v15  ;;  %8941 = vmatprep.subr.bf16.mxu0 %v15947_v19  ;;  %v16029_v15 = vcombine.high %v2129_v8, %v2137_v9  ;;  %v2144_v19 = vld [vmem:[#allocation12 + $0xeb0] sm:$0xff]  ;;  %v2217_v8 = vld [vmem:[#allocation12 + $0x10f8] sm:$0xff]  ;;  %v16092_v9 = vcombine.low %v2193_v59, %v2201_v62 }
 0x728   :  { %9105 = vmatprep.subr.bf16.mxu1 %v15949_v20  ;;  %v2152_v20 = vld [vmem:[#allocation12 + $0xef0] sm:$0xff] }
 0x729   :  { %v16042_v28 = vcombine.low %v2144_v19, %v2152_v20 }
 0x72a   :  { %8942 = vmatpush1.bf16.msra.mxu0 %v15946_v23  ;;  %v16043_v23 = vcombine.high %v2144_v19, %v2152_v20  ;;  %v2225_v19 = vld [vmem:[#allocation12 + $0x1138] sm:$0xff] }
 0x72b   :  { %9106 = vmatpush1.bf16.msra.mxu1 %v15948_v24  ;;  %8943 = vmatprep.subr.bf16.mxu0 %v15963_v16  ;;  %v16045_v24 = vcombine.high %v2145_v52, %v2153_v55  ;;  %v2160_v16 = vld [vmem:[#allocation12 + $0xf30] sm:$0xff]  ;;  %v2233_v20 = vld [vmem:[#allocation12 + $0x1178] sm:$0xff]  ;;  %v16108_v55 = vcombine.low %v2209_v48, %v2217_v8 }
 0x72c   :  { %9107 = vmatprep.subr.bf16.mxu1 %v15965_v17  ;;  %v2168_v17 = vld [vmem:[#allocation12 + $0xf70] sm:$0xff] }
 0x72d   :  { %v16058_v43 = vcombine.low %v2160_v16, %v2168_v17 }
 0x72e   :  { %8944 = vmatpush1.bf16.msra.mxu0 %v15962_v42  ;;  %v16059_v42 = vcombine.high %v2160_v16, %v2168_v17  ;;  %v2241_v16 = vld [vmem:[#allocation12 + $0x11b8] sm:$0xff] }
 0x72f   :  { %9108 = vmatpush1.bf16.msra.mxu1 %v15964_v44  ;;  %8945 = vmatprep.subr.bf16.mxu0 %v15979_v21  ;;  %v16061_v44 = vcombine.high %v2161_v25, %v2169_v27  ;;  %v2176_v21 = vld [vmem:[#allocation12 + $0xfb0] sm:$0xff]  ;;  %v2249_v17 = vld [vmem:[#allocation12 + $0x11f8] sm:$0xff] }
 0x730   :  { %9109 = vmatprep.subr.bf16.mxu1 %v15981_v60  ;;  %v2184_v60 = vld [vmem:[#allocation12 + $0xff0] sm:$0xff] }
 0x731   :  { %v16074_v63 = vcombine.low %v2176_v21, %v2184_v60 }
 0x732   :  { %8946 = vmatpush1.bf16.msra.mxu0 %v15978_v47  ;;  %v16075_v47 = vcombine.high %v2176_v21, %v2184_v60  ;;  %v2265_v21 = vld [vmem:[#allocation12 + $0x1278] sm:$0xff]  ;;  %v16140_v60 = vcombine.low %v2241_v16, %v2249_v17 }
 0x733   :  { %9110 = vmatpush1.bf16.msra.mxu1 %v15980_v51  ;;  %8947 = vmatprep.subr.bf16.mxu0 %v15995_v54  ;;  %v16077_v51 = vcombine.high %v2177_v36, %v2185_v30  ;;  %v2192_v54 = vld [vmem:[#allocation12 + $0x1030] sm:$0xff] }
 0x734   :  { %9111 = vmatprep.subr.bf16.mxu1 %v15997_v57  ;;  %v2200_v57 = vld [vmem:[#allocation12 + $0x1070] sm:$0xff] }
 0x735   :  { %v16090_v7 = vcombine.low %v2192_v54, %v2200_v57 }
 0x736   :  { %8948 = vmatpush1.bf16.msra.mxu0 %v15994_v2  ;;  %v16091_v2 = vcombine.high %v2192_v54, %v2200_v57 }
 0x737   :  { %9112 = vmatpush1.bf16.msra.mxu1 %v15996_v33  ;;  %8949 = vmatprep.subr.bf16.mxu0 %v16011_v5  ;;  %v16093_v33 = vcombine.high %v2193_v59, %v2201_v62  ;;  %v2208_v5 = vld [vmem:[#allocation12 + $0x10b0] sm:$0xff] }
 0x738   :  { %9113 = vmatprep.subr.bf16.mxu1 %v16013_v6  ;;  %v2216_v6 = vld [vmem:[#allocation12 + $0x10f0] sm:$0xff] }
 0x739   :  { %v16106_v52 = vcombine.low %v2208_v5, %v2216_v6 }
 0x73a   :  { %8950 = vmatpush1.bf16.msra.mxu0 %v16010_v11  ;;  %v16107_v11 = vcombine.high %v2208_v5, %v2216_v6 }
 0x73b   :  { %9114 = vmatpush1.bf16.msra.mxu1 %v16012_v13  ;;  %8951 = vmatprep.subr.bf16.mxu0 %v16027_v14  ;;  %v2224_v13 = vld [vmem:[#allocation12 + $0x1130] sm:$0xff] }
 0x73c   :  { %9115 = vmatprep.subr.bf16.mxu1 %v16029_v15  ;;  %v2232_v14 = vld [vmem:[#allocation12 + $0x1170] sm:$0xff]  ;;  %v16109_v15 = vcombine.high %v2209_v48, %v2217_v8 }
 0x73d   :  { %v16122_v25 = vcombine.low %v2224_v13, %v2232_v14  ;;  %v2304_v8 = vld [vmem:[#allocation12 + $0x13b0] sm:$0xff] }
 0x73e   :  { %8952 = vmatpush1.bf16.msra.mxu0 %v16026_v58  ;;  %v16123_v58 = vcombine.high %v2224_v13, %v2232_v14  ;;  %v2313_v13 = vld [vmem:[#allocation12 + $0x13f8] sm:$0xff] }
 0x73f   :  { %9116 = vmatpush1.bf16.msra.mxu1 %v16028_v22  ;;  %8953 = vmatprep.subr.bf16.mxu0 %v16043_v23  ;;  %v16125_v22 = vcombine.high %v2225_v19, %v2233_v20  ;;  %v2240_v23 = vld [vmem:[#allocation12 + $0x11b0] sm:$0xff] }
 0x740   :  { %9117 = vmatprep.subr.bf16.mxu1 %v16045_v24  ;;  %v2248_v24 = vld [vmem:[#allocation12 + $0x11f0] sm:$0xff] }
 0x741   :  { %v16139_v27 = vcombine.high %v2240_v23, %v2248_v24 }
 0x742   :  { %8954 = vmatpush1.bf16.msra.mxu0 %v16042_v28  ;;  %v16141_v28 = vcombine.high %v2241_v16, %v2249_v17 }
 0x743   :  { %9118 = vmatpush1.bf16.msra.mxu1 %v16044_v39  ;;  %8955 = vmatprep.subr.bf16.mxu0 %v16059_v42  ;;  %v2256_v39 = vld [vmem:[#allocation12 + $0x1230] sm:$0xff] }
 0x744   :  { %9119 = vmatprep.subr.bf16.mxu1 %v16061_v44  ;;  %v2264_v42 = vld [vmem:[#allocation12 + $0x1270] sm:$0xff]  ;;  %v2257_v44 = vld [vmem:[#allocation12 + $0x1238] sm:$0xff] }
 0x745   :  { %v16155_v36 = vcombine.high %v2256_v39, %v2264_v42  ;;  %v16157_v30 = vcombine.high %v2257_v44, %v2265_v21  ;;  %v16154_v54 = vcombine.low %v2256_v39, %v2264_v42  ;;  %v16156_v57 = vcombine.low %v2257_v44, %v2265_v21 }
 0x746   :  { %8956 = vmatpush1.bf16.msra.mxu0 %v16058_v43  ;;  %v2272_v43 = vld [vmem:[#allocation12 + $0x12b0] sm:$0xff] }
 0x747   :  { %9120 = vmatpush1.bf16.msra.mxu1 %v16060_v46  ;;  %8957 = vmatprep.subr.bf16.mxu0 %v16075_v47  ;;  %v2280_v46 = vld [vmem:[#allocation12 + $0x12f0] sm:$0xff]  ;;  %v2273_v47 = vld [vmem:[#allocation12 + $0x12b8] sm:$0xff] }
 0x748   :  { %9121 = vmatprep.subr.bf16.mxu1 %v16077_v51  ;;  %v2281_v51 = vld [vmem:[#allocation12 + $0x12f8] sm:$0xff]  ;;  %v16171_v59 = vcombine.high %v2272_v43, %v2280_v46  ;;  %v16170_v5 = vcombine.low %v2272_v43, %v2280_v46 }
 0x749   :  { %v16173_v62 = vcombine.high %v2273_v47, %v2281_v51  ;;  %v16172_v6 = vcombine.low %v2273_v47, %v2281_v51 }
 0x74a   :  { %8958 = vmatpush1.bf16.msra.mxu0 %v16074_v63  ;;  %v2288_v63 = vld [vmem:[#allocation12 + $0x1330] sm:$0xff] }
 0x74b   :  { %9122 = vmatpush1.bf16.msra.mxu1 %v16076_v1  ;;  %8968 = vmatprep.subr.bf16.mxu0 %v16091_v2  ;;  %v2296_v1 = vld [vmem:[#allocation12 + $0x1370] sm:$0xff]  ;;  %v2289_v2 = vld [vmem:[#allocation12 + $0x1338] sm:$0xff] }
 0x74c   :  { %9132 = vmatprep.subr.bf16.mxu1 %v16093_v33  ;;  %v2297_v33 = vld [vmem:[#allocation12 + $0x1378] sm:$0xff]  ;;  %v16186_v14 = vcombine.low %v2288_v63, %v2296_v1 }
 0x74d   :  { %8960 = vmatmul.mubr.bf16.vlgmr.msra.gmra.mrb[24].mxu0 %v19821_v3  ;;  %v16189_v48 = vcombine.high %v2289_v2, %v2297_v33 }
 0x74e   :  { %9124 = vmatmul.mubr.bf16.vlgmr.msra.gmra.mrb[24].mxu1 %v19821_v3  ;;  %8969 = vmatpush1.bf16.msra.mxu0 %v16090_v7  ;;  %v16124_v3 = vcombine.low %v2225_v19, %v2233_v20  ;;  %v16187_v7 = vcombine.high %v2288_v63, %v2296_v1 }
 0x74f   :  { %9000 = vmatprep.mubr.bf16.mxu0 %v19823_v56  ;;  %9133 = vmatpush1.bf16.msra.mxu1 %v16092_v9  ;;  %v2312_v9 = vld [vmem:[#allocation12 + $0x13f0] sm:$0xff] }
 0x750   :  { %9164 = vmatprep.mubr.bf16.mxu1 %v19823_v56  ;;  %8970 = vmatprep.subr.bf16.mxu0 %v16107_v11  ;;  %v16138_v56 = vcombine.low %v2240_v23, %v2248_v24  ;;  %v2305_v11 = vld [vmem:[#allocation12 + $0x13b8] sm:$0xff]  ;;  %v16203_v19 = vcombine.high %v2304_v8, %v2312_v9  ;;  %v16202_v23 = vcombine.low %v2304_v8, %v2312_v9 }
 0x751   :  { %9134 = vmatprep.subr.bf16.mxu1 %v16109_v15  ;;  %v16188_v15 = vcombine.low %v2289_v2, %v2297_v33  ;;  %v16205_v20 = vcombine.high %v2305_v11, %v2313_v13  ;;  %v16204_v24 = vcombine.low %v2305_v11, %v2313_v13 }
 0x752   :  { %8971 = vmatpush1.bf16.msra.mxu0 %v16106_v52  ;;  %v2320_v52 = vld [vmem:[#allocation12 + $0x1430] sm:$0xff] }
 0x753   :  { %9135 = vmatpush1.bf16.msra.mxu1 %v16108_v55  ;;  %8972 = vmatprep.subr.bf16.mxu0 %v16123_v58  ;;  %v2328_v55 = vld [vmem:[#allocation12 + $0x1470] sm:$0xff]  ;;  %v2321_v58 = vld [vmem:[#allocation12 + $0x1438] sm:$0xff] }
 0x754   :  { %9136 = vmatprep.subr.bf16.mxu1 %v16125_v22  ;;  %v2329_v22 = vld [vmem:[#allocation12 + $0x1478] sm:$0xff]  ;;  %v16219_v16 = vcombine.high %v2320_v52, %v2328_v55  ;;  %v16218_v39 = vcombine.low %v2320_v52, %v2328_v55 }
 0x755   :  { %v16221_v17 = vcombine.high %v2321_v58, %v2329_v22  ;;  %v16220_v42 = vcombine.low %v2321_v58, %v2329_v22 }
 0x756   :  { %8973 = vmatpush1.bf16.msra.mxu0 %v16122_v25  ;;  %v2336_v25 = vld [vmem:[#allocation12 + $0x14b0] sm:$0xff] }
 0x757   :  { %9137 = vmatpush1.bf16.msra.mxu1 %v16124_v3  ;;  %8974 = vmatprep.subr.bf16.mxu0 %v16139_v27  ;;  %v2344_v3 = vld [vmem:[#allocation12 + $0x14f0] sm:$0xff]  ;;  %v2337_v27 = vld [vmem:[#allocation12 + $0x14b8] sm:$0xff] }
 0x758   :  { %9138 = vmatprep.subr.bf16.mxu1 %v16141_v28  ;;  %v2345_v28 = vld [vmem:[#allocation12 + $0x14f8] sm:$0xff]  ;;  %v16235_v44 = vcombine.high %v2336_v25, %v2344_v3  ;;  %v16234_v43 = vcombine.low %v2336_v25, %v2344_v3 }
 0x759   :  { %v16237_v21 = vcombine.high %v2337_v27, %v2345_v28  ;;  %v16236_v46 = vcombine.low %v2337_v27, %v2345_v28 }
 0x75a   :  { %8975 = vmatpush1.bf16.msra.mxu0 %v16138_v56  ;;  %v2352_v56 = vld [vmem:[#allocation12 + $0x1530] sm:$0xff] }
 0x75b   :  { %9139 = vmatpush1.bf16.msra.mxu1 %v16140_v60  ;;  %8976 = vmatprep.subr.bf16.mxu0 %v16155_v36  ;;  %v2360_v60 = vld [vmem:[#allocation12 + $0x1570] sm:$0xff]  ;;  %v2353_v36 = vld [vmem:[#allocation12 + $0x1538] sm:$0xff] }
 0x75c   :  { %9140 = vmatprep.subr.bf16.mxu1 %v16157_v30  ;;  %v2361_v30 = vld [vmem:[#allocation12 + $0x1578] sm:$0xff]  ;;  %v16251_v47 = vcombine.high %v2352_v56, %v2360_v60  ;;  %v16250_v63 = vcombine.low %v2352_v56, %v2360_v60 }
 0x75d   :  { %v16253_v51 = vcombine.high %v2353_v36, %v2361_v30  ;;  %v16252_v1 = vcombine.low %v2353_v36, %v2361_v30 }
 0x75e   :  { %8977 = vmatpush1.bf16.msra.mxu0 %v16154_v54  ;;  %v2368_v54 = vld [vmem:[#allocation12 + $0x15b0] sm:$0xff] }
 0x75f   :  { %9141 = vmatpush1.bf16.msra.mxu1 %v16156_v57  ;;  %8978 = vmatprep.subr.bf16.mxu0 %v16171_v59  ;;  %v2376_v57 = vld [vmem:[#allocation12 + $0x15f0] sm:$0xff]  ;;  %v2369_v59 = vld [vmem:[#allocation12 + $0x15b8] sm:$0xff] }
 0x760   :  { %9142 = vmatprep.subr.bf16.mxu1 %v16173_v62  ;;  %v2377_v62 = vld [vmem:[#allocation12 + $0x15f8] sm:$0xff]  ;;  %v16267_v2 = vcombine.high %v2368_v54, %v2376_v57  ;;  %v16266_v8 = vcombine.low %v2368_v54, %v2376_v57 }
 0x761   :  { %v16269_v33 = vcombine.high %v2369_v59, %v2377_v62  ;;  %v16268_v9 = vcombine.low %v2369_v59, %v2377_v62 }
 0x762   :  { %8979 = vmatpush1.bf16.msra.mxu0 %v16170_v5  ;;  %v2384_v5 = vld [vmem:[#allocation12 + $0x1630] sm:$0xff] }
 0x763   :  { %9143 = vmatpush1.bf16.msra.mxu1 %v16172_v6  ;;  %8980 = vmatprep.subr.bf16.mxu0 %v16187_v7  ;;  %v2392_v6 = vld [vmem:[#allocation12 + $0x1670] sm:$0xff]  ;;  %v2385_v7 = vld [vmem:[#allocation12 + $0x1638] sm:$0xff] }
 0x764   :  { %9144 = vmatprep.subr.bf16.mxu1 %v16189_v48  ;;  %v2393_v48 = vld [vmem:[#allocation12 + $0x1678] sm:$0xff]  ;;  %v16283_v11 = vcombine.high %v2384_v5, %v2392_v6  ;;  %v16282_v52 = vcombine.low %v2384_v5, %v2392_v6 }
 0x765   :  { %v16285_v13 = vcombine.high %v2385_v7, %v2393_v48  ;;  %v16284_v55 = vcombine.low %v2385_v7, %v2393_v48  ;;  %v2473_v5 = vld [vmem:[#allocation12 + $0x18f8] sm:$0xff]  ;;  %v2480_v48 = vld [vmem:[#allocation12 + $0x1930] sm:$0xff] }
 0x766   :  { %8981 = vmatpush1.bf16.msra.mxu0 %v16186_v14  ;;  %v2400_v14 = vld [vmem:[#allocation12 + $0x16b0] sm:$0xff] }
 0x767   :  { %9145 = vmatpush1.bf16.msra.mxu1 %v16188_v15  ;;  %8982 = vmatprep.subr.bf16.mxu0 %v16203_v19  ;;  %v2408_v15 = vld [vmem:[#allocation12 + $0x16f0] sm:$0xff]  ;;  %v2401_v19 = vld [vmem:[#allocation12 + $0x16b8] sm:$0xff] }
 0x768   :  { %9146 = vmatprep.subr.bf16.mxu1 %v16205_v20  ;;  %v2409_v20 = vld [vmem:[#allocation12 + $0x16f8] sm:$0xff]  ;;  %v16299_v58 = vcombine.high %v2400_v14, %v2408_v15  ;;  %v16298_v25 = vcombine.low %v2400_v14, %v2408_v15 }
 0x769   :  { %v16301_v22 = vcombine.high %v2401_v19, %v2409_v20  ;;  %v16300_v3 = vcombine.low %v2401_v19, %v2409_v20 }
 0x76a   :  { %8983 = vmatpush1.bf16.msra.mxu0 %v16202_v23  ;;  %v2416_v23 = vld [vmem:[#allocation12 + $0x1730] sm:$0xff] }
 0x76b   :  { %9147 = vmatpush1.bf16.msra.mxu1 %v16204_v24  ;;  %8984 = vmatprep.subr.bf16.mxu0 %v16219_v16  ;;  %v2424_v24 = vld [vmem:[#allocation12 + $0x1770] sm:$0xff]  ;;  %v2417_v16 = vld [vmem:[#allocation12 + $0x1738] sm:$0xff] }
 0x76c   :  { %9148 = vmatprep.subr.bf16.mxu1 %v16221_v17  ;;  %v2425_v17 = vld [vmem:[#allocation12 + $0x1778] sm:$0xff]  ;;  %v16315_v27 = vcombine.high %v2416_v23, %v2424_v24  ;;  %v16314_v56 = vcombine.low %v2416_v23, %v2424_v24 }
 0x76d   :  { %v16317_v28 = vcombine.high %v2417_v16, %v2425_v17  ;;  %v16316_v60 = vcombine.low %v2417_v16, %v2425_v17  ;;  %v2512_v17 = vld [vmem:[#allocation12 + $0x1a30] sm:$0xff] }
 0x76e   :  { %8985 = vmatpush1.bf16.msra.mxu0 %v16218_v39  ;;  %v2432_v39 = vld [vmem:[#allocation12 + $0x17b0] sm:$0xff] }
 0x76f   :  { %9149 = vmatpush1.bf16.msra.mxu1 %v16220_v42  ;;  %8986 = vmatprep.subr.bf16.mxu0 %v16235_v44  ;;  %v2440_v42 = vld [vmem:[#allocation12 + $0x17f0] sm:$0xff]  ;;  %v2433_v44 = vld [vmem:[#allocation12 + $0x17b8] sm:$0xff] }
 0x770   :  { %9150 = vmatprep.subr.bf16.mxu1 %v16237_v21  ;;  %v2441_v21 = vld [vmem:[#allocation12 + $0x17f8] sm:$0xff]  ;;  %v16331_v36 = vcombine.high %v2432_v39, %v2440_v42  ;;  %v16330_v54 = vcombine.low %v2432_v39, %v2440_v42 }
 0x771   :  { %v16333_v30 = vcombine.high %v2433_v44, %v2441_v21  ;;  %v16332_v57 = vcombine.low %v2433_v44, %v2441_v21  ;;  %v2528_v44 = vld [vmem:[#allocation12 + $0x1ab0] sm:$0xff] }
 0x772   :  { %8987 = vmatpush1.bf16.msra.mxu0 %v16234_v43  ;;  %v2448_v43 = vld [vmem:[#allocation12 + $0x1830] sm:$0xff] }
 0x773   :  { %9151 = vmatpush1.bf16.msra.mxu1 %v16236_v46  ;;  %8988 = vmatprep.subr.bf16.mxu0 %v16251_v47  ;;  %v2456_v46 = vld [vmem:[#allocation12 + $0x1870] sm:$0xff]  ;;  %v2449_v47 = vld [vmem:[#allocation12 + $0x1838] sm:$0xff] }
 0x774   :  { %9152 = vmatprep.subr.bf16.mxu1 %v16253_v51  ;;  %v2457_v51 = vld [vmem:[#allocation12 + $0x1878] sm:$0xff]  ;;  %v16347_v59 = vcombine.high %v2448_v43, %v2456_v46  ;;  %v2536_v21 = vld [vmem:[#allocation12 + $0x1af0] sm:$0xff] }
 0x775   :  { %v16349_v62 = vcombine.high %v2449_v47, %v2457_v51  ;;  %v16348_v6 = vcombine.low %v2449_v47, %v2457_v51  ;;  %v2544_v47 = vld [vmem:[#allocation12 + $0x1b30] sm:$0xff] }
 0x776   :  { %8989 = vmatpush1.bf16.msra.mxu0 %v16250_v63  ;;  %v2464_v63 = vld [vmem:[#allocation12 + $0x18b0] sm:$0xff] }
 0x777   :  { %9153 = vmatpush1.bf16.msra.mxu1 %v16252_v1  ;;  %8990 = vmatprep.subr.bf16.mxu0 %v16267_v2  ;;  %v2472_v1 = vld [vmem:[#allocation12 + $0x18f0] sm:$0xff]  ;;  %v16346_v2 = vcombine.low %v2448_v43, %v2456_v46  ;;  %v16427_v43 = vcombine.high %v2528_v44, %v2536_v21 }
 0x778   :  { %9154 = vmatprep.subr.bf16.mxu1 %v16269_v33  ;;  %v2465_v33 = vld [vmem:[#allocation12 + $0x18b8] sm:$0xff]  ;;  %v16363_v7 = vcombine.high %v2464_v63, %v2472_v1  ;;  %v16362_v14 = vcombine.low %v2464_v63, %v2472_v1  ;;  %v2552_v51 = vld [vmem:[#allocation12 + $0x1b70] sm:$0xff] }
 0x779   :  { %v16364_v15 = vcombine.low %v2465_v33, %v2473_v5  ;;  %v16443_v63 = vcombine.high %v2544_v47, %v2552_v51 }
 0x77a   :  { %8991 = vmatpush1.bf16.msra.mxu0 %v16266_v8  ;;  %v2488_v8 = vld [vmem:[#allocation12 + $0x1970] sm:$0xff] }
 0x77b   :  { %9155 = vmatpush1.bf16.msra.mxu1 %v16268_v9  ;;  %8992 = vmatprep.subr.bf16.mxu0 %v16283_v11  ;;  %v16365_v9 = vcombine.high %v2465_v33, %v2473_v5  ;;  %v2481_v11 = vld [vmem:[#allocation12 + $0x1938] sm:$0xff]  ;;  %v16379_v19 = vcombine.high %v2480_v48, %v2488_v8  ;;  %v16378_v23 = vcombine.low %v2480_v48, %v2488_v8  ;;  %v2560_v33 = vld [vmem:[#allocation12 + $0x1bb0] sm:$0xff] }
 0x77c   :  { %9156 = vmatprep.subr.bf16.mxu1 %v16285_v13  ;;  %v2489_v13 = vld [vmem:[#allocation12 + $0x1978] sm:$0xff]  ;;  %v2568_v5 = vld [vmem:[#allocation12 + $0x1bf0] sm:$0xff] }
 0x77d   :  { %v16381_v20 = vcombine.high %v2481_v11, %v2489_v13  ;;  %v2561_v48 = vld [vmem:[#allocation12 + $0x1bb8] sm:$0xff] }
 0x77e   :  { %8993 = vmatpush1.bf16.msra.mxu0 %v16282_v52  ;;  %v2496_v52 = vld [vmem:[#allocation12 + $0x19b0] sm:$0xff]  ;;  %v2569_v8 = vld [vmem:[#allocation12 + $0x1bf8] sm:$0xff] }
 0x77f   :  { %9157 = vmatpush1.bf16.msra.mxu1 %v16284_v55  ;;  %8994 = vmatprep.subr.bf16.mxu0 %v16299_v58  ;;  %v2504_v55 = vld [vmem:[#allocation12 + $0x19f0] sm:$0xff]  ;;  %v2497_v58 = vld [vmem:[#allocation12 + $0x19b8] sm:$0xff] }
 0x780   :  { %9158 = vmatprep.subr.bf16.mxu1 %v16301_v22  ;;  %v2505_v22 = vld [vmem:[#allocation12 + $0x19f8] sm:$0xff]  ;;  %v16395_v24 = vcombine.high %v2496_v52, %v2504_v55 }
 0x781   :  { %v16397_v16 = vcombine.high %v2497_v58, %v2505_v22 }
 0x782   :  { %8995 = vmatpush1.bf16.msra.mxu0 %v16298_v25  ;;  %v2520_v25 = vld [vmem:[#allocation12 + $0x1a70] sm:$0xff] }
 0x783   :  { %9159 = vmatpush1.bf16.msra.mxu1 %v16300_v3  ;;  %8996 = vmatprep.subr.bf16.mxu0 %v16315_v27  ;;  %v2513_v3 = vld [vmem:[#allocation12 + $0x1a38] sm:$0xff]  ;;  %v16411_v39 = vcombine.high %v2512_v17, %v2520_v25 }
 0x784   :  { %9160 = vmatprep.subr.bf16.mxu1 %v16317_v28  ;;  %v2521_v27 = vld [vmem:[#allocation12 + $0x1a78] sm:$0xff]  ;;  %v16396_v28 = vcombine.low %v2497_v58, %v2505_v22  ;;  %v2576_v58 = vld [vmem:[#allocation12 + $0x1c30] sm:$0xff] }
 0x785   :  { %v16413_v42 = vcombine.high %v2513_v3, %v2521_v27  ;;  %v2584_v22 = vld [vmem:[#allocation12 + $0x1c70] sm:$0xff] }
 0x786   :  { %8997 = vmatpush1.bf16.msra.mxu0 %v16314_v56  ;;  %v2529_v56 = vld [vmem:[#allocation12 + $0x1ab8] sm:$0xff] }
 0x787   :  { %9161 = vmatpush1.bf16.msra.mxu1 %v16316_v60  ;;  %8998 = vmatprep.subr.bf16.mxu0 %v16331_v36  ;;  %v2537_v60 = vld [vmem:[#allocation12 + $0x1af8] sm:$0xff]  ;;  %v16410_v36 = vcombine.low %v2512_v17, %v2520_v25  ;;  %v16475_v17 = vcombine.high %v2576_v58, %v2584_v22 }
 0x788   :  { %9162 = vmatprep.subr.bf16.mxu1 %v16333_v30  ;;  %v16412_v30 = vcombine.low %v2513_v3, %v2521_v27  ;;  %v16429_v46 = vcombine.high %v2529_v56, %v2537_v60  ;;  %v2592_v3 = vld [vmem:[#allocation12 + $0x1cb0] sm:$0xff] }
 0x789   :  { %v2600_v27 = vld [vmem:[#allocation12 + $0x1cf0] sm:$0xff] }
 0x78a   :  { %8999 = vmatpush1.bf16.msra.mxu0 %v16330_v54  ;;  %v2545_v54 = vld [vmem:[#allocation12 + $0x1b38] sm:$0xff] }
 0x78b   :  { %9163 = vmatpush1.bf16.msra.mxu1 %v16332_v57  ;;  %9009 = vmatprep.subr.bf16.mxu0 %v16347_v59  ;;  %v2553_v57 = vld [vmem:[#allocation12 + $0x1b78] sm:$0xff]  ;;  %v16426_v59 = vcombine.low %v2528_v44, %v2536_v21  ;;  %v16491_v44 = vcombine.high %v2592_v3, %v2600_v27 }
 0x78c   :  { %9173 = vmatprep.subr.bf16.mxu1 %v16349_v62  ;;  %v16428_v62 = vcombine.low %v2529_v56, %v2537_v60  ;;  %v2608_v56 = vld [vmem:[#allocation12 + $0x1d30] sm:$0xff] }
 0x78d   :  { %9001 = vmatmul.mubr.bf16.vlgmr.msra.gmra.mrb[24].mxu0 %v19841_v32  ;;  %v2616_v60 = vld [vmem:[#allocation12 + $0x1d70] sm:$0xff] }
 0x78e   :  { %9165 = vmatmul.mubr.bf16.vlgmr.msra.gmra.mrb[24].mxu1 %v19841_v32  ;;  %9010 = vmatpush1.bf16.msra.mxu0 %v16346_v2  ;;  %v16380_v32 = vcombine.low %v2481_v11, %v2489_v13  ;;  %v16445_v2 = vcombine.high %v2545_v54, %v2553_v57  ;;  %v16442_v13 = vcombine.low %v2544_v47, %v2552_v51 }
 0x78f   :  { %9041 = vmatprep.mubr.bf16.mxu0 %v19843_v37  ;;  %9174 = vmatpush1.bf16.msra.mxu1 %v16348_v6  ;;  %v16507_v47 = vcombine.high %v2608_v56, %v2616_v60 }
 0x790   :  { %9205 = vmatprep.mubr.bf16.mxu1 %v19843_v37  ;;  %9011 = vmatprep.subr.bf16.mxu0 %v16363_v7  ;;  %v16394_v37 = vcombine.low %v2496_v52, %v2504_v55  ;;  %v16461_v55 = vcombine.high %v2561_v48, %v2569_v8 }
 0x791   :  { %9175 = vmatprep.subr.bf16.mxu1 %v16365_v9 }
 0x792   :  { %9012 = vmatpush1.bf16.msra.mxu0 %v16362_v14 }
 0x793   :  { %9176 = vmatpush1.bf16.msra.mxu1 %v16364_v15  ;;  %9013 = vmatprep.subr.bf16.mxu0 %v16379_v19  ;;  %v16444_v19 = vcombine.low %v2545_v54, %v2553_v57  ;;  %v2624_v54 = vld [vmem:[#allocation12 + $0x1db0] sm:$0xff] }
 0x794   :  { %9177 = vmatprep.subr.bf16.mxu1 %v16381_v20  ;;  %v16459_v20 = vcombine.high %v2560_v33, %v2568_v5  ;;  %v2632_v57 = vld [vmem:[#allocation12 + $0x1df0] sm:$0xff] }
 0x796   :  { %9014 = vmatpush1.bf16.msra.mxu0 %v16378_v23  ;;  %v2577_v23 = vld [vmem:[#allocation12 + $0x1c38] sm:$0xff] }
 0x797   :  { %9178 = vmatpush1.bf16.msra.mxu1 %v16380_v32  ;;  %9015 = vmatprep.subr.bf16.mxu0 %v16395_v24  ;;  %v2585_v32 = vld [vmem:[#allocation12 + $0x1c78] sm:$0xff]  ;;  %v16458_v24 = vcombine.low %v2560_v33, %v2568_v5  ;;  %v16523_v33 = vcombine.high %v2624_v54, %v2632_v57 }
 0x798   :  { %9179 = vmatprep.subr.bf16.mxu1 %v16397_v16  ;;  %v16460_v16 = vcombine.low %v2561_v48, %v2569_v8  ;;  %v16477_v25 = vcombine.high %v2577_v23, %v2585_v32  ;;  %v2640_v48 = vld [vmem:[#allocation12 + $0x1e30] sm:$0xff] }
 0x799   :  { %v2648_v8 = vld [vmem:[#allocation12 + $0x1e70] sm:$0xff] }
 0x79a   :  { %9016 = vmatpush1.bf16.msra.mxu0 %v16394_v37  ;;  %v2593_v37 = vld [vmem:[#allocation12 + $0x1cb8] sm:$0xff] }
 0x79b   :  { %9180 = vmatpush1.bf16.msra.mxu1 %v16396_v28  ;;  %9017 = vmatprep.subr.bf16.mxu0 %v16411_v39  ;;  %v2601_v28 = vld [vmem:[#allocation12 + $0x1cf8] sm:$0xff]  ;;  %v16474_v39 = vcombine.low %v2576_v58, %v2584_v22 }
 0x79c   :  { %9181 = vmatprep.subr.bf16.mxu1 %v16413_v42  ;;  %v16476_v42 = vcombine.low %v2577_v23, %v2585_v32  ;;  %v16493_v21 = vcombine.high %v2593_v37, %v2601_v28  ;;  %v2657_v58 = vld [vmem:[#allocation12 + $0x1eb8] sm:$0xff]  ;;  %v16538_v23 = vcombine.low %v2640_v48, %v2648_v8 }
 0x79d   :  { %v2665_v22 = vld [vmem:[#allocation12 + $0x1ef8] sm:$0xff] }
 0x79e   :  { %9018 = vmatpush1.bf16.msra.mxu0 %v16410_v36  ;;  %v2609_v36 = vld [vmem:[#allocation12 + $0x1d38] sm:$0xff] }
 0x79f   :  { %9182 = vmatpush1.bf16.msra.mxu1 %v16412_v30  ;;  %9019 = vmatprep.subr.bf16.mxu0 %v16427_v43  ;;  %v2617_v30 = vld [vmem:[#allocation12 + $0x1d78] sm:$0xff]  ;;  %v16490_v43 = vcombine.low %v2592_v3, %v2600_v27 }
 0x7a0   :  { %v19920_v1 = vpop.f32.mrb[20].mxu0  ;;  %9183 = vmatprep.subr.bf16.mxu1 %v16429_v46  ;;  %v16492_v46 = vcombine.low %v2593_v37, %v2601_v28  ;;  %v16509_v51 = vcombine.high %v2609_v36, %v2617_v30  ;;  %v2673_v3 = vld [vmem:[#allocation12 + $0x1f38] sm:$0xff]  ;;  %v19928_v37 = vld [vmem:[#allocation13] sm:$0xff] }
 0x7a1   :  { %v19922_v6 = vpop.f32.mrb[20].mxu1  ;;  %v19924_v7 = vpop.f32.mrb[21].mxu0  ;;  %v2681_v27 = vld [vmem:[#allocation12 + $0x1f78] sm:$0xff] }
 0x7a2   :  { %v19926_v9 = vpop.f32.mrb[21].mxu1  ;;  %v8719_v11 = vpop.f32.mrb[22].mxu0  ;;  %9020 = vmatpush1.bf16.msra.mxu0 %v16426_v59  ;;  %v2625_v59 = vld [vmem:[#allocation12 + $0x1db8] sm:$0xff] }
 0x7a3   :  { %v8883_v14 = vpop.f32.mrb[22].mxu1  ;;  %9184 = vmatpush1.bf16.msra.mxu1 %v16428_v62  ;;  %v8720_v15 = vpop.f32.mrb[23].mxu0  ;;  %9021 = vmatprep.subr.bf16.mxu0 %v16443_v63  ;;  %v2633_v62 = vld [vmem:[#allocation12 + $0x1df8] sm:$0xff]  ;;  %v16506_v63 = vcombine.low %v2608_v56, %v2616_v60  ;;  %v2696_v56 = vld [vmem:[#allocation12 + $0x1ff0] sm:$0xff]  ;;  %v2709_v60 = vrot.slane %v19928_v37, %v19742_v50 }
 0x7a4   :  { %v8884_v52 = vpop.f32.mrb[23].mxu1  ;;  %9185 = vmatprep.subr.bf16.mxu1 %v16445_v2  ;;  %v16508_v2 = vcombine.low %v2609_v36, %v2617_v30  ;;  %v16525_v5 = vcombine.high %v2625_v59, %v2633_v62  ;;  %v2641_v11 = vld [vmem:[#allocation12 + $0x1e38] sm:$0xff]  ;;  %v16522_v14 = vcombine.low %v2624_v54, %v2632_v57  ;;  %v16524_v15 = vcombine.low %v2625_v59, %v2633_v62  ;;  %v17887_v62 = vld [vmem:[#allocation15 + $0x4] ss:$20 sps:$4 sm:$0xff]  }
 0x7a5   :  { %v2656_v52 = vld [vmem:[#allocation12 + $0x1eb0] sm:$0xff]  ;;  %v2689_v36 = vld [vmem:[#allocation12 + $0x1fb8] sm:$0xff]  ;;  %v17602_v54 = vadd.f32 %v19876_v31, %v2709_v60 }
 0x7a6   :  { %9022 = vmatpush1.bf16.msra.mxu0 %v16442_v13  ;;  %v2649_v13 = vld [vmem:[#allocation12 + $0x1e78] sm:$0xff]  ;;  %v17930_v60 = vld [vmem:[#allocation15 + $0x120] ss:$20 sps:$4 sm:$0xff]  }
 0x7a7   :  { %9186 = vmatpush1.bf16.msra.mxu1 %v16444_v19  ;;  %9023 = vmatprep.subr.bf16.mxu0 %v16459_v20  ;;  %v16539_v19 = vcombine.high %v2640_v48, %v2648_v8  ;;  %v16541_v20 = vcombine.high %v2641_v11, %v2649_v13  ;;  %v16540_v32 = vcombine.low %v2641_v11, %v2649_v13  ;;  %v2697_v30 = vld [vmem:[#allocation12 + $0x1ff8] sm:$0xff]  ;;  %v17894_v13 = vld [vmem:[#allocation15 + $0x30] ss:$20 sps:$4 sm:$0xff]  }
 0x7a8   :  { %9187 = vmatprep.subr.bf16.mxu1 %v16461_v55  ;;  %v2664_v55 = vld [vmem:[#allocation12 + $0x1ef0] sm:$0xff]  ;;  %v16588_v59 = vcombine.low %v2689_v36, %v2697_v30  ;;  %v17896_v31 = vld [vmem:[#allocation15 + $0x34] ss:$20 sps:$4 sm:$0xff]  }
 0x7a9   :  { %v16554_v28 = vcombine.low %v2656_v52, %v2664_v55  ;;  %v17893_v48 = vld [vmem:[#allocation15 + $0x2c] ss:$20 sps:$4 sm:$0xff]   ;;  %v17891_v11 = vld [vmem:[#allocation15 + $0x28] ss:$20 sps:$4 sm:$0xff]  }
 0x7aa   :  { %9024 = vmatpush1.bf16.msra.mxu0 %v16458_v24  ;;  %v16555_v24 = vcombine.high %v2656_v52, %v2664_v55  ;;  %v17905_v52 = vld [vmem:[#allocation15 + $0x7c] ss:$20 sps:$4 sm:$0xff]   ;;  %v17903_v55 = vld [vmem:[#allocation15 + $0x78] ss:$20 sps:$4 sm:$0xff]  }
 0x7ab   :  { %9188 = vmatpush1.bf16.msra.mxu1 %v16460_v16  ;;  %9025 = vmatprep.subr.bf16.mxu0 %v16475_v17  ;;  %v16557_v16 = vcombine.high %v2657_v58, %v2665_v22  ;;  %v2672_v17 = vld [vmem:[#allocation12 + $0x1f30] sm:$0xff] }
 0x7ac   :  { %9189 = vmatprep.subr.bf16.mxu1 %v16477_v25  ;;  %v2680_v25 = vld [vmem:[#allocation12 + $0x1f70] sm:$0xff] }
 0x7ae   :  { %9026 = vmatpush1.bf16.msra.mxu0 %v16474_v39  ;;  %v16556_v39 = vcombine.low %v2657_v58, %v2665_v22  ;;  %v17906_v58 = vld [vmem:[#allocation15 + $0x80] ss:$20 sps:$4 sm:$0xff]   ;;  %v17911_v22 = vld [vmem:[#allocation15 + $0xa4] ss:$20 sps:$4 sm:$0xff]  }
 0x7af   :  { %9190 = vmatpush1.bf16.msra.mxu1 %v16476_v42  ;;  %9027 = vmatprep.subr.bf16.mxu0 %v16491_v44  ;;  %v16571_v42 = vcombine.high %v2672_v17, %v2680_v25  ;;  %v16573_v44 = vcombine.high %v2673_v3, %v2681_v27 }
 0x7b0   :  { %9191 = vmatprep.subr.bf16.mxu1 %v16493_v21  ;;  %v2688_v21 = vld [vmem:[#allocation12 + $0x1fb0] sm:$0xff] }
 0x7b1   :  { %v16586_v57 = vcombine.low %v2688_v21, %v2696_v56 }
 0x7b2   :  { %9028 = vmatpush1.bf16.msra.mxu0 %v16490_v43  ;;  %v16570_v43 = vcombine.low %v2672_v17, %v2680_v25  ;;  %v17920_v17 = vld [vmem:[#allocation15 + $0xd4] ss:$20 sps:$4 sm:$0xff]  }
 0x7b3   :  { %9192 = vmatpush1.bf16.msra.mxu1 %v16492_v46  ;;  %9029 = vmatprep.subr.bf16.mxu0 %v16507_v47  ;;  %v16572_v46 = vcombine.low %v2673_v3, %v2681_v27  ;;  %v16587_v47 = vcombine.high %v2688_v21, %v2696_v56  ;;  %v17915_v25 = vld [vmem:[#allocation15 + $0xc8] ss:$20 sps:$4 sm:$0xff]   ;;  %v17918_v3 = vld [vmem:[#allocation15 + $0xd0] ss:$20 sps:$4 sm:$0xff]   ;;  %v17927_v56 = vld [vmem:[#allocation15 + $0x118] ss:$20 sps:$4 sm:$0xff]  }
 0x7b4   :  { %9193 = vmatprep.subr.bf16.mxu1 %v16509_v51  ;;  %v16589_v51 = vcombine.high %v2689_v36, %v2697_v30  ;;  %v17923_v27 = vld [vmem:[#allocation15 + $0xf4] ss:$20 sps:$4 sm:$0xff]   ;;  %v17932_v21 = vld [vmem:[#allocation15 + $0x124] ss:$20 sps:$4 sm:$0xff]   ;;  %v17938_v30 = vld [vmem:[#allocation15 + $0x14c] ss:$20 sps:$4 sm:$0xff]  }
 0x7b5   :  { %v17935_v36 = vld [vmem:[#allocation15 + $0x144] ss:$20 sps:$4 sm:$0xff]  }
 0x7b6   :  { %9030 = vmatpush1.bf16.msra.mxu0 %v16506_v63  ;;  %v17890_v63 = vld [vmem:[#allocation15 + $0xc] ss:$20 sps:$4 sm:$0xff]  }
 0x7b7   :  { %9194 = vmatpush1.bf16.msra.mxu1 %v16508_v2  ;;  %9031 = vmatprep.subr.bf16.mxu0 %v16523_v33  ;;  %v9215_v2 = vmax.f32 %v17602_v54, 0.0  ;;  %v17885_v33 = vld [vmem:[#allocation15] ss:$20 sps:$4 sm:$0xff]   ;;  %v17939_v54 = vld [vmem:[#allocation15 + $0x168] ss:$20 sps:$4 sm:$0xff]  }
 0x7b8   :  { %9195 = vmatprep.subr.bf16.mxu1 %v16525_v5  ;;  %v17888_v5 = vld [vmem:[#allocation15 + $0x8] ss:$20 sps:$4 sm:$0xff]  }
 0x7b9   :  { %v19933_v8 = vpack.c.bf16 %v9215_v2, %v9215_v2  ;;  %v17948_v2 = vld [vmem:[#allocation15 + $0x198] ss:$20 sps:$4 sm:$0xff]  }
 0x7ba   :  { %9032 = vmatpush1.bf16.msra.mxu0 %v16522_v14  ;;  %v17899_v14 = vld [vmem:[#allocation15 + $0x54] ss:$20 sps:$4 sm:$0xff]  }
 0x7bb   :  { %9196 = vmatpush1.bf16.msra.mxu1 %v16524_v15  ;;  %9033 = vmatprep.subr.bf16.mxu0 %v16539_v19  ;;  %v17902_v15 = vld [vmem:[#allocation15 + $0x5c] ss:$20 sps:$4 sm:$0xff]  }
 0x7bc   :  { %9197 = vmatprep.subr.bf16.mxu1 %v16541_v20  ;;  %v17897_v19 = vld [vmem:[#allocation15 + $0x50] ss:$20 sps:$4 sm:$0xff]   ;;  %v17900_v20 = vld [vmem:[#allocation15 + $0x58] ss:$20 sps:$4 sm:$0xff]  }
 0x7be   :  { %9034 = vmatpush1.bf16.msra.mxu0 %v16538_v23  ;;  %v17914_v23 = vld [vmem:[#allocation15 + $0xac] ss:$20 sps:$4 sm:$0xff]  }
 0x7bf   :  { %9198 = vmatpush1.bf16.msra.mxu1 %v16540_v32  ;;  %9035 = vmatprep.subr.bf16.mxu0 %v16555_v24  ;;  %v17909_v32 = vld [vmem:[#allocation15 + $0xa0] ss:$20 sps:$4 sm:$0xff]   ;;  %v17912_v24 = vld [vmem:[#allocation15 + $0xa8] ss:$20 sps:$4 sm:$0xff]  }
 0x7c0   :  { %9199 = vmatprep.subr.bf16.mxu1 %v16557_v16  ;;  %v17917_v16 = vld [vmem:[#allocation15 + $0xcc] ss:$20 sps:$4 sm:$0xff]  }
 0x7c2   :  { %9036 = vmatpush1.bf16.msra.mxu0 %v16554_v28  ;;  %v17926_v28 = vld [vmem:[#allocation15 + $0xfc] ss:$20 sps:$4 sm:$0xff]  }
 0x7c3   :  { %9200 = vmatpush1.bf16.msra.mxu1 %v16556_v39  ;;  %9037 = vmatprep.subr.bf16.mxu0 %v16571_v42  ;;  %v17921_v39 = vld [vmem:[#allocation15 + $0xf0] ss:$20 sps:$4 sm:$0xff]   ;;  %v17924_v42 = vld [vmem:[#allocation15 + $0xf8] ss:$20 sps:$4 sm:$0xff]  }
 0x7c4   :  { %9201 = vmatprep.subr.bf16.mxu1 %v16573_v44  ;;  %v17929_v44 = vld [vmem:[#allocation15 + $0x11c] ss:$20 sps:$4 sm:$0xff]  }
 0x7c6   :  { %9038 = vmatpush1.bf16.msra.mxu0 %v16570_v43  ;;  %v17933_v43 = vld [vmem:[#allocation15 + $0x140] ss:$20 sps:$4 sm:$0xff]  }
 0x7c7   :  { %9202 = vmatpush1.bf16.msra.mxu1 %v16572_v46  ;;  %9039 = vmatprep.subr.bf16.mxu0 %v16587_v47  ;;  %v17936_v46 = vld [vmem:[#allocation15 + $0x148] ss:$20 sps:$4 sm:$0xff]   ;;  %v17941_v47 = vld [vmem:[#allocation15 + $0x16c] ss:$20 sps:$4 sm:$0xff]  }
 0x7c8   :  { %9203 = vmatprep.subr.bf16.mxu1 %v16589_v51  ;;  %v17944_v51 = vld [vmem:[#allocation15 + $0x174] ss:$20 sps:$4 sm:$0xff]  }
 0x7ca   :  { %9040 = vmatpush1.bf16.msra.mxu0 %v16586_v57  ;;  %v17942_v57 = vld [vmem:[#allocation15 + $0x170] ss:$20 sps:$4 sm:$0xff]  }
 0x7cb   :  { %9204 = vmatpush1.bf16.msra.mxu1 %v16588_v59  ;;  %13369 = vmatprep.subr.bf16.mxu0 %v17887_v62  ;;  %v17947_v59 = vld [vmem:[#allocation15 + $0x194] ss:$20 sps:$4 sm:$0xff]   ;;  %v17950_v62 = vld [vmem:[#allocation15 + $0x19c] ss:$20 sps:$4 sm:$0xff]  }
 0x7cc   :  { %13697 = vmatprep.subr.bf16.mxu1 %v17890_v63  ;;  %v17945_v63 = vld [vmem:[#allocation15 + $0x190] ss:$20 sps:$4 sm:$0xff]  }
 0x7cd   :  { %9042 = vmatmul.mubr.bf16.vlgmr.msra.gmra.mrb[24].mxu0 %v19854_v26 }
 0x7ce   :  { %9206 = vmatmul.mubr.bf16.vlgmr.msra.gmra.mrb[24].mxu1 %v19854_v26  ;;  %13370 = vmatpush1.bf16.msra.mxu0 %v17885_v33  ;;  %v17908_v26 = vld [vmem:[#allocation15 + $0x84] ss:$20 sps:$4 sm:$0xff]   ;;  %v17953_v33 = vld [vmem:[#allocation15 + $0x1bc] ss:$20 sps:$4 sm:$0xff]  }
 0x7cf   :  { %13401 = vmatprep.mubr.bf16.mxu0 %v19933_v8  ;;  %13698 = vmatpush1.bf16.msra.mxu1 %v17888_v5  ;;  %v17956_v5 = vld [vmem:[#allocation15 + $0x1c4] ss:$20 sps:$4 sm:$0xff]  }
 0x7d0   :  { %13729 = vmatprep.mubr.bf16.mxu1 %v19933_v8  ;;  %13371 = vmatprep.subr.bf16.mxu0 %v17893_v48  ;;  %v17951_v48 = vld [vmem:[#allocation15 + $0x1b8] ss:$20 sps:$4 sm:$0xff]  }
 0x7d1   :  { %13699 = vmatprep.subr.bf16.mxu1 %v17896_v31  ;;  %v17954_v31 = vld [vmem:[#allocation15 + $0x1c0] ss:$20 sps:$4 sm:$0xff]  }
 0x7d2   :  { %13372 = vmatpush1.bf16.msra.mxu0 %v17891_v11  ;;  %v17959_v11 = vld [vmem:[#allocation15 + $0x1e4] ss:$20 sps:$4 sm:$0xff]  }
 0x7d3   :  { %13700 = vmatpush1.bf16.msra.mxu1 %v17894_v13  ;;  %13373 = vmatprep.subr.bf16.mxu0 %v17899_v14  ;;  %v17962_v13 = vld [vmem:[#allocation15 + $0x1ec] ss:$20 sps:$4 sm:$0xff]  }
 0x7d4   :  { %13701 = vmatprep.subr.bf16.mxu1 %v17902_v15  ;;  %v17957_v14 = vld [vmem:[#allocation15 + $0x1e0] ss:$20 sps:$4 sm:$0xff]   ;;  %v17960_v15 = vld [vmem:[#allocation15 + $0x1e8] ss:$20 sps:$4 sm:$0xff]  }
 0x7d6   :  { %13374 = vmatpush1.bf16.msra.mxu0 %v17897_v19  ;;  %v17965_v19 = vld [vmem:[#allocation15 + $0x20c] ss:$20 sps:$4 sm:$0xff]  }
 0x7d7   :  { %13702 = vmatpush1.bf16.msra.mxu1 %v17900_v20  ;;  %13375 = vmatprep.subr.bf16.mxu0 %v17905_v52  ;;  %v17968_v20 = vld [vmem:[#allocation15 + $0x214] ss:$20 sps:$4 sm:$0xff]  }
 0x7d8   :  { %13703 = vmatprep.subr.bf16.mxu1 %v17908_v26  ;;  %v17963_v52 = vld [vmem:[#allocation15 + $0x208] ss:$20 sps:$4 sm:$0xff]   ;;  %v2705_v26 = vrot.slane %v19928_v37, %v19739_v49 }
 0x7da   :  { %13376 = vmatpush1.bf16.msra.mxu0 %v17903_v55  ;;  %v17966_v55 = vld [vmem:[#allocation15 + $0x210] ss:$20 sps:$4 sm:$0xff]  }
 0x7db   :  { %13704 = vmatpush1.bf16.msra.mxu1 %v17906_v58  ;;  %13377 = vmatprep.subr.bf16.mxu0 %v17911_v22  ;;  %v17971_v58 = vld [vmem:[#allocation15 + $0x234] ss:$20 sps:$4 sm:$0xff]   ;;  %v17974_v22 = vld [vmem:[#allocation15 + $0x23c] ss:$20 sps:$4 sm:$0xff]  }
 0x7dc   :  { %13705 = vmatprep.subr.bf16.mxu1 %v17914_v23  ;;  %v2717_v23 = vrot.slane %v19928_v37, %v19776_v61 }
 0x7de   :  { %13378 = vmatpush1.bf16.msra.mxu0 %v17909_v32  ;;  %v17969_v32 = vld [vmem:[#allocation15 + $0x230] ss:$20 sps:$4 sm:$0xff]  }
 0x7df   :  { %13706 = vmatpush1.bf16.msra.mxu1 %v17912_v24  ;;  %13379 = vmatprep.subr.bf16.mxu0 %v17917_v16  ;;  %v17601_v24 = vadd.f32 %v19872_v29, %v2705_v26  ;;  %v17972_v16 = vld [vmem:[#allocation15 + $0x238] ss:$20 sps:$4 sm:$0xff]   ;;  %v17981_v29 = vld [vmem:[#allocation15 + $0x280] ss:$20 sps:$4 sm:$0xff]  }
 0x7e0   :  { %13707 = vmatprep.subr.bf16.mxu1 %v17920_v17  ;;  %v17977_v17 = vld [vmem:[#allocation15 + $0x25c] ss:$20 sps:$4 sm:$0xff]   ;;  %v18020_v26 = vld [vmem:[#allocation15 + $0x378] ss:$20 sps:$4 sm:$0xff]  }
 0x7e2   :  { %13380 = vmatpush1.bf16.msra.mxu0 %v17915_v25  ;;  %v17980_v25 = vld [vmem:[#allocation15 + $0x264] ss:$20 sps:$4 sm:$0xff]  }
 0x7e3   :  { %13708 = vmatpush1.bf16.msra.mxu1 %v17918_v3  ;;  %13381 = vmatprep.subr.bf16.mxu0 %v17923_v27  ;;  %v17604_v3 = vadd.f32 %v19878_v38, %v2717_v23  ;;  %v17975_v27 = vld [vmem:[#allocation15 + $0x258] ss:$20 sps:$4 sm:$0xff]   ;;  %v18026_v23 = vld [vmem:[#allocation15 + $0x3a0] ss:$20 sps:$4 sm:$0xff]  }
 0x7e4   :  { %13709 = vmatprep.subr.bf16.mxu1 %v17926_v28  ;;  %v9214_v28 = vmax.f32 %v17601_v24, 0.0  ;;  %v18034_v24 = vld [vmem:[#allocation15 + $0x3cc] ss:$20 sps:$4 sm:$0xff]  }
 0x7e6   :  { %13382 = vmatpush1.bf16.msra.mxu0 %v17921_v39  ;;  %v17978_v39 = vld [vmem:[#allocation15 + $0x260] ss:$20 sps:$4 sm:$0xff]  }
 0x7e7   :  { %13710 = vmatpush1.bf16.msra.mxu1 %v17924_v42  ;;  %13383 = vmatprep.subr.bf16.mxu0 %v17929_v44  ;;  %v17983_v42 = vld [vmem:[#allocation15 + $0x284] ss:$20 sps:$4 sm:$0xff]   ;;  %v17986_v44 = vld [vmem:[#allocation15 + $0x28c] ss:$20 sps:$4 sm:$0xff]  }
 0x7e8   :  { %13711 = vmatprep.subr.bf16.mxu1 %v17932_v21  ;;  %v9217_v21 = vmax.f32 %v17604_v3, 0.0  ;;  %v18040_v3 = vld [vmem:[#allocation15 + $0x3f4] ss:$20 sps:$4 sm:$0xff]  }
 0x7ea   :  { %13384 = vmatpush1.bf16.msra.mxu0 %v17927_v56  ;;  %v19945_v56 = vpack.c.bf16 %v9214_v28, %v9214_v28  ;;  %v19947_v38 = vpack.c.bf16 %v9217_v21, %v9217_v21  ;;  %v18038_v28 = vld [vmem:[#allocation15 + $0x3f0] ss:$20 sps:$4 sm:$0xff]   ;;  %v18044_v21 = vld [vmem:[#allocation15 + $0x418] ss:$20 sps:$4 sm:$0xff]  }
 0x7eb   :  { %13712 = vmatpush1.bf16.msra.mxu1 %v17930_v60  ;;  %13385 = vmatprep.subr.bf16.mxu0 %v17935_v36  ;;  %v17984_v60 = vld [vmem:[#allocation15 + $0x288] ss:$20 sps:$4 sm:$0xff]   ;;  %v17989_v36 = vld [vmem:[#allocation15 + $0x2ac] ss:$20 sps:$4 sm:$0xff]  }
 0x7ec   :  { %13713 = vmatprep.subr.bf16.mxu1 %v17938_v30  ;;  %v17992_v30 = vld [vmem:[#allocation15 + $0x2b4] ss:$20 sps:$4 sm:$0xff]  }
 0x7ee   :  { %13386 = vmatpush1.bf16.msra.mxu0 %v17933_v43  ;;  %v17987_v43 = vld [vmem:[#allocation15 + $0x2a8] ss:$20 sps:$4 sm:$0xff]  }
 0x7ef   :  { %13714 = vmatpush1.bf16.msra.mxu1 %v17936_v46  ;;  %13387 = vmatprep.subr.bf16.mxu0 %v17941_v47  ;;  %v17990_v46 = vld [vmem:[#allocation15 + $0x2b0] ss:$20 sps:$4 sm:$0xff]   ;;  %v17995_v47 = vld [vmem:[#allocation15 + $0x2d4] ss:$20 sps:$4 sm:$0xff]  }
 0x7f0   :  { %13715 = vmatprep.subr.bf16.mxu1 %v17944_v51  ;;  %v17998_v51 = vld [vmem:[#allocation15 + $0x2dc] ss:$20 sps:$4 sm:$0xff]  }
 0x7f2   :  { %13388 = vmatpush1.bf16.msra.mxu0 %v17939_v54  ;;  %v17993_v54 = vld [vmem:[#allocation15 + $0x2d0] ss:$20 sps:$4 sm:$0xff]  }
 0x7f3   :  { %13716 = vmatpush1.bf16.msra.mxu1 %v17942_v57  ;;  %13389 = vmatprep.subr.bf16.mxu0 %v17947_v59  ;;  %v17996_v57 = vld [vmem:[#allocation15 + $0x2d8] ss:$20 sps:$4 sm:$0xff]   ;;  %v18001_v59 = vld [vmem:[#allocation15 + $0x2fc] ss:$20 sps:$4 sm:$0xff]  }
 0x7f4   :  { %13717 = vmatprep.subr.bf16.mxu1 %v17950_v62  ;;  %v18004_v62 = vld [vmem:[#allocation15 + $0x304] ss:$20 sps:$4 sm:$0xff]  }
 0x7f6   :  { %13390 = vmatpush1.bf16.msra.mxu0 %v17945_v63  ;;  %v17999_v63 = vld [vmem:[#allocation15 + $0x2f8] ss:$20 sps:$4 sm:$0xff]  }
 0x7f7   :  { %13718 = vmatpush1.bf16.msra.mxu1 %v17948_v2  ;;  %13391 = vmatprep.subr.bf16.mxu0 %v17953_v33  ;;  %v18002_v2 = vld [vmem:[#allocation15 + $0x300] ss:$20 sps:$4 sm:$0xff]   ;;  %v18007_v33 = vld [vmem:[#allocation15 + $0x324] ss:$20 sps:$4 sm:$0xff]  }
 0x7f8   :  { %13719 = vmatprep.subr.bf16.mxu1 %v17956_v5  ;;  %v18010_v5 = vld [vmem:[#allocation15 + $0x32c] ss:$20 sps:$4 sm:$0xff]  }
 0x7fa   :  { %13392 = vmatpush1.bf16.msra.mxu0 %v17951_v48  ;;  %v18005_v48 = vld [vmem:[#allocation15 + $0x320] ss:$20 sps:$4 sm:$0xff]  }
 0x7fb   :  { %13720 = vmatpush1.bf16.msra.mxu1 %v17954_v31  ;;  %13393 = vmatprep.subr.bf16.mxu0 %v17959_v11  ;;  %v18008_v31 = vld [vmem:[#allocation15 + $0x328] ss:$20 sps:$4 sm:$0xff]   ;;  %v18013_v11 = vld [vmem:[#allocation15 + $0x34c] ss:$20 sps:$4 sm:$0xff]  }
 0x7fc   :  { %13721 = vmatprep.subr.bf16.mxu1 %v17962_v13  ;;  %v18016_v13 = vld [vmem:[#allocation15 + $0x354] ss:$20 sps:$4 sm:$0xff]  }
 0x7fe   :  { %13394 = vmatpush1.bf16.msra.mxu0 %v17957_v14  ;;  %v18011_v14 = vld [vmem:[#allocation15 + $0x348] ss:$20 sps:$4 sm:$0xff]  }
 0x7ff   :  { %13722 = vmatpush1.bf16.msra.mxu1 %v17960_v15  ;;  %13395 = vmatprep.subr.bf16.mxu0 %v17965_v19  ;;  %v18014_v15 = vld [vmem:[#allocation15 + $0x350] ss:$20 sps:$4 sm:$0xff]   ;;  %v18019_v19 = vld [vmem:[#allocation15 + $0x374] ss:$20 sps:$4 sm:$0xff]  }
 0x800   :  { %13723 = vmatprep.subr.bf16.mxu1 %v17968_v20  ;;  %v18022_v20 = vld [vmem:[#allocation15 + $0x37c] ss:$20 sps:$4 sm:$0xff]  }
 0x802   :  { %13396 = vmatpush1.bf16.msra.mxu0 %v17963_v52  ;;  %v18017_v52 = vld [vmem:[#allocation15 + $0x370] ss:$20 sps:$4 sm:$0xff]  }
 0x803   :  { %13724 = vmatpush1.bf16.msra.mxu1 %v17966_v55  ;;  %13397 = vmatprep.subr.bf16.mxu0 %v17971_v58  ;;  %v18025_v55 = vld [vmem:[#allocation15 + $0x39c] ss:$20 sps:$4 sm:$0xff]   ;;  %v18028_v58 = vld [vmem:[#allocation15 + $0x3a4] ss:$20 sps:$4 sm:$0xff]  }
 0x804   :  { %13725 = vmatprep.subr.bf16.mxu1 %v17974_v22  ;;  %v18023_v22 = vld [vmem:[#allocation15 + $0x398] ss:$20 sps:$4 sm:$0xff]  }
 0x806   :  { %13398 = vmatpush1.bf16.msra.mxu0 %v17969_v32  ;;  %v18031_v32 = vld [vmem:[#allocation15 + $0x3c4] ss:$20 sps:$4 sm:$0xff]  }
 0x807   :  { %13726 = vmatpush1.bf16.msra.mxu1 %v17972_v16  ;;  %13399 = vmatprep.subr.bf16.mxu0 %v17977_v17  ;;  %v18029_v16 = vld [vmem:[#allocation15 + $0x3c0] ss:$20 sps:$4 sm:$0xff]   ;;  %v18032_v17 = vld [vmem:[#allocation15 + $0x3c8] ss:$20 sps:$4 sm:$0xff]  }
 0x808   :  { %13727 = vmatprep.subr.bf16.mxu1 %v17980_v25  ;;  %v18037_v25 = vld [vmem:[#allocation15 + $0x3ec] ss:$20 sps:$4 sm:$0xff]  }
 0x80a   :  { %13400 = vmatpush1.bf16.msra.mxu0 %v17975_v27  ;;  %v18035_v27 = vld [vmem:[#allocation15 + $0x3e8] ss:$20 sps:$4 sm:$0xff]  }
 0x80b   :  { %13728 = vmatpush1.bf16.msra.mxu1 %v17978_v39  ;;  %13410 = vmatprep.subr.bf16.mxu0 %v17983_v42  ;;  %v18043_v39 = vld [vmem:[#allocation15 + $0x414] ss:$20 sps:$4 sm:$0xff]   ;;  %v18046_v42 = vld [vmem:[#allocation15 + $0x41c] ss:$20 sps:$4 sm:$0xff]  }
 0x80c   :  { %13738 = vmatprep.subr.bf16.mxu1 %v17986_v44  ;;  %v18041_v44 = vld [vmem:[#allocation15 + $0x410] ss:$20 sps:$4 sm:$0xff]  }
 0x80d   :  { %13402 = vmatmul.mubr.bf16.vlgmr.msra.gmra.mrb[28].mxu0 %v19945_v56 }
 0x80e   :  { %13730 = vmatmul.mubr.bf16.vlgmr.msra.gmra.mrb[28].mxu1 %v19945_v56  ;;  %13411 = vmatpush1.bf16.msra.mxu0 %v17981_v29  ;;  %v18049_v29 = vld [vmem:[#allocation15 + $0x43c] ss:$20 sps:$4 sm:$0xff]  }
 0x80f   :  { %13442 = vmatprep.mubr.bf16.mxu0 %v19947_v38  ;;  %13739 = vmatpush1.bf16.msra.mxu1 %v17984_v60  ;;  %v18052_v60 = vld [vmem:[#allocation15 + $0x444] ss:$20 sps:$4 sm:$0xff]  }
 0x810   :  { %13770 = vmatprep.mubr.bf16.mxu1 %v19947_v38  ;;  %13412 = vmatprep.subr.bf16.mxu0 %v17989_v36  ;;  %v18047_v36 = vld [vmem:[#allocation15 + $0x438] ss:$20 sps:$4 sm:$0xff]  }
 0x811   :  { %13740 = vmatprep.subr.bf16.mxu1 %v17992_v30  ;;  %v18050_v30 = vld [vmem:[#allocation15 + $0x440] ss:$20 sps:$4 sm:$0xff]  }
 0x812   :  { %13413 = vmatpush1.bf16.msra.mxu0 %v17987_v43  ;;  %v18055_v43 = vld [vmem:[#allocation15 + $0x464] ss:$20 sps:$4 sm:$0xff]  }
 0x813   :  { %13741 = vmatpush1.bf16.msra.mxu1 %v17990_v46  ;;  %13414 = vmatprep.subr.bf16.mxu0 %v17995_v47  ;;  %v18058_v46 = vld [vmem:[#allocation15 + $0x46c] ss:$20 sps:$4 sm:$0xff]  }
 0x814   :  { %13742 = vmatprep.subr.bf16.mxu1 %v17998_v51  ;;  %v18053_v47 = vld [vmem:[#allocation15 + $0x460] ss:$20 sps:$4 sm:$0xff]   ;;  %v18056_v51 = vld [vmem:[#allocation15 + $0x468] ss:$20 sps:$4 sm:$0xff]  }
 0x816   :  { %13415 = vmatpush1.bf16.msra.mxu0 %v17993_v54  ;;  %v18061_v54 = vld [vmem:[#allocation15 + $0x48c] ss:$20 sps:$4 sm:$0xff]  }
 0x817   :  { %13743 = vmatpush1.bf16.msra.mxu1 %v17996_v57  ;;  %13416 = vmatprep.subr.bf16.mxu0 %v18001_v59  ;;  %v18064_v57 = vld [vmem:[#allocation15 + $0x494] ss:$20 sps:$4 sm:$0xff]  }
 0x818   :  { %13744 = vmatprep.subr.bf16.mxu1 %v18004_v62  ;;  %v18059_v59 = vld [vmem:[#allocation15 + $0x488] ss:$20 sps:$4 sm:$0xff]   ;;  %v2713_v62 = vrot.slane %v19928_v37, %v19805_v12 }
 0x81a   :  { %13417 = vmatpush1.bf16.msra.mxu0 %v17999_v63  ;;  %v18062_v63 = vld [vmem:[#allocation15 + $0x490] ss:$20 sps:$4 sm:$0xff]  }
 0x81b   :  { %13745 = vmatpush1.bf16.msra.mxu1 %v18002_v2  ;;  %13418 = vmatprep.subr.bf16.mxu0 %v18007_v33  ;;  %v18067_v2 = vld [vmem:[#allocation15 + $0x4b4] ss:$20 sps:$4 sm:$0xff]   ;;  %v18070_v33 = vld [vmem:[#allocation15 + $0x4bc] ss:$20 sps:$4 sm:$0xff]  }
 0x81c   :  { %13746 = vmatprep.subr.bf16.mxu1 %v18010_v5  ;;  %v2725_v5 = vrot.slane %v19928_v37, %v19808_v18 }
 0x81e   :  { %13419 = vmatpush1.bf16.msra.mxu0 %v18005_v48  ;;  %v18065_v48 = vld [vmem:[#allocation15 + $0x4b0] ss:$20 sps:$4 sm:$0xff]  }
 0x81f   :  { %13747 = vmatpush1.bf16.msra.mxu1 %v18008_v31  ;;  %13420 = vmatprep.subr.bf16.mxu0 %v18013_v11  ;;  %v17603_v31 = vadd.f32 %v19874_v45, %v2713_v62  ;;  %v18068_v11 = vld [vmem:[#allocation15 + $0x4b8] ss:$20 sps:$4 sm:$0xff]   ;;  %v18077_v45 = vld [vmem:[#allocation15 + $0x500] ss:$20 sps:$4 sm:$0xff]  }
 0x820   :  { %13748 = vmatprep.subr.bf16.mxu1 %v18016_v13  ;;  %v18073_v13 = vld [vmem:[#allocation15 + $0x4dc] ss:$20 sps:$4 sm:$0xff]   ;;  %v18116_v62 = vld [vmem:[#allocation15 + $0x5f8] ss:$20 sps:$4 sm:$0xff]  }
 0x822   :  { %13421 = vmatpush1.bf16.msra.mxu0 %v18011_v14  ;;  %v18076_v14 = vld [vmem:[#allocation15 + $0x4e4] ss:$20 sps:$4 sm:$0xff]  }
 0x823   :  { %13749 = vmatpush1.bf16.msra.mxu1 %v18014_v15  ;;  %13422 = vmatprep.subr.bf16.mxu0 %v18019_v19  ;;  %v17606_v15 = vadd.f32 %v19900_v35, %v2725_v5  ;;  %v18071_v19 = vld [vmem:[#allocation15 + $0x4d8] ss:$20 sps:$4 sm:$0xff]   ;;  %v18122_v5 = vld [vmem:[#allocation15 + $0x620] ss:$20 sps:$4 sm:$0xff]  }
 0x824   :  { %13750 = vmatprep.subr.bf16.mxu1 %v18022_v20  ;;  %v9216_v20 = vmax.f32 %v17603_v31, 0.0  ;;  %v18130_v31 = vld [vmem:[#allocation15 + $0x64c] ss:$20 sps:$4 sm:$0xff]  }
 0x826   :  { %13423 = vmatpush1.bf16.msra.mxu0 %v18017_v52  ;;  %v18074_v52 = vld [vmem:[#allocation15 + $0x4e0] ss:$20 sps:$4 sm:$0xff]  }
 0x827   :  { %13751 = vmatpush1.bf16.msra.mxu1 %v18020_v26  ;;  %13424 = vmatprep.subr.bf16.mxu0 %v18025_v55  ;;  %v18079_v26 = vld [vmem:[#allocation15 + $0x504] ss:$20 sps:$4 sm:$0xff]   ;;  %v18082_v55 = vld [vmem:[#allocation15 + $0x50c] ss:$20 sps:$4 sm:$0xff]  }
 0x828   :  { %13752 = vmatprep.subr.bf16.mxu1 %v18028_v58  ;;  %v9219_v58 = vmax.f32 %v17606_v15, 0.0  ;;  %v18136_v15 = vld [vmem:[#allocation15 + $0x674] ss:$20 sps:$4 sm:$0xff]  }
 0x82a   :  { %13425 = vmatpush1.bf16.msra.mxu0 %v18023_v22  ;;  %v19959_v22 = vpack.c.bf16 %v9216_v20, %v9216_v20  ;;  %v19961_v35 = vpack.c.bf16 %v9219_v58, %v9219_v58  ;;  %v18134_v20 = vld [vmem:[#allocation15 + $0x670] ss:$20 sps:$4 sm:$0xff]   ;;  %v18140_v58 = vld [vmem:[#allocation15 + $0x698] ss:$20 sps:$4 sm:$0xff]  }
 0x82b   :  { %13753 = vmatpush1.bf16.msra.mxu1 %v18026_v23  ;;  %13426 = vmatprep.subr.bf16.mxu0 %v18031_v32  ;;  %v18080_v23 = vld [vmem:[#allocation15 + $0x508] ss:$20 sps:$4 sm:$0xff]   ;;  %v18085_v32 = vld [vmem:[#allocation15 + $0x52c] ss:$20 sps:$4 sm:$0xff]  }
 0x82c   :  { %13754 = vmatprep.subr.bf16.mxu1 %v18034_v24  ;;  %v18088_v24 = vld [vmem:[#allocation15 + $0x534] ss:$20 sps:$4 sm:$0xff]  }
 0x82e   :  { %13427 = vmatpush1.bf16.msra.mxu0 %v18029_v16  ;;  %v18083_v16 = vld [vmem:[#allocation15 + $0x528] ss:$20 sps:$4 sm:$0xff]  }
 0x82f   :  { %13755 = vmatpush1.bf16.msra.mxu1 %v18032_v17  ;;  %13428 = vmatprep.subr.bf16.mxu0 %v18037_v25  ;;  %v18086_v17 = vld [vmem:[#allocation15 + $0x530] ss:$20 sps:$4 sm:$0xff]   ;;  %v18091_v25 = vld [vmem:[#allocation15 + $0x554] ss:$20 sps:$4 sm:$0xff]  }
 0x830   :  { %13756 = vmatprep.subr.bf16.mxu1 %v18040_v3  ;;  %v18094_v3 = vld [vmem:[#allocation15 + $0x55c] ss:$20 sps:$4 sm:$0xff]  }
 0x832   :  { %13429 = vmatpush1.bf16.msra.mxu0 %v18035_v27  ;;  %v18089_v27 = vld [vmem:[#allocation15 + $0x550] ss:$20 sps:$4 sm:$0xff]  }
 0x833   :  { %13757 = vmatpush1.bf16.msra.mxu1 %v18038_v28  ;;  %13430 = vmatprep.subr.bf16.mxu0 %v18043_v39  ;;  %v18092_v28 = vld [vmem:[#allocation15 + $0x558] ss:$20 sps:$4 sm:$0xff]   ;;  %v18097_v39 = vld [vmem:[#allocation15 + $0x57c] ss:$20 sps:$4 sm:$0xff]  }
 0x834   :  { %13758 = vmatprep.subr.bf16.mxu1 %v18046_v42  ;;  %v18100_v42 = vld [vmem:[#allocation15 + $0x584] ss:$20 sps:$4 sm:$0xff]  }
 0x836   :  { %13431 = vmatpush1.bf16.msra.mxu0 %v18041_v44  ;;  %v18095_v44 = vld [vmem:[#allocation15 + $0x578] ss:$20 sps:$4 sm:$0xff]  }
 0x837   :  { %13759 = vmatpush1.bf16.msra.mxu1 %v18044_v21  ;;  %13432 = vmatprep.subr.bf16.mxu0 %v18049_v29  ;;  %v18098_v21 = vld [vmem:[#allocation15 + $0x580] ss:$20 sps:$4 sm:$0xff]   ;;  %v18103_v29 = vld [vmem:[#allocation15 + $0x5a4] ss:$20 sps:$4 sm:$0xff]  }
 0x838   :  { %13760 = vmatprep.subr.bf16.mxu1 %v18052_v60  ;;  %v18106_v60 = vld [vmem:[#allocation15 + $0x5ac] ss:$20 sps:$4 sm:$0xff]  }
 0x83a   :  { %13433 = vmatpush1.bf16.msra.mxu0 %v18047_v36  ;;  %v18101_v36 = vld [vmem:[#allocation15 + $0x5a0] ss:$20 sps:$4 sm:$0xff]  }
 0x83b   :  { %13761 = vmatpush1.bf16.msra.mxu1 %v18050_v30  ;;  %13434 = vmatprep.subr.bf16.mxu0 %v18055_v43  ;;  %v18104_v30 = vld [vmem:[#allocation15 + $0x5a8] ss:$20 sps:$4 sm:$0xff]   ;;  %v18109_v43 = vld [vmem:[#allocation15 + $0x5cc] ss:$20 sps:$4 sm:$0xff]  }
 0x83c   :  { %13762 = vmatprep.subr.bf16.mxu1 %v18058_v46  ;;  %v18112_v46 = vld [vmem:[#allocation15 + $0x5d4] ss:$20 sps:$4 sm:$0xff]  }
 0x83e   :  { %13435 = vmatpush1.bf16.msra.mxu0 %v18053_v47  ;;  %v18107_v47 = vld [vmem:[#allocation15 + $0x5c8] ss:$20 sps:$4 sm:$0xff]  }
 0x83f   :  { %13763 = vmatpush1.bf16.msra.mxu1 %v18056_v51  ;;  %13436 = vmatprep.subr.bf16.mxu0 %v18061_v54  ;;  %v18110_v51 = vld [vmem:[#allocation15 + $0x5d0] ss:$20 sps:$4 sm:$0xff]   ;;  %v18115_v54 = vld [vmem:[#allocation15 + $0x5f4] ss:$20 sps:$4 sm:$0xff]  }
 0x840   :  { %13764 = vmatprep.subr.bf16.mxu1 %v18064_v57  ;;  %v18118_v57 = vld [vmem:[#allocation15 + $0x5fc] ss:$20 sps:$4 sm:$0xff]  }
 0x842   :  { %13437 = vmatpush1.bf16.msra.mxu0 %v18059_v59  ;;  %v18113_v59 = vld [vmem:[#allocation15 + $0x5f0] ss:$20 sps:$4 sm:$0xff]  }
 0x843   :  { %13765 = vmatpush1.bf16.msra.mxu1 %v18062_v63  ;;  %13438 = vmatprep.subr.bf16.mxu0 %v18067_v2  ;;  %v18121_v63 = vld [vmem:[#allocation15 + $0x61c] ss:$20 sps:$4 sm:$0xff]   ;;  %v18124_v2 = vld [vmem:[#allocation15 + $0x624] ss:$20 sps:$4 sm:$0xff]  }
 0x844   :  { %13766 = vmatprep.subr.bf16.mxu1 %v18070_v33  ;;  %v18119_v33 = vld [vmem:[#allocation15 + $0x618] ss:$20 sps:$4 sm:$0xff]  }
 0x846   :  { %13439 = vmatpush1.bf16.msra.mxu0 %v18065_v48  ;;  %v18127_v48 = vld [vmem:[#allocation15 + $0x644] ss:$20 sps:$4 sm:$0xff]  }
 0x847   :  { %13767 = vmatpush1.bf16.msra.mxu1 %v18068_v11  ;;  %13440 = vmatprep.subr.bf16.mxu0 %v18073_v13  ;;  %v18125_v11 = vld [vmem:[#allocation15 + $0x640] ss:$20 sps:$4 sm:$0xff]   ;;  %v18128_v13 = vld [vmem:[#allocation15 + $0x648] ss:$20 sps:$4 sm:$0xff]  }
 0x848   :  { %13768 = vmatprep.subr.bf16.mxu1 %v18076_v14  ;;  %v18133_v14 = vld [vmem:[#allocation15 + $0x66c] ss:$20 sps:$4 sm:$0xff]  }
 0x84a   :  { %13441 = vmatpush1.bf16.msra.mxu0 %v18071_v19  ;;  %v18131_v19 = vld [vmem:[#allocation15 + $0x668] ss:$20 sps:$4 sm:$0xff]  }
 0x84b   :  { %13769 = vmatpush1.bf16.msra.mxu1 %v18074_v52  ;;  %13451 = vmatprep.subr.bf16.mxu0 %v18079_v26  ;;  %v18139_v52 = vld [vmem:[#allocation15 + $0x694] ss:$20 sps:$4 sm:$0xff]   ;;  %v18142_v26 = vld [vmem:[#allocation15 + $0x69c] ss:$20 sps:$4 sm:$0xff]  }
 0x84c   :  { %13779 = vmatprep.subr.bf16.mxu1 %v18082_v55  ;;  %v18137_v55 = vld [vmem:[#allocation15 + $0x690] ss:$20 sps:$4 sm:$0xff]  }
 0x84d   :  { %13443 = vmatmul.mubr.bf16.vlgmr.msra.gmra.mrb[28].mxu0 %v19959_v22 }
 0x84e   :  { %13771 = vmatmul.mubr.bf16.vlgmr.msra.gmra.mrb[28].mxu1 %v19959_v22  ;;  %13452 = vmatpush1.bf16.msra.mxu0 %v18077_v45  ;;  %v18145_v45 = vld [vmem:[#allocation15 + $0x6bc] ss:$20 sps:$4 sm:$0xff]  }
 0x84f   :  { %13483 = vmatprep.mubr.bf16.mxu0 %v19961_v35  ;;  %13780 = vmatpush1.bf16.msra.mxu1 %v18080_v23  ;;  %v18148_v23 = vld [vmem:[#allocation15 + $0x6c4] ss:$20 sps:$4 sm:$0xff]  }
 0x850   :  { %13811 = vmatprep.mubr.bf16.mxu1 %v19961_v35  ;;  %13453 = vmatprep.subr.bf16.mxu0 %v18085_v32  ;;  %v18143_v32 = vld [vmem:[#allocation15 + $0x6b8] ss:$20 sps:$4 sm:$0xff]  }
 0x851   :  { %13781 = vmatprep.subr.bf16.mxu1 %v18088_v24  ;;  %v18146_v24 = vld [vmem:[#allocation15 + $0x6c0] ss:$20 sps:$4 sm:$0xff]  }
 0x852   :  { %13454 = vmatpush1.bf16.msra.mxu0 %v18083_v16  ;;  %v18151_v16 = vld [vmem:[#allocation15 + $0x6e4] ss:$20 sps:$4 sm:$0xff]  }
 0x853   :  { %13782 = vmatpush1.bf16.msra.mxu1 %v18086_v17  ;;  %13455 = vmatprep.subr.bf16.mxu0 %v18091_v25  ;;  %v18154_v17 = vld [vmem:[#allocation15 + $0x6ec] ss:$20 sps:$4 sm:$0xff]  }
 0x854   :  { %13783 = vmatprep.subr.bf16.mxu1 %v18094_v3  ;;  %v18149_v25 = vld [vmem:[#allocation15 + $0x6e0] ss:$20 sps:$4 sm:$0xff]   ;;  %v18152_v3 = vld [vmem:[#allocation15 + $0x6e8] ss:$20 sps:$4 sm:$0xff]  }
 0x856   :  { %13456 = vmatpush1.bf16.msra.mxu0 %v18089_v27  ;;  %v18157_v27 = vld [vmem:[#allocation15 + $0x70c] ss:$20 sps:$4 sm:$0xff]  }
 0x857   :  { %13784 = vmatpush1.bf16.msra.mxu1 %v18092_v28  ;;  %13457 = vmatprep.subr.bf16.mxu0 %v18097_v39  ;;  %v18160_v28 = vld [vmem:[#allocation15 + $0x714] ss:$20 sps:$4 sm:$0xff]  }
 0x858   :  { %13785 = vmatprep.subr.bf16.mxu1 %v18100_v42  ;;  %v18155_v39 = vld [vmem:[#allocation15 + $0x708] ss:$20 sps:$4 sm:$0xff]   ;;  %v2721_v42 = vrot.slane %v19928_v37, %v19830_v4 }
 0x85a   :  { %13458 = vmatpush1.bf16.msra.mxu0 %v18095_v44  ;;  %v18158_v44 = vld [vmem:[#allocation15 + $0x710] ss:$20 sps:$4 sm:$0xff]  }
 0x85b   :  { %13786 = vmatpush1.bf16.msra.mxu1 %v18098_v21  ;;  %13459 = vmatprep.subr.bf16.mxu0 %v18103_v29  ;;  %v18163_v21 = vld [vmem:[#allocation15 + $0x734] ss:$20 sps:$4 sm:$0xff]   ;;  %v18166_v29 = vld [vmem:[#allocation15 + $0x73c] ss:$20 sps:$4 sm:$0xff]  }
 0x85c   :  { %13787 = vmatprep.subr.bf16.mxu1 %v18106_v60  ;;  %v2733_v60 = vrot.slane %v19928_v37, %v19833_v10  ;;  %v18178_v37 = vld [vmem:[#allocation15 + $0x78c] ss:$20 sps:$4 sm:$0xff]  }
 0x85e   :  { %13460 = vmatpush1.bf16.msra.mxu0 %v18101_v36  ;;  %v18161_v36 = vld [vmem:[#allocation15 + $0x730] ss:$20 sps:$4 sm:$0xff]  }
 0x85f   :  { %13788 = vmatpush1.bf16.msra.mxu1 %v18104_v30  ;;  %13461 = vmatprep.subr.bf16.mxu0 %v18109_v43  ;;  %v17605_v30 = vadd.f32 %v19896_v40, %v2721_v42  ;;  %v18164_v43 = vld [vmem:[#allocation15 + $0x738] ss:$20 sps:$4 sm:$0xff]   ;;  %v18173_v40 = vld [vmem:[#allocation15 + $0x780] ss:$20 sps:$4 sm:$0xff]  }
 0x860   :  { %13789 = vmatprep.subr.bf16.mxu1 %v18112_v46  ;;  %v18169_v46 = vld [vmem:[#allocation15 + $0x75c] ss:$20 sps:$4 sm:$0xff]  }
 0x862   :  { %13462 = vmatpush1.bf16.msra.mxu0 %v18107_v47  ;;  %v18172_v47 = vld [vmem:[#allocation15 + $0x764] ss:$20 sps:$4 sm:$0xff]  }
 0x863   :  { %13790 = vmatpush1.bf16.msra.mxu1 %v18110_v51  ;;  %13463 = vmatprep.subr.bf16.mxu0 %v18115_v54  ;;  %v17608_v51 = vadd.f32 %v19902_v41, %v2733_v60  ;;  %v18167_v54 = vld [vmem:[#allocation15 + $0x758] ss:$20 sps:$4 sm:$0xff]  }
 0x864   :  { %13791 = vmatprep.subr.bf16.mxu1 %v18118_v57  ;;  %v9218_v57 = vmax.f32 %v17605_v30, 0.0  ;;  %v18212_v30 = vld [vmem:[#allocation15 + $0x878] ss:$20 sps:$4 sm:$0xff]  }
 0x866   :  { %13464 = vmatpush1.bf16.msra.mxu0 %v18113_v59  ;;  %v18170_v59 = vld [vmem:[#allocation15 + $0x760] ss:$20 sps:$4 sm:$0xff]  }
 0x867   :  { %13792 = vmatpush1.bf16.msra.mxu1 %v18116_v62  ;;  %13465 = vmatprep.subr.bf16.mxu0 %v18121_v63  ;;  %v18175_v62 = vld [vmem:[#allocation15 + $0x784] ss:$20 sps:$4 sm:$0xff]   ;;  %v9221_v63 = vmax.f32 %v17608_v51, 0.0 }
 0x868   :  { %13793 = vmatprep.subr.bf16.mxu1 %v18124_v2  ;;  %v19973_v2 = vpack.c.bf16 %v9218_v57, %v9218_v57  ;;  %v18215_v51 = vld [vmem:[#allocation15 + $0x898] ss:$20 sps:$4 sm:$0xff]  }
 0x869   :  { %v19975_v41 = vpack.c.bf16 %v9221_v63, %v9221_v63  ;;  %v18223_v57 = vld [vmem:[#allocation15 + $0x8c4] ss:$20 sps:$4 sm:$0xff]   ;;  %v18229_v63 = vld [vmem:[#allocation15 + $0x8ec] ss:$20 sps:$4 sm:$0xff]  }
 0x86a   :  { %13466 = vmatpush1.bf16.msra.mxu0 %v18119_v33  ;;  %v18176_v33 = vld [vmem:[#allocation15 + $0x788] ss:$20 sps:$4 sm:$0xff]  }
 0x86b   :  { %13794 = vmatpush1.bf16.msra.mxu1 %v18122_v5  ;;  %13467 = vmatprep.subr.bf16.mxu0 %v18127_v48  ;;  %v18181_v5 = vld [vmem:[#allocation15 + $0x7ac] ss:$20 sps:$4 sm:$0xff]   ;;  %v18184_v48 = vld [vmem:[#allocation15 + $0x7b4] ss:$20 sps:$4 sm:$0xff]  }
 0x86c   :  { %13795 = vmatprep.subr.bf16.mxu1 %v18130_v31  ;;  %v18179_v31 = vld [vmem:[#allocation15 + $0x7a8] ss:$20 sps:$4 sm:$0xff]  }
 0x86e   :  { %13468 = vmatpush1.bf16.msra.mxu0 %v18125_v11  ;;  %v18182_v11 = vld [vmem:[#allocation15 + $0x7b0] ss:$20 sps:$4 sm:$0xff]  }
 0x86f   :  { %13796 = vmatpush1.bf16.msra.mxu1 %v18128_v13  ;;  %13469 = vmatprep.subr.bf16.mxu0 %v18133_v14  ;;  %v18187_v13 = vld [vmem:[#allocation15 + $0x7d4] ss:$20 sps:$4 sm:$0xff]   ;;  %v18190_v14 = vld [vmem:[#allocation15 + $0x7dc] ss:$20 sps:$4 sm:$0xff]  }
 0x870   :  { %13797 = vmatprep.subr.bf16.mxu1 %v18136_v15  ;;  %v18185_v15 = vld [vmem:[#allocation15 + $0x7d0] ss:$20 sps:$4 sm:$0xff]  }
 0x872   :  { %13470 = vmatpush1.bf16.msra.mxu0 %v18131_v19  ;;  %v18188_v19 = vld [vmem:[#allocation15 + $0x7d8] ss:$20 sps:$4 sm:$0xff]  }
 0x873   :  { %13798 = vmatpush1.bf16.msra.mxu1 %v18134_v20  ;;  %13471 = vmatprep.subr.bf16.mxu0 %v18139_v52  ;;  %v18193_v20 = vld [vmem:[#allocation15 + $0x7fc] ss:$20 sps:$4 sm:$0xff]   ;;  %v18196_v52 = vld [vmem:[#allocation15 + $0x804] ss:$20 sps:$4 sm:$0xff]  }
 0x874   :  { %13799 = vmatprep.subr.bf16.mxu1 %v18142_v26  ;;  %v18191_v26 = vld [vmem:[#allocation15 + $0x7f8] ss:$20 sps:$4 sm:$0xff]  }
 0x876   :  { %13472 = vmatpush1.bf16.msra.mxu0 %v18137_v55  ;;  %v18194_v55 = vld [vmem:[#allocation15 + $0x800] ss:$20 sps:$4 sm:$0xff]  }
 0x877   :  { %13800 = vmatpush1.bf16.msra.mxu1 %v18140_v58  ;;  %13473 = vmatprep.subr.bf16.mxu0 %v18145_v45  ;;  %v18199_v58 = vld [vmem:[#allocation15 + $0x824] ss:$20 sps:$4 sm:$0xff]   ;;  %v18202_v45 = vld [vmem:[#allocation15 + $0x82c] ss:$20 sps:$4 sm:$0xff]  }
 0x878   :  { %13801 = vmatprep.subr.bf16.mxu1 %v18148_v23  ;;  %v18197_v23 = vld [vmem:[#allocation15 + $0x820] ss:$20 sps:$4 sm:$0xff]  }
 0x87a   :  { %13474 = vmatpush1.bf16.msra.mxu0 %v18143_v32  ;;  %v18200_v32 = vld [vmem:[#allocation15 + $0x828] ss:$20 sps:$4 sm:$0xff]  }
 0x87b   :  { %13802 = vmatpush1.bf16.msra.mxu1 %v18146_v24  ;;  %13475 = vmatprep.subr.bf16.mxu0 %v18151_v16  ;;  %v18205_v24 = vld [vmem:[#allocation15 + $0x84c] ss:$20 sps:$4 sm:$0xff]   ;;  %v18208_v16 = vld [vmem:[#allocation15 + $0x854] ss:$20 sps:$4 sm:$0xff]  }
 0x87c   :  { %13803 = vmatprep.subr.bf16.mxu1 %v18154_v17  ;;  %v18203_v17 = vld [vmem:[#allocation15 + $0x848] ss:$20 sps:$4 sm:$0xff]  }
 0x87e   :  { %13476 = vmatpush1.bf16.msra.mxu0 %v18149_v25  ;;  %v18206_v25 = vld [vmem:[#allocation15 + $0x850] ss:$20 sps:$4 sm:$0xff]  }
 0x87f   :  { %13804 = vmatpush1.bf16.msra.mxu1 %v18152_v3  ;;  %13477 = vmatprep.subr.bf16.mxu0 %v18157_v27  ;;  %v18211_v3 = vld [vmem:[#allocation15 + $0x874] ss:$20 sps:$4 sm:$0xff]  }
 0x880   :  { %13805 = vmatprep.subr.bf16.mxu1 %v18160_v28  ;;  %v18214_v28 = vld [vmem:[#allocation15 + $0x87c] ss:$20 sps:$4 sm:$0xff]  }
 0x882   :  { %13478 = vmatpush1.bf16.msra.mxu0 %v18155_v39 }
 0x883   :  { %13806 = vmatpush1.bf16.msra.mxu1 %v18158_v44  ;;  %13479 = vmatprep.subr.bf16.mxu0 %v18163_v21 }
 0x884   :  { %13807 = vmatprep.subr.bf16.mxu1 %v18166_v29  ;;  %v18209_v29 = vld [vmem:[#allocation15 + $0x870] ss:$20 sps:$4 sm:$0xff]  }
 0x886   :  { %13480 = vmatpush1.bf16.msra.mxu0 %v18161_v36 }
 0x887   :  { %13808 = vmatpush1.bf16.msra.mxu1 %v18164_v43  ;;  %13481 = vmatprep.subr.bf16.mxu0 %v18169_v46  ;;  %v18217_v43 = vld [vmem:[#allocation15 + $0x89c] ss:$20 sps:$4 sm:$0xff]  }
 0x888   :  { %13809 = vmatprep.subr.bf16.mxu1 %v18172_v47  ;;  %v18220_v47 = vld [vmem:[#allocation15 + $0x8a4] ss:$20 sps:$4 sm:$0xff]  }
 0x88a   :  { %13482 = vmatpush1.bf16.msra.mxu0 %v18167_v54  ;;  %v18218_v54 = vld [vmem:[#allocation15 + $0x8a0] ss:$20 sps:$4 sm:$0xff]  }
 0x88b   :  { %13810 = vmatpush1.bf16.msra.mxu1 %v18170_v59  ;;  %13492 = vmatprep.subr.bf16.mxu0 %v18175_v62  ;;  %v18226_v59 = vld [vmem:[#allocation15 + $0x8cc] ss:$20 sps:$4 sm:$0xff]  }
 0x88c   :  { %13820 = vmatprep.subr.bf16.mxu1 %v18178_v37  ;;  %v18221_v62 = vld [vmem:[#allocation15 + $0x8c0] ss:$20 sps:$4 sm:$0xff]   ;;  %v18224_v37 = vld [vmem:[#allocation15 + $0x8c8] ss:$20 sps:$4 sm:$0xff]  }
 0x88d   :  { %13484 = vmatmul.mubr.bf16.vlgmr.msra.gmra.mrb[28].mxu0 %v19973_v2 }
 0x88e   :  { %13812 = vmatmul.mubr.bf16.vlgmr.msra.gmra.mrb[28].mxu1 %v19973_v2  ;;  %13493 = vmatpush1.bf16.msra.mxu0 %v18173_v40  ;;  %v18232_v40 = vld [vmem:[#allocation15 + $0x8f4] ss:$20 sps:$4 sm:$0xff]  }
 0x88f   :  { %13524 = vmatprep.mubr.bf16.mxu0 %v19975_v41  ;;  %13821 = vmatpush1.bf16.msra.mxu1 %v18176_v33  ;;  %v18227_v33 = vld [vmem:[#allocation15 + $0x8e8] ss:$20 sps:$4 sm:$0xff]  }
 0x890   :  { %13852 = vmatprep.mubr.bf16.mxu1 %v19975_v41  ;;  %13494 = vmatprep.subr.bf16.mxu0 %v18181_v5  ;;  %v18230_v5 = vld [vmem:[#allocation15 + $0x8f0] ss:$20 sps:$4 sm:$0xff]  }
 0x891   :  { %13822 = vmatprep.subr.bf16.mxu1 %v18184_v48  ;;  %v18235_v48 = vld [vmem:[#allocation15 + $0x914] ss:$20 sps:$4 sm:$0xff]  }
 0x892   :  { %13495 = vmatpush1.bf16.msra.mxu0 %v18179_v31  ;;  %v18238_v31 = vld [vmem:[#allocation15 + $0x91c] ss:$20 sps:$4 sm:$0xff]  }
 0x893   :  { %13823 = vmatpush1.bf16.msra.mxu1 %v18182_v11  ;;  %13496 = vmatprep.subr.bf16.mxu0 %v18187_v13  ;;  %v18233_v11 = vld [vmem:[#allocation15 + $0x910] ss:$20 sps:$4 sm:$0xff]   ;;  %v18236_v13 = vld [vmem:[#allocation15 + $0x918] ss:$20 sps:$4 sm:$0xff]  }
 0x894   :  { %13824 = vmatprep.subr.bf16.mxu1 %v18190_v14  ;;  %v18241_v14 = vld [vmem:[#allocation15 + $0x93c] ss:$20 sps:$4 sm:$0xff]  }
 0x896   :  { %13497 = vmatpush1.bf16.msra.mxu0 %v18185_v15  ;;  %v18244_v15 = vld [vmem:[#allocation15 + $0x944] ss:$20 sps:$4 sm:$0xff]  }
 0x897   :  { %13825 = vmatpush1.bf16.msra.mxu1 %v18188_v19  ;;  %13498 = vmatprep.subr.bf16.mxu0 %v18193_v20  ;;  %v18239_v19 = vld [vmem:[#allocation15 + $0x938] ss:$20 sps:$4 sm:$0xff]   ;;  %v18242_v20 = vld [vmem:[#allocation15 + $0x940] ss:$20 sps:$4 sm:$0xff]  }
 0x898   :  { %13826 = vmatprep.subr.bf16.mxu1 %v18196_v52  ;;  %v18247_v52 = vld [vmem:[#allocation15 + $0x964] ss:$20 sps:$4 sm:$0xff]  }
 0x89a   :  { %13499 = vmatpush1.bf16.msra.mxu0 %v18191_v26  ;;  %v18250_v26 = vld [vmem:[#allocation15 + $0x96c] ss:$20 sps:$4 sm:$0xff]  }
 0x89b   :  { %13827 = vmatpush1.bf16.msra.mxu1 %v18194_v55  ;;  %13500 = vmatprep.subr.bf16.mxu0 %v18199_v58  ;;  %v18245_v55 = vld [vmem:[#allocation15 + $0x960] ss:$20 sps:$4 sm:$0xff]   ;;  %v18248_v58 = vld [vmem:[#allocation15 + $0x968] ss:$20 sps:$4 sm:$0xff]  }
 0x89c   :  { %13828 = vmatprep.subr.bf16.mxu1 %v18202_v45  ;;  %v18253_v45 = vld [vmem:[#allocation15 + $0x98c] ss:$20 sps:$4 sm:$0xff]  }
 0x89e   :  { %13501 = vmatpush1.bf16.msra.mxu0 %v18197_v23  ;;  %v18256_v23 = vld [vmem:[#allocation15 + $0x994] ss:$20 sps:$4 sm:$0xff]  }
 0x89f   :  { %13829 = vmatpush1.bf16.msra.mxu1 %v18200_v32  ;;  %13502 = vmatprep.subr.bf16.mxu0 %v18205_v24  ;;  %v19989_v32 = vld [vmem:[#allocation13 + $0x8] sm:$0xff] }
 0x8a0   :  { %v19981_v27 = vpop.f32.mrb[24].mxu0  ;;  %13830 = vmatprep.subr.bf16.mxu1 %v18208_v16  ;;  %v18251_v24 = vld [vmem:[#allocation15 + $0x988] ss:$20 sps:$4 sm:$0xff]   ;;  %v18934_v16 = vld [vmem:[#allocation13] sm:$0xff] }
 0x8a1   :  { %v19983_v39 = vpop.f32.mrb[24].mxu1  ;;  %v19985_v42 = vpop.f32.mrb[25].mxu0 }
 0x8a2   :  { %v19987_v44 = vpop.f32.mrb[25].mxu1  ;;  %v9047_v21 = vpop.f32.mrb[26].mxu0  ;;  %13503 = vmatpush1.bf16.msra.mxu0 %v18203_v17  ;;  %v2729_v17 = vrot.slane %v18934_v16, %v19850_v53  ;;  %v18299_v16 = vld [vmem:[#allocation15 + $0xac8] ss:$20 sps:$4 sm:$0xff]  }
 0x8a3   :  { %v9211_v60 = vpop.f32.mrb[26].mxu1  ;;  %13831 = vmatpush1.bf16.msra.mxu1 %v18206_v25  ;;  %v9048_v36 = vpop.f32.mrb[27].mxu0  ;;  %13504 = vmatprep.subr.bf16.mxu0 %v18211_v3  ;;  %v18254_v25 = vld [vmem:[#allocation15 + $0x990] ss:$20 sps:$4 sm:$0xff]   ;;  %v18259_v3 = vld [vmem:[#allocation15 + $0x9b4] ss:$20 sps:$4 sm:$0xff]   ;;  %v2741_v21 = vrot.slane %v19989_v32, %v19742_v50 }
 0x8a4   :  { %v9212_v46 = vpop.f32.mrb[27].mxu1  ;;  %13832 = vmatprep.subr.bf16.mxu1 %v18214_v28  ;;  %v18262_v28 = vld [vmem:[#allocation15 + $0x9bc] ss:$20 sps:$4 sm:$0xff]   ;;  %v17607_v60 = vadd.f32 %v19898_v34, %v2729_v17  ;;  %v18260_v36 = vld [vmem:[#allocation15 + $0x9b8] ss:$20 sps:$4 sm:$0xff]  }
 0x8a5   :  { %v17610_v46 = vadd.f32 %v19924_v7, %v2741_v21  ;;  %v18269_v34 = vld [vmem:[#allocation15 + $0xa00] ss:$20 sps:$4 sm:$0xff]   ;;  %v18302_v17 = vld [vmem:[#allocation15 + $0xad0] ss:$20 sps:$4 sm:$0xff]   ;;  %v18308_v21 = vld [vmem:[#allocation15 + $0xaf8] ss:$20 sps:$4 sm:$0xff]  }
 0x8a6   :  { %13505 = vmatpush1.bf16.msra.mxu0 %v18209_v29  ;;  %v18257_v29 = vld [vmem:[#allocation15 + $0x9b0] ss:$20 sps:$4 sm:$0xff]  }
 0x8a7   :  { %13833 = vmatpush1.bf16.msra.mxu1 %v18212_v30  ;;  %13506 = vmatprep.subr.bf16.mxu0 %v18217_v43  ;;  %v18265_v30 = vld [vmem:[#allocation15 + $0x9dc] ss:$20 sps:$4 sm:$0xff]   ;;  %v18268_v43 = vld [vmem:[#allocation15 + $0x9e4] ss:$20 sps:$4 sm:$0xff]  }
 0x8a8   :  { %13834 = vmatprep.subr.bf16.mxu1 %v18220_v47  ;;  %v18263_v47 = vld [vmem:[#allocation15 + $0x9d8] ss:$20 sps:$4 sm:$0xff]  }
 0x8aa   :  { %13507 = vmatpush1.bf16.msra.mxu0 %v18215_v51  ;;  %v9220_v51 = vmax.f32 %v17607_v60, 0.0  ;;  %v18316_v60 = vld [vmem:[#allocation15 + $0xb24] ss:$20 sps:$4 sm:$0xff]  }
 0x8ab   :  { %13835 = vmatpush1.bf16.msra.mxu1 %v18218_v54  ;;  %13508 = vmatprep.subr.bf16.mxu0 %v18223_v57  ;;  %v18266_v54 = vld [vmem:[#allocation15 + $0x9e0] ss:$20 sps:$4 sm:$0xff]   ;;  %v18271_v57 = vld [vmem:[#allocation15 + $0xa04] ss:$20 sps:$4 sm:$0xff]  }
 0x8ac   :  { %13836 = vmatprep.subr.bf16.mxu1 %v18226_v59  ;;  %v18274_v59 = vld [vmem:[#allocation15 + $0xa0c] ss:$20 sps:$4 sm:$0xff]  }
 0x8ae   :  { %13509 = vmatpush1.bf16.msra.mxu0 %v18221_v62  ;;  %v9223_v62 = vmax.f32 %v17610_v46, 0.0  ;;  %v18322_v46 = vld [vmem:[#allocation15 + $0xb4c] ss:$20 sps:$4 sm:$0xff]  }
 0x8af   :  { %13837 = vmatpush1.bf16.msra.mxu1 %v18224_v37  ;;  %13510 = vmatprep.subr.bf16.mxu0 %v18229_v63  ;;  %v19996_v37 = vpack.c.bf16 %v9220_v51, %v9220_v51  ;;  %v18272_v63 = vld [vmem:[#allocation15 + $0xa08] ss:$20 sps:$4 sm:$0xff]  }
 0x8b0   :  { %13838 = vmatprep.subr.bf16.mxu1 %v18232_v40  ;;  %v18277_v40 = vld [vmem:[#allocation15 + $0xa2c] ss:$20 sps:$4 sm:$0xff]   ;;  %v19998_v7 = vpack.c.bf16 %v9223_v62, %v9223_v62  ;;  %v18320_v51 = vld [vmem:[#allocation15 + $0xb48] ss:$20 sps:$4 sm:$0xff]   ;;  %v18326_v62 = vld [vmem:[#allocation15 + $0xb70] ss:$20 sps:$4 sm:$0xff]  }
 0x8b2   :  { %13511 = vmatpush1.bf16.msra.mxu0 %v18227_v33  ;;  %v18280_v33 = vld [vmem:[#allocation15 + $0xa34] ss:$20 sps:$4 sm:$0xff]  }
 0x8b3   :  { %13839 = vmatpush1.bf16.msra.mxu1 %v18230_v5  ;;  %13512 = vmatprep.subr.bf16.mxu0 %v18235_v48  ;;  %v18275_v5 = vld [vmem:[#allocation15 + $0xa28] ss:$20 sps:$4 sm:$0xff]   ;;  %v18278_v48 = vld [vmem:[#allocation15 + $0xa30] ss:$20 sps:$4 sm:$0xff]  }
 0x8b4   :  { %13840 = vmatprep.subr.bf16.mxu1 %v18238_v31  ;;  %v18283_v31 = vld [vmem:[#allocation15 + $0xa54] ss:$20 sps:$4 sm:$0xff]  }
 0x8b6   :  { %13513 = vmatpush1.bf16.msra.mxu0 %v18233_v11  ;;  %v18286_v11 = vld [vmem:[#allocation15 + $0xa5c] ss:$20 sps:$4 sm:$0xff]  }
 0x8b7   :  { %13841 = vmatpush1.bf16.msra.mxu1 %v18236_v13  ;;  %13514 = vmatprep.subr.bf16.mxu0 %v18241_v14  ;;  %v18281_v13 = vld [vmem:[#allocation15 + $0xa50] ss:$20 sps:$4 sm:$0xff]   ;;  %v18284_v14 = vld [vmem:[#allocation15 + $0xa58] ss:$20 sps:$4 sm:$0xff]  }
 0x8b8   :  { %13842 = vmatprep.subr.bf16.mxu1 %v18244_v15  ;;  %v18289_v15 = vld [vmem:[#allocation15 + $0xa7c] ss:$20 sps:$4 sm:$0xff]  }
 0x8ba   :  { %13515 = vmatpush1.bf16.msra.mxu0 %v18239_v19  ;;  %v18292_v19 = vld [vmem:[#allocation15 + $0xa84] ss:$20 sps:$4 sm:$0xff]  }
 0x8bb   :  { %13843 = vmatpush1.bf16.msra.mxu1 %v18242_v20  ;;  %13516 = vmatprep.subr.bf16.mxu0 %v18247_v52  ;;  %v18287_v20 = vld [vmem:[#allocation15 + $0xa78] ss:$20 sps:$4 sm:$0xff]   ;;  %v18290_v52 = vld [vmem:[#allocation15 + $0xa80] ss:$20 sps:$4 sm:$0xff]  }
 0x8bc   :  { %13844 = vmatprep.subr.bf16.mxu1 %v18250_v26  ;;  %v18295_v26 = vld [vmem:[#allocation15 + $0xaa4] ss:$20 sps:$4 sm:$0xff]  }
 0x8be   :  { %13517 = vmatpush1.bf16.msra.mxu0 %v18245_v55  ;;  %v18298_v55 = vld [vmem:[#allocation15 + $0xaac] ss:$20 sps:$4 sm:$0xff]  }
 0x8bf   :  { %13845 = vmatpush1.bf16.msra.mxu1 %v18248_v58  ;;  %13518 = vmatprep.subr.bf16.mxu0 %v18253_v45  ;;  %v18293_v58 = vld [vmem:[#allocation15 + $0xaa0] ss:$20 sps:$4 sm:$0xff]   ;;  %v18296_v45 = vld [vmem:[#allocation15 + $0xaa8] ss:$20 sps:$4 sm:$0xff]  }
 0x8c0   :  { %13846 = vmatprep.subr.bf16.mxu1 %v18256_v23  ;;  %v18301_v23 = vld [vmem:[#allocation15 + $0xacc] ss:$20 sps:$4 sm:$0xff]  }
 0x8c2   :  { %13519 = vmatpush1.bf16.msra.mxu0 %v18251_v24  ;;  %v18304_v24 = vld [vmem:[#allocation15 + $0xad4] ss:$20 sps:$4 sm:$0xff]  }
 0x8c3   :  { %13847 = vmatpush1.bf16.msra.mxu1 %v18254_v25  ;;  %13520 = vmatprep.subr.bf16.mxu0 %v18259_v3  ;;  %v18307_v25 = vld [vmem:[#allocation15 + $0xaf4] ss:$20 sps:$4 sm:$0xff]   ;;  %v18310_v3 = vld [vmem:[#allocation15 + $0xafc] ss:$20 sps:$4 sm:$0xff]  }
 0x8c4   :  { %13848 = vmatprep.subr.bf16.mxu1 %v18262_v28  ;;  %v18305_v28 = vld [vmem:[#allocation15 + $0xaf0] ss:$20 sps:$4 sm:$0xff]  }
 0x8c6   :  { %13521 = vmatpush1.bf16.msra.mxu0 %v18257_v29  ;;  %v18313_v29 = vld [vmem:[#allocation15 + $0xb1c] ss:$20 sps:$4 sm:$0xff]  }
 0x8c7   :  { %13849 = vmatpush1.bf16.msra.mxu1 %v18260_v36  ;;  %13522 = vmatprep.subr.bf16.mxu0 %v18265_v30  ;;  %v18311_v36 = vld [vmem:[#allocation15 + $0xb18] ss:$20 sps:$4 sm:$0xff]   ;;  %v18314_v30 = vld [vmem:[#allocation15 + $0xb20] ss:$20 sps:$4 sm:$0xff]  }
 0x8c8   :  { %13850 = vmatprep.subr.bf16.mxu1 %v18268_v43  ;;  %v18319_v43 = vld [vmem:[#allocation15 + $0xb44] ss:$20 sps:$4 sm:$0xff]  }
 0x8ca   :  { %13523 = vmatpush1.bf16.msra.mxu0 %v18263_v47  ;;  %v18317_v47 = vld [vmem:[#allocation15 + $0xb40] ss:$20 sps:$4 sm:$0xff]  }
 0x8cb   :  { %13851 = vmatpush1.bf16.msra.mxu1 %v18266_v54  ;;  %13533 = vmatprep.subr.bf16.mxu0 %v18271_v57  ;;  %v18325_v54 = vld [vmem:[#allocation15 + $0xb6c] ss:$20 sps:$4 sm:$0xff]   ;;  %v18328_v57 = vld [vmem:[#allocation15 + $0xb74] ss:$20 sps:$4 sm:$0xff]  }
 0x8cc   :  { %13861 = vmatprep.subr.bf16.mxu1 %v18274_v59  ;;  %v18323_v59 = vld [vmem:[#allocation15 + $0xb68] ss:$20 sps:$4 sm:$0xff]  }
 0x8cd   :  { %13525 = vmatmul.mubr.bf16.vlgmr.msra.gmra.mrb[28].mxu0 %v19996_v37 }
 0x8ce   :  { %13853 = vmatmul.mubr.bf16.vlgmr.msra.gmra.mrb[28].mxu1 %v19996_v37  ;;  %13534 = vmatpush1.bf16.msra.mxu0 %v18269_v34  ;;  %v18331_v34 = vld [vmem:[#allocation15 + $0xb94] ss:$20 sps:$4 sm:$0xff]  }
 0x8cf   :  { %13565 = vmatprep.mubr.bf16.mxu0 %v19998_v7  ;;  %13862 = vmatpush1.bf16.msra.mxu1 %v18272_v63  ;;  %v18334_v63 = vld [vmem:[#allocation15 + $0xb9c] ss:$20 sps:$4 sm:$0xff]  }
 0x8d0   :  { %13893 = vmatprep.mubr.bf16.mxu1 %v19998_v7  ;;  %13535 = vmatprep.subr.bf16.mxu0 %v18277_v40  ;;  %v18329_v40 = vld [vmem:[#allocation15 + $0xb90] ss:$20 sps:$4 sm:$0xff]  }
 0x8d1   :  { %13863 = vmatprep.subr.bf16.mxu1 %v18280_v33  ;;  %v18332_v33 = vld [vmem:[#allocation15 + $0xb98] ss:$20 sps:$4 sm:$0xff]  }
 0x8d2   :  { %13536 = vmatpush1.bf16.msra.mxu0 %v18275_v5  ;;  %v18337_v5 = vld [vmem:[#allocation15 + $0xbbc] ss:$20 sps:$4 sm:$0xff]  }
 0x8d3   :  { %13864 = vmatpush1.bf16.msra.mxu1 %v18278_v48  ;;  %13537 = vmatprep.subr.bf16.mxu0 %v18283_v31  ;;  %v18340_v48 = vld [vmem:[#allocation15 + $0xbc4] ss:$20 sps:$4 sm:$0xff]  }
 0x8d4   :  { %13865 = vmatprep.subr.bf16.mxu1 %v18286_v11  ;;  %v18335_v31 = vld [vmem:[#allocation15 + $0xbb8] ss:$20 sps:$4 sm:$0xff]   ;;  %v18338_v11 = vld [vmem:[#allocation15 + $0xbc0] ss:$20 sps:$4 sm:$0xff]  }
 0x8d6   :  { %13538 = vmatpush1.bf16.msra.mxu0 %v18281_v13  ;;  %v18343_v13 = vld [vmem:[#allocation15 + $0xbe4] ss:$20 sps:$4 sm:$0xff]  }
 0x8d7   :  { %13866 = vmatpush1.bf16.msra.mxu1 %v18284_v14  ;;  %13539 = vmatprep.subr.bf16.mxu0 %v18289_v15  ;;  %v18346_v14 = vld [vmem:[#allocation15 + $0xbec] ss:$20 sps:$4 sm:$0xff]  }
 0x8d8   :  { %13867 = vmatprep.subr.bf16.mxu1 %v18292_v19  ;;  %v18341_v15 = vld [vmem:[#allocation15 + $0xbe0] ss:$20 sps:$4 sm:$0xff]   ;;  %v18344_v19 = vld [vmem:[#allocation15 + $0xbe8] ss:$20 sps:$4 sm:$0xff]  }
 0x8da   :  { %13540 = vmatpush1.bf16.msra.mxu0 %v18287_v20  ;;  %v18349_v20 = vld [vmem:[#allocation15 + $0xc0c] ss:$20 sps:$4 sm:$0xff]  }
 0x8db   :  { %13868 = vmatpush1.bf16.msra.mxu1 %v18290_v52  ;;  %13541 = vmatprep.subr.bf16.mxu0 %v18295_v26  ;;  %v18352_v52 = vld [vmem:[#allocation15 + $0xc14] ss:$20 sps:$4 sm:$0xff]  }
 0x8dc   :  { %13869 = vmatprep.subr.bf16.mxu1 %v18298_v55  ;;  %v18347_v26 = vld [vmem:[#allocation15 + $0xc08] ss:$20 sps:$4 sm:$0xff]   ;;  %v2737_v55 = vrot.slane %v19989_v32, %v19739_v49 }
 0x8de   :  { %13542 = vmatpush1.bf16.msra.mxu0 %v18293_v58  ;;  %v18350_v58 = vld [vmem:[#allocation15 + $0xc10] ss:$20 sps:$4 sm:$0xff]  }
 0x8df   :  { %13870 = vmatpush1.bf16.msra.mxu1 %v18296_v45  ;;  %13543 = vmatprep.subr.bf16.mxu0 %v18301_v23  ;;  %v18355_v45 = vld [vmem:[#allocation15 + $0xc34] ss:$20 sps:$4 sm:$0xff]   ;;  %v18358_v23 = vld [vmem:[#allocation15 + $0xc3c] ss:$20 sps:$4 sm:$0xff]  }
 0x8e0   :  { %13871 = vmatprep.subr.bf16.mxu1 %v18304_v24  ;;  %v2749_v24 = vrot.slane %v19989_v32, %v19776_v61 }
 0x8e2   :  { %13544 = vmatpush1.bf16.msra.mxu0 %v18299_v16  ;;  %v18353_v16 = vld [vmem:[#allocation15 + $0xc30] ss:$20 sps:$4 sm:$0xff]  }
 0x8e3   :  { %13872 = vmatpush1.bf16.msra.mxu1 %v18302_v17  ;;  %13545 = vmatprep.subr.bf16.mxu0 %v18307_v25  ;;  %v17609_v17 = vadd.f32 %v19920_v1, %v2737_v55  ;;  %v18356_v25 = vld [vmem:[#allocation15 + $0xc38] ss:$20 sps:$4 sm:$0xff]   ;;  %v18365_v1 = vld [vmem:[#allocation15 + $0xc80] ss:$20 sps:$4 sm:$0xff]   ;;  %v18398_v55 = vld [vmem:[#allocation15 + $0xd50] ss:$20 sps:$4 sm:$0xff]  }
 0x8e4   :  { %13873 = vmatprep.subr.bf16.mxu1 %v18310_v3  ;;  %v18361_v3 = vld [vmem:[#allocation15 + $0xc5c] ss:$20 sps:$4 sm:$0xff]  }
 0x8e6   :  { %13546 = vmatpush1.bf16.msra.mxu0 %v18305_v28  ;;  %v18364_v28 = vld [vmem:[#allocation15 + $0xc64] ss:$20 sps:$4 sm:$0xff]  }
 0x8e7   :  { %13874 = vmatpush1.bf16.msra.mxu1 %v18308_v21  ;;  %13547 = vmatprep.subr.bf16.mxu0 %v18313_v29  ;;  %v17612_v21 = vadd.f32 %v19926_v9, %v2749_v24  ;;  %v18359_v29 = vld [vmem:[#allocation15 + $0xc58] ss:$20 sps:$4 sm:$0xff]  }
 0x8e8   :  { %13875 = vmatprep.subr.bf16.mxu1 %v18316_v60  ;;  %v9222_v60 = vmax.f32 %v17609_v17, 0.0  ;;  %v18404_v24 = vld [vmem:[#allocation15 + $0xd78] ss:$20 sps:$4 sm:$0xff]  }
 0x8e9   :  { %v18412_v17 = vld [vmem:[#allocation15 + $0xda4] ss:$20 sps:$4 sm:$0xff]  }
 0x8ea   :  { %13548 = vmatpush1.bf16.msra.mxu0 %v18311_v36  ;;  %v18362_v36 = vld [vmem:[#allocation15 + $0xc60] ss:$20 sps:$4 sm:$0xff]  }
 0x8eb   :  { %13876 = vmatpush1.bf16.msra.mxu1 %v18314_v30  ;;  %13549 = vmatprep.subr.bf16.mxu0 %v18319_v43  ;;  %v18367_v30 = vld [vmem:[#allocation15 + $0xc84] ss:$20 sps:$4 sm:$0xff]   ;;  %v18370_v43 = vld [vmem:[#allocation15 + $0xc8c] ss:$20 sps:$4 sm:$0xff]  }
 0x8ec   :  { %13877 = vmatprep.subr.bf16.mxu1 %v18322_v46  ;;  %v9225_v46 = vmax.f32 %v17612_v21, 0.0  ;;  %v18418_v21 = vld [vmem:[#allocation15 + $0xdcc] ss:$20 sps:$4 sm:$0xff]  }
 0x8ee   :  { %13550 = vmatpush1.bf16.msra.mxu0 %v18317_v47  ;;  %v20010_v47 = vpack.c.bf16 %v9222_v60, %v9222_v60  ;;  %v20012_v9 = vpack.c.bf16 %v9225_v46, %v9225_v46  ;;  %v18416_v60 = vld [vmem:[#allocation15 + $0xdc8] ss:$20 sps:$4 sm:$0xff]   ;;  %v18422_v46 = vld [vmem:[#allocation15 + $0xdf0] ss:$20 sps:$4 sm:$0xff]  }
 0x8ef   :  { %13878 = vmatpush1.bf16.msra.mxu1 %v18320_v51  ;;  %13551 = vmatprep.subr.bf16.mxu0 %v18325_v54  ;;  %v18368_v51 = vld [vmem:[#allocation15 + $0xc88] ss:$20 sps:$4 sm:$0xff]   ;;  %v18373_v54 = vld [vmem:[#allocation15 + $0xcac] ss:$20 sps:$4 sm:$0xff]  }
 0x8f0   :  { %13879 = vmatprep.subr.bf16.mxu1 %v18328_v57  ;;  %v18376_v57 = vld [vmem:[#allocation15 + $0xcb4] ss:$20 sps:$4 sm:$0xff]  }
 0x8f2   :  { %13552 = vmatpush1.bf16.msra.mxu0 %v18323_v59  ;;  %v18371_v59 = vld [vmem:[#allocation15 + $0xca8] ss:$20 sps:$4 sm:$0xff]  }
 0x8f3   :  { %13880 = vmatpush1.bf16.msra.mxu1 %v18326_v62  ;;  %13553 = vmatprep.subr.bf16.mxu0 %v18331_v34  ;;  %v18374_v62 = vld [vmem:[#allocation15 + $0xcb0] ss:$20 sps:$4 sm:$0xff]   ;;  %v18379_v34 = vld [vmem:[#allocation15 + $0xcd4] ss:$20 sps:$4 sm:$0xff]  }
 0x8f4   :  { %13881 = vmatprep.subr.bf16.mxu1 %v18334_v63  ;;  %v18382_v63 = vld [vmem:[#allocation15 + $0xcdc] ss:$20 sps:$4 sm:$0xff]  }
 0x8f6   :  { %13554 = vmatpush1.bf16.msra.mxu0 %v18329_v40  ;;  %v18377_v40 = vld [vmem:[#allocation15 + $0xcd0] ss:$20 sps:$4 sm:$0xff]  }
 0x8f7   :  { %13882 = vmatpush1.bf16.msra.mxu1 %v18332_v33  ;;  %13555 = vmatprep.subr.bf16.mxu0 %v18337_v5  ;;  %v18380_v33 = vld [vmem:[#allocation15 + $0xcd8] ss:$20 sps:$4 sm:$0xff]   ;;  %v18385_v5 = vld [vmem:[#allocation15 + $0xcfc] ss:$20 sps:$4 sm:$0xff]  }
 0x8f8   :  { %13883 = vmatprep.subr.bf16.mxu1 %v18340_v48  ;;  %v18388_v48 = vld [vmem:[#allocation15 + $0xd04] ss:$20 sps:$4 sm:$0xff]  }
 0x8fa   :  { %13556 = vmatpush1.bf16.msra.mxu0 %v18335_v31  ;;  %v18383_v31 = vld [vmem:[#allocation15 + $0xcf8] ss:$20 sps:$4 sm:$0xff]  }
 0x8fb   :  { %13884 = vmatpush1.bf16.msra.mxu1 %v18338_v11  ;;  %13557 = vmatprep.subr.bf16.mxu0 %v18343_v13  ;;  %v18386_v11 = vld [vmem:[#allocation15 + $0xd00] ss:$20 sps:$4 sm:$0xff]   ;;  %v18391_v13 = vld [vmem:[#allocation15 + $0xd24] ss:$20 sps:$4 sm:$0xff]  }
 0x8fc   :  { %13885 = vmatprep.subr.bf16.mxu1 %v18346_v14  ;;  %v18394_v14 = vld [vmem:[#allocation15 + $0xd2c] ss:$20 sps:$4 sm:$0xff]  }
 0x8fe   :  { %13558 = vmatpush1.bf16.msra.mxu0 %v18341_v15  ;;  %v18389_v15 = vld [vmem:[#allocation15 + $0xd20] ss:$20 sps:$4 sm:$0xff]  }
 0x8ff   :  { %13886 = vmatpush1.bf16.msra.mxu1 %v18344_v19  ;;  %13559 = vmatprep.subr.bf16.mxu0 %v18349_v20  ;;  %v18392_v19 = vld [vmem:[#allocation15 + $0xd28] ss:$20 sps:$4 sm:$0xff]   ;;  %v18397_v20 = vld [vmem:[#allocation15 + $0xd4c] ss:$20 sps:$4 sm:$0xff]  }
 0x900   :  { %13887 = vmatprep.subr.bf16.mxu1 %v18352_v52  ;;  %v18400_v52 = vld [vmem:[#allocation15 + $0xd54] ss:$20 sps:$4 sm:$0xff]  }
 0x902   :  { %13560 = vmatpush1.bf16.msra.mxu0 %v18347_v26  ;;  %v18395_v26 = vld [vmem:[#allocation15 + $0xd48] ss:$20 sps:$4 sm:$0xff]  }
 0x903   :  { %13888 = vmatpush1.bf16.msra.mxu1 %v18350_v58  ;;  %13561 = vmatprep.subr.bf16.mxu0 %v18355_v45  ;;  %v18403_v58 = vld [vmem:[#allocation15 + $0xd74] ss:$20 sps:$4 sm:$0xff]   ;;  %v18406_v45 = vld [vmem:[#allocation15 + $0xd7c] ss:$20 sps:$4 sm:$0xff]  }
 0x904   :  { %13889 = vmatprep.subr.bf16.mxu1 %v18358_v23  ;;  %v18401_v23 = vld [vmem:[#allocation15 + $0xd70] ss:$20 sps:$4 sm:$0xff]  }
 0x906   :  { %13562 = vmatpush1.bf16.msra.mxu0 %v18353_v16  ;;  %v18409_v16 = vld [vmem:[#allocation15 + $0xd9c] ss:$20 sps:$4 sm:$0xff]  }
 0x907   :  { %13890 = vmatpush1.bf16.msra.mxu1 %v18356_v25  ;;  %13563 = vmatprep.subr.bf16.mxu0 %v18361_v3  ;;  %v18407_v25 = vld [vmem:[#allocation15 + $0xd98] ss:$20 sps:$4 sm:$0xff]   ;;  %v18410_v3 = vld [vmem:[#allocation15 + $0xda0] ss:$20 sps:$4 sm:$0xff]  }
 0x908   :  { %13891 = vmatprep.subr.bf16.mxu1 %v18364_v28  ;;  %v18415_v28 = vld [vmem:[#allocation15 + $0xdc4] ss:$20 sps:$4 sm:$0xff]  }
 0x90a   :  { %13564 = vmatpush1.bf16.msra.mxu0 %v18359_v29  ;;  %v18413_v29 = vld [vmem:[#allocation15 + $0xdc0] ss:$20 sps:$4 sm:$0xff]  }
 0x90b   :  { %13892 = vmatpush1.bf16.msra.mxu1 %v18362_v36  ;;  %13574 = vmatprep.subr.bf16.mxu0 %v18367_v30  ;;  %v18421_v36 = vld [vmem:[#allocation15 + $0xdec] ss:$20 sps:$4 sm:$0xff]   ;;  %v18424_v30 = vld [vmem:[#allocation15 + $0xdf4] ss:$20 sps:$4 sm:$0xff]  }
 0x90c   :  { %13902 = vmatprep.subr.bf16.mxu1 %v18370_v43  ;;  %v18419_v43 = vld [vmem:[#allocation15 + $0xde8] ss:$20 sps:$4 sm:$0xff]  }
 0x90d   :  { %13566 = vmatmul.mubr.bf16.vlgmr.msra.gmra.mrb[28].mxu0 %v20010_v47 }
 0x90e   :  { %13894 = vmatmul.mubr.bf16.vlgmr.msra.gmra.mrb[28].mxu1 %v20010_v47  ;;  %13575 = vmatpush1.bf16.msra.mxu0 %v18365_v1  ;;  %v18427_v1 = vld [vmem:[#allocation15 + $0xe14] ss:$20 sps:$4 sm:$0xff]  }
 0x90f   :  { %13606 = vmatprep.mubr.bf16.mxu0 %v20012_v9  ;;  %13903 = vmatpush1.bf16.msra.mxu1 %v18368_v51  ;;  %v18430_v51 = vld [vmem:[#allocation15 + $0xe1c] ss:$20 sps:$4 sm:$0xff]  }
 0x910   :  { %13934 = vmatprep.mubr.bf16.mxu1 %v20012_v9  ;;  %13576 = vmatprep.subr.bf16.mxu0 %v18373_v54  ;;  %v18425_v54 = vld [vmem:[#allocation15 + $0xe10] ss:$20 sps:$4 sm:$0xff]  }
 0x911   :  { %13904 = vmatprep.subr.bf16.mxu1 %v18376_v57  ;;  %v18428_v57 = vld [vmem:[#allocation15 + $0xe18] ss:$20 sps:$4 sm:$0xff]  }
 0x912   :  { %13577 = vmatpush1.bf16.msra.mxu0 %v18371_v59  ;;  %v18433_v59 = vld [vmem:[#allocation15 + $0xe3c] ss:$20 sps:$4 sm:$0xff]  }
 0x913   :  { %13905 = vmatpush1.bf16.msra.mxu1 %v18374_v62  ;;  %13578 = vmatprep.subr.bf16.mxu0 %v18379_v34  ;;  %v18436_v62 = vld [vmem:[#allocation15 + $0xe44] ss:$20 sps:$4 sm:$0xff]  }
 0x914   :  { %13906 = vmatprep.subr.bf16.mxu1 %v18382_v63  ;;  %v18431_v34 = vld [vmem:[#allocation15 + $0xe38] ss:$20 sps:$4 sm:$0xff]   ;;  %v18434_v63 = vld [vmem:[#allocation15 + $0xe40] ss:$20 sps:$4 sm:$0xff]  }
 0x916   :  { %13579 = vmatpush1.bf16.msra.mxu0 %v18377_v40  ;;  %v18439_v40 = vld [vmem:[#allocation15 + $0xe64] ss:$20 sps:$4 sm:$0xff]  }
 0x917   :  { %13907 = vmatpush1.bf16.msra.mxu1 %v18380_v33  ;;  %13580 = vmatprep.subr.bf16.mxu0 %v18385_v5  ;;  %v18442_v33 = vld [vmem:[#allocation15 + $0xe6c] ss:$20 sps:$4 sm:$0xff]  }
 0x918   :  { %13908 = vmatprep.subr.bf16.mxu1 %v18388_v48  ;;  %v18437_v5 = vld [vmem:[#allocation15 + $0xe60] ss:$20 sps:$4 sm:$0xff]   ;;  %v18440_v48 = vld [vmem:[#allocation15 + $0xe68] ss:$20 sps:$4 sm:$0xff]  }
 0x91a   :  { %13581 = vmatpush1.bf16.msra.mxu0 %v18383_v31  ;;  %v18445_v31 = vld [vmem:[#allocation15 + $0xe8c] ss:$20 sps:$4 sm:$0xff]  }
 0x91b   :  { %13909 = vmatpush1.bf16.msra.mxu1 %v18386_v11  ;;  %13582 = vmatprep.subr.bf16.mxu0 %v18391_v13  ;;  %v18448_v11 = vld [vmem:[#allocation15 + $0xe94] ss:$20 sps:$4 sm:$0xff]  }
 0x91c   :  { %13910 = vmatprep.subr.bf16.mxu1 %v18394_v14  ;;  %v18443_v13 = vld [vmem:[#allocation15 + $0xe88] ss:$20 sps:$4 sm:$0xff]   ;;  %v2745_v14 = vrot.slane %v19989_v32, %v19805_v12 }
 0x91e   :  { %13583 = vmatpush1.bf16.msra.mxu0 %v18389_v15  ;;  %v18446_v15 = vld [vmem:[#allocation15 + $0xe90] ss:$20 sps:$4 sm:$0xff]  }
 0x91f   :  { %13911 = vmatpush1.bf16.msra.mxu1 %v18392_v19  ;;  %13584 = vmatprep.subr.bf16.mxu0 %v18397_v20  ;;  %v18451_v19 = vld [vmem:[#allocation15 + $0xeb4] ss:$20 sps:$4 sm:$0xff]   ;;  %v18454_v20 = vld [vmem:[#allocation15 + $0xebc] ss:$20 sps:$4 sm:$0xff]  }
 0x920   :  { %13912 = vmatprep.subr.bf16.mxu1 %v18400_v52  ;;  %v2757_v52 = vrot.slane %v19989_v32, %v19808_v18  ;;  %v18466_v18 = vld [vmem:[#allocation15 + $0xf0c] ss:$20 sps:$4 sm:$0xff]  }
 0x922   :  { %13585 = vmatpush1.bf16.msra.mxu0 %v18395_v26  ;;  %v18449_v26 = vld [vmem:[#allocation15 + $0xeb0] ss:$20 sps:$4 sm:$0xff]  }
 0x923   :  { %13913 = vmatpush1.bf16.msra.mxu1 %v18398_v55  ;;  %13586 = vmatprep.subr.bf16.mxu0 %v18403_v58  ;;  %v17611_v55 = vadd.f32 %v19922_v6, %v2745_v14  ;;  %v18452_v58 = vld [vmem:[#allocation15 + $0xeb8] ss:$20 sps:$4 sm:$0xff]   ;;  %v18461_v6 = vld [vmem:[#allocation15 + $0xf00] ss:$20 sps:$4 sm:$0xff]  }
 0x924   :  { %13914 = vmatprep.subr.bf16.mxu1 %v18406_v45  ;;  %v18457_v45 = vld [vmem:[#allocation15 + $0xedc] ss:$20 sps:$4 sm:$0xff]   ;;  %v18499_v14 = vld [vmem:[#allocation15 + $0xff4] ss:$20 sps:$4 sm:$0xff]  }
 0x926   :  { %13587 = vmatpush1.bf16.msra.mxu0 %v18401_v23  ;;  %v18460_v23 = vld [vmem:[#allocation15 + $0xee4] ss:$20 sps:$4 sm:$0xff]  }
 0x927   :  { %13915 = vmatpush1.bf16.msra.mxu1 %v18404_v24  ;;  %13588 = vmatprep.subr.bf16.mxu0 %v18409_v16  ;;  %v17614_v24 = vadd.f32 %v19985_v42, %v2757_v52  ;;  %v18455_v16 = vld [vmem:[#allocation15 + $0xed8] ss:$20 sps:$4 sm:$0xff]   ;;  %v18505_v52 = vld [vmem:[#allocation15 + $0x101c] ss:$20 sps:$4 sm:$0xff]  }
 0x928   :  { %13916 = vmatprep.subr.bf16.mxu1 %v18412_v17  ;;  %v9224_v17 = vmax.f32 %v17611_v55, 0.0  ;;  %v18503_v55 = vld [vmem:[#allocation15 + $0x1018] ss:$20 sps:$4 sm:$0xff]  }
 0x92a   :  { %13589 = vmatpush1.bf16.msra.mxu0 %v18407_v25  ;;  %v18458_v25 = vld [vmem:[#allocation15 + $0xee0] ss:$20 sps:$4 sm:$0xff]  }
 0x92b   :  { %13917 = vmatpush1.bf16.msra.mxu1 %v18410_v3  ;;  %13590 = vmatprep.subr.bf16.mxu0 %v18415_v28  ;;  %v18463_v3 = vld [vmem:[#allocation15 + $0xf04] ss:$20 sps:$4 sm:$0xff]   ;;  %v9227_v28 = vmax.f32 %v17614_v24, 0.0  ;;  %v18509_v24 = vld [vmem:[#allocation15 + $0x1040] ss:$20 sps:$4 sm:$0xff]  }
 0x92c   :  { %13918 = vmatprep.subr.bf16.mxu1 %v18418_v21  ;;  %v20024_v21 = vpack.c.bf16 %v9224_v17, %v9224_v17  ;;  %v18517_v17 = vld [vmem:[#allocation15 + $0x106c] ss:$20 sps:$4 sm:$0xff]  }
 0x92d   :  { %v20026_v42 = vpack.c.bf16 %v9227_v28, %v9227_v28  ;;  %v18523_v28 = vld [vmem:[#allocation15 + $0x1094] ss:$20 sps:$4 sm:$0xff]  }
 0x92e   :  { %13591 = vmatpush1.bf16.msra.mxu0 %v18413_v29  ;;  %v18464_v29 = vld [vmem:[#allocation15 + $0xf08] ss:$20 sps:$4 sm:$0xff]  }
 0x92f   :  { %13919 = vmatpush1.bf16.msra.mxu1 %v18416_v60  ;;  %13592 = vmatprep.subr.bf16.mxu0 %v18421_v36  ;;  %v18469_v60 = vld [vmem:[#allocation15 + $0xf2c] ss:$20 sps:$4 sm:$0xff]   ;;  %v18472_v36 = vld [vmem:[#allocation15 + $0xf34] ss:$20 sps:$4 sm:$0xff]  }
 0x930   :  { %13920 = vmatprep.subr.bf16.mxu1 %v18424_v30  ;;  %v18467_v30 = vld [vmem:[#allocation15 + $0xf28] ss:$20 sps:$4 sm:$0xff]  }
 0x932   :  { %13593 = vmatpush1.bf16.msra.mxu0 %v18419_v43  ;;  %v18470_v43 = vld [vmem:[#allocation15 + $0xf30] ss:$20 sps:$4 sm:$0xff]  }
 0x933   :  { %13921 = vmatpush1.bf16.msra.mxu1 %v18422_v46  ;;  %13594 = vmatprep.subr.bf16.mxu0 %v18427_v1  ;;  %v18475_v46 = vld [vmem:[#allocation15 + $0xf54] ss:$20 sps:$4 sm:$0xff]   ;;  %v18478_v1 = vld [vmem:[#allocation15 + $0xf5c] ss:$20 sps:$4 sm:$0xff]  }
 0x934   :  { %13922 = vmatprep.subr.bf16.mxu1 %v18430_v51  ;;  %v18473_v51 = vld [vmem:[#allocation15 + $0xf50] ss:$20 sps:$4 sm:$0xff]  }
 0x936   :  { %13595 = vmatpush1.bf16.msra.mxu0 %v18425_v54  ;;  %v18476_v54 = vld [vmem:[#allocation15 + $0xf58] ss:$20 sps:$4 sm:$0xff]  }
 0x937   :  { %13923 = vmatpush1.bf16.msra.mxu1 %v18428_v57  ;;  %13596 = vmatprep.subr.bf16.mxu0 %v18433_v59  ;;  %v18481_v57 = vld [vmem:[#allocation15 + $0xf7c] ss:$20 sps:$4 sm:$0xff]   ;;  %v18484_v59 = vld [vmem:[#allocation15 + $0xf84] ss:$20 sps:$4 sm:$0xff]  }
 0x938   :  { %13924 = vmatprep.subr.bf16.mxu1 %v18436_v62  ;;  %v18479_v62 = vld [vmem:[#allocation15 + $0xf78] ss:$20 sps:$4 sm:$0xff]  }
 0x93a   :  { %13597 = vmatpush1.bf16.msra.mxu0 %v18431_v34  ;;  %v18482_v34 = vld [vmem:[#allocation15 + $0xf80] ss:$20 sps:$4 sm:$0xff]  }
 0x93b   :  { %13925 = vmatpush1.bf16.msra.mxu1 %v18434_v63  ;;  %13598 = vmatprep.subr.bf16.mxu0 %v18439_v40  ;;  %v18487_v63 = vld [vmem:[#allocation15 + $0xfa4] ss:$20 sps:$4 sm:$0xff]   ;;  %v18490_v40 = vld [vmem:[#allocation15 + $0xfac] ss:$20 sps:$4 sm:$0xff]  }
 0x93c   :  { %13926 = vmatprep.subr.bf16.mxu1 %v18442_v33  ;;  %v18485_v33 = vld [vmem:[#allocation15 + $0xfa0] ss:$20 sps:$4 sm:$0xff]  }
 0x93e   :  { %13599 = vmatpush1.bf16.msra.mxu0 %v18437_v5  ;;  %v18488_v5 = vld [vmem:[#allocation15 + $0xfa8] ss:$20 sps:$4 sm:$0xff]  }
 0x93f   :  { %13927 = vmatpush1.bf16.msra.mxu1 %v18440_v48  ;;  %13600 = vmatprep.subr.bf16.mxu0 %v18445_v31  ;;  %v18493_v48 = vld [vmem:[#allocation15 + $0xfcc] ss:$20 sps:$4 sm:$0xff]   ;;  %v18496_v31 = vld [vmem:[#allocation15 + $0xfd4] ss:$20 sps:$4 sm:$0xff]  }
 0x940   :  { %13928 = vmatprep.subr.bf16.mxu1 %v18448_v11  ;;  %v18491_v11 = vld [vmem:[#allocation15 + $0xfc8] ss:$20 sps:$4 sm:$0xff]  }
 0x942   :  { %13601 = vmatpush1.bf16.msra.mxu0 %v18443_v13  ;;  %v18494_v13 = vld [vmem:[#allocation15 + $0xfd0] ss:$20 sps:$4 sm:$0xff]  }
 0x943   :  { %13929 = vmatpush1.bf16.msra.mxu1 %v18446_v15  ;;  %13602 = vmatprep.subr.bf16.mxu0 %v18451_v19  ;;  %v18502_v15 = vld [vmem:[#allocation15 + $0xffc] ss:$20 sps:$4 sm:$0xff]  }
 0x944   :  { %13930 = vmatprep.subr.bf16.mxu1 %v18454_v20  ;;  %v18497_v19 = vld [vmem:[#allocation15 + $0xff0] ss:$20 sps:$4 sm:$0xff]   ;;  %v18500_v20 = vld [vmem:[#allocation15 + $0xff8] ss:$20 sps:$4 sm:$0xff]  }
 0x946   :  { %13603 = vmatpush1.bf16.msra.mxu0 %v18449_v26  ;;  %v18508_v26 = vld [vmem:[#allocation15 + $0x1024] ss:$20 sps:$4 sm:$0xff]  }
 0x947   :  { %13931 = vmatpush1.bf16.msra.mxu1 %v18452_v58  ;;  %13604 = vmatprep.subr.bf16.mxu0 %v18457_v45  ;;  %v18506_v58 = vld [vmem:[#allocation15 + $0x1020] ss:$20 sps:$4 sm:$0xff]   ;;  %v18511_v45 = vld [vmem:[#allocation15 + $0x1044] ss:$20 sps:$4 sm:$0xff]  }
 0x948   :  { %13932 = vmatprep.subr.bf16.mxu1 %v18460_v23  ;;  %v18514_v23 = vld [vmem:[#allocation15 + $0x104c] ss:$20 sps:$4 sm:$0xff]  }
 0x94a   :  { %13605 = vmatpush1.bf16.msra.mxu0 %v18455_v16  ;;  %v18512_v16 = vld [vmem:[#allocation15 + $0x1048] ss:$20 sps:$4 sm:$0xff]  }
 0x94b   :  { %13933 = vmatpush1.bf16.msra.mxu1 %v18458_v25  ;;  %13615 = vmatprep.subr.bf16.mxu0 %v18463_v3  ;;  %v18520_v25 = vld [vmem:[#allocation15 + $0x1074] ss:$20 sps:$4 sm:$0xff]  }
 0x94c   :  { %13943 = vmatprep.subr.bf16.mxu1 %v18466_v18  ;;  %v18515_v3 = vld [vmem:[#allocation15 + $0x1068] ss:$20 sps:$4 sm:$0xff]   ;;  %v18518_v18 = vld [vmem:[#allocation15 + $0x1070] ss:$20 sps:$4 sm:$0xff]  }
 0x94d   :  { %13607 = vmatmul.mubr.bf16.vlgmr.msra.gmra.mrb[28].mxu0 %v20024_v21 }
 0x94e   :  { %13935 = vmatmul.mubr.bf16.vlgmr.msra.gmra.mrb[28].mxu1 %v20024_v21  ;;  %13616 = vmatpush1.bf16.msra.mxu0 %v18461_v6  ;;  %v18526_v6 = vld [vmem:[#allocation15 + $0x109c] ss:$20 sps:$4 sm:$0xff]  }
 0x94f   :  { %13647 = vmatprep.mubr.bf16.mxu0 %v20026_v42  ;;  %13944 = vmatpush1.bf16.msra.mxu1 %v18464_v29  ;;  %v18521_v29 = vld [vmem:[#allocation15 + $0x1090] ss:$20 sps:$4 sm:$0xff]  }
 0x950   :  { %13975 = vmatprep.mubr.bf16.mxu1 %v20026_v42  ;;  %13617 = vmatprep.subr.bf16.mxu0 %v18469_v60  ;;  %v18524_v60 = vld [vmem:[#allocation15 + $0x1098] ss:$20 sps:$4 sm:$0xff]  }
 0x951   :  { %13945 = vmatprep.subr.bf16.mxu1 %v18472_v36  ;;  %v18529_v36 = vld [vmem:[#allocation15 + $0x10bc] ss:$20 sps:$4 sm:$0xff]  }
 0x952   :  { %13618 = vmatpush1.bf16.msra.mxu0 %v18467_v30  ;;  %v18532_v30 = vld [vmem:[#allocation15 + $0x10c4] ss:$20 sps:$4 sm:$0xff]  }
 0x953   :  { %13946 = vmatpush1.bf16.msra.mxu1 %v18470_v43  ;;  %13619 = vmatprep.subr.bf16.mxu0 %v18475_v46  ;;  %v18527_v43 = vld [vmem:[#allocation15 + $0x10b8] ss:$20 sps:$4 sm:$0xff]   ;;  %v18530_v46 = vld [vmem:[#allocation15 + $0x10c0] ss:$20 sps:$4 sm:$0xff]  }
 0x954   :  { %13947 = vmatprep.subr.bf16.mxu1 %v18478_v1  ;;  %v18535_v1 = vld [vmem:[#allocation15 + $0x10e4] ss:$20 sps:$4 sm:$0xff]  }
 0x956   :  { %13620 = vmatpush1.bf16.msra.mxu0 %v18473_v51  ;;  %v18538_v51 = vld [vmem:[#allocation15 + $0x10ec] ss:$20 sps:$4 sm:$0xff]  }
 0x957   :  { %13948 = vmatpush1.bf16.msra.mxu1 %v18476_v54  ;;  %13621 = vmatprep.subr.bf16.mxu0 %v18481_v57  ;;  %v18533_v54 = vld [vmem:[#allocation15 + $0x10e0] ss:$20 sps:$4 sm:$0xff]   ;;  %v18536_v57 = vld [vmem:[#allocation15 + $0x10e8] ss:$20 sps:$4 sm:$0xff]  }
 0x958   :  { %13949 = vmatprep.subr.bf16.mxu1 %v18484_v59  ;;  %v18541_v59 = vld [vmem:[#allocation15 + $0x110c] ss:$20 sps:$4 sm:$0xff]  }
 0x95a   :  { %13622 = vmatpush1.bf16.msra.mxu0 %v18479_v62  ;;  %v18544_v62 = vld [vmem:[#allocation15 + $0x1114] ss:$20 sps:$4 sm:$0xff]  }
 0x95b   :  { %13950 = vmatpush1.bf16.msra.mxu1 %v18482_v34  ;;  %13623 = vmatprep.subr.bf16.mxu0 %v18487_v63  ;;  %v18539_v34 = vld [vmem:[#allocation15 + $0x1108] ss:$20 sps:$4 sm:$0xff]   ;;  %v2753_v63 = vrot.slane %v19989_v32, %v19830_v4 }
 0x95c   :  { %13951 = vmatprep.subr.bf16.mxu1 %v18490_v40  ;;  %v18542_v40 = vld [vmem:[#allocation15 + $0x1110] ss:$20 sps:$4 sm:$0xff]  }
 0x95e   :  { %13624 = vmatpush1.bf16.msra.mxu0 %v18485_v33  ;;  %v18547_v33 = vld [vmem:[#allocation15 + $0x1134] ss:$20 sps:$4 sm:$0xff]  }
 0x95f   :  { %13952 = vmatpush1.bf16.msra.mxu1 %v18488_v5  ;;  %13625 = vmatprep.subr.bf16.mxu0 %v18493_v48  ;;  %v18550_v5 = vld [vmem:[#allocation15 + $0x113c] ss:$20 sps:$4 sm:$0xff]   ;;  %v2765_v48 = vrot.slane %v19989_v32, %v19833_v10  ;;  %v18562_v10 = vld [vmem:[#allocation15 + $0x118c] ss:$20 sps:$4 sm:$0xff]  }
 0x960   :  { %13953 = vmatprep.subr.bf16.mxu1 %v18496_v31  ;;  %v18545_v31 = vld [vmem:[#allocation15 + $0x1130] ss:$20 sps:$4 sm:$0xff]  }
 0x962   :  { %13626 = vmatpush1.bf16.msra.mxu0 %v18491_v11  ;;  %v17613_v11 = vadd.f32 %v19981_v27, %v2753_v63  ;;  %v18557_v27 = vld [vmem:[#allocation15 + $0x1180] ss:$20 sps:$4 sm:$0xff]   ;;  %v18593_v63 = vld [vmem:[#allocation15 + $0x1270] ss:$20 sps:$4 sm:$0xff]  }
 0x963   :  { %13954 = vmatpush1.bf16.msra.mxu1 %v18494_v13  ;;  %13627 = vmatprep.subr.bf16.mxu0 %v18499_v14  ;;  %v18548_v13 = vld [vmem:[#allocation15 + $0x1138] ss:$20 sps:$4 sm:$0xff]   ;;  %v18553_v14 = vld [vmem:[#allocation15 + $0x115c] ss:$20 sps:$4 sm:$0xff]  }
 0x964   :  { %13955 = vmatprep.subr.bf16.mxu1 %v18502_v15  ;;  %v18556_v15 = vld [vmem:[#allocation15 + $0x1164] ss:$20 sps:$4 sm:$0xff]  }
 0x966   :  { %13628 = vmatpush1.bf16.msra.mxu0 %v18497_v19  ;;  %v17616_v19 = vadd.f32 %v19987_v44, %v2765_v48  ;;  %v18599_v48 = vld [vmem:[#allocation15 + $0x1298] ss:$20 sps:$4 sm:$0xff]  }
 0x967   :  { %13956 = vmatpush1.bf16.msra.mxu1 %v18500_v20  ;;  %13629 = vmatprep.subr.bf16.mxu0 %v18505_v52  ;;  %v18551_v20 = vld [vmem:[#allocation15 + $0x1158] ss:$20 sps:$4 sm:$0xff]   ;;  %v9226_v52 = vmax.f32 %v17613_v11, 0.0 }
 0x968   :  { %13957 = vmatprep.subr.bf16.mxu1 %v18508_v26  ;;  %v18554_v26 = vld [vmem:[#allocation15 + $0x1160] ss:$20 sps:$4 sm:$0xff]   ;;  %v9229_v32 = vmax.f32 %v17616_v19, 0.0  ;;  %v18607_v11 = vld [vmem:[#allocation15 + $0x12c4] ss:$20 sps:$4 sm:$0xff]  }
 0x969   :  { %v18613_v19 = vld [vmem:[#allocation15 + $0x12ec] ss:$20 sps:$4 sm:$0xff]  }
 0x96a   :  { %13630 = vmatpush1.bf16.msra.mxu0 %v18503_v55  ;;  %v18559_v55 = vld [vmem:[#allocation15 + $0x1184] ss:$20 sps:$4 sm:$0xff]   ;;  %v20040_v44 = vpack.c.bf16 %v9229_v32, %v9229_v32 }
 0x96b   :  { %13958 = vmatpush1.bf16.msra.mxu1 %v18506_v58  ;;  %13631 = vmatprep.subr.bf16.mxu0 %v18511_v45  ;;  %v20038_v58 = vpack.c.bf16 %v9226_v52, %v9226_v52  ;;  %v18560_v45 = vld [vmem:[#allocation15 + $0x1188] ss:$20 sps:$4 sm:$0xff]   ;;  %v18617_v32 = vld [vmem:[#allocation15 + $0x1310] ss:$20 sps:$4 sm:$0xff]  }
 0x96c   :  { %13959 = vmatprep.subr.bf16.mxu1 %v18514_v23  ;;  %v18565_v23 = vld [vmem:[#allocation15 + $0x11ac] ss:$20 sps:$4 sm:$0xff]   ;;  %v18611_v52 = vld [vmem:[#allocation15 + $0x12e8] ss:$20 sps:$4 sm:$0xff]  }
 0x96e   :  { %13632 = vmatpush1.bf16.msra.mxu0 %v18509_v24  ;;  %v18568_v24 = vld [vmem:[#allocation15 + $0x11b4] ss:$20 sps:$4 sm:$0xff]  }
 0x96f   :  { %13960 = vmatpush1.bf16.msra.mxu1 %v18512_v16  ;;  %13633 = vmatprep.subr.bf16.mxu0 %v18517_v17  ;;  %v18563_v16 = vld [vmem:[#allocation15 + $0x11a8] ss:$20 sps:$4 sm:$0xff]   ;;  %v18566_v17 = vld [vmem:[#allocation15 + $0x11b0] ss:$20 sps:$4 sm:$0xff]  }
 0x970   :  { %13961 = vmatprep.subr.bf16.mxu1 %v18520_v25  ;;  %v18571_v25 = vld [vmem:[#allocation15 + $0x11d4] ss:$20 sps:$4 sm:$0xff]  }
 0x972   :  { %13634 = vmatpush1.bf16.msra.mxu0 %v18515_v3  ;;  %v18574_v3 = vld [vmem:[#allocation15 + $0x11dc] ss:$20 sps:$4 sm:$0xff]  }
 0x973   :  { %13962 = vmatpush1.bf16.msra.mxu1 %v18518_v18  ;;  %13635 = vmatprep.subr.bf16.mxu0 %v18523_v28  ;;  %v18569_v18 = vld [vmem:[#allocation15 + $0x11d0] ss:$20 sps:$4 sm:$0xff]   ;;  %v18572_v28 = vld [vmem:[#allocation15 + $0x11d8] ss:$20 sps:$4 sm:$0xff]  }
 0x974   :  { %13963 = vmatprep.subr.bf16.mxu1 %v18526_v6  ;;  %v18577_v6 = vld [vmem:[#allocation15 + $0x11fc] ss:$20 sps:$4 sm:$0xff]  }
 0x976   :  { %13636 = vmatpush1.bf16.msra.mxu0 %v18521_v29  ;;  %v18580_v29 = vld [vmem:[#allocation15 + $0x1204] ss:$20 sps:$4 sm:$0xff]  }
 0x977   :  { %13964 = vmatpush1.bf16.msra.mxu1 %v18524_v60  ;;  %13637 = vmatprep.subr.bf16.mxu0 %v18529_v36  ;;  %v18575_v60 = vld [vmem:[#allocation15 + $0x11f8] ss:$20 sps:$4 sm:$0xff]   ;;  %v18578_v36 = vld [vmem:[#allocation15 + $0x1200] ss:$20 sps:$4 sm:$0xff]  }
 0x978   :  { %13965 = vmatprep.subr.bf16.mxu1 %v18532_v30  ;;  %v18583_v30 = vld [vmem:[#allocation15 + $0x1224] ss:$20 sps:$4 sm:$0xff]  }
 0x97a   :  { %13638 = vmatpush1.bf16.msra.mxu0 %v18527_v43  ;;  %v18586_v43 = vld [vmem:[#allocation15 + $0x122c] ss:$20 sps:$4 sm:$0xff]  }
 0x97b   :  { %13966 = vmatpush1.bf16.msra.mxu1 %v18530_v46  ;;  %13639 = vmatprep.subr.bf16.mxu0 %v18535_v1  ;;  %v18581_v46 = vld [vmem:[#allocation15 + $0x1220] ss:$20 sps:$4 sm:$0xff]   ;;  %v18584_v1 = vld [vmem:[#allocation15 + $0x1228] ss:$20 sps:$4 sm:$0xff]  }
 0x97c   :  { %13967 = vmatprep.subr.bf16.mxu1 %v18538_v51  ;;  %v18589_v51 = vld [vmem:[#allocation15 + $0x124c] ss:$20 sps:$4 sm:$0xff]  }
 0x97e   :  { %13640 = vmatpush1.bf16.msra.mxu0 %v18533_v54  ;;  %v18592_v54 = vld [vmem:[#allocation15 + $0x1254] ss:$20 sps:$4 sm:$0xff]  }
 0x97f   :  { %13968 = vmatpush1.bf16.msra.mxu1 %v18536_v57  ;;  %13641 = vmatprep.subr.bf16.mxu0 %v18541_v59  ;;  %v18587_v57 = vld [vmem:[#allocation15 + $0x1248] ss:$20 sps:$4 sm:$0xff]   ;;  %v18590_v59 = vld [vmem:[#allocation15 + $0x1250] ss:$20 sps:$4 sm:$0xff]  }
 0x980   :  { %13969 = vmatprep.subr.bf16.mxu1 %v18544_v62  ;;  %v18595_v62 = vld [vmem:[#allocation15 + $0x1274] ss:$20 sps:$4 sm:$0xff]  }
 0x982   :  { %13642 = vmatpush1.bf16.msra.mxu0 %v18539_v34  ;;  %v18598_v34 = vld [vmem:[#allocation15 + $0x127c] ss:$20 sps:$4 sm:$0xff]  }
 0x983   :  { %13970 = vmatpush1.bf16.msra.mxu1 %v18542_v40  ;;  %13643 = vmatprep.subr.bf16.mxu0 %v18547_v33  ;;  %v18596_v40 = vld [vmem:[#allocation15 + $0x1278] ss:$20 sps:$4 sm:$0xff]   ;;  %v18601_v33 = vld [vmem:[#allocation15 + $0x129c] ss:$20 sps:$4 sm:$0xff]  }
 0x984   :  { %13971 = vmatprep.subr.bf16.mxu1 %v18550_v5  ;;  %v18604_v5 = vld [vmem:[#allocation15 + $0x12a4] ss:$20 sps:$4 sm:$0xff]  }
 0x986   :  { %13644 = vmatpush1.bf16.msra.mxu0 %v18545_v31  ;;  %v18602_v31 = vld [vmem:[#allocation15 + $0x12a0] ss:$20 sps:$4 sm:$0xff]  }
 0x987   :  { %13972 = vmatpush1.bf16.msra.mxu1 %v18548_v13  ;;  %13645 = vmatprep.subr.bf16.mxu0 %v18553_v14  ;;  %v18610_v13 = vld [vmem:[#allocation15 + $0x12cc] ss:$20 sps:$4 sm:$0xff]  }
 0x988   :  { %13973 = vmatprep.subr.bf16.mxu1 %v18556_v15  ;;  %v18605_v14 = vld [vmem:[#allocation15 + $0x12c0] ss:$20 sps:$4 sm:$0xff]   ;;  %v18608_v15 = vld [vmem:[#allocation15 + $0x12c8] ss:$20 sps:$4 sm:$0xff]  }
 0x98a   :  { %13646 = vmatpush1.bf16.msra.mxu0 %v18551_v20  ;;  %v18616_v20 = vld [vmem:[#allocation15 + $0x12f4] ss:$20 sps:$4 sm:$0xff]  }
 0x98b   :  { %13974 = vmatpush1.bf16.msra.mxu1 %v18554_v26  ;;  %13656 = vmatprep.subr.bf16.mxu0 %v18559_v55  ;;  %v18614_v26 = vld [vmem:[#allocation15 + $0x12f0] ss:$20 sps:$4 sm:$0xff]   ;;  %v18619_v55 = vld [vmem:[#allocation15 + $0x1314] ss:$20 sps:$4 sm:$0xff]  }
 0x98c   :  { %13984 = vmatprep.subr.bf16.mxu1 %v18562_v10  ;;  %v18622_v10 = vld [vmem:[#allocation15 + $0x131c] ss:$20 sps:$4 sm:$0xff]  }
 0x98d   :  { %13648 = vmatmul.mubr.bf16.vlgmr.msra.gmra.mrb[28].mxu0 %v20038_v58 }
 0x98e   :  { %13976 = vmatmul.mubr.bf16.vlgmr.msra.gmra.mrb[28].mxu1 %v20038_v58  ;;  %13657 = vmatpush1.bf16.msra.mxu0 %v18557_v27  ;;  %v18620_v27 = vld [vmem:[#allocation15 + $0x1318] ss:$20 sps:$4 sm:$0xff]  }
 0x98f   :  { %13688 = vmatprep.mubr.bf16.mxu0 %v20040_v44  ;;  %13985 = vmatpush1.bf16.msra.mxu1 %v18560_v45  ;;  %v18625_v45 = vld [vmem:[#allocation15 + $0x133c] ss:$20 sps:$4 sm:$0xff]  }
 0x990   :  { %14016 = vmatprep.mubr.bf16.mxu1 %v20040_v44  ;;  %13658 = vmatprep.subr.bf16.mxu0 %v18565_v23  ;;  %v18628_v23 = vld [vmem:[#allocation15 + $0x1344] ss:$20 sps:$4 sm:$0xff]  }
 0x991   :  { %13986 = vmatprep.subr.bf16.mxu1 %v18568_v24  ;;  %v18623_v24 = vld [vmem:[#allocation15 + $0x1338] ss:$20 sps:$4 sm:$0xff]  }
 0x992   :  { %13659 = vmatpush1.bf16.msra.mxu0 %v18563_v16  ;;  %v18626_v16 = vld [vmem:[#allocation15 + $0x1340] ss:$20 sps:$4 sm:$0xff]  }
 0x993   :  { %13987 = vmatpush1.bf16.msra.mxu1 %v18566_v17  ;;  %13660 = vmatprep.subr.bf16.mxu0 %v18571_v25  ;;  %v18631_v17 = vld [vmem:[#allocation15 + $0x1364] ss:$20 sps:$4 sm:$0xff]   ;;  %v18634_v25 = vld [vmem:[#allocation15 + $0x136c] ss:$20 sps:$4 sm:$0xff]  }
 0x994   :  { %13988 = vmatprep.subr.bf16.mxu1 %v18574_v3  ;;  %v18629_v3 = vld [vmem:[#allocation15 + $0x1360] ss:$20 sps:$4 sm:$0xff]  }
 0x996   :  { %13661 = vmatpush1.bf16.msra.mxu0 %v18569_v18  ;;  %v18632_v18 = vld [vmem:[#allocation15 + $0x1368] ss:$20 sps:$4 sm:$0xff]  }
 0x997   :  { %13989 = vmatpush1.bf16.msra.mxu1 %v18572_v28  ;;  %13662 = vmatprep.subr.bf16.mxu0 %v18577_v6  ;;  %v18637_v28 = vld [vmem:[#allocation15 + $0x138c] ss:$20 sps:$4 sm:$0xff]   ;;  %v18640_v6 = vld [vmem:[#allocation15 + $0x1394] ss:$20 sps:$4 sm:$0xff]  }
 0x998   :  { %13990 = vmatprep.subr.bf16.mxu1 %v18580_v29  ;;  %v18635_v29 = vld [vmem:[#allocation15 + $0x1388] ss:$20 sps:$4 sm:$0xff]  }
 0x99a   :  { %13663 = vmatpush1.bf16.msra.mxu0 %v18575_v60  ;;  %v18935_v60 = vld [vmem:[#allocation13 + $0x8] sm:$0xff] }
 0x99b   :  { %13991 = vmatpush1.bf16.msra.mxu1 %v18578_v36  ;;  %13664 = vmatprep.subr.bf16.mxu0 %v18583_v30  ;;  %v2761_v36 = vrot.slane %v18935_v60, %v19850_v53  ;;  %v18638_v30 = vld [vmem:[#allocation15 + $0x1390] ss:$20 sps:$4 sm:$0xff]   ;;  %v18650_v53 = vld [vmem:[#allocation15 + $0x13e0] ss:$20 sps:$4 sm:$0xff]   ;;  %v18684_v60 = vld [vmem:[#allocation15 + $0x628] ss:$20 sps:$4 sm:$0xff]  }
 0x99c   :  { %13992 = vmatprep.subr.bf16.mxu1 %v18586_v43  ;;  %v18643_v43 = vld [vmem:[#allocation15 + $0x13b4] ss:$20 sps:$4 sm:$0xff]  }
 0x99e   :  { %13665 = vmatpush1.bf16.msra.mxu0 %v18581_v46  ;;  %v18646_v46 = vld [vmem:[#allocation15 + $0x13bc] ss:$20 sps:$4 sm:$0xff]  }
 0x99f   :  { %13993 = vmatpush1.bf16.msra.mxu1 %v18584_v1  ;;  %13666 = vmatprep.subr.bf16.mxu0 %v18589_v51  ;;  %v18641_v1 = vld [vmem:[#allocation15 + $0x13b0] ss:$20 sps:$4 sm:$0xff]   ;;  %v17615_v51 = vadd.f32 %v19983_v39, %v2761_v36 }
 0x9a0   :  { %13994 = vmatprep.subr.bf16.mxu1 %v18592_v54  ;;  %v18644_v54 = vld [vmem:[#allocation15 + $0x13b8] ss:$20 sps:$4 sm:$0xff]   ;;  %v18656_v39 = vld [vmem:[#allocation15 + $0x510] ss:$20 sps:$4 sm:$0xff]  }
 0x9a1   :  { %v18685_v36 = vld [vmem:[#allocation15 + $0x3d0] ss:$20 sps:$4 sm:$0xff]  }
 0x9a2   :  { %13667 = vmatpush1.bf16.msra.mxu0 %v18587_v57  ;;  %v18649_v57 = vld [vmem:[#allocation15 + $0x13dc] ss:$20 sps:$4 sm:$0xff]  }
 0x9a3   :  { %13995 = vmatpush1.bf16.msra.mxu1 %v18590_v59  ;;  %13668 = vmatprep.subr.bf16.mxu0 %v18595_v62  ;;  %v18652_v59 = vld [vmem:[#allocation15 + $0x13e4] ss:$20 sps:$4 sm:$0xff]  }
 0x9a4   :  { %13996 = vmatprep.subr.bf16.mxu1 %v18598_v34  ;;  %v18647_v62 = vld [vmem:[#allocation15 + $0x13d8] ss:$20 sps:$4 sm:$0xff]   ;;  %v9228_v34 = vmax.f32 %v17615_v51, 0.0 }
 0x9a5   :  { %v18690_v51 = vld [vmem:[#allocation15 + $0xb78] ss:$20 sps:$4 sm:$0xff]  }
 0x9a6   :  { %13669 = vmatpush1.bf16.msra.mxu0 %v18593_v63  ;;  %v18653_v63 = vld [vmem:[#allocation15 + $0x150] ss:$20 sps:$4 sm:$0xff]  }
 0x9a7   :  { %13997 = vmatpush1.bf16.msra.mxu1 %v18596_v40  ;;  %13670 = vmatprep.subr.bf16.mxu0 %v18601_v33  ;;  %v18654_v40 = vld [vmem:[#allocation15 + $0x650] ss:$20 sps:$4 sm:$0xff]  }
 0x9a8   :  { %13998 = vmatprep.subr.bf16.mxu1 %v18604_v5  ;;  %v18655_v33 = vld [vmem:[#allocation15 + $0x10] ss:$20 sps:$4 sm:$0xff]   ;;  %v20048_v5 = vpack.c.bf16 %v9228_v34, %v9228_v34  ;;  %v18695_v34 = vld [vmem:[#allocation15 + $0x2e0] ss:$20 sps:$4 sm:$0xff]  }
 0x9aa   :  { %13671 = vmatpush1.bf16.msra.mxu0 %v18599_v48  ;;  %v18657_v48 = vld [vmem:[#allocation15 + $0x178] ss:$20 sps:$4 sm:$0xff]  }
 0x9ab   :  { %13999 = vmatpush1.bf16.msra.mxu1 %v18602_v31  ;;  %13672 = vmatprep.subr.bf16.mxu0 %v18607_v11  ;;  %v18658_v31 = vld [vmem:[#allocation15 + $0x678] ss:$20 sps:$4 sm:$0xff]  }
 0x9ac   :  { %14000 = vmatprep.subr.bf16.mxu1 %v18610_v13  ;;  %v18659_v11 = vld [vmem:[#allocation15 + $0x38] ss:$20 sps:$4 sm:$0xff]  }
 0x9ad   :  { %v18660_v13 = vld [vmem:[#allocation15 + $0x538] ss:$20 sps:$4 sm:$0xff]  }
 0x9ae   :  { %13673 = vmatpush1.bf16.msra.mxu0 %v18605_v14  ;;  %v18661_v14 = vld [vmem:[#allocation15 + $0x1a0] ss:$20 sps:$4 sm:$0xff]  }
 0x9af   :  { %14001 = vmatpush1.bf16.msra.mxu1 %v18608_v15  ;;  %13674 = vmatprep.subr.bf16.mxu0 %v18613_v19  ;;  %v18662_v15 = vld [vmem:[#allocation15 + $0x6a0] ss:$20 sps:$4 sm:$0xff]  }
 0x9b0   :  { %14002 = vmatprep.subr.bf16.mxu1 %v18616_v20  ;;  %v18663_v19 = vld [vmem:[#allocation15 + $0x60] ss:$20 sps:$4 sm:$0xff]  }
 0x9b1   :  { %v18664_v20 = vld [vmem:[#allocation15 + $0x560] ss:$20 sps:$4 sm:$0xff]  }
 0x9b2   :  { %13675 = vmatpush1.bf16.msra.mxu0 %v18611_v52  ;;  %v18665_v52 = vld [vmem:[#allocation15 + $0x1c8] ss:$20 sps:$4 sm:$0xff]  }
 0x9b3   :  { %14003 = vmatpush1.bf16.msra.mxu1 %v18614_v26  ;;  %13676 = vmatprep.subr.bf16.mxu0 %v18619_v55  ;;  %v18666_v26 = vld [vmem:[#allocation15 + $0x6c8] ss:$20 sps:$4 sm:$0xff]  }
 0x9b4   :  { %14004 = vmatprep.subr.bf16.mxu1 %v18622_v10  ;;  %v18667_v55 = vld [vmem:[#allocation15 + $0x88] ss:$20 sps:$4 sm:$0xff]   ;;  %v18669_v10 = vld [vmem:[#allocation15 + $0x1f0] ss:$20 sps:$4 sm:$0xff]  }
 0x9b6   :  { %13677 = vmatpush1.bf16.msra.mxu0 %v18617_v32  ;;  %v18670_v32 = vld [vmem:[#allocation15 + $0x6f0] ss:$20 sps:$4 sm:$0xff]  }
 0x9b7   :  { %14005 = vmatpush1.bf16.msra.mxu1 %v18620_v27  ;;  %13678 = vmatprep.subr.bf16.mxu0 %v18625_v45  ;;  %v18672_v27 = vld [vmem:[#allocation15 + $0x5b0] ss:$20 sps:$4 sm:$0xff]   ;;  %v18673_v45 = vld [vmem:[#allocation15 + $0x218] ss:$20 sps:$4 sm:$0xff]  }
 0x9b8   :  { %14006 = vmatprep.subr.bf16.mxu1 %v18628_v23  ;;  %v18674_v23 = vld [vmem:[#allocation15 + $0x718] ss:$20 sps:$4 sm:$0xff]  }
 0x9ba   :  { %13679 = vmatpush1.bf16.msra.mxu0 %v18623_v24  ;;  %v18675_v24 = vld [vmem:[#allocation15 + $0xd8] ss:$20 sps:$4 sm:$0xff]  }
 0x9bb   :  { %14007 = vmatpush1.bf16.msra.mxu1 %v18626_v16  ;;  %13680 = vmatprep.subr.bf16.mxu0 %v18631_v17  ;;  %v18676_v16 = vld [vmem:[#allocation15 + $0x5d8] ss:$20 sps:$4 sm:$0xff]   ;;  %v18677_v17 = vld [vmem:[#allocation15 + $0x240] ss:$20 sps:$4 sm:$0xff]  }
 0x9bc   :  { %14008 = vmatprep.subr.bf16.mxu1 %v18634_v25  ;;  %v18678_v25 = vld [vmem:[#allocation15 + $0x740] ss:$20 sps:$4 sm:$0xff]  }
 0x9be   :  { %13681 = vmatpush1.bf16.msra.mxu0 %v18629_v3  ;;  %v18679_v3 = vld [vmem:[#allocation15 + $0x100] ss:$20 sps:$4 sm:$0xff]  }
 0x9bf   :  { %14009 = vmatpush1.bf16.msra.mxu1 %v18632_v18  ;;  %13682 = vmatprep.subr.bf16.mxu0 %v18637_v28  ;;  %v18680_v18 = vld [vmem:[#allocation15 + $0x600] ss:$20 sps:$4 sm:$0xff]   ;;  %v18681_v28 = vld [vmem:[#allocation15 + $0x268] ss:$20 sps:$4 sm:$0xff]  }
 0x9c0   :  { %14010 = vmatprep.subr.bf16.mxu1 %v18640_v6  ;;  %v18682_v6 = vld [vmem:[#allocation15 + $0x768] ss:$20 sps:$4 sm:$0xff]  }
 0x9c2   :  { %13683 = vmatpush1.bf16.msra.mxu0 %v18635_v29  ;;  %v18683_v29 = vld [vmem:[#allocation15 + $0x128] ss:$20 sps:$4 sm:$0xff]  }
 0x9c3   :  { %14011 = vmatpush1.bf16.msra.mxu1 %v18638_v30  ;;  %13684 = vmatprep.subr.bf16.mxu0 %v18643_v43  ;;  %v18686_v30 = vld [vmem:[#allocation15 + $0xb50] ss:$20 sps:$4 sm:$0xff]  }
 0x9c4   :  { %14012 = vmatprep.subr.bf16.mxu1 %v18646_v46  ;;  %v18687_v43 = vld [vmem:[#allocation15 + $0x290] ss:$20 sps:$4 sm:$0xff]  }
 0x9c5   :  { %v18688_v46 = vld [vmem:[#allocation15 + $0xa10] ss:$20 sps:$4 sm:$0xff]  }
 0x9c6   :  { %13685 = vmatpush1.bf16.msra.mxu0 %v18641_v1  ;;  %v18689_v1 = vld [vmem:[#allocation15 + $0x3f8] ss:$20 sps:$4 sm:$0xff]  }
 0x9c7   :  { %14013 = vmatpush1.bf16.msra.mxu1 %v18644_v54  ;;  %13686 = vmatprep.subr.bf16.mxu0 %v18649_v57  ;;  %v18691_v54 = vld [vmem:[#allocation15 + $0x2b8] ss:$20 sps:$4 sm:$0xff]  }
 0x9c8   :  { %14014 = vmatprep.subr.bf16.mxu1 %v18652_v59  ;;  %v18692_v57 = vld [vmem:[#allocation15 + $0xa38] ss:$20 sps:$4 sm:$0xff]   ;;  %v18693_v59 = vld [vmem:[#allocation15 + $0x420] ss:$20 sps:$4 sm:$0xff]  }
 0x9ca   :  { %13687 = vmatpush1.bf16.msra.mxu0 %v18647_v62  ;;  %v18694_v62 = vld [vmem:[#allocation15 + $0xba0] ss:$20 sps:$4 sm:$0xff]  }
 0x9cb   :  { %14015 = vmatpush1.bf16.msra.mxu1 %v18650_v53  ;;  %17345 = vmatprep.subr.bf16.mxu0 %v18653_v63  ;;  %v18697_v53 = vld [vmem:[#allocation15 + $0x448] ss:$20 sps:$4 sm:$0xff]  }
 0x9cc   :  { %17389 = vmatprep.subr.bf16.mxu1 %v18654_v40  ;;  %v18699_v63 = vld [vmem:[#allocation15 + $0x308] ss:$20 sps:$4 sm:$0xff]   ;;  %v18701_v40 = vld [vmem:[#allocation15 + $0x470] ss:$20 sps:$4 sm:$0xff]  }
 0x9cd   :  { %13689 = vmatmul.mubr.bf16.vlgmr.msra.gmra.mrb[28].mxu0 %v20048_v5 }
 0x9ce   :  { %14017 = vmatmul.mubr.bf16.vlgmr.msra.gmra.mrb[28].mxu1 %v20048_v5  ;;  %17346 = vmatpush3.bf16.msra.mxu0 %v18655_v33  ;;  %v18702_v33 = vld [vmem:[#allocation15 + $0xbf0] ss:$20 sps:$4 sm:$0xff]  }
 0x9cf   :  { %14057 = vmatprep.mubr.bf16.mxu0 %v19933_v8  ;;  %17390 = vmatpush3.bf16.msra.mxu1 %v18656_v39  ;;  %v18668_v8 = vld [vmem:[#allocation15 + $0x588] ss:$20 sps:$4 sm:$0xff]   ;;  %v18704_v39 = vld [vmem:[#allocation15 + $0xab0] ss:$20 sps:$4 sm:$0xff]  }
 0x9d0   :  { %14137 = vmatprep.mubr.bf16.mxu1 %v19961_v35  ;;  %17347 = vmatprep.subr.bf16.mxu0 %v18657_v48  ;;  %v18671_v35 = vld [vmem:[#allocation15 + $0xb0] ss:$20 sps:$4 sm:$0xff]   ;;  %v18705_v48 = vld [vmem:[#allocation15 + $0x498] ss:$20 sps:$4 sm:$0xff]  }
 0x9d1   :  { %17391 = vmatprep.subr.bf16.mxu1 %v18658_v31  ;;  %v18706_v31 = vld [vmem:[#allocation15 + $0xc18] ss:$20 sps:$4 sm:$0xff]  }
 0x9d2   :  { %17348 = vmatpush3.bf16.msra.mxu0 %v18659_v11  ;;  %v18707_v11 = vld [vmem:[#allocation15 + $0x358] ss:$20 sps:$4 sm:$0xff]  }
 0x9d3   :  { %17392 = vmatpush3.bf16.msra.mxu1 %v18660_v13  ;;  %17349 = vmatprep.subr.bf16.mxu0 %v18661_v14  ;;  %v18708_v13 = vld [vmem:[#allocation15 + $0xad8] ss:$20 sps:$4 sm:$0xff]   ;;  %v18709_v14 = vld [vmem:[#allocation15 + $0x4c0] ss:$20 sps:$4 sm:$0xff]  }
 0x9d4   :  { %17393 = vmatprep.subr.bf16.mxu1 %v18662_v15  ;;  %v18710_v15 = vld [vmem:[#allocation15 + $0xc40] ss:$20 sps:$4 sm:$0xff]  }
 0x9d6   :  { %17350 = vmatpush3.bf16.msra.mxu0 %v18663_v19  ;;  %v18711_v19 = vld [vmem:[#allocation15 + $0x380] ss:$20 sps:$4 sm:$0xff]  }
 0x9d7   :  { %17394 = vmatpush3.bf16.msra.mxu1 %v18664_v20  ;;  %17351 = vmatprep.subr.bf16.mxu0 %v18665_v52  ;;  %v18712_v20 = vld [vmem:[#allocation15 + $0xb00] ss:$20 sps:$4 sm:$0xff]   ;;  %v18713_v52 = vld [vmem:[#allocation15 + $0x4e8] ss:$20 sps:$4 sm:$0xff]  }
 0x9d8   :  { %17395 = vmatprep.subr.bf16.mxu1 %v18666_v26  ;;  %v18714_v26 = vld [vmem:[#allocation15 + $0xc68] ss:$20 sps:$4 sm:$0xff]  }
 0x9da   :  { %17352 = vmatpush3.bf16.msra.mxu0 %v18667_v55  ;;  %v18715_v55 = vld [vmem:[#allocation15 + $0x3a8] ss:$20 sps:$4 sm:$0xff]  }
 0x9db   :  { %17396 = vmatpush3.bf16.msra.mxu1 %v18668_v8  ;;  %17353 = vmatprep.subr.bf16.mxu0 %v18669_v10  ;;  %v18716_v8 = vld [vmem:[#allocation15 + $0xb28] ss:$20 sps:$4 sm:$0xff]   ;;  %v18717_v10 = vld [vmem:[#allocation15 + $0x8d0] ss:$20 sps:$4 sm:$0xff]  }
 0x9dc   :  { %17397 = vmatprep.subr.bf16.mxu1 %v18670_v32  ;;  %v18718_v32 = vld [vmem:[#allocation15 + $0x1050] ss:$20 sps:$4 sm:$0xff]  }
 0x9de   :  { %17354 = vmatpush3.bf16.msra.mxu0 %v18671_v35  ;;  %v18719_v35 = vld [vmem:[#allocation15 + $0x790] ss:$20 sps:$4 sm:$0xff]  }
 0x9df   :  { %17398 = vmatpush3.bf16.msra.mxu1 %v18672_v27  ;;  %17355 = vmatprep.subr.bf16.mxu0 %v18673_v45  ;;  %v18720_v27 = vld [vmem:[#allocation15 + $0xf10] ss:$20 sps:$4 sm:$0xff]   ;;  %v18721_v45 = vld [vmem:[#allocation15 + $0x8f8] ss:$20 sps:$4 sm:$0xff]  }
 0x9e0   :  { %17399 = vmatprep.subr.bf16.mxu1 %v18674_v23  ;;  %v18722_v23 = vld [vmem:[#allocation15 + $0x1078] ss:$20 sps:$4 sm:$0xff]  }
 0x9e2   :  { %17356 = vmatpush3.bf16.msra.mxu0 %v18675_v24  ;;  %v18723_v24 = vld [vmem:[#allocation15 + $0x7b8] ss:$20 sps:$4 sm:$0xff]  }
 0x9e3   :  { %17400 = vmatpush3.bf16.msra.mxu1 %v18676_v16  ;;  %17357 = vmatprep.subr.bf16.mxu0 %v18677_v17  ;;  %v18724_v16 = vld [vmem:[#allocation15 + $0xf38] ss:$20 sps:$4 sm:$0xff]   ;;  %v18725_v17 = vld [vmem:[#allocation15 + $0x920] ss:$20 sps:$4 sm:$0xff]  }
 0x9e4   :  { %17401 = vmatprep.subr.bf16.mxu1 %v18678_v25  ;;  %v18726_v25 = vld [vmem:[#allocation15 + $0x10a0] ss:$20 sps:$4 sm:$0xff]  }
 0x9e6   :  { %17358 = vmatpush3.bf16.msra.mxu0 %v18679_v3  ;;  %v18727_v3 = vld [vmem:[#allocation15 + $0x7e0] ss:$20 sps:$4 sm:$0xff]  }
 0x9e7   :  { %17402 = vmatpush3.bf16.msra.mxu1 %v18680_v18  ;;  %17359 = vmatprep.subr.bf16.mxu0 %v18681_v28  ;;  %v18729_v18 = vld [vmem:[#allocation15 + $0x948] ss:$20 sps:$4 sm:$0xff]  }
 0x9e8   :  { %17403 = vmatprep.subr.bf16.mxu1 %v18682_v6  ;;  %v18731_v28 = vld [vmem:[#allocation15 + $0x808] ss:$20 sps:$4 sm:$0xff]   ;;  %v18733_v6 = vld [vmem:[#allocation15 + $0x970] ss:$20 sps:$4 sm:$0xff]  }
 0x9ea   :  { %17360 = vmatpush3.bf16.msra.mxu0 %v18683_v29  ;;  %v18734_v29 = vld [vmem:[#allocation15 + $0x10f0] ss:$20 sps:$4 sm:$0xff]  }
 0x9eb   :  { %17404 = vmatpush3.bf16.msra.mxu1 %v18684_v60  ;;  %17367 = vmatprep.subr.bf16.mxu0 %v18685_v36  ;;  %v18736_v60 = vld [vmem:[#allocation15 + $0xfb0] ss:$20 sps:$4 sm:$0xff]   ;;  %v18737_v36 = vld [vmem:[#allocation15 + $0x998] ss:$20 sps:$4 sm:$0xff]  }
 0x9ec   :  { %17433 = vmatprep.subr.bf16.mxu1 %v18686_v30  ;;  %v18738_v30 = vld [vmem:[#allocation15 + $0x1118] ss:$20 sps:$4 sm:$0xff]  }
 0x9ed   :  { %14058 = vmatmul.mubr.bf16.vlgmr.msra.gmra.mrb[32].mxu0 %v19945_v56  ;;  %v18696_v56 = vld [vmem:[#allocation15 + $0xa60] ss:$20 sps:$4 sm:$0xff]  }
 0x9ee   :  { %14138 = vmatmul.mubr.bf16.vlgmr.msra.gmra.mrb[32].mxu1 %v19973_v2  ;;  %17368 = vmatpush3.bf16.msra.mxu0 %v18687_v43  ;;  %v18698_v2 = vld [vmem:[#allocation15 + $0xbc8] ss:$20 sps:$4 sm:$0xff]   ;;  %v18739_v43 = vld [vmem:[#allocation15 + $0x858] ss:$20 sps:$4 sm:$0xff]  }
 0x9ef   :  { %14097 = vmatprep.mubr.bf16.mxu0 %v19947_v38  ;;  %17434 = vmatpush3.bf16.msra.mxu1 %v18688_v46  ;;  %v18700_v38 = vld [vmem:[#allocation15 + $0xa88] ss:$20 sps:$4 sm:$0xff]   ;;  %v18740_v46 = vld [vmem:[#allocation15 + $0xfd8] ss:$20 sps:$4 sm:$0xff]  }
 0x9f0   :  { %14217 = vmatprep.mubr.bf16.mxu1 %v19998_v7  ;;  %17369 = vmatprep.subr.bf16.mxu0 %v18689_v1  ;;  %v18703_v7 = vld [vmem:[#allocation15 + $0x330] ss:$20 sps:$4 sm:$0xff]   ;;  %v18741_v1 = vld [vmem:[#allocation15 + $0x9c0] ss:$20 sps:$4 sm:$0xff]  }
 0x9f1   :  { %17435 = vmatprep.subr.bf16.mxu1 %v18690_v51  ;;  %v18742_v51 = vld [vmem:[#allocation15 + $0x1140] ss:$20 sps:$4 sm:$0xff]  }
 0x9f2   :  { %17370 = vmatpush3.bf16.msra.mxu0 %v18691_v54  ;;  %v18743_v54 = vld [vmem:[#allocation15 + $0x880] ss:$20 sps:$4 sm:$0xff]  }
 0x9f3   :  { %17436 = vmatpush3.bf16.msra.mxu1 %v18692_v57  ;;  %17371 = vmatprep.subr.bf16.mxu0 %v18693_v59  ;;  %v18744_v57 = vld [vmem:[#allocation15 + $0x1000] ss:$20 sps:$4 sm:$0xff]   ;;  %v18745_v59 = vld [vmem:[#allocation15 + $0x9e8] ss:$20 sps:$4 sm:$0xff]  }
 0x9f4   :  { %17437 = vmatprep.subr.bf16.mxu1 %v18694_v62  ;;  %v18746_v62 = vld [vmem:[#allocation15 + $0x1168] ss:$20 sps:$4 sm:$0xff]  }
 0x9f6   :  { %17372 = vmatpush3.bf16.msra.mxu0 %v18695_v34  ;;  %v18747_v34 = vld [vmem:[#allocation15 + $0x8a8] ss:$20 sps:$4 sm:$0xff]  }
 0x9f7   :  { %17438 = vmatpush3.bf16.msra.mxu1 %v18696_v56  ;;  %17373 = vmatprep.subr.bf16.mxu0 %v18697_v53  ;;  %v18748_v56 = vld [vmem:[#allocation15 + $0x1028] ss:$20 sps:$4 sm:$0xff]   ;;  %v18749_v53 = vld [vmem:[#allocation15 + $0xdd0] ss:$20 sps:$4 sm:$0xff]  }
 0x9f8   :  { %17439 = vmatprep.subr.bf16.mxu1 %v18698_v2  ;;  %v18781_v2 = vld [vmem:[#allocation18 + $0x4] ss:$8 sps:$4 sm:$0xff]  }
 0x9fa   :  { %17374 = vmatpush3.bf16.msra.mxu0 %v18699_v63  ;;  %v18750_v63 = vld [vmem:[#allocation15 + $0xc90] ss:$20 sps:$4 sm:$0xff]  }
 0x9fb   :  { %17440 = vmatpush3.bf16.msra.mxu1 %v18700_v38  ;;  %17375 = vmatprep.subr.bf16.mxu0 %v18701_v40  ;;  %v18751_v38 = vld [vmem:[#allocation15 + $0xdf8] ss:$20 sps:$4 sm:$0xff]  }
 0x9fc   :  { %17441 = vmatprep.subr.bf16.mxu1 %v18702_v33  ;;  %v18779_v40 = vld [vmem:[#allocation18] ss:$8 sps:$4 sm:$0xff]   ;;  %v18786_v33 = vld [vmem:[#allocation18 + $0x14] ss:$8 sps:$4 sm:$0xff]  }
 0x9fe   :  { %17376 = vmatpush3.bf16.msra.mxu0 %v18703_v7  ;;  %v18752_v7 = vld [vmem:[#allocation15 + $0xcb8] ss:$20 sps:$4 sm:$0xff]  }
 0x9ff   :  { %17442 = vmatpush3.bf16.msra.mxu1 %v18704_v39  ;;  %17377 = vmatprep.subr.bf16.mxu0 %v18705_v48  ;;  %v18753_v39 = vld [vmem:[#allocation15 + $0xe20] ss:$20 sps:$4 sm:$0xff]  }
 0xa00   :  { %17443 = vmatprep.subr.bf16.mxu1 %v18706_v31  ;;  %v18784_v48 = vld [vmem:[#allocation18 + $0x10] ss:$8 sps:$4 sm:$0xff]   ;;  %v18789_v31 = vld [vmem:[#allocation18 + $0x24] ss:$8 sps:$4 sm:$0xff]  }
 0xa02   :  { %17378 = vmatpush3.bf16.msra.mxu0 %v18707_v11  ;;  %v18754_v11 = vld [vmem:[#allocation15 + $0xce0] ss:$20 sps:$4 sm:$0xff]  }
 0xa03   :  { %17444 = vmatpush3.bf16.msra.mxu1 %v18708_v13  ;;  %17379 = vmatprep.subr.bf16.mxu0 %v18709_v14  ;;  %v18755_v13 = vld [vmem:[#allocation15 + $0xe48] ss:$20 sps:$4 sm:$0xff]  }
 0xa04   :  { %17445 = vmatprep.subr.bf16.mxu1 %v18710_v15  ;;  %v18787_v14 = vld [vmem:[#allocation18 + $0x20] ss:$8 sps:$4 sm:$0xff]  }
 0xa05   :  { %v18757_v15 = vld [vmem:[#allocation15 + $0xe70] ss:$20 sps:$4 sm:$0xff]  }
 0xa06   :  { %17380 = vmatpush3.bf16.msra.mxu0 %v18711_v19  ;;  %v18795_v19 = vld [vmem:[#allocation18 + $0x44] ss:$8 sps:$4 sm:$0xff]  }
 0xa07   :  { %17446 = vmatpush3.bf16.msra.mxu1 %v18712_v20  ;;  %17381 = vmatprep.subr.bf16.mxu0 %v18713_v52  ;;  %v18758_v20 = vld [vmem:[#allocation15 + $0xd30] ss:$20 sps:$4 sm:$0xff]   ;;  %v18759_v52 = vld [vmem:[#allocation15 + $0xe98] ss:$20 sps:$4 sm:$0xff]  }
 0xa08   :  { %17447 = vmatprep.subr.bf16.mxu1 %v18714_v26  ;;  %v18793_v26 = vld [vmem:[#allocation18 + $0x40] ss:$8 sps:$4 sm:$0xff]  }
 0xa0a   :  { %17382 = vmatpush3.bf16.msra.mxu0 %v18715_v55  ;;  %v18798_v55 = vld [vmem:[#allocation18 + $0x54] ss:$8 sps:$4 sm:$0xff]  }
 0xa0b   :  { %17448 = vmatpush3.bf16.msra.mxu1 %v18716_v8  ;;  %17411 = vmatprep.subr.bf16.mxu0 %v18717_v10  ;;  %v18760_v8 = vld [vmem:[#allocation15 + $0xd58] ss:$20 sps:$4 sm:$0xff]   ;;  %v18761_v10 = vld [vmem:[#allocation15 + $0xec0] ss:$20 sps:$4 sm:$0xff]  }
 0xa0c   :  { %17477 = vmatprep.subr.bf16.mxu1 %v18718_v32  ;;  %v18796_v32 = vld [vmem:[#allocation18 + $0x50] ss:$8 sps:$4 sm:$0xff]  }
 0xa0d   :  { %14098 = vmatmul.mubr.bf16.vlgmr.msra.gmra.mrb[36].mxu0 %v19959_v22  ;;  %v18728_v22 = vld [vmem:[#allocation15 + $0xf60] ss:$20 sps:$4 sm:$0xff]  }
 0xa0e   :  { %14218 = vmatmul.mubr.bf16.vlgmr.msra.gmra.mrb[36].mxu1 %v20010_v47  ;;  %17412 = vmatpush3.bf16.msra.mxu0 %v18719_v35  ;;  %v18730_v47 = vld [vmem:[#allocation15 + $0x10c8] ss:$20 sps:$4 sm:$0xff]  }
 0xa0f   :  { %14177 = vmatprep.mubr.bf16.mxu0 %v19975_v41  ;;  %17478 = vmatpush3.bf16.msra.mxu1 %v18720_v27  ;;  %v18732_v41 = vld [vmem:[#allocation15 + $0xf88] ss:$20 sps:$4 sm:$0xff]   ;;  %v18762_v27 = vld [vmem:[#allocation15 + $0xd80] ss:$20 sps:$4 sm:$0xff]  }
 0xa10   :  { %14297 = vmatprep.mubr.bf16.mxu1 %v20026_v42  ;;  %17413 = vmatprep.subr.bf16.mxu0 %v18721_v45  ;;  %v18735_v42 = vld [vmem:[#allocation15 + $0x830] ss:$20 sps:$4 sm:$0xff]   ;;  %v18763_v45 = vld [vmem:[#allocation15 + $0xee8] ss:$20 sps:$4 sm:$0xff]  }
 0xa11   :  { %17479 = vmatprep.subr.bf16.mxu1 %v18722_v23  ;;  %v18801_v35 = vld [vmem:[#allocation18 + $0x64] ss:$8 sps:$4 sm:$0xff]   ;;  %v18799_v23 = vld [vmem:[#allocation18 + $0x60] ss:$8 sps:$4 sm:$0xff]  }
 0xa12   :  { %17414 = vmatpush3.bf16.msra.mxu0 %v18723_v24  ;;  %v18804_v24 = vld [vmem:[#allocation18 + $0x74] ss:$8 sps:$4 sm:$0xff]  }
 0xa13   :  { %17480 = vmatpush3.bf16.msra.mxu1 %v18724_v16  ;;  %17415 = vmatprep.subr.bf16.mxu0 %v18725_v17  ;;  %v18764_v16 = vld [vmem:[#allocation15 + $0xda8] ss:$20 sps:$4 sm:$0xff]   ;;  %v18765_v17 = vld [vmem:[#allocation15 + $0x12d0] ss:$20 sps:$4 sm:$0xff]  }
 0xa14   :  { %17481 = vmatprep.subr.bf16.mxu1 %v18726_v25  ;;  %v18802_v25 = vld [vmem:[#allocation18 + $0x70] ss:$8 sps:$4 sm:$0xff]  }
 0xa16   :  { %17416 = vmatpush3.bf16.msra.mxu0 %v18727_v3  ;;  %v18807_v3 = vld [vmem:[#allocation18 + $0x84] ss:$8 sps:$4 sm:$0xff]  }
 0xa17   :  { %17482 = vmatpush3.bf16.msra.mxu1 %v18728_v22  ;;  %17417 = vmatprep.subr.bf16.mxu0 %v18729_v18  ;;  %v18766_v22 = vld [vmem:[#allocation15 + $0x1190] ss:$20 sps:$4 sm:$0xff]   ;;  %v18767_v18 = vld [vmem:[#allocation15 + $0x12f8] ss:$20 sps:$4 sm:$0xff]  }
 0xa18   :  { %17483 = vmatprep.subr.bf16.mxu1 %v18730_v47  ;;  %v18805_v47 = vld [vmem:[#allocation18 + $0x80] ss:$8 sps:$4 sm:$0xff]  }
 0xa1a   :  { %17418 = vmatpush3.bf16.msra.mxu0 %v18731_v28  ;;  %v18810_v28 = vld [vmem:[#allocation18 + $0x94] ss:$8 sps:$4 sm:$0xff]  }
 0xa1b   :  { %17484 = vmatpush3.bf16.msra.mxu1 %v18732_v41  ;;  %17419 = vmatprep.subr.bf16.mxu0 %v18733_v6  ;;  %v18768_v41 = vld [vmem:[#allocation15 + $0x11b8] ss:$20 sps:$4 sm:$0xff]   ;;  %v18769_v6 = vld [vmem:[#allocation15 + $0x1320] ss:$20 sps:$4 sm:$0xff]  }
 0xa1c   :  { %17485 = vmatprep.subr.bf16.mxu1 %v18734_v29  ;;  %v18808_v29 = vld [vmem:[#allocation18 + $0x90] ss:$8 sps:$4 sm:$0xff]  }
 0xa1e   :  { %17420 = vmatpush3.bf16.msra.mxu0 %v18735_v42  ;;  %v18813_v42 = vld [vmem:[#allocation18 + $0xa4] ss:$8 sps:$4 sm:$0xff]  }
 0xa1f   :  { %17486 = vmatpush3.bf16.msra.mxu1 %v18736_v60  ;;  %17421 = vmatprep.subr.bf16.mxu0 %v18737_v36  ;;  %v18770_v60 = vld [vmem:[#allocation15 + $0x11e0] ss:$20 sps:$4 sm:$0xff]   ;;  %v18771_v36 = vld [vmem:[#allocation15 + $0x1348] ss:$20 sps:$4 sm:$0xff]  }
 0xa20   :  { %17487 = vmatprep.subr.bf16.mxu1 %v18738_v30  ;;  %v18811_v30 = vld [vmem:[#allocation18 + $0xa0] ss:$8 sps:$4 sm:$0xff]  }
 0xa22   :  { %17422 = vmatpush3.bf16.msra.mxu0 %v18739_v43  ;;  %v18772_v43 = vld [vmem:[#allocation15 + $0x1208] ss:$20 sps:$4 sm:$0xff]  }
 0xa23   :  { %17488 = vmatpush3.bf16.msra.mxu1 %v18740_v46  ;;  %17423 = vmatprep.subr.bf16.mxu0 %v18741_v1  ;;  %v18773_v46 = vld [vmem:[#allocation15 + $0x1370] ss:$20 sps:$4 sm:$0xff]  }
 0xa24   :  { %17489 = vmatprep.subr.bf16.mxu1 %v18742_v51  ;;  %v18819_v1 = vld [vmem:[#allocation18 + $0xc4] ss:$8 sps:$4 sm:$0xff]  }
 0xa25   :  { %v18774_v51 = vld [vmem:[#allocation15 + $0x1230] ss:$20 sps:$4 sm:$0xff]  }
 0xa26   :  { %17424 = vmatpush3.bf16.msra.mxu0 %v18743_v54  ;;  %v18775_v54 = vld [vmem:[#allocation15 + $0x1398] ss:$20 sps:$4 sm:$0xff]  }
 0xa27   :  { %17490 = vmatpush3.bf16.msra.mxu1 %v18744_v57  ;;  %17425 = vmatprep.subr.bf16.mxu0 %v18745_v59  ;;  %v18817_v57 = vld [vmem:[#allocation18 + $0xc0] ss:$8 sps:$4 sm:$0xff]   ;;  %v18822_v59 = vld [vmem:[#allocation18 + $0xd4] ss:$8 sps:$4 sm:$0xff]  }
 0xa28   :  { %17491 = vmatprep.subr.bf16.mxu1 %v18746_v62  ;;  %v18776_v62 = vld [vmem:[#allocation15 + $0x1258] ss:$20 sps:$4 sm:$0xff]  }
 0xa2a   :  { %17426 = vmatpush3.bf16.msra.mxu0 %v18747_v34  ;;  %v18777_v34 = vld [vmem:[#allocation15 + $0x13c0] ss:$20 sps:$4 sm:$0xff]  }
 0xa2b   :  { %17492 = vmatpush3.bf16.msra.mxu1 %v18748_v56  ;;  %17455 = vmatprep.subr.bf16.mxu0 %v18749_v53  ;;  %v18820_v56 = vld [vmem:[#allocation18 + $0xd0] ss:$8 sps:$4 sm:$0xff]   ;;  %v18825_v53 = vld [vmem:[#allocation18 + $0xe4] ss:$8 sps:$4 sm:$0xff]  }
 0xa2c   :  { %14847 = vmatprep.subr.bf16.mxu1 %v18781_v2  ;;  %v18778_v2 = vld [vmem:[#allocation15 + $0x1280] ss:$20 sps:$4 sm:$0xff]  }
 0xa2d   :  { %14178 = vmatmul.mubr.bf16.vlgmr.msra.gmra.mrb[40].mxu0 %v19996_v37  ;;  %v18792_v37 = vld [vmem:[#allocation18 + $0x34] ss:$8 sps:$4 sm:$0xff]  }
 0xa2e   :  { %14298 = vmatmul.mubr.bf16.vlgmr.msra.gmra.mrb[40].mxu1 %v20038_v58  ;;  %17456 = vmatpush3.bf16.msra.mxu0 %v18750_v63  ;;  %v18756_v58 = vld [vmem:[#allocation15 + $0xd08] ss:$20 sps:$4 sm:$0xff]  }
 0xa2f   :  { %14257 = vmatprep.mubr.bf16.mxu0 %v20012_v9  ;;  %17457 = vmatprep.subr.bf16.mxu0 %v18751_v38  ;;  %v18790_v9 = vld [vmem:[#allocation18 + $0x30] ss:$8 sps:$4 sm:$0xff]   ;;  %v18823_v38 = vld [vmem:[#allocation18 + $0xe0] ss:$8 sps:$4 sm:$0xff]  }
 0xa30   :  { %14848 = vmatpush1.bf16.msra.mxu1 %v18779_v40  ;;  %v18782_v63 = vld [vmem:[#allocation15 + $0x13e8] ss:$20 sps:$4 sm:$0xff]  }
 0xa31   :  { %14849 = vmatprep.subr.bf16.mxu1 %v18786_v33  ;;  %v18828_v40 = vld [vmem:[#allocation18 + $0xf4] ss:$8 sps:$4 sm:$0xff]  }
 0xa32   :  { %17458 = vmatpush3.bf16.msra.mxu0 %v18752_v7  ;;  %v18783_v33 = vld [vmem:[#allocation15 + $0x12a8] ss:$20 sps:$4 sm:$0xff]  }
 0xa33   :  { %17459 = vmatprep.subr.bf16.mxu0 %v18753_v39  ;;  %v18826_v7 = vld [vmem:[#allocation18 + $0xf0] ss:$8 sps:$4 sm:$0xff]   ;;  %v18831_v39 = vld [vmem:[#allocation18 + $0x104] ss:$8 sps:$4 sm:$0xff]  }
 0xa34   :  { %14850 = vmatpush1.bf16.msra.mxu1 %v18784_v48  ;;  %v20068_v48 = vld [vmem:[#allocation16] sm:$0x1f] }
 0xa35   :  { %14851 = vmatprep.subr.bf16.mxu1 %v18789_v31  ;;  %v10019_v31 = vrot.slane %v20068_v48, %v19739_v49 }
 0xa36   :  { %17460 = vmatpush3.bf16.msra.mxu0 %v18754_v11  ;;  %v10023_v11 = vrot.slane %v20068_v48, %v19742_v50 }
 0xa37   :  { %17461 = vmatprep.subr.bf16.mxu0 %v18755_v13  ;;  %v10031_v13 = vrot.slane %v20068_v48, %v19776_v61 }
 0xa38   :  { %14852 = vmatpush1.bf16.msra.mxu1 %v18787_v14 }
 0xa39   :  { %14853 = vmatprep.subr.bf16.mxu1 %v18792_v37 }
 0xa3a   :  { %17462 = vmatpush3.bf16.msra.mxu0 %v18756_v58 }
 0xa3b   :  { %17463 = vmatprep.subr.bf16.mxu0 %v18757_v15 }
 0xa3c   :  { %14854 = vmatpush1.bf16.msra.mxu1 %v18790_v9 }
 0xa3d   :  { %14855 = vmatprep.subr.bf16.mxu1 %v18795_v19 }
 0xa3e   :  { %17464 = vmatpush3.bf16.msra.mxu0 %v18758_v20 }
 0xa3f   :  { %17465 = vmatprep.subr.bf16.mxu0 %v18759_v52 }
 0xa40   :  { %14856 = vmatpush1.bf16.msra.mxu1 %v18793_v26 }
 0xa41   :  { %14857 = vmatprep.subr.bf16.mxu1 %v18798_v55 }
 0xa42   :  { %17466 = vmatpush3.bf16.msra.mxu0 %v18760_v8 }
 0xa43   :  { %17467 = vmatprep.subr.bf16.mxu0 %v18761_v10 }
 0xa44   :  { %14858 = vmatpush1.bf16.msra.mxu1 %v18796_v32 }
 0xa45   :  { %14859 = vmatprep.subr.bf16.mxu1 %v18801_v35 }
 0xa46   :  { %17468 = vmatpush3.bf16.msra.mxu0 %v18762_v27  ;;  %v18829_v27 = vld [vmem:[#allocation18 + $0x100] ss:$8 sps:$4 sm:$0xff]  }
 0xa47   :  { %17469 = vmatprep.subr.bf16.mxu0 %v18763_v45 }
 0xa48   :  { %14860 = vmatpush1.bf16.msra.mxu1 %v18799_v23  ;;  %v18834_v23 = vld [vmem:[#allocation18 + $0x114] ss:$8 sps:$4 sm:$0xff]  }
 0xa49   :  { %14861 = vmatprep.subr.bf16.mxu1 %v18804_v24  ;;  %v18832_v24 = vld [vmem:[#allocation18 + $0x110] ss:$8 sps:$4 sm:$0xff]  }
 0xa4a   :  { %17470 = vmatpush3.bf16.msra.mxu0 %v18764_v16  ;;  %v18837_v16 = vld [vmem:[#allocation18 + $0x124] ss:$8 sps:$4 sm:$0xff]  }
 0xa4b   :  { %17499 = vmatprep.subr.bf16.mxu0 %v18765_v17  ;;  %v18835_v17 = vld [vmem:[#allocation18 + $0x120] ss:$8 sps:$4 sm:$0xff]  }
 0xa4c   :  { %14862 = vmatpush1.bf16.msra.mxu1 %v18802_v25  ;;  %v18840_v25 = vld [vmem:[#allocation18 + $0x134] ss:$8 sps:$4 sm:$0xff]  }
 0xa4d   :  { %14258 = vmatmul.mubr.bf16.vlgmr.msra.gmra.mrb[44].mxu0 %v20024_v21  ;;  %14863 = vmatprep.subr.bf16.mxu1 %v18807_v3  ;;  %v18816_v21 = vld [vmem:[#allocation18 + $0xb4] ss:$8 sps:$4 sm:$0xff]   ;;  %v18838_v3 = vld [vmem:[#allocation18 + $0x130] ss:$8 sps:$4 sm:$0xff]  }
 0xa4e   :  { %17500 = vmatpush3.bf16.msra.mxu0 %v18766_v22  ;;  %14337 = vmatprep.mubr.bf16.mxu0 %v20040_v44  ;;  %v18814_v44 = vld [vmem:[#allocation18 + $0xb0] ss:$8 sps:$4 sm:$0xff]   ;;  %v18843_v22 = vld [vmem:[#allocation18 + $0x144] ss:$8 sps:$4 sm:$0xff]  }
 0xa4f   :  { %17501 = vmatprep.subr.bf16.mxu0 %v18767_v18  ;;  %v18841_v18 = vld [vmem:[#allocation18 + $0x140] ss:$8 sps:$4 sm:$0xff]  }
 0xa50   :  { %14864 = vmatpush1.bf16.msra.mxu1 %v18805_v47  ;;  %v18846_v47 = vld [vmem:[#allocation18 + $0x154] ss:$8 sps:$4 sm:$0xff]  }
 0xa51   :  { %14865 = vmatprep.subr.bf16.mxu1 %v18810_v28  ;;  %v18844_v28 = vld [vmem:[#allocation18 + $0x150] ss:$8 sps:$4 sm:$0xff]  }
 0xa52   :  { %17502 = vmatpush3.bf16.msra.mxu0 %v18768_v41  ;;  %v18849_v41 = vld [vmem:[#allocation18 + $0x164] ss:$8 sps:$4 sm:$0xff]  }
 0xa53   :  { %17503 = vmatprep.subr.bf16.mxu0 %v18769_v6  ;;  %v18847_v6 = vld [vmem:[#allocation18 + $0x160] ss:$8 sps:$4 sm:$0xff]  }
 0xa54   :  { %14866 = vmatpush1.bf16.msra.mxu1 %v18808_v29  ;;  %v18852_v29 = vld [vmem:[#allocation18 + $0x174] ss:$8 sps:$4 sm:$0xff]  }
 0xa55   :  { %14867 = vmatprep.subr.bf16.mxu1 %v18813_v42 }
 0xa56   :  { %17504 = vmatpush3.bf16.msra.mxu0 %v18770_v60 }
 0xa57   :  { %17505 = vmatprep.subr.bf16.mxu0 %v18771_v36 }
 0xa58   :  { %14868 = vmatpush1.bf16.msra.mxu1 %v18811_v30 }
 0xa59   :  { %14869 = vmatprep.subr.bf16.mxu1 %v18816_v21 }
 0xa5a   :  { %17506 = vmatpush3.bf16.msra.mxu0 %v18772_v43 }
 0xa5b   :  { %17507 = vmatprep.subr.bf16.mxu0 %v18773_v46  ;;  %v18850_v46 = vld [vmem:[#allocation18 + $0x170] ss:$8 sps:$4 sm:$0xff]  }
 0xa5c   :  { %14870 = vmatpush1.bf16.msra.mxu1 %v18814_v44 }
 0xa5d   :  { %14871 = vmatprep.subr.bf16.mxu1 %v18819_v1 }
 0xa5e   :  { %17508 = vmatpush3.bf16.msra.mxu0 %v18774_v51 }
 0xa5f   :  { %17509 = vmatprep.subr.bf16.mxu0 %v18775_v54  ;;  %v18855_v54 = vld [vmem:[#allocation18 + $0x184] ss:$8 sps:$4 sm:$0xff]  }
 0xa60   :  { %14872 = vmatpush1.bf16.msra.mxu1 %v18817_v57 }
 0xa61   :  { %14873 = vmatprep.subr.bf16.mxu1 %v18822_v59  ;;  %v18853_v59 = vld [vmem:[#allocation18 + $0x180] ss:$8 sps:$4 sm:$0xff]  }
 0xa62   :  { %17510 = vmatpush3.bf16.msra.mxu0 %v18776_v62  ;;  %v18858_v62 = vld [vmem:[#allocation18 + $0x194] ss:$8 sps:$4 sm:$0xff]  }
 0xa63   :  { %17511 = vmatprep.subr.bf16.mxu0 %v18777_v34  ;;  %v18856_v34 = vld [vmem:[#allocation18 + $0x190] ss:$8 sps:$4 sm:$0xff]  }
 0xa64   :  { %14874 = vmatpush1.bf16.msra.mxu1 %v18820_v56  ;;  %v18901_v56 = vld [vmem:[#allocation21 + $0x40] sm:$0xff]  }
 0xa65   :  { %14875 = vmatprep.subr.bf16.mxu1 %v18825_v53  ;;  %v18902_v53 = vld [vmem:[#allocation21] sm:$0xff]  }
 0xa66   :  { %17512 = vmatpush3.bf16.msra.mxu0 %v18778_v2  ;;  %v18903_v2 = vld [vmem:[#allocation21 + $0x48] sm:$0xff]  }
 0xa67   :  { %17513 = vmatprep.subr.bf16.mxu0 %v18782_v63  ;;  %v18861_v63 = vld [vmem:[#allocation18 + $0x1a4] ss:$8 sps:$4 sm:$0xff]  }
 0xa68   :  { %14876 = vmatpush1.bf16.msra.mxu1 %v18823_v38  ;;  %v18904_v38 = vld [vmem:[#allocation21 + $0x8] sm:$0xff]  }
 0xa69   :  { %14877 = vmatprep.subr.bf16.mxu1 %v18828_v40  ;;  %v18859_v40 = vld [vmem:[#allocation18 + $0x1a0] ss:$8 sps:$4 sm:$0xff]  }
 0xa6a   :  { %17514 = vmatpush3.bf16.msra.mxu0 %v18783_v33  ;;  %v18905_v33 = vld [vmem:[#allocation21 + $0x50] sm:$0xff]  }
 0xa6b   :  { %17521 = vmatprep.subr.bf16.mxu0 %v18901_v56 }
 0xa6c   :  { %14878 = vmatpush1.bf16.msra.mxu1 %v18826_v7  ;;  %v18864_v7 = vld [vmem:[#allocation18 + $0x1b4] ss:$8 sps:$4 sm:$0xff]  }
 0xa6d   :  { %14338 = vmatmul.mubr.bf16.vlgmr.msra.gmra.mrb[48].mxu0 %v20048_v5  ;;  %14888 = vmatprep.subr.bf16.mxu1 %v18831_v39  ;;  %v18906_v39 = vld [vmem:[#allocation21 + $0x10] sm:$0xff]  }
 0xa6e   :  { %17522 = vmatpush3.bf16.msra.mxu0 %v18902_v53  ;;  %v18898_v53 = vld [vmem:[#allocation18 + $0x270] ss:$8 sps:$4 sm:$0xff]  }
 0xa6f   :  { %17523 = vmatprep.subr.bf16.mxu0 %v18903_v2 }
 0xa72   :  { %17524 = vmatpush3.bf16.msra.mxu0 %v18904_v38 }
 0xa73   :  { %17525 = vmatprep.subr.bf16.mxu0 %v18905_v33 }
 0xa76   :  { %17526 = vmatpush3.bf16.msra.mxu0 %v18906_v39 }
 0xaa0   :  { %v13690_v14 = vpop.f32.mrb[28].mxu0 }
 0xaa1   :  { %v17617_v37 = vadd.f32 %v13690_v14, %v10019_v31  ;;  %v20076_v58 = vpop.f32.mrb[28].mxu1  ;;  %v13692_v15 = vpop.f32.mrb[29].mxu0  ;;  %v18862_v31 = vld [vmem:[#allocation18 + $0x1b0] ss:$8 sps:$4 sm:$0xff]  }
 0xaa2   :  { %v17618_v9 = vadd.f32 %v13692_v15, %v10023_v11  ;;  %v14020_v19 = vpop.f32.mrb[29].mxu1  ;;  %v13694_v5 = vpop.f32.mrb[30].mxu0  ;;  %v18907_v11 = vld [vmem:[#allocation21 + $0x58] sm:$0xff]   ;;  %v18909_v15 = vld [vmem:[#allocation21 + $0x60] sm:$0xff]  }
 0xaa3   :  { %v14345_v20 = vmax.f32 %v17617_v37, 0.0  ;;  %v17620_v52 = vadd.f32 %v14020_v19, %v10031_v13  ;;  %v14022_v26 = vpop.f32.mrb[30].mxu1  ;;  %v13695_v55 = vpop.f32.mrb[31].mxu0  ;;  %v18867_v13 = vld [vmem:[#allocation18 + $0x1c4] ss:$8 sps:$4 sm:$0xff]   ;;  %v18908_v14 = vld [vmem:[#allocation21 + $0x18] sm:$0xff]   ;;  %17527 = vmatprep.subr.bf16.mxu0 %v18907_v11 }
 0xaa4   :  { %v14346_v8 = vmax.f32 %v17618_v9, 0.0  ;;  %v14023_v10 = vpop.f32.mrb[31].mxu1  ;;  %v18865_v37 = vld [vmem:[#allocation18 + $0x1c0] ss:$8 sps:$4 sm:$0xff]   ;;  %v18870_v9 = vld [vmem:[#allocation18 + $0x1d4] ss:$8 sps:$4 sm:$0xff]   ;;  %17528 = vmatpush3.bf16.msra.mxu0 %v18908_v14 }
 0xaa5   :  { %v14348_v32 = vmax.f32 %v17620_v52, 0.0  ;;  %v14350_v45 = vpack.c.bf16 %v14345_v20, %v14345_v20  ;;  %v18910_v19 = vld [vmem:[#allocation21 + $0x20] sm:$0xff]   ;;  %v18868_v5 = vld [vmem:[#allocation18 + $0x1d0] ss:$8 sps:$4 sm:$0xff]   ;;  %17529 = vmatprep.subr.bf16.mxu0 %v18909_v15  ;;  %v10027_v52 = vrot.slane %v20068_v48, %v19805_v12 }
 0xaa6   :  { %v14351_v35 = vpack.c.bf16 %v14346_v8, %v14346_v8  ;;  %v18911_v20 = vld [vmem:[#allocation21 + $0x68] sm:$0xff]   ;;  %v10035_v8 = vrot.slane %v20068_v48, %v19830_v4 }
 0xaa7   :  { %v14353_v61 = vpack.c.bf16 %v14348_v32, %v14348_v32  ;;  %v18873_v26 = vld [vmem:[#allocation18 + $0x1e4] ss:$8 sps:$4 sm:$0xff]   ;;  %v18871_v10 = vld [vmem:[#allocation18 + $0x1e0] ss:$8 sps:$4 sm:$0xff]   ;;  %v17619_v32 = vadd.f32 %v20076_v58, %v10027_v52 }
 0xaa8   :  { %14879 = vmatprep.mubr.bf16.mxu1 %v14351_v35  ;;  %17530 = vmatpush3.bf16.msra.mxu0 %v18910_v19  ;;  %v18912_v55 = vld [vmem:[#allocation21 + $0x28] sm:$0xff]   ;;  %v18876_v35 = vld [vmem:[#allocation18 + $0x1f4] ss:$8 sps:$4 sm:$0xff]  }
 0xaa9   :  { %14880 = vmatmul.mubr.bf16.vlgmr.msra.gmra.mrb[44].mxu1 %v14350_v45  ;;  %17531 = vmatprep.subr.bf16.mxu0 %v18911_v20 }
 0xaaa   :  { %14889 = vmatpush1.bf16.msra.mxu1 %v18829_v27  ;;  %14920 = vmatprep.mubr.bf16.mxu1 %v14353_v61 }
 0xaab   :  { %14890 = vmatprep.subr.bf16.mxu1 %v18834_v23 }
 0xaac   :  { %17532 = vmatpush3.bf16.msra.mxu0 %v18912_v55 }
 0xaae   :  { %14891 = vmatpush1.bf16.msra.mxu1 %v18832_v24 }
 0xaaf   :  { %14892 = vmatprep.subr.bf16.mxu1 %v18837_v16 }
 0xab2   :  { %14893 = vmatpush1.bf16.msra.mxu1 %v18835_v17  ;;  %v18874_v17 = vld [vmem:[#allocation18 + $0x1f0] ss:$8 sps:$4 sm:$0xff]  }
 0xab3   :  { %14894 = vmatprep.subr.bf16.mxu1 %v18840_v25  ;;  %v14347_v25 = vmax.f32 %v17619_v32, 0.0  ;;  %v18914_v32 = vld [vmem:[#allocation21 + $0x30] sm:$0xff]  }
 0xab6   :  { %14895 = vmatpush1.bf16.msra.mxu1 %v18838_v3 }
 0xab7   :  { %14896 = vmatprep.subr.bf16.mxu1 %v18843_v22  ;;  %v18879_v22 = vld [vmem:[#allocation18 + $0x204] ss:$8 sps:$4 sm:$0xff]  }
 0xaba   :  { %14897 = vmatpush1.bf16.msra.mxu1 %v18841_v18 }
 0xabb   :  { %14898 = vmatprep.subr.bf16.mxu1 %v18846_v47 }
 0xabe   :  { %14899 = vmatpush1.bf16.msra.mxu1 %v18844_v28  ;;  %v18877_v28 = vld [vmem:[#allocation18 + $0x200] ss:$8 sps:$4 sm:$0xff]  }
 0xabf   :  { %14900 = vmatprep.subr.bf16.mxu1 %v18849_v41  ;;  %v14352_v41 = vpack.c.bf16 %v14347_v25, %v14347_v25 }
 0xac0   :  { %v17361_v42 = vpop.f32.mrb[32].mxu0 }
 0xac1   :  { %v17405_v60 = vpop.f32.mrb[32].mxu1  ;;  %v17362_v36 = vpop.f32.mrb[33].mxu0 }
 0xac2   :  { %v20078_v30 = vadd.f32 %v17362_v36, %v17361_v42  ;;  %v17406_v21 = vpop.f32.mrb[33].mxu1  ;;  %14901 = vmatpush1.bf16.msra.mxu1 %v18847_v6  ;;  %v17364_v43 = vpop.f32.mrb[34].mxu0  ;;  %v18882_v6 = vld [vmem:[#allocation18 + $0x214] ss:$8 sps:$4 sm:$0xff]   ;;  %v18885_v42 = vld [vmem:[#allocation18 + $0x224] ss:$8 sps:$4 sm:$0xff]  }
 0xac3   :  { %v20080_v44 = vadd.f32 %v17406_v21, %v17405_v60  ;;  %v17408_v1 = vpop.f32.mrb[34].mxu1  ;;  %v17365_v51 = vpop.f32.mrb[35].mxu0  ;;  %14902 = vmatprep.subr.bf16.mxu1 %v18852_v29  ;;  %v18880_v29 = vld [vmem:[#allocation18 + $0x210] ss:$8 sps:$4 sm:$0xff]   ;;  %v18883_v60 = vld [vmem:[#allocation18 + $0x220] ss:$8 sps:$4 sm:$0xff]  }
 0xac4   :  { %v17409_v57 = vpop.f32.mrb[35].mxu1  ;;  %v14060_v12 = vadd.f32 %v20078_v30, %v10035_v8  ;;  %v18888_v36 = vld [vmem:[#allocation18 + $0x234] ss:$8 sps:$4 sm:$0xff]   ;;  %v18886_v30 = vld [vmem:[#allocation18 + $0x230] ss:$8 sps:$4 sm:$0xff]  }
 0xac5   :  { %v18891_v21 = vld [vmem:[#allocation18 + $0x244] ss:$8 sps:$4 sm:$0xff]   ;;  %v18889_v43 = vld [vmem:[#allocation18 + $0x240] ss:$8 sps:$4 sm:$0xff]   ;;  %v18900_v51 = vld [vmem:[#allocation18 + $0x274] ss:$8 sps:$4 sm:$0xff]  }
 0xac6   :  { %14903 = vmatpush1.bf16.msra.mxu1 %v18850_v46  ;;  %v18894_v46 = vld [vmem:[#allocation18 + $0x254] ss:$8 sps:$4 sm:$0xff]   ;;  %v18897_v1 = vld [vmem:[#allocation18 + $0x264] ss:$8 sps:$4 sm:$0xff]  }
 0xac7   :  { %14904 = vmatprep.subr.bf16.mxu1 %v18855_v54 }
 0xaca   :  { %14905 = vmatpush1.bf16.msra.mxu1 %v18853_v59 }
 0xacb   :  { %14906 = vmatprep.subr.bf16.mxu1 %v18858_v62 }
 0xace   :  { %14907 = vmatpush1.bf16.msra.mxu1 %v18856_v34 }
 0xacf   :  { %14908 = vmatprep.subr.bf16.mxu1 %v18861_v63 }
 0xad2   :  { %14909 = vmatpush1.bf16.msra.mxu1 %v18859_v40 }
 0xad3   :  { %14910 = vmatprep.subr.bf16.mxu1 %v18864_v7 }
 0xad6   :  { %14911 = vmatpush1.bf16.msra.mxu1 %v18862_v31 }
 0xad7   :  { %14912 = vmatprep.subr.bf16.mxu1 %v18867_v13 }
 0xada   :  { %14913 = vmatpush1.bf16.msra.mxu1 %v18865_v37 }
 0xadb   :  { %14914 = vmatprep.subr.bf16.mxu1 %v18870_v9 }
 0xade   :  { %14915 = vmatpush1.bf16.msra.mxu1 %v18868_v5 }
 0xadf   :  { %14916 = vmatprep.subr.bf16.mxu1 %v18873_v26 }
 0xae0   :  { %v17383_v27 = vpop.f32.mrb[36].mxu0 }
 0xae1   :  { %v17449_v45 = vpop.f32.mrb[36].mxu1  ;;  %v17384_v23 = vpop.f32.mrb[37].mxu0 }
 0xae2   :  { %v17385_v61 = vadd.f32 %v17384_v23, %v17383_v27  ;;  %v17450_v24 = vpop.f32.mrb[37].mxu1  ;;  %14917 = vmatpush1.bf16.msra.mxu1 %v18871_v10  ;;  %v17386_v16 = vpop.f32.mrb[38].mxu0  ;;  %v18913_v10 = vld [vmem:[#allocation21 + $0x70] sm:$0xff]   ;;  %v18916_v27 = vld [vmem:[#allocation21 + $0x38] sm:$0xff]  }
 0xae3   :  { %v17451_v4 = vadd.f32 %v17450_v24, %v17449_v45  ;;  %v17452_v48 = vpop.f32.mrb[38].mxu1  ;;  %v17387_v3 = vpop.f32.mrb[39].mxu0  ;;  %14918 = vmatprep.subr.bf16.mxu1 %v18876_v35  ;;  %17533 = vmatprep.subr.bf16.mxu0 %v18913_v10  ;;  %v18915_v35 = vld [vmem:[#allocation21 + $0x78] sm:$0xff]   ;;  %v19380_v45 = vmov 0.0  }
 0xae4   :  { %v14100_v58 = vadd.f32 %v17385_v61, %v14060_v12  ;;  %v17453_v18 = vpop.f32.mrb[39].mxu1  ;;  %17534 = vmatpush3.bf16.msra.mxu0 %v18914_v32  ;;  %v14435_v23 = vld [vmem:[#allocation19] sm:$0x3] }
 0xae5   :  { %17535 = vmatprep.subr.bf16.mxu0 %v18915_v35  ;;  %v14440_v12 = vrot.slane %v14435_v23, %v19739_v49  ;;  %v14444_v61 = vrot.slane %v14435_v23, %v19742_v50  ;;  %v18917_v18 = vld [vmem:[#allocation24] sm:$0xff]   ;;  %v18919_v49 = vld [vmem:[#allocation24 + $0x10] sm:$0xff]   ;;  %v18920_v50 = vld [vmem:[#allocation24 + $0x18] sm:$0xff]  }
 0xae6   :  { %14919 = vmatpush1.bf16.msra.mxu1 %v18874_v17  ;;  %v14140_v47 = vadd.f32 %v20080_v44, %v14100_v58  ;;  %v18892_v44 = vld [vmem:[#allocation18 + $0x250] ss:$8 sps:$4 sm:$0xff]  }
 0xae7   :  { %14929 = vmatprep.subr.bf16.mxu1 %v18879_v22 }
 0xae8   :  { %17536 = vmatpush3.bf16.msra.mxu0 %v18916_v27 }
 0xae9   :  { %14921 = vmatmul.mubr.bf16.vlgmr.msra.gmra.mrb[44].mxu1 %v14352_v41  ;;  %17561 = vmatprep.subr.bf16.mxu0 %v19380_v45  ;;  %v18921_v41 = vld [vmem:[#allocation24 + $0x20] sm:$0xff]  }
 0xaea   :  { %14930 = vmatpush1.bf16.msra.mxu1 %v18877_v28  ;;  %14961 = vmatprep.mubr.bf16.mxu1 %v19379_v0  ;;  %v18895_v0 = vld [vmem:[#allocation18 + $0x260] ss:$8 sps:$4 sm:$0xff]   ;;  %v18918_v28 = vld [vmem:[#allocation24 + $0x8] sm:$0xff]  }
 0xaeb   :  { %14931 = vmatprep.subr.bf16.mxu1 %v18882_v6  ;;  %v18922_v6 = vld [vmem:[#allocation24 + $0x28] sm:$0xff]  }
 0xaee   :  { %14932 = vmatpush1.bf16.msra.mxu1 %v18880_v29  ;;  %v18923_v29 = vld [vmem:[#allocation24 + $0x30] sm:$0xff]  }
 0xaef   :  { %14933 = vmatprep.subr.bf16.mxu1 %v18885_v42  ;;  %v18924_v42 = vld [vmem:[#allocation24 + $0x38] sm:$0xff]  }
 0xaf2   :  { %14934 = vmatpush1.bf16.msra.mxu1 %v18883_v60 }
 0xaf3   :  { %14935 = vmatprep.subr.bf16.mxu1 %v18888_v36  ;;  %v17310_v36 = vld [vmem:[#allocation22] ss:$0 sm:$0xff] }
 0xaf6   :  { %14936 = vmatpush1.bf16.msra.mxu1 %v18886_v30 }
 0xaf7   :  { %14937 = vmatprep.subr.bf16.mxu1 %v18891_v21 }
 0xafa   :  { %14938 = vmatpush1.bf16.msra.mxu1 %v18889_v43 }
 0xafb   :  { %14939 = vmatprep.subr.bf16.mxu1 %v18894_v46 }
 0xafe   :  { %14940 = vmatpush1.bf16.msra.mxu1 %v18892_v44 }
 0xaff   :  { %14941 = vmatprep.subr.bf16.mxu1 %v18897_v1 }
 0xb00   :  { %v17427_v54 = vpop.f32.mrb[40].mxu0 }
 0xb01   :  { %v17493_v57 = vpop.f32.mrb[40].mxu1  ;;  %v17428_v59 = vpop.f32.mrb[41].mxu0 }
 0xb02   :  { %v17429_v62 = vadd.f32 %v17428_v59, %v17427_v54  ;;  %v17494_v34 = vpop.f32.mrb[41].mxu1  ;;  %v17430_v56 = vpop.f32.mrb[42].mxu0  ;;  %14942 = vmatpush1.bf16.msra.mxu1 %v18895_v0  ;;  %v18925_v0 = vld [vmem:[#allocation27] sm:$0xff]   ;;  %v18926_v54 = vld [vmem:[#allocation27 + $0x8] sm:$0xff]   ;;  %v18928_v59 = vld [vmem:[#allocation27 + $0x18] sm:$0xff]  }
 0xb03   :  { %v17495_v2 = vadd.f32 %v17494_v34, %v17493_v57  ;;  %v17496_v63 = vpop.f32.mrb[42].mxu1  ;;  %v17431_v38 = vpop.f32.mrb[43].mxu0  ;;  %14943 = vmatprep.subr.bf16.mxu1 %v18900_v51  ;;  %v18927_v57 = vld [vmem:[#allocation27 + $0x10] sm:$0xff]   ;;  %v18930_v34 = vld [vmem:[#allocation27 + $0x28] sm:$0xff]  }
 0xb04   :  { %v14180_v40 = vadd.f32 %v17429_v62, %v14140_v47  ;;  %v17497_v33 = vpop.f32.mrb[43].mxu1  ;;  %v18929_v62 = vld [vmem:[#allocation27 + $0x20] sm:$0xff]   ;;  %v18931_v56 = vld [vmem:[#allocation27 + $0x30] sm:$0xff]  }
 0xb06   :  { %v14220_v7 = vadd.f32 %v17451_v4, %v14180_v40  ;;  %14944 = vmatpush1.bf16.msra.mxu1 %v18898_v53  ;;  %v18932_v53 = vld [vmem:[#allocation27 + $0x38] sm:$0xff]  }
 0xb20   :  { %v17471_v39 = vpop.f32.mrb[44].mxu0 }
 0xb21   :  { %v17472_v31 = vpop.f32.mrb[45].mxu0 }
 0xb22   :  { %v17473_v11 = vadd.f32 %v17472_v31, %v17471_v39  ;;  %v17474_v13 = vpop.f32.mrb[46].mxu0 }
 0xb23   :  { %v17475_v14 = vpop.f32.mrb[47].mxu0 }
 0xb24   :  { %v14260_v37 = vadd.f32 %v17473_v11, %v14220_v7  ;;  %v17336_v11 = vld [vmem:[#allocation28] ss:$0 sm:$0xff] }
 0xb26   :  { %v14300_v15 = vadd.f32 %v17495_v2, %v14260_v37  ;;  %v17327_v2 = vld [vmem:[#allocation25] ss:$0 sm:$0xff] }
 0xb40   :  { %v17515_v9 = vpop.f32.mrb[48].mxu0 }
 0xb41   :  { %v17516_v19 = vpop.f32.mrb[49].mxu0 }
 0xb42   :  { %v17517_v5 = vadd.f32 %v17516_v19, %v17515_v9  ;;  %v17518_v20 = vpop.f32.mrb[50].mxu0 }
 0xb43   :  { %v17519_v52 = vpop.f32.mrb[51].mxu0 }
 0xb44   :  { %v14340_v26 = vadd.f32 %v17517_v5, %v14300_v15 }
 0xb46   :  { %v14349_v55 = vmax.f32 %v14340_v26, 0.0 }
 0xb48   :  { %v14354_v8 = vpack.c.bf16 %v14349_v55, %v14349_v55 }
 0xb4a   :  { %14962 = vmatmul.mubr.bf16.vlgmr.msra.gmra.mrb[44].mxu1 %v14354_v8 }
 0xc1d   :  { %v14963_v24 = vpop.f32.mrb[44].mxu1 }
 0xc1e   :  { %v17621_v16 = vadd.f32 %v14963_v24, %v14440_v12  ;;  %v14965_v17 = vpop.f32.mrb[45].mxu1 }
 0xc1f   :  { %v17622_v25 = vadd.f32 %v14965_v17, %v14444_v61  ;;  %v14967_v4 = vpop.f32.mrb[46].mxu1 }
 0xc20   :  { %v14970_v48 = vmax.f32 %v17621_v16, 0.0  ;;  %v14968_v3 = vpop.f32.mrb[47].mxu1 }
 0xc21   :  { %v14971_v22 = vmax.f32 %v17622_v25, 0.0 }
 0xc22   :  { %v14972_v47 = vpack.c.bf16 %v14970_v48, %v14970_v48 }
 0xc23   :  { %v14973_v58 = vpack.c.bf16 %v14971_v22, %v14971_v22 }
 0xc25   :  { %15141 = vmatprep.mubr.bf16.mxu0 %v14973_v58 }
 0xc26   :  { %15142 = vmatmul.mubr.bf16.vlgmr.msra.gmra.mrb[52].mxu0 %v14972_v47 }
 0xc27   :  { %17562 = vmatpush3.bf16.msra.mxu0 %v18917_v18  ;;  %17577 = vmatprep.mubr.msk.bf16.mxu0 %vm19381_vm0, %v19380_v45 }
 0xc28   :  { %17563 = vmatprep.subr.bf16.mxu0 %v19380_v45 }
 0xc2b   :  { %17564 = vmatpush3.bf16.msra.mxu0 %v18918_v28 }
 0xc2c   :  { %17565 = vmatprep.subr.bf16.mxu0 %v19380_v45 }
 0xc2f   :  { %17566 = vmatpush3.bf16.msra.mxu0 %v18919_v49 }
 0xc30   :  { %17567 = vmatprep.subr.bf16.mxu0 %v19380_v45 }
 0xc33   :  { %17568 = vmatpush3.bf16.msra.mxu0 %v18920_v50 }
 0xc34   :  { %17569 = vmatprep.subr.bf16.mxu0 %v19380_v45 }
 0xc37   :  { %17570 = vmatpush3.bf16.msra.mxu0 %v18921_v41 }
 0xc38   :  { %17571 = vmatprep.subr.bf16.mxu0 %v19380_v45 }
 0xc3b   :  { %17572 = vmatpush3.bf16.msra.mxu0 %v18922_v6 }
 0xc3c   :  { %17573 = vmatprep.subr.bf16.mxu0 %v19380_v45 }
 0xc3f   :  { %17574 = vmatpush3.bf16.msra.mxu0 %v18923_v29 }
 0xc40   :  { %17575 = vmatprep.subr.bf16.mxu0 %v19380_v45 }
 0xc43   :  { %17576 = vmatpush3.bf16.msra.mxu0 %v18924_v42 }
 0xc44   :  { %17581 = vmatprep.subr.bf16.mxu0 %v19380_v45 }
 0xcf9   :  { %v17537_v60 = vpop.f32.mrb[52].mxu0 }
 0xcfa   :  { %v17538_v30 = vpop.f32.mrb[53].mxu0 }
 0xcfb   :  { %v17539_v21 = vadd.f32 %v17538_v30, %v17537_v60  ;;  %v17540_v43 = vpop.f32.mrb[54].mxu0 }
 0xcfc   :  { %v17541_v46 = vpop.f32.mrb[55].mxu0 }
 0xcfd   :  { %v15144_v44 = vadd.f32 %v17539_v21, %v17310_v36 }
 0xcff   :  { %v15149_v1 = vmax.f32 %v15144_v44, 0.0 }
 0xd01   :  { %v15150_v51 = vpack.c.bf16 %v15149_v1, %v15149_v1 }
 0xd03   :  { %17578 = vmatmul.mubr.bf16.vlgmr.msra.gmra.mrb[56].mxu0 %v15150_v51 }
 0xd04   :  { %17582 = vmatpush3.bf16.msra.mxu0 %v18925_v0  ;;  %17597 = vmatprep.mubr.msk.bf16.mxu0 %vm19381_vm0, %v19380_v45 }
 0xd05   :  { %17583 = vmatprep.subr.bf16.mxu0 %v19380_v45 }
 0xd08   :  { %17584 = vmatpush3.bf16.msra.mxu0 %v18926_v54 }
 0xd09   :  { %17585 = vmatprep.subr.bf16.mxu0 %v19380_v45 }
 0xd0c   :  { %17586 = vmatpush3.bf16.msra.mxu0 %v18927_v57 }
 0xd0d   :  { %17587 = vmatprep.subr.bf16.mxu0 %v19380_v45 }
 0xd10   :  { %17588 = vmatpush3.bf16.msra.mxu0 %v18928_v59 }
 0xd11   :  { %17589 = vmatprep.subr.bf16.mxu0 %v19380_v45 }
 0xd14   :  { %17590 = vmatpush3.bf16.msra.mxu0 %v18929_v62 }
 0xd15   :  { %17591 = vmatprep.subr.bf16.mxu0 %v19380_v45 }
 0xd18   :  { %17592 = vmatpush3.bf16.msra.mxu0 %v18930_v34 }
 0xd19   :  { %17593 = vmatprep.subr.bf16.mxu0 %v19380_v45 }
 0xd1c   :  { %17594 = vmatpush3.bf16.msra.mxu0 %v18931_v56 }
 0xd1d   :  { %17595 = vmatprep.subr.bf16.mxu0 %v19380_v45 }
 0xd20   :  { %17596 = vmatpush3.bf16.msra.mxu0 %v18932_v53 }
 0xdd6   :  { %v15256_v63 = vpop.f32.mrb[56].mxu0 }
 0xdd7   :  { %v15257_v38 = vadd.f32 %v17327_v2, %v15256_v63  ;;  %v17579_v40 = vpop.f32.mrb[57].mxu0 }
 0xdd8   :  { %v15259_v33 = vpop.f32.mrb[58].mxu0 }
 0xdd9   :  { %v15262_v7 = vmax.f32 %v15257_v38, 0.0  ;;  %v17580_v39 = vpop.f32.mrb[59].mxu0 }
 0xddb   :  { %v15263_v31 = vpack.c.bf16 %v15262_v7, %v15262_v7 }
 0xddd   :  { %17598 = vmatmul.mubr.bf16.vlgmr.msra.gmra.mrb[60].mxu0 %v15263_v31 }
 0xeb0   :  { %v15369_v13 = vpop.f32.mrb[60].mxu0 }
 0xeb1   :  { %v15370_v14 = vadd.f32 %v17336_v11, %v15369_v13  ;;  %v17599_v37 = vpop.f32.mrb[61].mxu0 }
 0xeb2   :  { %v15372_v15 = vpop.f32.mrb[62].mxu0 }
 0xeb3   :  { %15375 = vst [vmem:[%s20134_s19] sm:$0xff] %v15370_v14  ;;  %v17600_v9 = vpop.f32.mrb[63].mxu0 }
 0xeb4   :  { %15380 = vsyncpa [#allocation3], 1 }
 0xeb5   :  { %15381 = vsyncpa [#allocation5], 1 }
 0xeb6   :  { %15382 = vsyncpa [#allocation8], 1 }
 0xeb7   :  { %15383 = vsyncpa [#allocation11], 1 }
 0xeb8   :  { %15384 = vsyncpa [#allocation14], 1 }
 0xeb9   :  { %15385 = vsyncpa [#allocation17], 1 }
 0xeba   :  { %15386 = vsyncpa [#allocation20], 1 }
 0xebb   :  { %15387 = vsyncpa [#allocation23], 1 }
 0xebc   :  { %15388 = vsyncpa [#allocation26], 1 }
 0xebd   :  { %15389 = vsyncpa [#allocation29], 1 }

</bundles_post_ra>
